<compile_context>
chip_gen: v6e
topology: v6e:2x2x1
jax: 0.10.0
libtpu: 0.0.40
codegen_flags: <defaults>
</compile_context>

<pallas_src>
import functools

import jax
import jax.numpy as jnp
from jax import lax
from jax.experimental import pallas as pl
from jax.experimental.pallas import tpu as pltpu

_LANE = 128  # TPU lane width; source voxels are factored as (lane, row).


def _compose_kernel(a_ref, id_ref, b_ref, out_ref, *, D, H, W, R, T):
    """One (batch, spatial-tile) pair per grid step.

    a_ref  : (1, 1, 3, T)    displacement_a for this output tile (x, y, z rows)
    id_ref : (1, 3, T)       identity grid tile (shared across batch)
    b_ref  : (1, 3, 128, R)  full displacement_b, (lane, row)-factored source
    out_ref: (1, 1, 3, T)    composed displacement for this tile
    """
    f32 = jnp.float32
    a = a_ref[0, 0].astype(f32)                      # (3, T)
    ident = id_ref[0].astype(f32)                    # (3, T)
    bT = [b_ref[0, ch].astype(f32) for ch in range(3)]  # 3 x (128, R)

    # ---- sampling coordinates: dense (3, T) math --------------------------
    g = ident + a                                    # normalized coords (x,y,z)
    axis_id = lax.broadcasted_iota(jnp.int32, (3, T), 0)
    scale = jnp.where(axis_id == 0, float(W),
                      jnp.where(axis_id == 1, float(H), float(D)))
    # align_corners=False un-normalization: i = ((c + 1) * size - 1) / 2
    idx = (g + 1.0) * (scale * 0.5) - 0.5            # (3, T)
    i0f = jnp.floor(idx)
    frac = idx - i0f
    i0 = i0f.astype(jnp.int32)

    x0, y0, z0 = i0[0:1], i0[1:2], i0[2:3]           # (1, T) int32
    fx, fy, fz = frac[0:1], frac[1:2], frac[2:3]     # (1, T) f32
    wxs = (1.0 - fx, fx)
    wys = (1.0 - fy, fy)
    wzs = (1.0 - fz, fz)

    src_row_iota = lax.broadcasted_iota(jnp.int32, (R, T), 0)      # (R, T)
    src_lane_iota = lax.broadcasted_iota(jnp.int32, (_LANE, T), 0)  # (128, T)

    acc = [jnp.zeros((1, T), f32) for _ in range(3)]

    # 8 trilinear corners, fully unrolled.
    for cz in (0, 1):
        zi = z0 + cz
        zc = jnp.clip(zi, 0, D - 1)
        z_ok = (zi >= 0) & (zi < D)
        for cy in (0, 1):
            yi = y0 + cy
            yc = jnp.clip(yi, 0, H - 1)
            zy_ok = z_ok & (yi >= 0) & (yi < H)
            w_zy = wzs[cz] * wys[cy]
            zy_flat = (zc * H + yc) * W
            for cx in (0, 1):
                xi = x0 + cx
                xc = jnp.clip(xi, 0, W - 1)
                valid = zy_ok & (xi >= 0) & (xi < W)        # zero-padding mask
                w = jnp.where(valid, w_zy * wxs[cx], 0.0)   # (1, T)

                flat = zy_flat + xc                          # (1, T), in [0, S)
                row = jnp.right_shift(flat, 7)               # flat // 128
                lane = jnp.bitwise_and(flat, _LANE - 1)      # flat %  128

                # one-hot over source *rows* only: (R, T) with R = S/128
                row_oh = jnp.where(src_row_iota == row, 1.0, 0.0)
                lane_hit = src_lane_iota == lane             # (128, T) bool

                for ch in range(3):
                    # MXU fetches the full 128-lane source row per output voxel
                    rows = jnp.dot(bT[ch], row_oh,
                                   preferred_element_type=f32)   # (128, T)
                    picked = jnp.where(lane_hit, rows, 0.0)       # VPU select
                    acc[ch] = acc[ch] + w * jnp.sum(picked, axis=0,
                                                    keepdims=True)  # XLU reduce

    # merge the three (1, T) channel accumulators into one dense (3, T) store
    sampled = jnp.where(axis_id == 0, acc[0],
                        jnp.where(axis_id == 1, acc[1], acc[2]))
    out_ref[0, 0] = (a + sampled).astype(out_ref.dtype)


def _round_up(x, m):
    return ((x + m - 1) // m) * m


def _pick_tile(p_out):
    # Lane-dense output tile; prefer >=2 tiles so the spatial grid axis can be
    # sharded across TensorCores (v7x megacore) even when the batch is tiny.
    for t in (512, 256, 128):
        if p_out % t == 0 and p_out // t >= 2:
            return t
    return p_out  # p_out == 128


def composition_transform(displacement_field_a, displacement_field_b, identity,
                          mode="bilinear"):
    """JAX/Pallas equivalent of CompositionTransform.forward.

    displacement_field_{a,b}: (N, 3, D, H, W); identity: (N, D, H, W, 3) or
    (D, H, W, 3).  Returns (N, 3, D, H, W).
    """
    if mode != "bilinear":
        # TODO(synk): only trilinear ('bilinear') interpolation is implemented.
        raise NotImplementedError("only mode='bilinear' is supported")

    N, C, D, H, W = displacement_field_a.shape
    assert C == 3 and displacement_field_b.shape == (N, 3, D, H, W)
    if identity.ndim == 5:
        # The identity grid is batch-invariant by construction; keep a single
        # copy so it is DMA'd once instead of once per batch element.
        identity = identity[0]
    assert identity.shape == (D, H, W, 3)

    S = D * H * W
    # Source rows: pad so R = p_src/128 is a multiple of 8 (clean MXU operands).
    p_src = _round_up(S, 8 * _LANE)
    R = p_src // _LANE
    # Output tiling: lane-dense tiles of the flattened spatial dim.
    p_out = _round_up(S, _LANE)
    T = _pick_tile(p_out)
    num_tiles = p_out // T

    a_cf = displacement_field_a.reshape(N, 3, S)
    b_cf = displacement_field_b.reshape(N, 3, S)
    id_cf = jnp.transpose(identity, (3, 0, 1, 2)).reshape(3, S)

    if p_out != S:
        a_cf = jnp.pad(a_cf, ((0, 0), (0, 0), (0, p_out - S)))
        id_cf = jnp.pad(id_cf, ((0, 0), (0, p_out - S)))
    if p_src != S:
        b_cf = jnp.pad(b_cf, ((0, 0), (0, 0), (0, p_src - S)))

    # (N, num_tiles, 3, T): one output tile per grid step (channels x lanes).
    a_t = a_cf.reshape(N, 3, num_tiles, T).transpose(0, 2, 1, 3)
    id_t = id_cf.reshape(3, num_tiles, T).transpose(1, 0, 2)
    # (N, 3, 128, R): source factored as (lane, row).  The whole displacement_b
    # for one batch element stays VMEM-resident across its spatial tiles.
    # TODO(synk): for very large volumes (>~64^3 per channel) the source itself
    # would also need tiling; not required for the sizes exercised here.
    b_src = b_cf.reshape(N, 3, R, _LANE).transpose(0, 1, 3, 2)

    kernel = functools.partial(_compose_kernel, D=D, H=H, W=W, R=R, T=T)

    out = pl.pallas_call(
        kernel,
        out_shape=jax.ShapeDtypeStruct((N, num_tiles, 3, T),
                                       displacement_field_a.dtype),
        grid_spec=pltpu.PrefetchScalarGridSpec(
            num_scalar_prefetch=0,
            grid=(N, num_tiles),
            in_specs=[
                pl.BlockSpec((1, 1, 3, T), lambda n, t: (n, t, 0, 0)),
                pl.BlockSpec((1, 3, T), lambda n, t: (t, 0, 0)),
                # same block for every spatial tile -> DMA'd once per batch el.
                pl.BlockSpec((1, 3, _LANE, R), lambda n, t: (n, 0, 0, 0)),
            ],
            out_specs=pl.BlockSpec((1, 1, 3, T), lambda n, t: (n, t, 0, 0)),
        ),
        compiler_params=pltpu.CompilerParams(
            dimension_semantics=("parallel", "parallel"),
            vmem_limit_bytes=32 * 1024 * 1024,
        ),
    )(a_t, id_t, b_src)

    out = out.transpose(0, 2, 1, 3).reshape(N, 3, p_out)[:, :, :S]
    return out.reshape(N, 3, D, H, W)


def make_identity_grid(N, D, H, W, dtype=jnp.float32):
    """Normalized identity sampling grid (align_corners=False voxel centers)."""
    zs = (2.0 * jnp.arange(D, dtype=dtype) + 1.0) / D - 1.0
    ys = (2.0 * jnp.arange(H, dtype=dtype) + 1.0) / H - 1.0
    xs = (2.0 * jnp.arange(W, dtype=dtype) + 1.0) / W - 1.0
    zz, yy, xx = jnp.meshgrid(zs, ys, xs, indexing="ij")       # each (D, H, W)
    grid = jnp.stack([xx, yy, zz], axis=-1)                    # (D, H, W, 3)
    return jnp.broadcast_to(grid[None], (N, D, H, W, 3)).astype(dtype)


def _composition_reference(disp_a, disp_b, identity):
    """Pure-JAX reference (torch.grid_sample semantics, zeros padding)."""
    N, _, D, H, W = disp_a.shape
    S = D * H * W
    grid = identity + jnp.transpose(disp_a, (0, 2, 3, 4, 1))    # (N,D,H,W,3)
    gx, gy, gz = grid[..., 0], grid[..., 1], grid[..., 2]
    ix = (gx + 1.0) * (W * 0.5) - 0.5
    iy = (gy + 1.0) * (H * 0.5) - 0.5
    iz = (gz + 1.0) * (D * 0.5) - 0.5
    x0 = jnp.floor(ix); y0 = jnp.floor(iy); z0 = jnp.floor(iz)
    fx, fy, fz = ix - x0, iy - y0, iz - z0
    x0 = x0.astype(jnp.int32); y0 = y0.astype(jnp.int32); z0 = z0.astype(jnp.int32)
    b_flat = disp_b.reshape(N, 3, S)
    sampled = jnp.zeros((N, 3, D, H, W), jnp.float32)
    for cz in (0, 1):
        for cy in (0, 1):
            for cx in (0, 1):
                xi, yi, zi = x0 + cx, y0 + cy, z0 + cz
                valid = ((xi >= 0) & (xi < W) & (yi >= 0) & (yi < H)
                         & (zi >= 0) & (zi < D))
                xc = jnp.clip(xi, 0, W - 1)
                yc = jnp.clip(yi, 0, H - 1)
                zc = jnp.clip(zi, 0, D - 1)
                flat = ((zc * H + yc) * W + xc).reshape(N, 1, S)
                vals = jnp.take_along_axis(
                    b_flat, jnp.broadcast_to(flat, (N, 3, S)),
                    axis=2).reshape(N, 3, D, H, W)
                w = ((fx if cx else 1.0 - fx) * (fy if cy else 1.0 - fy)
                     * (fz if cz else 1.0 - fz) * valid.astype(jnp.float32))
                sampled = sampled + vals * w[:, None]
    return disp_a + sampled


if __name__ == "__main__":
    N, C, D, H, W = 2, 3, 8, 8, 8

    key = jax.random.PRNGKey(0)
    ka, kb = jax.random.split(key)
    disp_a = 0.2 * jax.random.normal(ka, (N, C, D, H, W), dtype=jnp.float32)
    disp_b = 0.2 * jax.random.normal(kb, (N, C, D, H, W), dtype=jnp.float32)
    identity = make_identity_grid(N, D, H, W)

    out = composition_transform(disp_a, disp_b, identity)
    out = jax.block_until_ready(out)
    assert out.shape == (N, C, D, H, W)
    assert jnp.isfinite(out).all()

    # Cross-check against a pure-JAX reference with NONZERO displacements:
    # validates the (x,y,z)->(W,H,D) axis mapping and zero-padding behaviour,
    # not just sampling at voxel centers.
    ref = _composition_reference(disp_a, disp_b, identity)
    max_err = float(jnp.max(jnp.abs(out - ref)))
    assert jnp.allclose(out, ref, atol=1e-4, rtol=1e-4), max_err

    print("KERNEL_OK")
</pallas_src>

<mosaic_0001>
module attributes {stable_mosaic.version = 11 : i64} {
  func.func @_compose_kernel(%arg0: i32, %arg1: i32, %arg2: memref<1x1x3x256xf32, #tpu.memory_space<vmem>>, %arg3: memref<1x3x256xf32, #tpu.memory_space<vmem>>, %arg4: memref<1x3x128x8xf32, #tpu.memory_space<vmem>>, %arg5: memref<1x1x3x256xf32, #tpu.memory_space<vmem>>) attributes {dimension_semantics = [#tpu.dimension_semantics<parallel>, #tpu.dimension_semantics<parallel>], iteration_bounds = array<i64: 2, 2>, scalar_prefetch = 0 : i64, scratch_operands = 0 : i64, tpu.core_type = #tpu.core_type<tc>, window_params = [{transform_indices = @transform_0, window_bounds = array<i64: 1, 1, 3, 256>}, {transform_indices = @transform_1, window_bounds = array<i64: 1, 3, 256>}, {transform_indices = @transform_2, window_bounds = array<i64: 1, 3, 128, 8>}, {transform_indices = @transform_3, window_bounds = array<i64: 1, 1, 3, 256>}]} {
    %c0 = arith.constant 0 : index
    %c0_0 = arith.constant 0 : index
    %c0_1 = arith.constant 0 : index
    %c0_2 = arith.constant 0 : index
    %0 = vector.load %arg2[%c0, %c0_0, %c0_1, %c0_2] : memref<1x1x3x256xf32, #tpu.memory_space<vmem>>, vector<1x1x3x256xf32>
    %1 = vector.shape_cast %0 : vector<1x1x3x256xf32> to vector<3x256xf32>
    %c0_3 = arith.constant 0 : index
    %c0_4 = arith.constant 0 : index
    %c0_5 = arith.constant 0 : index
    %2 = vector.load %arg3[%c0_3, %c0_4, %c0_5] : memref<1x3x256xf32, #tpu.memory_space<vmem>>, vector<1x3x256xf32>
    %3 = vector.shape_cast %2 : vector<1x3x256xf32> to vector<3x256xf32>
    %c0_6 = arith.constant 0 : index
    %c0_7 = arith.constant 0 : index
    %c0_8 = arith.constant 0 : index
    %c0_9 = arith.constant 0 : index
    %4 = vector.load %arg4[%c0_6, %c0_7, %c0_8, %c0_9] : memref<1x3x128x8xf32, #tpu.memory_space<vmem>>, vector<1x1x128x8xf32>
    %5 = vector.shape_cast %4 : vector<1x1x128x8xf32> to vector<128x8xf32>
    %c0_10 = arith.constant 0 : index
    %c1 = arith.constant 1 : index
    %c0_11 = arith.constant 0 : index
    %c0_12 = arith.constant 0 : index
    %6 = vector.load %arg4[%c0_10, %c1, %c0_11, %c0_12] : memref<1x3x128x8xf32, #tpu.memory_space<vmem>>, vector<1x1x128x8xf32>
    %7 = vector.shape_cast %6 : vector<1x1x128x8xf32> to vector<128x8xf32>
    %c0_13 = arith.constant 0 : index
    %c2 = arith.constant 2 : index
    %c0_14 = arith.constant 0 : index
    %c0_15 = arith.constant 0 : index
    %8 = vector.load %arg4[%c0_13, %c2, %c0_14, %c0_15] : memref<1x3x128x8xf32, #tpu.memory_space<vmem>>, vector<1x1x128x8xf32>
    %9 = vector.shape_cast %8 : vector<1x1x128x8xf32> to vector<128x8xf32>
    %10 = arith.addf %3, %1 : vector<3x256xf32>
    %11 = tpu.iota {dimensions = array<i32: 0>} : vector<3x256xi32>
    %c0_i32 = arith.constant 0 : i32
    %12 = vector.broadcast %c0_i32 : i32 to vector<3x256xi32>
    %13 = arith.cmpi eq, %11, %12 : vector<3x256xi32>
    %c1_i32 = arith.constant 1 : i32
    %14 = vector.broadcast %c1_i32 : i32 to vector<3x256xi32>
    %15 = arith.cmpi eq, %11, %14 : vector<3x256xi32>
    %cst = arith.constant 8.000000e+00 : f32
    %cst_16 = arith.constant 8.000000e+00 : f32
    %16 = vector.broadcast %cst : f32 to vector<3x256xf32>
    %17 = vector.broadcast %cst_16 : f32 to vector<3x256xf32>
    %18 = arith.select %15, %16, %17 : vector<3x256xi1>, vector<3x256xf32>
    %cst_17 = arith.constant 8.000000e+00 : f32
    %19 = vector.broadcast %cst_17 : f32 to vector<3x256xf32>
    %20 = arith.select %13, %19, %18 : vector<3x256xi1>, vector<3x256xf32>
    %cst_18 = arith.constant 1.000000e+00 : f32
    %21 = vector.broadcast %cst_18 : f32 to vector<3x256xf32>
    %22 = arith.addf %10, %21 : vector<3x256xf32>
    %cst_19 = arith.constant 5.000000e-01 : f32
    %23 = vector.broadcast %cst_19 : f32 to vector<3x256xf32>
    %24 = arith.mulf %20, %23 : vector<3x256xf32>
    %25 = arith.mulf %22, %24 : vector<3x256xf32>
    %cst_20 = arith.constant 5.000000e-01 : f32
    %26 = vector.broadcast %cst_20 : f32 to vector<3x256xf32>
    %27 = arith.subf %25, %26 : vector<3x256xf32>
    %28 = math.floor %27 : vector<3x256xf32>
    %29 = arith.subf %27, %28 : vector<3x256xf32>
    %30 = arith.fptosi %28 : vector<3x256xf32> to vector<3x256xi32>
    %31 = vector.extract_strided_slice %30 {offsets = [0, 0], sizes = [1, 256], strides = [1, 1]} : vector<3x256xi32> to vector<1x256xi32>
    %32 = vector.extract_strided_slice %30 {offsets = [1, 0], sizes = [1, 256], strides = [1, 1]} : vector<3x256xi32> to vector<1x256xi32>
    %33 = vector.extract_strided_slice %30 {offsets = [2, 0], sizes = [1, 256], strides = [1, 1]} : vector<3x256xi32> to vector<1x256xi32>
    %34 = vector.extract_strided_slice %29 {offsets = [0, 0], sizes = [1, 256], strides = [1, 1]} : vector<3x256xf32> to vector<1x256xf32>
    %35 = vector.extract_strided_slice %29 {offsets = [1, 0], sizes = [1, 256], strides = [1, 1]} : vector<3x256xf32> to vector<1x256xf32>
    %36 = vector.extract_strided_slice %29 {offsets = [2, 0], sizes = [1, 256], strides = [1, 1]} : vector<3x256xf32> to vector<1x256xf32>
    %cst_21 = arith.constant 1.000000e+00 : f32
    %37 = vector.broadcast %cst_21 : f32 to vector<1x256xf32>
    %38 = arith.subf %37, %34 : vector<1x256xf32>
    %cst_22 = arith.constant 1.000000e+00 : f32
    %39 = vector.broadcast %cst_22 : f32 to vector<1x256xf32>
    %40 = arith.subf %39, %35 : vector<1x256xf32>
    %cst_23 = arith.constant 1.000000e+00 : f32
    %41 = vector.broadcast %cst_23 : f32 to vector<1x256xf32>
    %42 = arith.subf %41, %36 : vector<1x256xf32>
    %43 = tpu.iota {dimensions = array<i32: 0>} : vector<8x256xi32>
    %44 = tpu.iota {dimensions = array<i32: 0>} : vector<128x256xi32>
    %cst_24 = arith.constant 0.000000e+00 : f32
    %45 = vector.broadcast %cst_24 : f32 to vector<1x256xf32>
    %cst_25 = arith.constant 0.000000e+00 : f32
    %46 = vector.broadcast %cst_25 : f32 to vector<1x256xf32>
    %cst_26 = arith.constant 0.000000e+00 : f32
    %47 = vector.broadcast %cst_26 : f32 to vector<1x256xf32>
    %c0_i32_27 = arith.constant 0 : i32
    %48 = vector.broadcast %c0_i32_27 : i32 to vector<1x256xi32>
    %49 = arith.addi %33, %48 : vector<1x256xi32>
    %c0_i32_28 = arith.constant 0 : i32
    %c7_i32 = arith.constant 7 : i32
    %50 = vector.broadcast %c0_i32_28 : i32 to vector<1x256xi32>
    %51 = arith.maxsi %50, %49 : vector<1x256xi32>
    %52 = vector.broadcast %c7_i32 : i32 to vector<1x256xi32>
    %53 = arith.minsi %52, %51 : vector<1x256xi32>
    %c0_i32_29 = arith.constant 0 : i32
    %54 = vector.broadcast %c0_i32_29 : i32 to vector<1x256xi32>
    %55 = arith.cmpi sge, %49, %54 : vector<1x256xi32>
    %c8_i32 = arith.constant 8 : i32
    %56 = vector.broadcast %c8_i32 : i32 to vector<1x256xi32>
    %57 = arith.cmpi slt, %49, %56 : vector<1x256xi32>
    %58 = arith.andi %55, %57 : vector<1x256xi1>
    %c0_i32_30 = arith.constant 0 : i32
    %59 = vector.broadcast %c0_i32_30 : i32 to vector<1x256xi32>
    %60 = arith.addi %32, %59 : vector<1x256xi32>
    %c0_i32_31 = arith.constant 0 : i32
    %c7_i32_32 = arith.constant 7 : i32
    %61 = vector.broadcast %c0_i32_31 : i32 to vector<1x256xi32>
    %62 = arith.maxsi %61, %60 : vector<1x256xi32>
    %63 = vector.broadcast %c7_i32_32 : i32 to vector<1x256xi32>
    %64 = arith.minsi %63, %62 : vector<1x256xi32>
    %c0_i32_33 = arith.constant 0 : i32
    %65 = vector.broadcast %c0_i32_33 : i32 to vector<1x256xi32>
    %66 = arith.cmpi sge, %60, %65 : vector<1x256xi32>
    %67 = arith.andi %58, %66 : vector<1x256xi1>
    %c8_i32_34 = arith.constant 8 : i32
    %68 = vector.broadcast %c8_i32_34 : i32 to vector<1x256xi32>
    %69 = arith.cmpi slt, %60, %68 : vector<1x256xi32>
    %70 = arith.andi %67, %69 : vector<1x256xi1>
    %71 = arith.mulf %42, %40 : vector<1x256xf32>
    %c8_i32_35 = arith.constant 8 : i32
    %72 = vector.broadcast %c8_i32_35 : i32 to vector<1x256xi32>
    %73 = arith.muli %53, %72 : vector<1x256xi32>
    %74 = arith.addi %73, %64 : vector<1x256xi32>
    %c8_i32_36 = arith.constant 8 : i32
    %75 = vector.broadcast %c8_i32_36 : i32 to vector<1x256xi32>
    %76 = arith.muli %74, %75 : vector<1x256xi32>
    %c0_i32_37 = arith.constant 0 : i32
    %77 = vector.broadcast %c0_i32_37 : i32 to vector<1x256xi32>
    %78 = arith.addi %31, %77 : vector<1x256xi32>
    %c0_i32_38 = arith.constant 0 : i32
    %c7_i32_39 = arith.constant 7 : i32
    %79 = vector.broadcast %c0_i32_38 : i32 to vector<1x256xi32>
    %80 = arith.maxsi %79, %78 : vector<1x256xi32>
    %81 = vector.broadcast %c7_i32_39 : i32 to vector<1x256xi32>
    %82 = arith.minsi %81, %80 : vector<1x256xi32>
    %c0_i32_40 = arith.constant 0 : i32
    %83 = vector.broadcast %c0_i32_40 : i32 to vector<1x256xi32>
    %84 = arith.cmpi sge, %78, %83 : vector<1x256xi32>
    %85 = arith.andi %70, %84 : vector<1x256xi1>
    %c8_i32_41 = arith.constant 8 : i32
    %86 = vector.broadcast %c8_i32_41 : i32 to vector<1x256xi32>
    %87 = arith.cmpi slt, %78, %86 : vector<1x256xi32>
    %88 = arith.andi %85, %87 : vector<1x256xi1>
    %89 = arith.mulf %71, %38 : vector<1x256xf32>
    %cst_42 = arith.constant 0.000000e+00 : f32
    %90 = vector.broadcast %cst_42 : f32 to vector<1x256xf32>
    %91 = arith.select %88, %89, %90 : vector<1x256xi1>, vector<1x256xf32>
    %92 = arith.addi %76, %82 : vector<1x256xi32>
    %c7_i32_43 = arith.constant 7 : i32
    %93 = vector.broadcast %c7_i32_43 : i32 to vector<1x256xi32>
    %94 = arith.shrsi %92, %93 : vector<1x256xi32>
    %c127_i32 = arith.constant 127 : i32
    %95 = vector.broadcast %c127_i32 : i32 to vector<1x256xi32>
    %96 = arith.andi %92, %95 : vector<1x256xi32>
    %97 = vector.broadcast %94 : vector<1x256xi32> to vector<8x256xi32>
    %98 = arith.cmpi eq, %43, %97 : vector<8x256xi32>
    %cst_44 = arith.constant 1.000000e+00 : f32
    %cst_45 = arith.constant 0.000000e+00 : f32
    %99 = vector.broadcast %cst_44 : f32 to vector<8x256xf32>
    %100 = vector.broadcast %cst_45 : f32 to vector<8x256xf32>
    %101 = arith.select %98, %99, %100 : vector<8x256xi1>, vector<8x256xf32>
    %102 = vector.broadcast %96 : vector<1x256xi32> to vector<128x256xi32>
    %103 = arith.cmpi eq, %44, %102 : vector<128x256xi32>
    %cst_46 = arith.constant dense<0.000000e+00> : vector<128x256xf32>
    %104 = tpu.matmul %5, %101, %cst_46 {dimension_numbers = #tpu.dot_dimension_numbers<[1], [0], [0], [1], [0, 0, 1, 1], [], []>} : vector<128x8xf32>, vector<8x256xf32>, vector<128x256xf32> -> vector<128x256xf32>
    %cst_47 = arith.constant 0.000000e+00 : f32
    %105 = vector.broadcast %cst_47 : f32 to vector<128x256xf32>
    %106 = arith.select %103, %104, %105 : vector<128x256xi1>, vector<128x256xf32>
    %cst_48 = arith.constant dense<0.000000e+00> : vector<256xf32>
    %107 = vector.multi_reduction <add>, %106, %cst_48 [0] : vector<128x256xf32> to vector<256xf32>
    %108 = vector.shape_cast %107 : vector<256xf32> to vector<1x256xf32>
    %109 = arith.mulf %91, %108 : vector<1x256xf32>
    %110 = arith.addf %45, %109 : vector<1x256xf32>
    %cst_49 = arith.constant dense<0.000000e+00> : vector<128x256xf32>
    %111 = tpu.matmul %7, %101, %cst_49 {dimension_numbers = #tpu.dot_dimension_numbers<[1], [0], [0], [1], [0, 0, 1, 1], [], []>} : vector<128x8xf32>, vector<8x256xf32>, vector<128x256xf32> -> vector<128x256xf32>
    %cst_50 = arith.constant 0.000000e+00 : f32
    %112 = vector.broadcast %cst_50 : f32 to vector<128x256xf32>
    %113 = arith.select %103, %111, %112 : vector<128x256xi1>, vector<128x256xf32>
    %cst_51 = arith.constant dense<0.000000e+00> : vector<256xf32>
    %114 = vector.multi_reduction <add>, %113, %cst_51 [0] : vector<128x256xf32> to vector<256xf32>
    %115 = vector.shape_cast %114 : vector<256xf32> to vector<1x256xf32>
    %116 = arith.mulf %91, %115 : vector<1x256xf32>
    %117 = arith.addf %46, %116 : vector<1x256xf32>
    %cst_52 = arith.constant dense<0.000000e+00> : vector<128x256xf32>
    %118 = tpu.matmul %9, %101, %cst_52 {dimension_numbers = #tpu.dot_dimension_numbers<[1], [0], [0], [1], [0, 0, 1, 1], [], []>} : vector<128x8xf32>, vector<8x256xf32>, vector<128x256xf32> -> vector<128x256xf32>
    %cst_53 = arith.constant 0.000000e+00 : f32
    %119 = vector.broadcast %cst_53 : f32 to vector<128x256xf32>
    %120 = arith.select %103, %118, %119 : vector<128x256xi1>, vector<128x256xf32>
    %cst_54 = arith.constant dense<0.000000e+00> : vector<256xf32>
    %121 = vector.multi_reduction <add>, %120, %cst_54 [0] : vector<128x256xf32> to vector<256xf32>
    %122 = vector.shape_cast %121 : vector<256xf32> to vector<1x256xf32>
    %123 = arith.mulf %91, %122 : vector<1x256xf32>
    %124 = arith.addf %47, %123 : vector<1x256xf32>
    %c1_i32_55 = arith.constant 1 : i32
    %125 = vector.broadcast %c1_i32_55 : i32 to vector<1x256xi32>
    %126 = arith.addi %31, %125 : vector<1x256xi32>
    %c0_i32_56 = arith.constant 0 : i32
    %c7_i32_57 = arith.constant 7 : i32
    %127 = vector.broadcast %c0_i32_56 : i32 to vector<1x256xi32>
    %128 = arith.maxsi %127, %126 : vector<1x256xi32>
    %129 = vector.broadcast %c7_i32_57 : i32 to vector<1x256xi32>
    %130 = arith.minsi %129, %128 : vector<1x256xi32>
    %c0_i32_58 = arith.constant 0 : i32
    %131 = vector.broadcast %c0_i32_58 : i32 to vector<1x256xi32>
    %132 = arith.cmpi sge, %126, %131 : vector<1x256xi32>
    %133 = arith.andi %70, %132 : vector<1x256xi1>
    %c8_i32_59 = arith.constant 8 : i32
    %134 = vector.broadcast %c8_i32_59 : i32 to vector<1x256xi32>
    %135 = arith.cmpi slt, %126, %134 : vector<1x256xi32>
    %136 = arith.andi %133, %135 : vector<1x256xi1>
    %137 = arith.mulf %71, %34 : vector<1x256xf32>
    %cst_60 = arith.constant 0.000000e+00 : f32
    %138 = vector.broadcast %cst_60 : f32 to vector<1x256xf32>
    %139 = arith.select %136, %137, %138 : vector<1x256xi1>, vector<1x256xf32>
    %140 = arith.addi %76, %130 : vector<1x256xi32>
    %c7_i32_61 = arith.constant 7 : i32
    %141 = vector.broadcast %c7_i32_61 : i32 to vector<1x256xi32>
    %142 = arith.shrsi %140, %141 : vector<1x256xi32>
    %c127_i32_62 = arith.constant 127 : i32
    %143 = vector.broadcast %c127_i32_62 : i32 to vector<1x256xi32>
    %144 = arith.andi %140, %143 : vector<1x256xi32>
    %145 = vector.broadcast %142 : vector<1x256xi32> to vector<8x256xi32>
    %146 = arith.cmpi eq, %43, %145 : vector<8x256xi32>
    %cst_63 = arith.constant 1.000000e+00 : f32
    %cst_64 = arith.constant 0.000000e+00 : f32
    %147 = vector.broadcast %cst_63 : f32 to vector<8x256xf32>
    %148 = vector.broadcast %cst_64 : f32 to vector<8x256xf32>
    %149 = arith.select %146, %147, %148 : vector<8x256xi1>, vector<8x256xf32>
    %150 = vector.broadcast %144 : vector<1x256xi32> to vector<128x256xi32>
    %151 = arith.cmpi eq, %44, %150 : vector<128x256xi32>
    %cst_65 = arith.constant dense<0.000000e+00> : vector<128x256xf32>
    %152 = tpu.matmul %5, %149, %cst_65 {dimension_numbers = #tpu.dot_dimension_numbers<[1], [0], [0], [1], [0, 0, 1, 1], [], []>} : vector<128x8xf32>, vector<8x256xf32>, vector<128x256xf32> -> vector<128x256xf32>
    %cst_66 = arith.constant 0.000000e+00 : f32
    %153 = vector.broadcast %cst_66 : f32 to vector<128x256xf32>
    %154 = arith.select %151, %152, %153 : vector<128x256xi1>, vector<128x256xf32>
    %cst_67 = arith.constant dense<0.000000e+00> : vector<256xf32>
    %155 = vector.multi_reduction <add>, %154, %cst_67 [0] : vector<128x256xf32> to vector<256xf32>
    %156 = vector.shape_cast %155 : vector<256xf32> to vector<1x256xf32>
    %157 = arith.mulf %139, %156 : vector<1x256xf32>
    %158 = arith.addf %110, %157 : vector<1x256xf32>
    %cst_68 = arith.constant dense<0.000000e+00> : vector<128x256xf32>
    %159 = tpu.matmul %7, %149, %cst_68 {dimension_numbers = #tpu.dot_dimension_numbers<[1], [0], [0], [1], [0, 0, 1, 1], [], []>} : vector<128x8xf32>, vector<8x256xf32>, vector<128x256xf32> -> vector<128x256xf32>
    %cst_69 = arith.constant 0.000000e+00 : f32
    %160 = vector.broadcast %cst_69 : f32 to vector<128x256xf32>
    %161 = arith.select %151, %159, %160 : vector<128x256xi1>, vector<128x256xf32>
    %cst_70 = arith.constant dense<0.000000e+00> : vector<256xf32>
    %162 = vector.multi_reduction <add>, %161, %cst_70 [0] : vector<128x256xf32> to vector<256xf32>
    %163 = vector.shape_cast %162 : vector<256xf32> to vector<1x256xf32>
    %164 = arith.mulf %139, %163 : vector<1x256xf32>
    %165 = arith.addf %117, %164 : vector<1x256xf32>
    %cst_71 = arith.constant dense<0.000000e+00> : vector<128x256xf32>
    %166 = tpu.matmul %9, %149, %cst_71 {dimension_numbers = #tpu.dot_dimension_numbers<[1], [0], [0], [1], [0, 0, 1, 1], [], []>} : vector<128x8xf32>, vector<8x256xf32>, vector<128x256xf32> -> vector<128x256xf32>
    %cst_72 = arith.constant 0.000000e+00 : f32
    %167 = vector.broadcast %cst_72 : f32 to vector<128x256xf32>
    %168 = arith.select %151, %166, %167 : vector<128x256xi1>, vector<128x256xf32>
    %cst_73 = arith.constant dense<0.000000e+00> : vector<256xf32>
    %169 = vector.multi_reduction <add>, %168, %cst_73 [0] : vector<128x256xf32> to vector<256xf32>
    %170 = vector.shape_cast %169 : vector<256xf32> to vector<1x256xf32>
    %171 = arith.mulf %139, %170 : vector<1x256xf32>
    %172 = arith.addf %124, %171 : vector<1x256xf32>
    %c1_i32_74 = arith.constant 1 : i32
    %173 = vector.broadcast %c1_i32_74 : i32 to vector<1x256xi32>
    %174 = arith.addi %32, %173 : vector<1x256xi32>
    %c0_i32_75 = arith.constant 0 : i32
    %c7_i32_76 = arith.constant 7 : i32
    %175 = vector.broadcast %c0_i32_75 : i32 to vector<1x256xi32>
    %176 = arith.maxsi %175, %174 : vector<1x256xi32>
    %177 = vector.broadcast %c7_i32_76 : i32 to vector<1x256xi32>
    %178 = arith.minsi %177, %176 : vector<1x256xi32>
    %c0_i32_77 = arith.constant 0 : i32
    %179 = vector.broadcast %c0_i32_77 : i32 to vector<1x256xi32>
    %180 = arith.cmpi sge, %174, %179 : vector<1x256xi32>
    %181 = arith.andi %58, %180 : vector<1x256xi1>
    %c8_i32_78 = arith.constant 8 : i32
    %182 = vector.broadcast %c8_i32_78 : i32 to vector<1x256xi32>
    %183 = arith.cmpi slt, %174, %182 : vector<1x256xi32>
    %184 = arith.andi %181, %183 : vector<1x256xi1>
    %185 = arith.mulf %42, %35 : vector<1x256xf32>
    %c8_i32_79 = arith.constant 8 : i32
    %186 = vector.broadcast %c8_i32_79 : i32 to vector<1x256xi32>
    %187 = arith.muli %53, %186 : vector<1x256xi32>
    %188 = arith.addi %187, %178 : vector<1x256xi32>
    %c8_i32_80 = arith.constant 8 : i32
    %189 = vector.broadcast %c8_i32_80 : i32 to vector<1x256xi32>
    %190 = arith.muli %188, %189 : vector<1x256xi32>
    %c0_i32_81 = arith.constant 0 : i32
    %191 = vector.broadcast %c0_i32_81 : i32 to vector<1x256xi32>
    %192 = arith.addi %31, %191 : vector<1x256xi32>
    %c0_i32_82 = arith.constant 0 : i32
    %c7_i32_83 = arith.constant 7 : i32
    %193 = vector.broadcast %c0_i32_82 : i32 to vector<1x256xi32>
    %194 = arith.maxsi %193, %192 : vector<1x256xi32>
    %195 = vector.broadcast %c7_i32_83 : i32 to vector<1x256xi32>
    %196 = arith.minsi %195, %194 : vector<1x256xi32>
    %c0_i32_84 = arith.constant 0 : i32
    %197 = vector.broadcast %c0_i32_84 : i32 to vector<1x256xi32>
    %198 = arith.cmpi sge, %192, %197 : vector<1x256xi32>
    %199 = arith.andi %184, %198 : vector<1x256xi1>
    %c8_i32_85 = arith.constant 8 : i32
    %200 = vector.broadcast %c8_i32_85 : i32 to vector<1x256xi32>
    %201 = arith.cmpi slt, %192, %200 : vector<1x256xi32>
    %202 = arith.andi %199, %201 : vector<1x256xi1>
    %203 = arith.mulf %185, %38 : vector<1x256xf32>
    %cst_86 = arith.constant 0.000000e+00 : f32
    %204 = vector.broadcast %cst_86 : f32 to vector<1x256xf32>
    %205 = arith.select %202, %203, %204 : vector<1x256xi1>, vector<1x256xf32>
    %206 = arith.addi %190, %196 : vector<1x256xi32>
    %c7_i32_87 = arith.constant 7 : i32
    %207 = vector.broadcast %c7_i32_87 : i32 to vector<1x256xi32>
    %208 = arith.shrsi %206, %207 : vector<1x256xi32>
    %c127_i32_88 = arith.constant 127 : i32
    %209 = vector.broadcast %c127_i32_88 : i32 to vector<1x256xi32>
    %210 = arith.andi %206, %209 : vector<1x256xi32>
    %211 = vector.broadcast %208 : vector<1x256xi32> to vector<8x256xi32>
    %212 = arith.cmpi eq, %43, %211 : vector<8x256xi32>
    %cst_89 = arith.constant 1.000000e+00 : f32
    %cst_90 = arith.constant 0.000000e+00 : f32
    %213 = vector.broadcast %cst_89 : f32 to vector<8x256xf32>
    %214 = vector.broadcast %cst_90 : f32 to vector<8x256xf32>
    %215 = arith.select %212, %213, %214 : vector<8x256xi1>, vector<8x256xf32>
    %216 = vector.broadcast %210 : vector<1x256xi32> to vector<128x256xi32>
    %217 = arith.cmpi eq, %44, %216 : vector<128x256xi32>
    %cst_91 = arith.constant dense<0.000000e+00> : vector<128x256xf32>
    %218 = tpu.matmul %5, %215, %cst_91 {dimension_numbers = #tpu.dot_dimension_numbers<[1], [0], [0], [1], [0, 0, 1, 1], [], []>} : vector<128x8xf32>, vector<8x256xf32>, vector<128x256xf32> -> vector<128x256xf32>
    %cst_92 = arith.constant 0.000000e+00 : f32
    %219 = vector.broadcast %cst_92 : f32 to vector<128x256xf32>
    %220 = arith.select %217, %218, %219 : vector<128x256xi1>, vector<128x256xf32>
    %cst_93 = arith.constant dense<0.000000e+00> : vector<256xf32>
    %221 = vector.multi_reduction <add>, %220, %cst_93 [0] : vector<128x256xf32> to vector<256xf32>
    %222 = vector.shape_cast %221 : vector<256xf32> to vector<1x256xf32>
    %223 = arith.mulf %205, %222 : vector<1x256xf32>
    %224 = arith.addf %158, %223 : vector<1x256xf32>
    %cst_94 = arith.constant dense<0.000000e+00> : vector<128x256xf32>
    %225 = tpu.matmul %7, %215, %cst_94 {dimension_numbers = #tpu.dot_dimension_numbers<[1], [0], [0], [1], [0, 0, 1, 1], [], []>} : vector<128x8xf32>, vector<8x256xf32>, vector<128x256xf32> -> vector<128x256xf32>
    %cst_95 = arith.constant 0.000000e+00 : f32
    %226 = vector.broadcast %cst_95 : f32 to vector<128x256xf32>
    %227 = arith.select %217, %225, %226 : vector<128x256xi1>, vector<128x256xf32>
    %cst_96 = arith.constant dense<0.000000e+00> : vector<256xf32>
    %228 = vector.multi_reduction <add>, %227, %cst_96 [0] : vector<128x256xf32> to vector<256xf32>
    %229 = vector.shape_cast %228 : vector<256xf32> to vector<1x256xf32>
    %230 = arith.mulf %205, %229 : vector<1x256xf32>
    %231 = arith.addf %165, %230 : vector<1x256xf32>
    %cst_97 = arith.constant dense<0.000000e+00> : vector<128x256xf32>
    %232 = tpu.matmul %9, %215, %cst_97 {dimension_numbers = #tpu.dot_dimension_numbers<[1], [0], [0], [1], [0, 0, 1, 1], [], []>} : vector<128x8xf32>, vector<8x256xf32>, vector<128x256xf32> -> vector<128x256xf32>
    %cst_98 = arith.constant 0.000000e+00 : f32
    %233 = vector.broadcast %cst_98 : f32 to vector<128x256xf32>
    %234 = arith.select %217, %232, %233 : vector<128x256xi1>, vector<128x256xf32>
    %cst_99 = arith.constant dense<0.000000e+00> : vector<256xf32>
    %235 = vector.multi_reduction <add>, %234, %cst_99 [0] : vector<128x256xf32> to vector<256xf32>
    %236 = vector.shape_cast %235 : vector<256xf32> to vector<1x256xf32>
    %237 = arith.mulf %205, %236 : vector<1x256xf32>
    %238 = arith.addf %172, %237 : vector<1x256xf32>
    %c1_i32_100 = arith.constant 1 : i32
    %239 = vector.broadcast %c1_i32_100 : i32 to vector<1x256xi32>
    %240 = arith.addi %31, %239 : vector<1x256xi32>
    %c0_i32_101 = arith.constant 0 : i32
    %c7_i32_102 = arith.constant 7 : i32
    %241 = vector.broadcast %c0_i32_101 : i32 to vector<1x256xi32>
    %242 = arith.maxsi %241, %240 : vector<1x256xi32>
    %243 = vector.broadcast %c7_i32_102 : i32 to vector<1x256xi32>
    %244 = arith.minsi %243, %242 : vector<1x256xi32>
    %c0_i32_103 = arith.constant 0 : i32
    %245 = vector.broadcast %c0_i32_103 : i32 to vector<1x256xi32>
    %246 = arith.cmpi sge, %240, %245 : vector<1x256xi32>
    %247 = arith.andi %184, %246 : vector<1x256xi1>
    %c8_i32_104 = arith.constant 8 : i32
    %248 = vector.broadcast %c8_i32_104 : i32 to vector<1x256xi32>
    %249 = arith.cmpi slt, %240, %248 : vector<1x256xi32>
    %250 = arith.andi %247, %249 : vector<1x256xi1>
    %251 = arith.mulf %185, %34 : vector<1x256xf32>
    %cst_105 = arith.constant 0.000000e+00 : f32
    %252 = vector.broadcast %cst_105 : f32 to vector<1x256xf32>
    %253 = arith.select %250, %251, %252 : vector<1x256xi1>, vector<1x256xf32>
    %254 = arith.addi %190, %244 : vector<1x256xi32>
    %c7_i32_106 = arith.constant 7 : i32
    %255 = vector.broadcast %c7_i32_106 : i32 to vector<1x256xi32>
    %256 = arith.shrsi %254, %255 : vector<1x256xi32>
    %c127_i32_107 = arith.constant 127 : i32
    %257 = vector.broadcast %c127_i32_107 : i32 to vector<1x256xi32>
    %258 = arith.andi %254, %257 : vector<1x256xi32>
    %259 = vector.broadcast %256 : vector<1x256xi32> to vector<8x256xi32>
    %260 = arith.cmpi eq, %43, %259 : vector<8x256xi32>
    %cst_108 = arith.constant 1.000000e+00 : f32
    %cst_109 = arith.constant 0.000000e+00 : f32
    %261 = vector.broadcast %cst_108 : f32 to vector<8x256xf32>
    %262 = vector.broadcast %cst_109 : f32 to vector<8x256xf32>
    %263 = arith.select %260, %261, %262 : vector<8x256xi1>, vector<8x256xf32>
    %264 = vector.broadcast %258 : vector<1x256xi32> to vector<128x256xi32>
    %265 = arith.cmpi eq, %44, %264 : vector<128x256xi32>
    %cst_110 = arith.constant dense<0.000000e+00> : vector<128x256xf32>
    %266 = tpu.matmul %5, %263, %cst_110 {dimension_numbers = #tpu.dot_dimension_numbers<[1], [0], [0], [1], [0, 0, 1, 1], [], []>} : vector<128x8xf32>, vector<8x256xf32>, vector<128x256xf32> -> vector<128x256xf32>
    %cst_111 = arith.constant 0.000000e+00 : f32
    %267 = vector.broadcast %cst_111 : f32 to vector<128x256xf32>
    %268 = arith.select %265, %266, %267 : vector<128x256xi1>, vector<128x256xf32>
    %cst_112 = arith.constant dense<0.000000e+00> : vector<256xf32>
    %269 = vector.multi_reduction <add>, %268, %cst_112 [0] : vector<128x256xf32> to vector<256xf32>
    %270 = vector.shape_cast %269 : vector<256xf32> to vector<1x256xf32>
    %271 = arith.mulf %253, %270 : vector<1x256xf32>
    %272 = arith.addf %224, %271 : vector<1x256xf32>
    %cst_113 = arith.constant dense<0.000000e+00> : vector<128x256xf32>
    %273 = tpu.matmul %7, %263, %cst_113 {dimension_numbers = #tpu.dot_dimension_numbers<[1], [0], [0], [1], [0, 0, 1, 1], [], []>} : vector<128x8xf32>, vector<8x256xf32>, vector<128x256xf32> -> vector<128x256xf32>
    %cst_114 = arith.constant 0.000000e+00 : f32
    %274 = vector.broadcast %cst_114 : f32 to vector<128x256xf32>
    %275 = arith.select %265, %273, %274 : vector<128x256xi1>, vector<128x256xf32>
    %cst_115 = arith.constant dense<0.000000e+00> : vector<256xf32>
    %276 = vector.multi_reduction <add>, %275, %cst_115 [0] : vector<128x256xf32> to vector<256xf32>
    %277 = vector.shape_cast %276 : vector<256xf32> to vector<1x256xf32>
    %278 = arith.mulf %253, %277 : vector<1x256xf32>
    %279 = arith.addf %231, %278 : vector<1x256xf32>
    %cst_116 = arith.constant dense<0.000000e+00> : vector<128x256xf32>
    %280 = tpu.matmul %9, %263, %cst_116 {dimension_numbers = #tpu.dot_dimension_numbers<[1], [0], [0], [1], [0, 0, 1, 1], [], []>} : vector<128x8xf32>, vector<8x256xf32>, vector<128x256xf32> -> vector<128x256xf32>
    %cst_117 = arith.constant 0.000000e+00 : f32
    %281 = vector.broadcast %cst_117 : f32 to vector<128x256xf32>
    %282 = arith.select %265, %280, %281 : vector<128x256xi1>, vector<128x256xf32>
    %cst_118 = arith.constant dense<0.000000e+00> : vector<256xf32>
    %283 = vector.multi_reduction <add>, %282, %cst_118 [0] : vector<128x256xf32> to vector<256xf32>
    %284 = vector.shape_cast %283 : vector<256xf32> to vector<1x256xf32>
    %285 = arith.mulf %253, %284 : vector<1x256xf32>
    %286 = arith.addf %238, %285 : vector<1x256xf32>
    %c1_i32_119 = arith.constant 1 : i32
    %287 = vector.broadcast %c1_i32_119 : i32 to vector<1x256xi32>
    %288 = arith.addi %33, %287 : vector<1x256xi32>
    %c0_i32_120 = arith.constant 0 : i32
    %c7_i32_121 = arith.constant 7 : i32
    %289 = vector.broadcast %c0_i32_120 : i32 to vector<1x256xi32>
    %290 = arith.maxsi %289, %288 : vector<1x256xi32>
    %291 = vector.broadcast %c7_i32_121 : i32 to vector<1x256xi32>
    %292 = arith.minsi %291, %290 : vector<1x256xi32>
    %c0_i32_122 = arith.constant 0 : i32
    %293 = vector.broadcast %c0_i32_122 : i32 to vector<1x256xi32>
    %294 = arith.cmpi sge, %288, %293 : vector<1x256xi32>
    %c8_i32_123 = arith.constant 8 : i32
    %295 = vector.broadcast %c8_i32_123 : i32 to vector<1x256xi32>
    %296 = arith.cmpi slt, %288, %295 : vector<1x256xi32>
    %297 = arith.andi %294, %296 : vector<1x256xi1>
    %c0_i32_124 = arith.constant 0 : i32
    %298 = vector.broadcast %c0_i32_124 : i32 to vector<1x256xi32>
    %299 = arith.addi %32, %298 : vector<1x256xi32>
    %c0_i32_125 = arith.constant 0 : i32
    %c7_i32_126 = arith.constant 7 : i32
    %300 = vector.broadcast %c0_i32_125 : i32 to vector<1x256xi32>
    %301 = arith.maxsi %300, %299 : vector<1x256xi32>
    %302 = vector.broadcast %c7_i32_126 : i32 to vector<1x256xi32>
    %303 = arith.minsi %302, %301 : vector<1x256xi32>
    %c0_i32_127 = arith.constant 0 : i32
    %304 = vector.broadcast %c0_i32_127 : i32 to vector<1x256xi32>
    %305 = arith.cmpi sge, %299, %304 : vector<1x256xi32>
    %306 = arith.andi %297, %305 : vector<1x256xi1>
    %c8_i32_128 = arith.constant 8 : i32
    %307 = vector.broadcast %c8_i32_128 : i32 to vector<1x256xi32>
    %308 = arith.cmpi slt, %299, %307 : vector<1x256xi32>
    %309 = arith.andi %306, %308 : vector<1x256xi1>
    %310 = arith.mulf %36, %40 : vector<1x256xf32>
    %c8_i32_129 = arith.constant 8 : i32
    %311 = vector.broadcast %c8_i32_129 : i32 to vector<1x256xi32>
    %312 = arith.muli %292, %311 : vector<1x256xi32>
    %313 = arith.addi %312, %303 : vector<1x256xi32>
    %c8_i32_130 = arith.constant 8 : i32
    %314 = vector.broadcast %c8_i32_130 : i32 to vector<1x256xi32>
    %315 = arith.muli %313, %314 : vector<1x256xi32>
    %c0_i32_131 = arith.constant 0 : i32
    %316 = vector.broadcast %c0_i32_131 : i32 to vector<1x256xi32>
    %317 = arith.addi %31, %316 : vector<1x256xi32>
    %c0_i32_132 = arith.constant 0 : i32
    %c7_i32_133 = arith.constant 7 : i32
    %318 = vector.broadcast %c0_i32_132 : i32 to vector<1x256xi32>
    %319 = arith.maxsi %318, %317 : vector<1x256xi32>
    %320 = vector.broadcast %c7_i32_133 : i32 to vector<1x256xi32>
    %321 = arith.minsi %320, %319 : vector<1x256xi32>
    %c0_i32_134 = arith.constant 0 : i32
    %322 = vector.broadcast %c0_i32_134 : i32 to vector<1x256xi32>
    %323 = arith.cmpi sge, %317, %322 : vector<1x256xi32>
    %324 = arith.andi %309, %323 : vector<1x256xi1>
    %c8_i32_135 = arith.constant 8 : i32
    %325 = vector.broadcast %c8_i32_135 : i32 to vector<1x256xi32>
    %326 = arith.cmpi slt, %317, %325 : vector<1x256xi32>
    %327 = arith.andi %324, %326 : vector<1x256xi1>
    %328 = arith.mulf %310, %38 : vector<1x256xf32>
    %cst_136 = arith.constant 0.000000e+00 : f32
    %329 = vector.broadcast %cst_136 : f32 to vector<1x256xf32>
    %330 = arith.select %327, %328, %329 : vector<1x256xi1>, vector<1x256xf32>
    %331 = arith.addi %315, %321 : vector<1x256xi32>
    %c7_i32_137 = arith.constant 7 : i32
    %332 = vector.broadcast %c7_i32_137 : i32 to vector<1x256xi32>
    %333 = arith.shrsi %331, %332 : vector<1x256xi32>
    %c127_i32_138 = arith.constant 127 : i32
    %334 = vector.broadcast %c127_i32_138 : i32 to vector<1x256xi32>
    %335 = arith.andi %331, %334 : vector<1x256xi32>
    %336 = vector.broadcast %333 : vector<1x256xi32> to vector<8x256xi32>
    %337 = arith.cmpi eq, %43, %336 : vector<8x256xi32>
    %cst_139 = arith.constant 1.000000e+00 : f32
    %cst_140 = arith.constant 0.000000e+00 : f32
    %338 = vector.broadcast %cst_139 : f32 to vector<8x256xf32>
    %339 = vector.broadcast %cst_140 : f32 to vector<8x256xf32>
    %340 = arith.select %337, %338, %339 : vector<8x256xi1>, vector<8x256xf32>
    %341 = vector.broadcast %335 : vector<1x256xi32> to vector<128x256xi32>
    %342 = arith.cmpi eq, %44, %341 : vector<128x256xi32>
    %cst_141 = arith.constant dense<0.000000e+00> : vector<128x256xf32>
    %343 = tpu.matmul %5, %340, %cst_141 {dimension_numbers = #tpu.dot_dimension_numbers<[1], [0], [0], [1], [0, 0, 1, 1], [], []>} : vector<128x8xf32>, vector<8x256xf32>, vector<128x256xf32> -> vector<128x256xf32>
    %cst_142 = arith.constant 0.000000e+00 : f32
    %344 = vector.broadcast %cst_142 : f32 to vector<128x256xf32>
    %345 = arith.select %342, %343, %344 : vector<128x256xi1>, vector<128x256xf32>
    %cst_143 = arith.constant dense<0.000000e+00> : vector<256xf32>
    %346 = vector.multi_reduction <add>, %345, %cst_143 [0] : vector<128x256xf32> to vector<256xf32>
    %347 = vector.shape_cast %346 : vector<256xf32> to vector<1x256xf32>
    %348 = arith.mulf %330, %347 : vector<1x256xf32>
    %349 = arith.addf %272, %348 : vector<1x256xf32>
    %cst_144 = arith.constant dense<0.000000e+00> : vector<128x256xf32>
    %350 = tpu.matmul %7, %340, %cst_144 {dimension_numbers = #tpu.dot_dimension_numbers<[1], [0], [0], [1], [0, 0, 1, 1], [], []>} : vector<128x8xf32>, vector<8x256xf32>, vector<128x256xf32> -> vector<128x256xf32>
    %cst_145 = arith.constant 0.000000e+00 : f32
    %351 = vector.broadcast %cst_145 : f32 to vector<128x256xf32>
    %352 = arith.select %342, %350, %351 : vector<128x256xi1>, vector<128x256xf32>
    %cst_146 = arith.constant dense<0.000000e+00> : vector<256xf32>
    %353 = vector.multi_reduction <add>, %352, %cst_146 [0] : vector<128x256xf32> to vector<256xf32>
    %354 = vector.shape_cast %353 : vector<256xf32> to vector<1x256xf32>
    %355 = arith.mulf %330, %354 : vector<1x256xf32>
    %356 = arith.addf %279, %355 : vector<1x256xf32>
    %cst_147 = arith.constant dense<0.000000e+00> : vector<128x256xf32>
    %357 = tpu.matmul %9, %340, %cst_147 {dimension_numbers = #tpu.dot_dimension_numbers<[1], [0], [0], [1], [0, 0, 1, 1], [], []>} : vector<128x8xf32>, vector<8x256xf32>, vector<128x256xf32> -> vector<128x256xf32>
    %cst_148 = arith.constant 0.000000e+00 : f32
    %358 = vector.broadcast %cst_148 : f32 to vector<128x256xf32>
    %359 = arith.select %342, %357, %358 : vector<128x256xi1>, vector<128x256xf32>
    %cst_149 = arith.constant dense<0.000000e+00> : vector<256xf32>
    %360 = vector.multi_reduction <add>, %359, %cst_149 [0] : vector<128x256xf32> to vector<256xf32>
    %361 = vector.shape_cast %360 : vector<256xf32> to vector<1x256xf32>
    %362 = arith.mulf %330, %361 : vector<1x256xf32>
    %363 = arith.addf %286, %362 : vector<1x256xf32>
    %c1_i32_150 = arith.constant 1 : i32
    %364 = vector.broadcast %c1_i32_150 : i32 to vector<1x256xi32>
    %365 = arith.addi %31, %364 : vector<1x256xi32>
    %c0_i32_151 = arith.constant 0 : i32
    %c7_i32_152 = arith.constant 7 : i32
    %366 = vector.broadcast %c0_i32_151 : i32 to vector<1x256xi32>
    %367 = arith.maxsi %366, %365 : vector<1x256xi32>
    %368 = vector.broadcast %c7_i32_152 : i32 to vector<1x256xi32>
    %369 = arith.minsi %368, %367 : vector<1x256xi32>
    %c0_i32_153 = arith.constant 0 : i32
    %370 = vector.broadcast %c0_i32_153 : i32 to vector<1x256xi32>
    %371 = arith.cmpi sge, %365, %370 : vector<1x256xi32>
    %372 = arith.andi %309, %371 : vector<1x256xi1>
    %c8_i32_154 = arith.constant 8 : i32
    %373 = vector.broadcast %c8_i32_154 : i32 to vector<1x256xi32>
    %374 = arith.cmpi slt, %365, %373 : vector<1x256xi32>
    %375 = arith.andi %372, %374 : vector<1x256xi1>
    %376 = arith.mulf %310, %34 : vector<1x256xf32>
    %cst_155 = arith.constant 0.000000e+00 : f32
    %377 = vector.broadcast %cst_155 : f32 to vector<1x256xf32>
    %378 = arith.select %375, %376, %377 : vector<1x256xi1>, vector<1x256xf32>
    %379 = arith.addi %315, %369 : vector<1x256xi32>
    %c7_i32_156 = arith.constant 7 : i32
    %380 = vector.broadcast %c7_i32_156 : i32 to vector<1x256xi32>
    %381 = arith.shrsi %379, %380 : vector<1x256xi32>
    %c127_i32_157 = arith.constant 127 : i32
    %382 = vector.broadcast %c127_i32_157 : i32 to vector<1x256xi32>
    %383 = arith.andi %379, %382 : vector<1x256xi32>
    %384 = vector.broadcast %381 : vector<1x256xi32> to vector<8x256xi32>
    %385 = arith.cmpi eq, %43, %384 : vector<8x256xi32>
    %cst_158 = arith.constant 1.000000e+00 : f32
    %cst_159 = arith.constant 0.000000e+00 : f32
    %386 = vector.broadcast %cst_158 : f32 to vector<8x256xf32>
    %387 = vector.broadcast %cst_159 : f32 to vector<8x256xf32>
    %388 = arith.select %385, %386, %387 : vector<8x256xi1>, vector<8x256xf32>
    %389 = vector.broadcast %383 : vector<1x256xi32> to vector<128x256xi32>
    %390 = arith.cmpi eq, %44, %389 : vector<128x256xi32>
    %cst_160 = arith.constant dense<0.000000e+00> : vector<128x256xf32>
    %391 = tpu.matmul %5, %388, %cst_160 {dimension_numbers = #tpu.dot_dimension_numbers<[1], [0], [0], [1], [0, 0, 1, 1], [], []>} : vector<128x8xf32>, vector<8x256xf32>, vector<128x256xf32> -> vector<128x256xf32>
    %cst_161 = arith.constant 0.000000e+00 : f32
    %392 = vector.broadcast %cst_161 : f32 to vector<128x256xf32>
    %393 = arith.select %390, %391, %392 : vector<128x256xi1>, vector<128x256xf32>
    %cst_162 = arith.constant dense<0.000000e+00> : vector<256xf32>
    %394 = vector.multi_reduction <add>, %393, %cst_162 [0] : vector<128x256xf32> to vector<256xf32>
    %395 = vector.shape_cast %394 : vector<256xf32> to vector<1x256xf32>
    %396 = arith.mulf %378, %395 : vector<1x256xf32>
    %397 = arith.addf %349, %396 : vector<1x256xf32>
    %cst_163 = arith.constant dense<0.000000e+00> : vector<128x256xf32>
    %398 = tpu.matmul %7, %388, %cst_163 {dimension_numbers = #tpu.dot_dimension_numbers<[1], [0], [0], [1], [0, 0, 1, 1], [], []>} : vector<128x8xf32>, vector<8x256xf32>, vector<128x256xf32> -> vector<128x256xf32>
    %cst_164 = arith.constant 0.000000e+00 : f32
    %399 = vector.broadcast %cst_164 : f32 to vector<128x256xf32>
    %400 = arith.select %390, %398, %399 : vector<128x256xi1>, vector<128x256xf32>
    %cst_165 = arith.constant dense<0.000000e+00> : vector<256xf32>
    %401 = vector.multi_reduction <add>, %400, %cst_165 [0] : vector<128x256xf32> to vector<256xf32>
    %402 = vector.shape_cast %401 : vector<256xf32> to vector<1x256xf32>
    %403 = arith.mulf %378, %402 : vector<1x256xf32>
    %404 = arith.addf %356, %403 : vector<1x256xf32>
    %cst_166 = arith.constant dense<0.000000e+00> : vector<128x256xf32>
    %405 = tpu.matmul %9, %388, %cst_166 {dimension_numbers = #tpu.dot_dimension_numbers<[1], [0], [0], [1], [0, 0, 1, 1], [], []>} : vector<128x8xf32>, vector<8x256xf32>, vector<128x256xf32> -> vector<128x256xf32>
    %cst_167 = arith.constant 0.000000e+00 : f32
    %406 = vector.broadcast %cst_167 : f32 to vector<128x256xf32>
    %407 = arith.select %390, %405, %406 : vector<128x256xi1>, vector<128x256xf32>
    %cst_168 = arith.constant dense<0.000000e+00> : vector<256xf32>
    %408 = vector.multi_reduction <add>, %407, %cst_168 [0] : vector<128x256xf32> to vector<256xf32>
    %409 = vector.shape_cast %408 : vector<256xf32> to vector<1x256xf32>
    %410 = arith.mulf %378, %409 : vector<1x256xf32>
    %411 = arith.addf %363, %410 : vector<1x256xf32>
    %c1_i32_169 = arith.constant 1 : i32
    %412 = vector.broadcast %c1_i32_169 : i32 to vector<1x256xi32>
    %413 = arith.addi %32, %412 : vector<1x256xi32>
    %c0_i32_170 = arith.constant 0 : i32
    %c7_i32_171 = arith.constant 7 : i32
    %414 = vector.broadcast %c0_i32_170 : i32 to vector<1x256xi32>
    %415 = arith.maxsi %414, %413 : vector<1x256xi32>
    %416 = vector.broadcast %c7_i32_171 : i32 to vector<1x256xi32>
    %417 = arith.minsi %416, %415 : vector<1x256xi32>
    %c0_i32_172 = arith.constant 0 : i32
    %418 = vector.broadcast %c0_i32_172 : i32 to vector<1x256xi32>
    %419 = arith.cmpi sge, %413, %418 : vector<1x256xi32>
    %420 = arith.andi %297, %419 : vector<1x256xi1>
    %c8_i32_173 = arith.constant 8 : i32
    %421 = vector.broadcast %c8_i32_173 : i32 to vector<1x256xi32>
    %422 = arith.cmpi slt, %413, %421 : vector<1x256xi32>
    %423 = arith.andi %420, %422 : vector<1x256xi1>
    %424 = arith.mulf %36, %35 : vector<1x256xf32>
    %c8_i32_174 = arith.constant 8 : i32
    %425 = vector.broadcast %c8_i32_174 : i32 to vector<1x256xi32>
    %426 = arith.muli %292, %425 : vector<1x256xi32>
    %427 = arith.addi %426, %417 : vector<1x256xi32>
    %c8_i32_175 = arith.constant 8 : i32
    %428 = vector.broadcast %c8_i32_175 : i32 to vector<1x256xi32>
    %429 = arith.muli %427, %428 : vector<1x256xi32>
    %c0_i32_176 = arith.constant 0 : i32
    %430 = vector.broadcast %c0_i32_176 : i32 to vector<1x256xi32>
    %431 = arith.addi %31, %430 : vector<1x256xi32>
    %c0_i32_177 = arith.constant 0 : i32
    %c7_i32_178 = arith.constant 7 : i32
    %432 = vector.broadcast %c0_i32_177 : i32 to vector<1x256xi32>
    %433 = arith.maxsi %432, %431 : vector<1x256xi32>
    %434 = vector.broadcast %c7_i32_178 : i32 to vector<1x256xi32>
    %435 = arith.minsi %434, %433 : vector<1x256xi32>
    %c0_i32_179 = arith.constant 0 : i32
    %436 = vector.broadcast %c0_i32_179 : i32 to vector<1x256xi32>
    %437 = arith.cmpi sge, %431, %436 : vector<1x256xi32>
    %438 = arith.andi %423, %437 : vector<1x256xi1>
    %c8_i32_180 = arith.constant 8 : i32
    %439 = vector.broadcast %c8_i32_180 : i32 to vector<1x256xi32>
    %440 = arith.cmpi slt, %431, %439 : vector<1x256xi32>
    %441 = arith.andi %438, %440 : vector<1x256xi1>
    %442 = arith.mulf %424, %38 : vector<1x256xf32>
    %cst_181 = arith.constant 0.000000e+00 : f32
    %443 = vector.broadcast %cst_181 : f32 to vector<1x256xf32>
    %444 = arith.select %441, %442, %443 : vector<1x256xi1>, vector<1x256xf32>
    %445 = arith.addi %429, %435 : vector<1x256xi32>
    %c7_i32_182 = arith.constant 7 : i32
    %446 = vector.broadcast %c7_i32_182 : i32 to vector<1x256xi32>
    %447 = arith.shrsi %445, %446 : vector<1x256xi32>
    %c127_i32_183 = arith.constant 127 : i32
    %448 = vector.broadcast %c127_i32_183 : i32 to vector<1x256xi32>
    %449 = arith.andi %445, %448 : vector<1x256xi32>
    %450 = vector.broadcast %447 : vector<1x256xi32> to vector<8x256xi32>
    %451 = arith.cmpi eq, %43, %450 : vector<8x256xi32>
    %cst_184 = arith.constant 1.000000e+00 : f32
    %cst_185 = arith.constant 0.000000e+00 : f32
    %452 = vector.broadcast %cst_184 : f32 to vector<8x256xf32>
    %453 = vector.broadcast %cst_185 : f32 to vector<8x256xf32>
    %454 = arith.select %451, %452, %453 : vector<8x256xi1>, vector<8x256xf32>
    %455 = vector.broadcast %449 : vector<1x256xi32> to vector<128x256xi32>
    %456 = arith.cmpi eq, %44, %455 : vector<128x256xi32>
    %cst_186 = arith.constant dense<0.000000e+00> : vector<128x256xf32>
    %457 = tpu.matmul %5, %454, %cst_186 {dimension_numbers = #tpu.dot_dimension_numbers<[1], [0], [0], [1], [0, 0, 1, 1], [], []>} : vector<128x8xf32>, vector<8x256xf32>, vector<128x256xf32> -> vector<128x256xf32>
    %cst_187 = arith.constant 0.000000e+00 : f32
    %458 = vector.broadcast %cst_187 : f32 to vector<128x256xf32>
    %459 = arith.select %456, %457, %458 : vector<128x256xi1>, vector<128x256xf32>
    %cst_188 = arith.constant dense<0.000000e+00> : vector<256xf32>
    %460 = vector.multi_reduction <add>, %459, %cst_188 [0] : vector<128x256xf32> to vector<256xf32>
    %461 = vector.shape_cast %460 : vector<256xf32> to vector<1x256xf32>
    %462 = arith.mulf %444, %461 : vector<1x256xf32>
    %463 = arith.addf %397, %462 : vector<1x256xf32>
    %cst_189 = arith.constant dense<0.000000e+00> : vector<128x256xf32>
    %464 = tpu.matmul %7, %454, %cst_189 {dimension_numbers = #tpu.dot_dimension_numbers<[1], [0], [0], [1], [0, 0, 1, 1], [], []>} : vector<128x8xf32>, vector<8x256xf32>, vector<128x256xf32> -> vector<128x256xf32>
    %cst_190 = arith.constant 0.000000e+00 : f32
    %465 = vector.broadcast %cst_190 : f32 to vector<128x256xf32>
    %466 = arith.select %456, %464, %465 : vector<128x256xi1>, vector<128x256xf32>
    %cst_191 = arith.constant dense<0.000000e+00> : vector<256xf32>
    %467 = vector.multi_reduction <add>, %466, %cst_191 [0] : vector<128x256xf32> to vector<256xf32>
    %468 = vector.shape_cast %467 : vector<256xf32> to vector<1x256xf32>
    %469 = arith.mulf %444, %468 : vector<1x256xf32>
    %470 = arith.addf %404, %469 : vector<1x256xf32>
    %cst_192 = arith.constant dense<0.000000e+00> : vector<128x256xf32>
    %471 = tpu.matmul %9, %454, %cst_192 {dimension_numbers = #tpu.dot_dimension_numbers<[1], [0], [0], [1], [0, 0, 1, 1], [], []>} : vector<128x8xf32>, vector<8x256xf32>, vector<128x256xf32> -> vector<128x256xf32>
    %cst_193 = arith.constant 0.000000e+00 : f32
    %472 = vector.broadcast %cst_193 : f32 to vector<128x256xf32>
    %473 = arith.select %456, %471, %472 : vector<128x256xi1>, vector<128x256xf32>
    %cst_194 = arith.constant dense<0.000000e+00> : vector<256xf32>
    %474 = vector.multi_reduction <add>, %473, %cst_194 [0] : vector<128x256xf32> to vector<256xf32>
    %475 = vector.shape_cast %474 : vector<256xf32> to vector<1x256xf32>
    %476 = arith.mulf %444, %475 : vector<1x256xf32>
    %477 = arith.addf %411, %476 : vector<1x256xf32>
    %c1_i32_195 = arith.constant 1 : i32
    %478 = vector.broadcast %c1_i32_195 : i32 to vector<1x256xi32>
    %479 = arith.addi %31, %478 : vector<1x256xi32>
    %c0_i32_196 = arith.constant 0 : i32
    %c7_i32_197 = arith.constant 7 : i32
    %480 = vector.broadcast %c0_i32_196 : i32 to vector<1x256xi32>
    %481 = arith.maxsi %480, %479 : vector<1x256xi32>
    %482 = vector.broadcast %c7_i32_197 : i32 to vector<1x256xi32>
    %483 = arith.minsi %482, %481 : vector<1x256xi32>
    %c0_i32_198 = arith.constant 0 : i32
    %484 = vector.broadcast %c0_i32_198 : i32 to vector<1x256xi32>
    %485 = arith.cmpi sge, %479, %484 : vector<1x256xi32>
    %486 = arith.andi %423, %485 : vector<1x256xi1>
    %c8_i32_199 = arith.constant 8 : i32
    %487 = vector.broadcast %c8_i32_199 : i32 to vector<1x256xi32>
    %488 = arith.cmpi slt, %479, %487 : vector<1x256xi32>
    %489 = arith.andi %486, %488 : vector<1x256xi1>
    %490 = arith.mulf %424, %34 : vector<1x256xf32>
    %cst_200 = arith.constant 0.000000e+00 : f32
    %491 = vector.broadcast %cst_200 : f32 to vector<1x256xf32>
    %492 = arith.select %489, %490, %491 : vector<1x256xi1>, vector<1x256xf32>
    %493 = arith.addi %429, %483 : vector<1x256xi32>
    %c7_i32_201 = arith.constant 7 : i32
    %494 = vector.broadcast %c7_i32_201 : i32 to vector<1x256xi32>
    %495 = arith.shrsi %493, %494 : vector<1x256xi32>
    %c127_i32_202 = arith.constant 127 : i32
    %496 = vector.broadcast %c127_i32_202 : i32 to vector<1x256xi32>
    %497 = arith.andi %493, %496 : vector<1x256xi32>
    %498 = vector.broadcast %495 : vector<1x256xi32> to vector<8x256xi32>
    %499 = arith.cmpi eq, %43, %498 : vector<8x256xi32>
    %cst_203 = arith.constant 1.000000e+00 : f32
    %cst_204 = arith.constant 0.000000e+00 : f32
    %500 = vector.broadcast %cst_203 : f32 to vector<8x256xf32>
    %501 = vector.broadcast %cst_204 : f32 to vector<8x256xf32>
    %502 = arith.select %499, %500, %501 : vector<8x256xi1>, vector<8x256xf32>
    %503 = vector.broadcast %497 : vector<1x256xi32> to vector<128x256xi32>
    %504 = arith.cmpi eq, %44, %503 : vector<128x256xi32>
    %cst_205 = arith.constant dense<0.000000e+00> : vector<128x256xf32>
    %505 = tpu.matmul %5, %502, %cst_205 {dimension_numbers = #tpu.dot_dimension_numbers<[1], [0], [0], [1], [0, 0, 1, 1], [], []>} : vector<128x8xf32>, vector<8x256xf32>, vector<128x256xf32> -> vector<128x256xf32>
    %cst_206 = arith.constant 0.000000e+00 : f32
    %506 = vector.broadcast %cst_206 : f32 to vector<128x256xf32>
    %507 = arith.select %504, %505, %506 : vector<128x256xi1>, vector<128x256xf32>
    %cst_207 = arith.constant dense<0.000000e+00> : vector<256xf32>
    %508 = vector.multi_reduction <add>, %507, %cst_207 [0] : vector<128x256xf32> to vector<256xf32>
    %509 = vector.shape_cast %508 : vector<256xf32> to vector<1x256xf32>
    %510 = arith.mulf %492, %509 : vector<1x256xf32>
    %511 = arith.addf %463, %510 : vector<1x256xf32>
    %cst_208 = arith.constant dense<0.000000e+00> : vector<128x256xf32>
    %512 = tpu.matmul %7, %502, %cst_208 {dimension_numbers = #tpu.dot_dimension_numbers<[1], [0], [0], [1], [0, 0, 1, 1], [], []>} : vector<128x8xf32>, vector<8x256xf32>, vector<128x256xf32> -> vector<128x256xf32>
    %cst_209 = arith.constant 0.000000e+00 : f32
    %513 = vector.broadcast %cst_209 : f32 to vector<128x256xf32>
    %514 = arith.select %504, %512, %513 : vector<128x256xi1>, vector<128x256xf32>
    %cst_210 = arith.constant dense<0.000000e+00> : vector<256xf32>
    %515 = vector.multi_reduction <add>, %514, %cst_210 [0] : vector<128x256xf32> to vector<256xf32>
    %516 = vector.shape_cast %515 : vector<256xf32> to vector<1x256xf32>
    %517 = arith.mulf %492, %516 : vector<1x256xf32>
    %518 = arith.addf %470, %517 : vector<1x256xf32>
    %cst_211 = arith.constant dense<0.000000e+00> : vector<128x256xf32>
    %519 = tpu.matmul %9, %502, %cst_211 {dimension_numbers = #tpu.dot_dimension_numbers<[1], [0], [0], [1], [0, 0, 1, 1], [], []>} : vector<128x8xf32>, vector<8x256xf32>, vector<128x256xf32> -> vector<128x256xf32>
    %cst_212 = arith.constant 0.000000e+00 : f32
    %520 = vector.broadcast %cst_212 : f32 to vector<128x256xf32>
    %521 = arith.select %504, %519, %520 : vector<128x256xi1>, vector<128x256xf32>
    %cst_213 = arith.constant dense<0.000000e+00> : vector<256xf32>
    %522 = vector.multi_reduction <add>, %521, %cst_213 [0] : vector<128x256xf32> to vector<256xf32>
    %523 = vector.shape_cast %522 : vector<256xf32> to vector<1x256xf32>
    %524 = arith.mulf %492, %523 : vector<1x256xf32>
    %525 = arith.addf %477, %524 : vector<1x256xf32>
    %c0_i32_214 = arith.constant 0 : i32
    %526 = vector.broadcast %c0_i32_214 : i32 to vector<3x256xi32>
    %527 = arith.cmpi eq, %11, %526 : vector<3x256xi32>
    %c1_i32_215 = arith.constant 1 : i32
    %528 = vector.broadcast %c1_i32_215 : i32 to vector<3x256xi32>
    %529 = arith.cmpi eq, %11, %528 : vector<3x256xi32>
    %530 = vector.shape_cast %518 : vector<1x256xf32> to vector<1x256xf32>
    %531 = vector.broadcast %530 : vector<1x256xf32> to vector<3x256xf32>
    %532 = vector.shape_cast %525 : vector<1x256xf32> to vector<1x256xf32>
    %533 = vector.broadcast %532 : vector<1x256xf32> to vector<3x256xf32>
    %534 = arith.select %529, %531, %533 : vector<3x256xi1>, vector<3x256xf32>
    %535 = vector.shape_cast %511 : vector<1x256xf32> to vector<1x256xf32>
    %536 = vector.broadcast %535 : vector<1x256xf32> to vector<3x256xf32>
    %537 = arith.select %527, %536, %534 : vector<3x256xi1>, vector<3x256xf32>
    %538 = arith.addf %1, %537 : vector<3x256xf32>
    %c0_216 = arith.constant 0 : index
    %c0_217 = arith.constant 0 : index
    %c0_218 = arith.constant 0 : index
    %c0_219 = arith.constant 0 : index
    %539 = vector.load %arg5[%c0_216, %c0_217, %c0_218, %c0_219] : memref<1x1x3x256xf32, #tpu.memory_space<vmem>>, vector<1x1x3x256xf32>
    %540 = vector.shape_cast %539 : vector<1x1x3x256xf32> to vector<3x256xf32>
    %541 = vector.shape_cast %538 : vector<3x256xf32> to vector<1x1x3x256xf32>
    tpu.vector_store %arg5[%c0_216, %c0_217, %c0_218, %c0_219], %541 {strides = array<i32>} : memref<1x1x3x256xf32, #tpu.memory_space<vmem>>, vector<1x1x3x256xf32>,
    return
  }
  func.func @transform_0(%arg0: i32, %arg1: i32) -> (i32, i32, i32, i32) {
    %c0_i32 = arith.constant 0 : i32
    %c0_i32_0 = arith.constant 0 : i32
    %c0_i32_1 = arith.constant 0 : i32
    return %arg0, %arg1, %c0_i32, %c0_i32_0 : i32, i32, i32, i32
  }
  func.func @transform_1(%arg0: i32, %arg1: i32) -> (i32, i32, i32) {
    %c0_i32 = arith.constant 0 : i32
    %c0_i32_0 = arith.constant 0 : i32
    %c0_i32_1 = arith.constant 0 : i32
    return %arg1, %c0_i32, %c0_i32_0 : i32, i32, i32
  }
  func.func @transform_2(%arg0: i32, %arg1: i32) -> (i32, i32, i32, i32) {
    %c0_i32 = arith.constant 0 : i32
    %c0_i32_0 = arith.constant 0 : i32
    %c0_i32_1 = arith.constant 0 : i32
    %c0_i32_2 = arith.constant 0 : i32
    return %arg0, %c0_i32, %c0_i32_0, %c0_i32_1 : i32, i32, i32, i32
  }
  func.func @transform_3(%arg0: i32, %arg1: i32) -> (i32, i32, i32, i32) {
    %c0_i32 = arith.constant 0 : i32
    %c0_i32_0 = arith.constant 0 : i32
    %c0_i32_1 = arith.constant 0 : i32
    return %arg0, %arg1, %c0_i32, %c0_i32_0 : i32, i32, i32, i32
  }
}

</mosaic_0001>

<bundles_post_ra>
// kernel: tpu_custom_call.1
= control target key start
LH: loop header
LB: loop body
LE: loop exit
PB: predicated region body
PF: predicated region fallthrough
CT: control target
= control target key end

     0   :  { %s7872_s12 = smov 0   ;;  %s7874_s13 = smov 0   ;;  %s13388_s0 = inlined_call_operand.vmem [shape: f32[2,2,3,256], index: 0, kind: input, shape index: {}]   ;;  %s13389_s1 = inlined_call_operand.vmem [shape: f32[2,3,256], index: 1, kind: input, shape index: {}]   ;;  %s13390_s2 = inlined_call_operand.vmem [shape: f32[2,3,128,8], index: 2, kind: input, shape index: {}]   ;;  %s13391_s3 = inlined_call_operand.vmem [shape: f32[2,2,3,256], index: 3, kind: output, shape index: {}]  }
   0x1   :  { %s7876_s14 = smov 0   ;;  %s7878_s15 = smov 0  }
   0x2   :  { %s7880_s16 = smov 0  }
   0x3 LB: > { %s22_s17 = sadd.s32 1, %s7839_s14  ;;  %s25_s18 = sadd.s32 1, %s7843_s15  ;;  %s7847_s16 = sphi %s7880_s16, %s13_s16   ;;  %s7843_s15 = sphi %s7878_s15, %s14328_s15   ;;  %s7839_s14 = sphi %s7876_s14, %s14327_s14   ;;  %s7835_s13 = sphi %s7874_s13, %s14326_s13   ;;  %s7831_s12 = sphi %s7872_s12, %s14325_s12  }
   0x4   : > { %p23_p0 = scmp.ge.s32.totalorder %s22_s17, 2  ;;  %p7140_p1 = scmp.ge.s32.totalorder %s7847_s16, 1 }
   0x5   : > { %p177_p2 = scmp.lt.s32.totalorder %s7847_s16, 5 }
   0x6   : > { %s14330_s17 = smov (%p23_p0, %s22_s17), 0  ;;  %s14332_s18 = smov (!%p23_p0, %s25_s18), %s7843_s15 }
   0x7   : > { %p178_p3 = pnand %p7140_p1, %p177_p2  ;;  %p27_p4 = scmp.ge.s32.totalorder %s14332_s18, 2 }
   0x9   : > { %s14334_s18 = smov (%p27_p4, %s14332_s18), 0  ;;  %181 = sbr.rel (%p178_p3) target bundleno = 1058 (0x422), region = 32 }
   0xe   : > { %p219_p5 = scmp.lt.s32.totalorder %s7835_s13, 1  ;;  %p221_p6 = scmp.lt.s32.totalorder %s7831_s12, 1  ;;  %v13458_v0 = vmov 0.0   ;;  %v300_v12 = vlaneseq  ;;  %vm429_vm6 = vcmask 64512   ;;  %v13395_v40 = vmov 1.0  }
   0xf   : > { %542 = vmatprep.mubr.f32.mxu0 %v13458_v0  ;;  %832 = vmatprep.mubr.f32.mxu1 %v13458_v0 }
  0x10   : > { %s14336_s13 = smov (!%p219_p5, %s7835_s13), 1  ;;  %s14338_s12 = smov (!%p221_p6, %s7831_s12), 1  ;;  %v7941_v18 = vshrl.u32 %v300_v12, 7 }
  0x11   : > { %s7142_s19 = sshll.u32 %s14336_s13, 2  ;;  %s7141_s20 = sshll.u32 %s14338_s12, 1 }
  0x12   : > { %s7617_s21 = sshll.u32 %s14338_s12, 3  ;;  %s7907_s22 = sadd.s32 %s7142_s19, %s7141_s20  ;;  %13729 = vst [vmem:[#allocation6_spill] sm:$0xff] %v7941_v18  ;;  %v7957_v24 = vsub.s32 2, %v7941_v18  ;;  %v7960_v25 = vsub.s32 6, %v7941_v18 }
  0x13   : > { %s232_s25 = scalar_lea.vmem %s13389_s1, %s7617_s21  ;;  %s7143_s26 = sshll.u32 %s7907_s22, 2 }
  0x14   : > { %v248_v1 = vld [vmem:[%s232_s25] sm:$0x77]  ;;  %s7918_s29 = scalar_lea.vmem %s13388_s0, %s7143_s26  ;;  %13732 = vst [vmem:[#allocation9_spill] sm:$0xff] %v7957_v24  ;;  %13733 = vst [vmem:[#allocation10_spill] sm:$0xff] %v7960_v25  ;;  %s7618_s30 = smul.u32 384, %s14336_s13 }
  0x15   : > { %v247_v2 = vld [vmem:[%s7918_s29] sm:$0x77]  ;;  %s246_s9 = scalar_lea.vmem %s13391_s3, %s7143_s26 }
  0x16   : > { %v299_v3 = vadd.f32 %v248_v1, %v247_v2  ;;  %s7975_s6 = scalar_lea.vmem %s13390_s2, %s7618_s30 }
  0x17   : > { %v7988_v38 = vld [vmem:[%s7975_s6] sm:$0xff]  ;;  %v8020_v43 = vld [vmem:[%s7975_s6 + $0x8] sm:$0xff]  ;;  %v8040_v45 = vld [vmem:[%s7975_s6 + $0x10] sm:$0xff] }
  0x18   : > { %v302_v4 = vadd.f32 1.0, %v299_v3  ;;  %v7991_v39 = vld [vmem:[%s7975_s6 + $0x80] sm:$0xff]  ;;  %v8023_v44 = vld [vmem:[%s7975_s6 + $0x88] sm:$0xff]  ;;  %v8043_v46 = vld [vmem:[%s7975_s6 + $0x90] sm:$0xff] }
  0x19   : > { %v8058_v47 = vld [vmem:[%s7975_s6 + $0x18] sm:$0xff]  ;;  %v8070_v49 = vld [vmem:[%s7975_s6 + $0x20] sm:$0xff]  ;;  %v8082_v51 = vld [vmem:[%s7975_s6 + $0x28] sm:$0xff] }
  0x1a   : > { %v303_v5 = vmul.f32 4.0, %v302_v4  ;;  %v8061_v48 = vld [vmem:[%s7975_s6 + $0x98] sm:$0xff]  ;;  %v8073_v50 = vld [vmem:[%s7975_s6 + $0xa0] sm:$0xff]  ;;  %v8085_v52 = vld [vmem:[%s7975_s6 + $0xa8] sm:$0xff] }
  0x1b   : > { %v8094_v53 = vld [vmem:[%s7975_s6 + $0x30] sm:$0xff]  ;;  %v8106_v55 = vld [vmem:[%s7975_s6 + $0x38] sm:$0xff]  ;;  %v8118_v57 = vld [vmem:[%s7975_s6 + $0x40] sm:$0xff] }
  0x1c   : > { %v7921_v6 = vadd.f32 -0.5, %v303_v5  ;;  %v8097_v54 = vld [vmem:[%s7975_s6 + $0xb0] sm:$0xff]  ;;  %v8109_v56 = vld [vmem:[%s7975_s6 + $0xb8] sm:$0xff]  ;;  %v8121_v58 = vld [vmem:[%s7975_s6 + $0xc0] sm:$0xff] }
  0x1d   : > { %v8130_v59 = vld [vmem:[%s7975_s6 + $0x48] sm:$0xff]  ;;  %v8143_v62 = vld [vmem:[%s7975_s6 + $0x50] sm:$0xff]  ;;  %v8161_v2 = vld [vmem:[%s7975_s6 + $0x58] sm:$0xff] }
  0x1e   : > { %13725 = vst [vmem:[#allocation2_spill] sm:$0xff] %v7921_v6  ;;  %v13393_v7 = vfloor.f32 %v7921_v6  ;;  %v8133_v60 = vld [vmem:[%s7975_s6 + $0xc8] sm:$0xff]  ;;  %v8146_v63 = vld [vmem:[%s7975_s6 + $0xd0] sm:$0xff]  ;;  %v8164_v3 = vld [vmem:[%s7975_s6 + $0xd8] sm:$0xff] }
  0x1f   : > { %v8174_v5 = vld [vmem:[%s7975_s6 + $0x60] sm:$0xff]  ;;  %v8191_v12 = vld [vmem:[%s7975_s6 + $0x68] sm:$0xff]  ;;  %v8303_v41 = vld [vmem:[%s7975_s6 + $0x130] sm:$0xff] }
  0x20   : > { %v7619_v8 = vtrunc.f32 %v13393_v7  ;;  %13741 = vst [vmem:[#allocation12_spill] sm:$0xff] %v8191_v12  ;;  %v8294_v37 = vld [vmem:[%s7975_s6 + $0x128] sm:$0xff]  ;;  %v8312_v42 = vld [vmem:[%s7975_s6 + $0x138] sm:$0xff] }
  0x21   : > { %v8348_v7 = vld [vmem:[%s7975_s6 + $0x158] sm:$0xff] }
  0x22   : > { %v7926_v9 = vcvt.f32.s32 %v7619_v8  ;;  %v8177_v8 = vld [vmem:[%s7975_s6 + $0xe0] sm:$0xff]  ;;  %v8396_v6 = vld [vmem:[%s7975_s6 + $0x178] sm:$0xff] }
  0x24   : > { %13726 = vst [vmem:[#allocation3_spill] sm:$0xff] %v7926_v9  ;;  %vm324_vm0 = vcmp.gt.s32.totalorder %v7926_v9, 0  ;;  %v7930_v10 = vadd.s32 1, %v7926_v9 }
  0x25   : > { %v325_v11 = vsel %vm324_vm0, %v7926_v9, 0 }
  0x26   : > { %13727 = vst [vmem:[#allocation4_spill] sm:$0xff] %v7930_v10  ;;  %vm326_vm1 = vcmp.lt.s32.totalorder %v325_v11, 7  ;;  %vm1301_vm2 = vcmp.gt.s32.totalorder %v7930_v10, 0 }
  0x27   : > { %v7934_v13 = vsel %vm326_vm1, %v325_v11, 7  ;;  %v1302_v14 = vsel %vm1301_vm2, %v7930_v10, 0 }
  0x28   : > { %v343_v15 = vmul.u32 8, %v7934_v13  ;;  %v13394_v16 = vrot.slane %v7934_v13, 7  ;;  %vm1303_vm3 = vcmp.lt.s32.totalorder %v1302_v14, 7  ;;  %v7948_v20 = vrot.slane %v7934_v13, 6 }
  0x29   : > { %v7939_v17 = vsel %vm1303_vm3, %v1302_v14, 7  ;;  %v8194_v14 = vld [vmem:[%s7975_s6 + $0xe8] sm:$0xff] }
  0x2a   : > { %13728 = vst [vmem:[#allocation5_spill] sm:$0xff] %v7939_v17  ;;  %v345_v19 = vadd.s32 %v13394_v16, %v343_v15  ;;  %13730 = vst [vmem:[#allocation7_spill] sm:$0xff] %v7948_v20  ;;  %v7951_v21 = vrot.slane %v7939_v17, 6  ;;  %v13392_v61 = vrot.slane %v7939_v17, 7  ;;  %v8357_v16 = vld [vmem:[%s7975_s6 + $0x160] sm:$0xff] }
  0x2c   : > { %13731 = vst [vmem:[#allocation8_spill] sm:$0xff] %v7951_v21  ;;  %v346_v22 = vmul.u32 8, %v345_v19  ;;  %v8156_v1 = vadd.s32 %v13392_v61, %v343_v15  ;;  %v8204_v19 = vld [vmem:[%s7975_s6 + $0x70] sm:$0xff] }
  0x2d   : > { %v8339_v61 = vld [vmem:[%s7975_s6 + $0x150] sm:$0xff] }
  0x2e   : > { %v7954_v23 = vadd.s32 %v7948_v20, %v346_v22  ;;  %v7963_v26 = vadd.s32 %v7951_v21, %v346_v22  ;;  %v2129_v4 = vmul.u32 8, %v8156_v1  ;;  %v8207_v22 = vld [vmem:[%s7975_s6 + $0xf0] sm:$0xff] }
  0x2f   : > { %v8381_v1 = vld [vmem:[%s7975_s6 + $0x170] sm:$0xff] }
  0x30   : > { %v359_v27 = vshra.s32 %v7954_v23, 7  ;;  %v1322_v28 = vshra.s32 %v7963_v26, 7  ;;  %v8186_v11 = vadd.s32 %v2129_v4, %v7948_v20 }
  0x32   : > { %v368_v29 = vrot.slane %v359_v27, %v7960_v25  ;;  %v364_v30 = vrot.slane %v359_v27, %v7957_v24  ;;  %v1331_v31 = vrot.slane %v1322_v28, %v7960_v25  ;;  %v1327_v32 = vrot.slane %v1322_v28, %v7957_v24  ;;  %13740 = vst [vmem:[#allocation11_spill] sm:$0xff] %v8186_v11  ;;  %v8219_v28 = vld [vmem:[%s7975_s6 + $0x78] sm:$0xff] }
  0x33   : > { %v13397_v15 = vshra.s32 %v8186_v11, 7 }
  0x34   : > { %v376_v33 = vrot.slane %v368_v29, %v7957_v24  ;;  %v372_v34 = vrot.slane %v364_v30, %v7957_v24  ;;  %v1339_v35 = vrot.slane %v1331_v31, %v7957_v24  ;;  %v1335_v36 = vrot.slane %v1327_v32, %v7957_v24  ;;  %v8222_v29 = vld [vmem:[%s7975_s6 + $0xf8] sm:$0xff]  ;;  %v8232_v31 = vld [vmem:[%s7975_s6 + $0x100] sm:$0xff] }
  0x35   : > { %v2144_v27 = vrot.slane %v13397_v15, %v7960_v25  ;;  %v8371_v15 = vld [vmem:[%s7975_s6 + $0x168] sm:$0xff] }
  0x36   : > { %vm378_vm4 = vcmp.eq.s32.totalorder %v7941_v18, %v376_v33  ;;  %vm7983_vm5 = vcmp.eq.s32.totalorder %v7941_v18, %v372_v34  ;;  %vm7996_vm7 = vcmp.eq.s32.totalorder %v7941_v18, %v1339_v35  ;;  %vm8007_vm8 = vcmp.eq.s32.totalorder %v7941_v18, %v1335_v36  ;;  %v8250_v33 = vld [vmem:[%s7975_s6 + $0x108] sm:$0xff]  ;;  %v8267_v34 = vld [vmem:[%s7975_s6 + $0x110] sm:$0xff]  ;;  %v8276_v35 = vld [vmem:[%s7975_s6 + $0x118] sm:$0xff] }
  0x37   : > { %7183 = vmatprep.subr.msk.mxu0 %vm378_vm4, %v13395_v40  ;;  %7201 = vmatprep.subr.msk.mxu1 %vm378_vm4, %v13395_v40  ;;  %v2152_v30 = vrot.slane %v2144_v27, %v7957_v24  ;;  %v8285_v36 = vld [vmem:[%s7975_s6 + $0x120] sm:$0xff] }
  0x38   : > { %7184 = vmatpush1.msk.msra.mxu0 %vm7983_vm5, %v13395_v40  ;;  %7202 = vmatpush1.msk.msra.mxu1 %vm7983_vm5, %v13395_v40  ;;  %v8321_v27 = vld [vmem:[%s7975_s6 + $0x140] sm:$0xff] }
  0x39   : > { %7185 = vmatmul.mubr.msk.f32.vlgmr.msra.gmra.mxu0 %vm429_vm6, %v7988_v38  ;;  %7203 = vmatmul.mubr.msk.f32.vlgmr.msra.gmra.mxu1 %vm429_vm6, %v7991_v39  ;;  %vm8239_vm9 = vcmp.eq.s32.totalorder %v7941_v18, %v2152_v30  ;;  %v8330_v30 = vld [vmem:[%s7975_s6 + $0x148] sm:$0xff] }
  0x3a   : > { %7219 = vmatprep.subr.msk.mxu0 %vm378_vm4, %v13395_v40  ;;  %7237 = vmatprep.subr.msk.mxu1 %vm7996_vm7, %v13395_v40 }
  0x3b   : > { %7220 = vmatpush1.msk.msra.mxu0 %vm7983_vm5, %v13395_v40  ;;  %7238 = vmatpush1.msk.msra.mxu1 %vm8007_vm8, %v13395_v40 }
  0x3c   : > { %548 = vmatprep.mubr.f32.mxu0 %v13458_v0  ;;  %838 = vmatprep.mubr.f32.mxu1 %v13458_v0 }
  0x3d   : > { %7186 = vmatmul.mubr.msk.f32.gmra.mxu0 %vm429_vm6, %v8020_v43  ;;  %7204 = vmatmul.mubr.msk.f32.gmra.mxu1 %vm429_vm6, %v8023_v44 }
  0x3e   : > { %554 = vmatprep.mubr.f32.mxu0 %v13458_v0  ;;  %844 = vmatprep.mubr.f32.mxu1 %v13458_v0 }
  0x3f   : > { %7255 = vmatprep.subr.msk.mxu0 %vm7996_vm7, %v13395_v40  ;;  %7273 = vmatprep.subr.msk.mxu1 %vm7996_vm7, %v13395_v40 }
  0x41   : > { %7187 = vmatmul.mubr.msk.f32.gmra.mxu0 %vm429_vm6, %v8040_v45  ;;  %7205 = vmatmul.mubr.msk.f32.gmra.mxu1 %vm429_vm6, %v8043_v46 }
  0x42   : > { %560 = vmatprep.mubr.f32.mxu0 %v13458_v0  ;;  %850 = vmatprep.mubr.f32.mxu1 %v13458_v0 }
  0x45   : > { %7188 = vmatmul.mubr.msk.f32.gmra.mxu0 %vm429_vm6, %v8058_v47  ;;  %7206 = vmatmul.mubr.msk.f32.gmra.mxu1 %vm429_vm6, %v8061_v48 }
  0x46   : > { %566 = vmatprep.mubr.f32.mxu0 %v13458_v0  ;;  %856 = vmatprep.mubr.f32.mxu1 %v13458_v0 }
  0x49   : > { %7189 = vmatmul.mubr.msk.f32.gmra.mxu0 %vm429_vm6, %v8070_v49  ;;  %7207 = vmatmul.mubr.msk.f32.gmra.mxu1 %vm429_vm6, %v8073_v50 }
  0x4a   : > { %572 = vmatprep.mubr.f32.mxu0 %v13458_v0  ;;  %862 = vmatprep.mubr.f32.mxu1 %v13458_v0 }
  0x4d   : > { %7190 = vmatmul.mubr.msk.f32.gmra.mxu0 %vm429_vm6, %v8082_v51  ;;  %7208 = vmatmul.mubr.msk.f32.gmra.mxu1 %vm429_vm6, %v8085_v52 }
  0x4e   : > { %578 = vmatprep.mubr.f32.mxu0 %v13458_v0  ;;  %868 = vmatprep.mubr.f32.mxu1 %v13458_v0 }
  0x51   : > { %7191 = vmatmul.mubr.msk.f32.gmra.mxu0 %vm429_vm6, %v8094_v53  ;;  %7209 = vmatmul.mubr.msk.f32.gmra.mxu1 %vm429_vm6, %v8097_v54 }
  0x52   : > { %584 = vmatprep.mubr.f32.mxu0 %v13458_v0  ;;  %874 = vmatprep.mubr.f32.mxu1 %v13458_v0 }
  0x55   : > { %7192 = vmatmul.mubr.msk.f32.gmra.mxu0 %vm429_vm6, %v8106_v55  ;;  %7210 = vmatmul.mubr.msk.f32.gmra.mxu1 %vm429_vm6, %v8109_v56 }
  0x56   : > { %590 = vmatprep.mubr.f32.mxu0 %v13458_v0  ;;  %880 = vmatprep.mubr.f32.mxu1 %v13458_v0 }
  0x59   : > { %7193 = vmatmul.mubr.msk.f32.gmra.mxu0 %vm429_vm6, %v8118_v57  ;;  %7211 = vmatmul.mubr.msk.f32.gmra.mxu1 %vm429_vm6, %v8121_v58 }
  0x5a   : > { %596 = vmatprep.mubr.f32.mxu0 %v13458_v0  ;;  %886 = vmatprep.mubr.f32.mxu1 %v13458_v0 }
  0x5d   : > { %7194 = vmatmul.mubr.msk.f32.gmra.mxu0 %vm429_vm6, %v8130_v59  ;;  %7212 = vmatmul.mubr.msk.f32.gmra.mxu1 %vm429_vm6, %v8133_v60 }
  0x5e   : > { %602 = vmatprep.mubr.f32.mxu0 %v13458_v0  ;;  %892 = vmatprep.mubr.f32.mxu1 %v13458_v0 }
  0x61   : > { %7195 = vmatmul.mubr.msk.f32.gmra.mxu0 %vm429_vm6, %v8143_v62  ;;  %7213 = vmatmul.mubr.msk.f32.gmra.mxu1 %vm429_vm6, %v8146_v63 }
  0x62   : > { %608 = vmatprep.mubr.f32.mxu0 %v13458_v0  ;;  %898 = vmatprep.mubr.f32.mxu1 %v13458_v0 }
  0x65   : > { %7196 = vmatmul.mubr.msk.f32.gmra.mxu0 %vm429_vm6, %v8161_v2  ;;  %7214 = vmatmul.mubr.msk.f32.gmra.mxu1 %vm429_vm6, %v8164_v3 }
  0x66   : > { %614 = vmatprep.mubr.f32.mxu0 %v13458_v0  ;;  %904 = vmatprep.mubr.f32.mxu1 %v13458_v0 }
  0x69   : > { %7197 = vmatmul.mubr.msk.f32.gmra.mxu0 %vm429_vm6, %v8174_v5  ;;  %7215 = vmatmul.mubr.msk.f32.gmra.mxu1 %vm429_vm6, %v8177_v8 }
  0x6a   : > { %620 = vmatprep.mubr.f32.mxu0 %v13458_v0  ;;  %910 = vmatprep.mubr.f32.mxu1 %v13458_v0 }
  0x6d   : > { %7198 = vmatmul.mubr.msk.f32.gmra.mxu0 %vm429_vm6, %v8191_v12  ;;  %7216 = vmatmul.mubr.msk.f32.gmra.mxu1 %vm429_vm6, %v8194_v14 }
  0x6e   : > { %626 = vmatprep.mubr.f32.mxu0 %v13458_v0  ;;  %916 = vmatprep.mubr.f32.mxu1 %v13458_v0 }
  0x71   : > { %7199 = vmatmul.mubr.msk.f32.gmra.mxu0 %vm429_vm6, %v8204_v19  ;;  %7217 = vmatmul.mubr.msk.f32.gmra.mxu1 %vm429_vm6, %v8207_v22 }
  0x72   : > { %632 = vmatprep.mubr.f32.mxu0 %v13458_v0  ;;  %922 = vmatprep.mubr.f32.mxu1 %v13458_v0 }
  0x75   : > { %7200 = vmatmul.mubr.msk.f32.gmra.mxu0 %vm429_vm6, %v8219_v28  ;;  %7218 = vmatmul.mubr.msk.f32.gmra.mxu1 %vm429_vm6, %v8222_v29 }
  0x76   : > { %1122 = vmatprep.mubr.f32.mxu0 %v13458_v0  ;;  %1456 = vmatprep.mubr.f32.mxu1 %v13458_v0 }
  0x79   : > { %7221 = vmatmul.mubr.msk.f32.vlgmr.msra.gmra.mxu0 %vm429_vm6, %v8232_v31  ;;  %7239 = vmatmul.mubr.msk.f32.vlgmr.msra.gmra.mxu1 %vm429_vm6, %v7988_v38 }
  0x7a   : > { %7256 = vmatpush1.msk.msra.mxu0 %vm8007_vm8, %v13395_v40  ;;  %7274 = vmatpush1.msk.msra.mxu1 %vm8007_vm8, %v13395_v40 }
  0x7b   : > { %1128 = vmatprep.mubr.f32.mxu0 %v13458_v0  ;;  %1462 = vmatprep.mubr.f32.mxu1 %v13458_v0 }
  0x7c   : > { %7291 = vmatprep.subr.msk.mxu0 %vm8239_vm9, %v13395_v40  ;;  %7309 = vmatprep.subr.msk.mxu1 %vm8239_vm9, %v13395_v40  ;;  %v8366_v40 = vadd.s32 %v2129_v4, %v7951_v21  ;;  %v13745_v4 = vshra.s32 %v8186_v11, 7 }
  0x7d   : > { %7222 = vmatmul.mubr.msk.f32.gmra.mxu0 %vm429_vm6, %v8250_v33  ;;  %7240 = vmatmul.mubr.msk.f32.gmra.mxu1 %vm429_vm6, %v8020_v43 }
  0x7e   : > { %1134 = vmatprep.mubr.f32.mxu0 %v13458_v0  ;;  %1468 = vmatprep.mubr.f32.mxu1 %v13458_v0  ;;  %13744 = vst [vmem:[#allocation13_spill] sm:$0xff] %v8366_v40  ;;  %v13407_v10 = vshra.s32 %v8366_v40, 7  ;;  %v2140_v21 = vrot.slane %v13745_v4, %v7957_v24 }
  0x80   : > { %v2945_v9 = vrot.slane %v13407_v10, %v7960_v25 }
  0x81   : > { %7223 = vmatmul.mubr.msk.f32.gmra.mxu0 %vm429_vm6, %v8267_v34  ;;  %7241 = vmatmul.mubr.msk.f32.gmra.mxu1 %vm429_vm6, %v8040_v45 }
  0x82   : > { %1140 = vmatprep.mubr.f32.mxu0 %v13458_v0  ;;  %1474 = vmatprep.mubr.f32.mxu1 %v13458_v0  ;;  %v2953_v4 = vrot.slane %v2945_v9, %v7957_v24  ;;  %v13750_v9 = vmov 1.0  }
  0x84   : > { %vm8416_vm11 = vcmp.eq.s32.totalorder %v7941_v18, %v2953_v4 }
  0x85   : > { %7224 = vmatmul.mubr.msk.f32.gmra.mxu0 %vm429_vm6, %v8276_v35  ;;  %7242 = vmatmul.mubr.msk.f32.gmra.mxu1 %vm429_vm6, %v8058_v47 }
  0x86   : > { %1146 = vmatprep.mubr.f32.mxu0 %v13458_v0  ;;  %1480 = vmatprep.mubr.f32.mxu1 %v13458_v0 }
  0x89   : > { %7225 = vmatmul.mubr.msk.f32.gmra.mxu0 %vm429_vm6, %v8285_v36  ;;  %7243 = vmatmul.mubr.msk.f32.gmra.mxu1 %vm429_vm6, %v8070_v49 }
  0x8a   : > { %1152 = vmatprep.mubr.f32.mxu0 %v13458_v0  ;;  %1486 = vmatprep.mubr.f32.mxu1 %v13458_v0 }
  0x8d   : > { %7226 = vmatmul.mubr.msk.f32.gmra.mxu0 %vm429_vm6, %v8294_v37  ;;  %7244 = vmatmul.mubr.msk.f32.gmra.mxu1 %vm429_vm6, %v8082_v51 }
  0x8e   : > { %1158 = vmatprep.mubr.f32.mxu0 %v13458_v0  ;;  %1492 = vmatprep.mubr.f32.mxu1 %v13458_v0 }
  0x91   : > { %7227 = vmatmul.mubr.msk.f32.gmra.mxu0 %vm429_vm6, %v8303_v41  ;;  %7245 = vmatmul.mubr.msk.f32.gmra.mxu1 %vm429_vm6, %v8094_v53 }
  0x92   : > { %1164 = vmatprep.mubr.f32.mxu0 %v13458_v0  ;;  %1498 = vmatprep.mubr.f32.mxu1 %v13458_v0 }
  0x95   : > { %7228 = vmatmul.mubr.msk.f32.gmra.mxu0 %vm429_vm6, %v8312_v42  ;;  %7246 = vmatmul.mubr.msk.f32.gmra.mxu1 %vm429_vm6, %v8106_v55 }
  0x96   : > { %1170 = vmatprep.mubr.f32.mxu0 %v13458_v0  ;;  %1504 = vmatprep.mubr.f32.mxu1 %v13458_v0 }
  0x99   : > { %7229 = vmatmul.mubr.msk.f32.gmra.mxu0 %vm429_vm6, %v8321_v27  ;;  %7247 = vmatmul.mubr.msk.f32.gmra.mxu1 %vm429_vm6, %v8118_v57 }
  0x9a   : > { %1176 = vmatprep.mubr.f32.mxu0 %v13458_v0  ;;  %1510 = vmatprep.mubr.f32.mxu1 %v13458_v0 }
  0x9d   : > { %7230 = vmatmul.mubr.msk.f32.gmra.mxu0 %vm429_vm6, %v8330_v30  ;;  %7248 = vmatmul.mubr.msk.f32.gmra.mxu1 %vm429_vm6, %v8130_v59 }
  0x9e   : > { %1182 = vmatprep.mubr.f32.mxu0 %v13458_v0  ;;  %1516 = vmatprep.mubr.f32.mxu1 %v13458_v0 }
  0xa1   : > { %7231 = vmatmul.mubr.msk.f32.gmra.mxu0 %vm429_vm6, %v8339_v61  ;;  %7249 = vmatmul.mubr.msk.f32.gmra.mxu1 %vm429_vm6, %v8143_v62 }
  0xa2   : > { %1188 = vmatprep.mubr.f32.mxu0 %v13458_v0  ;;  %1522 = vmatprep.mubr.f32.mxu1 %v13458_v0 }
  0xa5   : > { %7232 = vmatmul.mubr.msk.f32.gmra.mxu0 %vm429_vm6, %v8348_v7  ;;  %7250 = vmatmul.mubr.msk.f32.gmra.mxu1 %vm429_vm6, %v8161_v2 }
  0xa6   : > { %1194 = vmatprep.mubr.f32.mxu0 %v13458_v0  ;;  %1528 = vmatprep.mubr.f32.mxu1 %v13458_v0 }
  0xa9   : > { %7233 = vmatmul.mubr.msk.f32.gmra.mxu0 %vm429_vm6, %v8357_v16  ;;  %7251 = vmatmul.mubr.msk.f32.gmra.mxu1 %vm429_vm6, %v8174_v5 }
  0xaa   : > { %1200 = vmatprep.mubr.f32.mxu0 %v13458_v0  ;;  %1534 = vmatprep.mubr.f32.mxu1 %v13458_v0 }
  0xad   : > { %7234 = vmatmul.mubr.msk.f32.gmra.mxu0 %vm429_vm6, %v8371_v15  ;;  %7252 = vmatmul.mubr.msk.f32.gmra.mxu1 %vm429_vm6, %v8191_v12  ;;  %v2148_v12 = vrot.slane %v2140_v21, %v7957_v24 }
  0xae   : > { %1206 = vmatprep.mubr.f32.mxu0 %v13458_v0  ;;  %1540 = vmatprep.mubr.f32.mxu1 %v13458_v0 }
  0xaf   : > { %vm8407_vm10 = vcmp.eq.s32.totalorder %v7941_v18, %v2148_v12 }
  0xb1   : > { %7235 = vmatmul.mubr.msk.f32.gmra.mxu0 %vm429_vm6, %v8381_v1  ;;  %7253 = vmatmul.mubr.msk.f32.gmra.mxu1 %vm429_vm6, %v8204_v19 }
  0xb2   : > { %1212 = vmatprep.mubr.f32.mxu0 %v13458_v0  ;;  %1546 = vmatprep.mubr.f32.mxu1 %v13458_v0 }
  0xb5   : > { %7236 = vmatmul.mubr.msk.f32.gmra.mxu0 %vm429_vm6, %v8396_v6  ;;  %7254 = vmatmul.mubr.msk.f32.gmra.mxu1 %vm429_vm6, %v8219_v28 }
  0xb6   : > { %1698 = vmatprep.mubr.f32.mxu0 %v13458_v0  ;;  %1940 = vmatprep.mubr.f32.mxu1 %v13458_v0 }
  0xb9   : > { %7257 = vmatmul.mubr.msk.f32.vlgmr.msra.gmra.mxu0 %vm429_vm6, %v7991_v39  ;;  %7275 = vmatmul.mubr.msk.f32.vlgmr.msra.gmra.mxu1 %vm429_vm6, %v8232_v31 }
  0xba   : > { %7292 = vmatpush1.msk.msra.mxu0 %vm8407_vm10, %v13750_v9  ;;  %7310 = vmatpush1.msk.msra.mxu1 %vm8407_vm10, %v13750_v9 }
  0xbb   : > { %1704 = vmatprep.mubr.f32.mxu0 %v13458_v0  ;;  %1946 = vmatprep.mubr.f32.mxu1 %v13458_v0 }
  0xbc   : > { %7327 = vmatprep.subr.msk.mxu0 %vm8239_vm9, %v13750_v9  ;;  %7345 = vmatprep.subr.msk.mxu1 %vm8416_vm11, %v13750_v9 }
  0xbd   : > { %7258 = vmatmul.mubr.msk.f32.gmra.mxu0 %vm429_vm6, %v8023_v44  ;;  %7276 = vmatmul.mubr.msk.f32.gmra.mxu1 %vm429_vm6, %v8250_v33 }
  0xbe   : > { %1710 = vmatprep.mubr.f32.mxu0 %v13458_v0  ;;  %1952 = vmatprep.mubr.f32.mxu1 %v13458_v0 }
  0xc1   : > { %7259 = vmatmul.mubr.msk.f32.gmra.mxu0 %vm429_vm6, %v8043_v46  ;;  %7277 = vmatmul.mubr.msk.f32.gmra.mxu1 %vm429_vm6, %v8267_v34  ;;  %v8540_v34 = vadd.s32 8, %v7941_v18 }
  0xc2   : > { %1716 = vmatprep.mubr.f32.mxu0 %v13458_v0  ;;  %1958 = vmatprep.mubr.f32.mxu1 %v13458_v0 }
  0xc3   : > { %13754 = vst [vmem:[#allocation14_spill] sm:$0xff] %v8540_v34 }
  0xc5   : > { %7260 = vmatmul.mubr.msk.f32.gmra.mxu0 %vm429_vm6, %v8061_v48  ;;  %7278 = vmatmul.mubr.msk.f32.gmra.mxu1 %vm429_vm6, %v8276_v35 }
  0xc6   : > { %1722 = vmatprep.mubr.f32.mxu0 %v13458_v0  ;;  %1964 = vmatprep.mubr.f32.mxu1 %v13458_v0 }
  0xc9   : > { %7261 = vmatmul.mubr.msk.f32.gmra.mxu0 %vm429_vm6, %v8073_v50  ;;  %7279 = vmatmul.mubr.msk.f32.gmra.mxu1 %vm429_vm6, %v8285_v36 }
  0xca   : > { %1728 = vmatprep.mubr.f32.mxu0 %v13458_v0  ;;  %1970 = vmatprep.mubr.f32.mxu1 %v13458_v0 }
  0xcd   : > { %7262 = vmatmul.mubr.msk.f32.gmra.mxu0 %vm429_vm6, %v8085_v52  ;;  %7280 = vmatmul.mubr.msk.f32.gmra.mxu1 %vm429_vm6, %v8294_v37 }
  0xce   : > { %1734 = vmatprep.mubr.f32.mxu0 %v13458_v0  ;;  %1976 = vmatprep.mubr.f32.mxu1 %v13458_v0 }
  0xd1   : > { %7263 = vmatmul.mubr.msk.f32.gmra.mxu0 %vm429_vm6, %v8097_v54  ;;  %7281 = vmatmul.mubr.msk.f32.gmra.mxu1 %vm429_vm6, %v8303_v41 }
  0xd2   : > { %1740 = vmatprep.mubr.f32.mxu0 %v13458_v0  ;;  %1982 = vmatprep.mubr.f32.mxu1 %v13458_v0 }
  0xd5   : > { %7264 = vmatmul.mubr.msk.f32.gmra.mxu0 %vm429_vm6, %v8109_v56  ;;  %7282 = vmatmul.mubr.msk.f32.gmra.mxu1 %vm429_vm6, %v8312_v42 }
  0xd6   : > { %1746 = vmatprep.mubr.f32.mxu0 %v13458_v0  ;;  %1988 = vmatprep.mubr.f32.mxu1 %v13458_v0 }
  0xd9   : > { %7265 = vmatmul.mubr.msk.f32.gmra.mxu0 %vm429_vm6, %v8121_v58  ;;  %7283 = vmatmul.mubr.msk.f32.gmra.mxu1 %vm429_vm6, %v8321_v27 }
  0xda   : > { %1752 = vmatprep.mubr.f32.mxu0 %v13458_v0  ;;  %1994 = vmatprep.mubr.f32.mxu1 %v13458_v0 }
  0xdd   : > { %7266 = vmatmul.mubr.msk.f32.gmra.mxu0 %vm429_vm6, %v8133_v60  ;;  %7284 = vmatmul.mubr.msk.f32.gmra.mxu1 %vm429_vm6, %v8330_v30 }
  0xde   : > { %1758 = vmatprep.mubr.f32.mxu0 %v13458_v0  ;;  %2000 = vmatprep.mubr.f32.mxu1 %v13458_v0 }
  0xe1   : > { %7267 = vmatmul.mubr.msk.f32.gmra.mxu0 %vm429_vm6, %v8146_v63  ;;  %7285 = vmatmul.mubr.msk.f32.gmra.mxu1 %vm429_vm6, %v8339_v61  ;;  %v13751_v61 = vshra.s32 %v8366_v40, 7 }
  0xe2   : > { %1764 = vmatprep.mubr.f32.mxu0 %v13458_v0  ;;  %2006 = vmatprep.mubr.f32.mxu1 %v13458_v0 }
  0xe5   : > { %7268 = vmatmul.mubr.msk.f32.gmra.mxu0 %vm429_vm6, %v8164_v3  ;;  %7286 = vmatmul.mubr.msk.f32.gmra.mxu1 %vm429_vm6, %v8348_v7  ;;  %v360_v7 = vand.u32 127, %v7954_v23 }
  0xe6   : > { %1770 = vmatprep.mubr.f32.mxu0 %v13458_v0  ;;  %2012 = vmatprep.mubr.f32.mxu1 %v13458_v0 }
  0xe7   : > { %v384_v12 = vrot.slane %v360_v7, %v7957_v24  ;;  %v388_v23 = vrot.slane %v360_v7, %v7960_v25  ;;  %v8595_v7 = vadd.s32 24, %v7941_v18 }
  0xe9   : > { %7269 = vmatmul.mubr.msk.f32.gmra.mxu0 %vm429_vm6, %v8177_v8  ;;  %7287 = vmatmul.mubr.msk.f32.gmra.mxu1 %vm429_vm6, %v8357_v16  ;;  %v2941_v16 = vrot.slane %v13751_v61, %v7957_v24  ;;  %v8532_v32 = vrot.slane %v384_v12, %v7957_v24 }
  0xea   : > { %1776 = vmatprep.mubr.f32.mxu0 %v13458_v0  ;;  %2018 = vmatprep.mubr.f32.mxu1 %v13458_v0 }
  0xeb   : > { %vm397_vm13 = vcmp.eq.s32.totalorder %v7941_v18, %v8532_v32  ;;  %vm399_vm14 = vcmp.eq.s32.totalorder %v8540_v34, %v8532_v32  ;;  %vm403_vm3 = vcmp.eq.s32.totalorder %v8595_v7, %v8532_v32 }
  0xed   : > { %7270 = vmatmul.mubr.msk.f32.gmra.mxu0 %vm429_vm6, %v8194_v14  ;;  %7288 = vmatmul.mubr.msk.f32.gmra.mxu1 %vm429_vm6, %v8371_v15  ;;  %v2949_v15 = vrot.slane %v2941_v16, %v7957_v24 }
  0xee   : > { %1782 = vmatprep.mubr.f32.mxu0 %v13458_v0  ;;  %2024 = vmatprep.mubr.f32.mxu1 %v13458_v0 }
  0xef   : > { %vm8535_vm12 = vcmp.eq.s32.totalorder %v7941_v18, %v2949_v15 }
  0xf1   : > { %7271 = vmatmul.mubr.msk.f32.gmra.mxu0 %vm429_vm6, %v8207_v22  ;;  %7289 = vmatmul.mubr.msk.f32.gmra.mxu1 %vm429_vm6, %v8381_v1 }
  0xf2   : > { %1788 = vmatprep.mubr.f32.mxu0 %v13458_v0  ;;  %2030 = vmatprep.mubr.f32.mxu1 %v13458_v0 }
  0xf5   : > { %7272 = vmatmul.mubr.msk.f32.gmra.mxu0 %vm429_vm6, %v8222_v29  ;;  %7290 = vmatmul.mubr.msk.f32.gmra.mxu1 %vm429_vm6, %v8396_v6  ;;  %v8547_v6 = vrot.slane %v388_v23, %v7957_v24 }
  0xf6   : > { %2269 = vmatprep.mubr.f32.mxu0 %v13458_v0  ;;  %2511 = vmatprep.mubr.f32.mxu1 %v13458_v0 }
  0xf7   : > { %vm398_vm15 = vcmp.eq.s32.totalorder %v7941_v18, %v8547_v6  ;;  %vm400_vm0 = vcmp.eq.s32.totalorder %v8540_v34, %v8547_v6  ;;  %vm404_vm4 = vcmp.eq.s32.totalorder %v8595_v7, %v8547_v6 }
  0xf9   : > { %v544_v35 = vpop.f32.mrf.mxu0  ;;  %v834_v36 = vpop.f32.mrf.mxu1  ;;  %7293 = vmatmul.mubr.msk.f32.vlgmr.msra.gmra.mxu0 %vm429_vm6, %v7988_v38  ;;  %7311 = vmatmul.mubr.msk.f32.vlgmr.msra.gmra.mxu1 %vm429_vm6, %v7991_v39  ;;  %v8562_v38 = vadd.s32 16, %v7941_v18 }
  0xfa   : > { %7328 = vmatpush1.msk.msra.mxu0 %vm8407_vm10, %v13750_v9  ;;  %7346 = vmatpush1.msk.msra.mxu1 %vm8535_vm12, %v13750_v9  ;;  %v639_v42 = vsel %vm397_vm13, %v544_v35, 0.0  ;;  %v929_v27 = vsel %vm397_vm13, %v834_v36, 0.0 }
  0xfb   : > { %v546_v37 = vpop.f32.mrf.mxu0  ;;  %v836_v41 = vpop.f32.mrf.mxu1  ;;  %2275 = vmatprep.mubr.f32.mxu0 %v13458_v0  ;;  %2517 = vmatprep.mubr.f32.mxu1 %v13458_v0  ;;  %vm401_vm1 = vcmp.eq.s32.totalorder %v8562_v38, %v8532_v32  ;;  %vm402_vm2 = vcmp.eq.s32.totalorder %v8562_v38, %v8547_v6 }
  0xfc   : > { %7363 = vmatprep.subr.msk.mxu0 %vm8416_vm11, %v13750_v9  ;;  %7381 = vmatprep.subr.msk.mxu1 %vm8416_vm11, %v13750_v9  ;;  %v640_v61 = vsel %vm398_vm15, %v546_v37, 0.0  ;;  %v930_v16 = vsel %vm398_vm15, %v836_v41, 0.0 }
  0xfd   : > { %v550_v10 = vpop.f32.mrf.mxu0  ;;  %v840_v39 = vpop.f32.mrf.mxu1  ;;  %7294 = vmatmul.mubr.msk.f32.gmra.mxu0 %vm429_vm6, %v8020_v43  ;;  %7312 = vmatmul.mubr.msk.f32.gmra.mxu1 %vm429_vm6, %v8023_v44 }
  0xfe   : > { %v641_v30 = vsel %vm399_vm14, %v550_v10, 0.0  ;;  %v931_v43 = vsel %vm399_vm14, %v840_v39, 0.0  ;;  %2281 = vmatprep.mubr.f32.mxu0 %v13458_v0  ;;  %2523 = vmatprep.mubr.f32.mxu1 %v13458_v0 }
  0xff   : > { %v671_v44 = vadd.f32 %v641_v30, %v639_v42  ;;  %v961_v1 = vadd.f32 %v931_v43, %v929_v27  ;;  %v552_v4 = vpop.f32.mrf.mxu0  ;;  %v842_v21 = vpop.f32.mrf.mxu1 }
 0x100   : > { %v642_v12 = vsel %vm400_vm0, %v552_v4, 0.0  ;;  %v932_v15 = vsel %vm400_vm0, %v842_v21, 0.0 }
 0x101   : > { %v692_v23 = vadd.f32 %v642_v12, %v640_v61  ;;  %v982_v35 = vadd.f32 %v932_v15, %v930_v16  ;;  %v556_v36 = vpop.f32.mrf.mxu0  ;;  %v846_v10 = vpop.f32.mrf.mxu1  ;;  %7295 = vmatmul.mubr.msk.f32.gmra.mxu0 %vm429_vm6, %v8040_v45  ;;  %7313 = vmatmul.mubr.msk.f32.gmra.mxu1 %vm429_vm6, %v8043_v46  ;;  %v8626_v46 = vadd.s32 32, %v7941_v18 }
 0x102   : > { %v643_v37 = vsel %vm401_vm1, %v556_v36, 0.0  ;;  %v933_v41 = vsel %vm401_vm1, %v846_v10, 0.0  ;;  %2287 = vmatprep.mubr.f32.mxu0 %v13458_v0  ;;  %2529 = vmatprep.mubr.f32.mxu1 %v13458_v0 }
 0x103   : > { %v672_v39 = vadd.f32 %v671_v44, %v643_v37  ;;  %v962_v45 = vadd.f32 %v961_v1, %v933_v41  ;;  %v558_v42 = vpop.f32.mrf.mxu0  ;;  %v848_v27 = vpop.f32.mrf.mxu1  ;;  %vm13432_vm5 = vcmp.eq.s32.totalorder %v8626_v46, %v8532_v32  ;;  %vm13430_vm7 = vcmp.eq.s32.totalorder %v8626_v46, %v8547_v6 }
 0x104   : > { %v644_v30 = vsel %vm402_vm2, %v558_v42, 0.0  ;;  %v934_v43 = vsel %vm402_vm2, %v848_v27, 0.0 }
 0x105   : > { %v693_v4 = vadd.f32 %v692_v23, %v644_v30  ;;  %v983_v21 = vadd.f32 %v982_v35, %v934_v43  ;;  %v562_v44 = vpop.f32.mrf.mxu0  ;;  %v852_v1 = vpop.f32.mrf.mxu1  ;;  %7296 = vmatmul.mubr.msk.f32.gmra.mxu0 %vm429_vm6, %v8058_v47  ;;  %7314 = vmatmul.mubr.msk.f32.gmra.mxu1 %vm429_vm6, %v8061_v48  ;;  %v8651_v48 = vadd.s32 40, %v7941_v18 }
 0x106   : > { %v645_v61 = vsel %vm403_vm3, %v562_v44, 0.0  ;;  %v935_v16 = vsel %vm403_vm3, %v852_v1, 0.0  ;;  %2293 = vmatprep.mubr.f32.mxu0 %v13458_v0  ;;  %2535 = vmatprep.mubr.f32.mxu1 %v13458_v0 }
 0x107   : > { %v673_v12 = vadd.f32 %v672_v39, %v645_v61  ;;  %v963_v47 = vadd.f32 %v962_v45, %v935_v16  ;;  %v564_v15 = vpop.f32.mrf.mxu0  ;;  %v854_v23 = vpop.f32.mrf.mxu1  ;;  %vm13428_vm8 = vcmp.eq.s32.totalorder %v8651_v48, %v8532_v32  ;;  %vm13408_vm9 = vcmp.eq.s32.totalorder %v8651_v48, %v8547_v6 }
 0x108   : > { %v646_v35 = vsel %vm404_vm4, %v564_v15, 0.0  ;;  %v936_v36 = vsel %vm404_vm4, %v854_v23, 0.0 }
 0x109   : > { %v694_v10 = vadd.f32 %v693_v4, %v646_v35  ;;  %v984_v37 = vadd.f32 %v983_v21, %v936_v36  ;;  %v568_v41 = vpop.f32.mrf.mxu0  ;;  %v858_v39 = vpop.f32.mrf.mxu1  ;;  %7297 = vmatmul.mubr.msk.f32.gmra.mxu0 %vm429_vm6, %v8070_v49  ;;  %7315 = vmatmul.mubr.msk.f32.gmra.mxu1 %vm429_vm6, %v8073_v50  ;;  %v8676_v50 = vadd.s32 48, %v7941_v18 }
 0x10a   : > { %v647_v45 = vsel %vm13432_vm5, %v568_v41, 0.0  ;;  %v937_v42 = vsel %vm13432_vm5, %v858_v39, 0.0  ;;  %2299 = vmatprep.mubr.f32.mxu0 %v13458_v0  ;;  %2541 = vmatprep.mubr.f32.mxu1 %v13458_v0 }
 0x10b   : > { %v674_v27 = vadd.f32 %v673_v12, %v647_v45  ;;  %v964_v49 = vadd.f32 %v963_v47, %v937_v42  ;;  %v570_v30 = vpop.f32.mrf.mxu0  ;;  %v860_v43 = vpop.f32.mrf.mxu1  ;;  %vm13409_vm10 = vcmp.eq.s32.totalorder %v8676_v50, %v8532_v32  ;;  %vm13410_vm11 = vcmp.eq.s32.totalorder %v8676_v50, %v8547_v6 }
 0x10c   : > { %v648_v4 = vsel %vm13430_vm7, %v570_v30, 0.0  ;;  %v938_v21 = vsel %vm13430_vm7, %v860_v43, 0.0 }
 0x10d   : > { %v695_v44 = vadd.f32 %v694_v10, %v648_v4  ;;  %v985_v1 = vadd.f32 %v984_v37, %v938_v21  ;;  %v574_v61 = vpop.f32.mrf.mxu0  ;;  %v864_v16 = vpop.f32.mrf.mxu1  ;;  %7298 = vmatmul.mubr.msk.f32.gmra.mxu0 %vm429_vm6, %v8082_v51  ;;  %7316 = vmatmul.mubr.msk.f32.gmra.mxu1 %vm429_vm6, %v8085_v52  ;;  %v8701_v52 = vadd.s32 56, %v7941_v18 }
 0x10e   : > { %v649_v12 = vsel %vm13428_vm8, %v574_v61, 0.0  ;;  %v939_v47 = vsel %vm13428_vm8, %v864_v16, 0.0  ;;  %2305 = vmatprep.mubr.f32.mxu0 %v13458_v0  ;;  %2547 = vmatprep.mubr.f32.mxu1 %v13458_v0 }
 0x10f   : > { %v675_v15 = vadd.f32 %v674_v27, %v649_v12  ;;  %v965_v51 = vadd.f32 %v964_v49, %v939_v47  ;;  %v576_v23 = vpop.f32.mrf.mxu0  ;;  %v866_v35 = vpop.f32.mrf.mxu1 }
 0x110   : > { %v650_v36 = vsel %vm13408_vm9, %v576_v23, 0.0  ;;  %v940_v10 = vsel %vm13408_vm9, %v866_v35, 0.0  ;;  %vm13411_vm9 = vcmp.eq.s32.totalorder %v8701_v52, %v8532_v32 }
 0x111   : > { %v696_v37 = vadd.f32 %v695_v44, %v650_v36  ;;  %v986_v41 = vadd.f32 %v985_v1, %v940_v10  ;;  %v580_v39 = vpop.f32.mrf.mxu0  ;;  %v870_v45 = vpop.f32.mrf.mxu1  ;;  %7299 = vmatmul.mubr.msk.f32.gmra.mxu0 %vm429_vm6, %v8094_v53  ;;  %7317 = vmatmul.mubr.msk.f32.gmra.mxu1 %vm429_vm6, %v8097_v54  ;;  %v8726_v54 = vadd.s32 64, %v7941_v18 }
 0x112   : > { %v651_v42 = vsel %vm13409_vm10, %v580_v39, 0.0  ;;  %v941_v27 = vsel %vm13409_vm10, %v870_v45, 0.0  ;;  %2311 = vmatprep.mubr.f32.mxu0 %v13458_v0  ;;  %2553 = vmatprep.mubr.f32.mxu1 %v13458_v0  ;;  %vm13412_vm10 = vcmp.eq.s32.totalorder %v8701_v52, %v8547_v6 }
 0x113   : > { %v676_v49 = vadd.f32 %v675_v15, %v651_v42  ;;  %v966_v53 = vadd.f32 %v965_v51, %v941_v27  ;;  %v582_v30 = vpop.f32.mrf.mxu0  ;;  %v872_v43 = vpop.f32.mrf.mxu1 }
 0x114   : > { %v652_v4 = vsel %vm13410_vm11, %v582_v30, 0.0  ;;  %v942_v21 = vsel %vm13410_vm11, %v872_v43, 0.0  ;;  %vm13413_vm11 = vcmp.eq.s32.totalorder %v8726_v54, %v8532_v32 }
 0x115   : > { %v697_v44 = vadd.f32 %v696_v37, %v652_v4  ;;  %v987_v1 = vadd.f32 %v986_v41, %v942_v21  ;;  %v586_v61 = vpop.f32.mrf.mxu0  ;;  %v876_v16 = vpop.f32.mrf.mxu1  ;;  %7300 = vmatmul.mubr.msk.f32.gmra.mxu0 %vm429_vm6, %v8106_v55  ;;  %7318 = vmatmul.mubr.msk.f32.gmra.mxu1 %vm429_vm6, %v8109_v56  ;;  %v8751_v56 = vadd.s32 72, %v7941_v18  ;;  %v13442_v4 = vmul.u32 8, %v7939_v17 }
 0x116   : > { %v653_v12 = vsel %vm13411_vm9, %v586_v61, 0.0  ;;  %v943_v47 = vsel %vm13411_vm9, %v876_v16, 0.0  ;;  %2317 = vmatprep.mubr.f32.mxu0 %v13458_v0  ;;  %2559 = vmatprep.mubr.f32.mxu1 %v13458_v0  ;;  %vm13414_vm9 = vcmp.eq.s32.totalorder %v8726_v54, %v8547_v6 }
 0x117   : > { %v677_v15 = vadd.f32 %v676_v49, %v653_v12  ;;  %v967_v55 = vadd.f32 %v966_v53, %v943_v47  ;;  %v588_v51 = vpop.f32.mrf.mxu0  ;;  %v878_v23 = vpop.f32.mrf.mxu1 }
 0x118   : > { %v654_v35 = vsel %vm13412_vm10, %v588_v51, 0.0  ;;  %v944_v36 = vsel %vm13412_vm10, %v878_v23, 0.0  ;;  %vm13415_vm10 = vcmp.eq.s32.totalorder %v8751_v56, %v8532_v32 }
 0x119   : > { %v698_v10 = vadd.f32 %v697_v44, %v654_v35  ;;  %v988_v37 = vadd.f32 %v987_v1, %v944_v36  ;;  %v592_v41 = vpop.f32.mrf.mxu0  ;;  %v882_v39 = vpop.f32.mrf.mxu1  ;;  %7301 = vmatmul.mubr.msk.f32.gmra.mxu0 %vm429_vm6, %v8118_v57  ;;  %7319 = vmatmul.mubr.msk.f32.gmra.mxu1 %vm429_vm6, %v8121_v58  ;;  %v8776_v58 = vadd.s32 80, %v7941_v18  ;;  %v13755_v35 = vrot.slane %v7934_v13, 7 }
 0x11a   : > { %v655_v45 = vsel %vm13413_vm11, %v592_v41, 0.0  ;;  %v945_v42 = vsel %vm13413_vm11, %v882_v39, 0.0  ;;  %2323 = vmatprep.mubr.f32.mxu0 %v13458_v0  ;;  %2565 = vmatprep.mubr.f32.mxu1 %v13458_v0  ;;  %vm13416_vm11 = vcmp.eq.s32.totalorder %v8751_v56, %v8547_v6 }
 0x11b   : > { %v678_v27 = vadd.f32 %v677_v15, %v655_v45  ;;  %v968_v57 = vadd.f32 %v967_v55, %v945_v42  ;;  %v594_v49 = vpop.f32.mrf.mxu0  ;;  %v884_v53 = vpop.f32.mrf.mxu1  ;;  %v8814_v36 = vadd.s32 %v13442_v4, %v13755_v35 }
 0x11c   : > { %v656_v30 = vsel %vm13414_vm9, %v594_v49, 0.0  ;;  %v946_v43 = vsel %vm13414_vm9, %v884_v53, 0.0  ;;  %vm13417_vm9 = vcmp.eq.s32.totalorder %v8776_v58, %v8532_v32 }
 0x11d   : > { %v699_v21 = vadd.f32 %v698_v10, %v656_v30  ;;  %v989_v44 = vadd.f32 %v988_v37, %v946_v43  ;;  %v598_v1 = vpop.f32.mrf.mxu0  ;;  %v888_v61 = vpop.f32.mrf.mxu1  ;;  %7302 = vmatmul.mubr.msk.f32.gmra.mxu0 %vm429_vm6, %v8130_v59  ;;  %7320 = vmatmul.mubr.msk.f32.gmra.mxu1 %vm429_vm6, %v8133_v60  ;;  %v8802_v60 = vadd.s32 88, %v7941_v18  ;;  %v13448_v30 = vmul.u32 8, %v8814_v36 }
 0x11e   : > { %v657_v16 = vsel %vm13415_vm10, %v598_v1, 0.0  ;;  %v947_v12 = vsel %vm13415_vm10, %v888_v61, 0.0  ;;  %2329 = vmatprep.mubr.f32.mxu0 %v13458_v0  ;;  %2571 = vmatprep.mubr.f32.mxu1 %v13458_v0  ;;  %vm13418_vm10 = vcmp.eq.s32.totalorder %v8776_v58, %v8547_v6 }
 0x11f   : > { %v679_v47 = vadd.f32 %v678_v27, %v657_v16  ;;  %v969_v59 = vadd.f32 %v968_v57, %v947_v12  ;;  %v600_v15 = vpop.f32.mrf.mxu0  ;;  %v890_v55 = vpop.f32.mrf.mxu1 }
 0x120   : > { %v658_v51 = vsel %vm13416_vm11, %v600_v15, 0.0  ;;  %v948_v23 = vsel %vm13416_vm11, %v890_v55, 0.0  ;;  %vm13419_vm11 = vcmp.eq.s32.totalorder %v8802_v60, %v8532_v32 }
 0x121   : > { %v700_v10 = vadd.f32 %v699_v21, %v658_v51  ;;  %v990_v37 = vadd.f32 %v989_v44, %v948_v23  ;;  %v604_v41 = vpop.f32.mrf.mxu0  ;;  %v894_v39 = vpop.f32.mrf.mxu1  ;;  %7303 = vmatmul.mubr.msk.f32.gmra.mxu0 %vm429_vm6, %v8143_v62  ;;  %7321 = vmatmul.mubr.msk.f32.gmra.mxu1 %vm429_vm6, %v8146_v63  ;;  %v8833_v63 = vadd.s32 96, %v7941_v18  ;;  %v8870_v51 = vadd.s32 %v13448_v30, %v7948_v20  ;;  %v9322_v30 = vld [vmem:[%s7975_s6 + $0x160] sm:$0xff] }
 0x122   : > { %v659_v13 = vsel %vm13417_vm9, %v604_v41, 0.0  ;;  %v949_v45 = vsel %vm13417_vm9, %v894_v39, 0.0  ;;  %2335 = vmatprep.mubr.f32.mxu0 %v13458_v0  ;;  %2577 = vmatprep.mubr.f32.mxu1 %v13458_v0  ;;  %vm13420_vm9 = vcmp.eq.s32.totalorder %v8802_v60, %v8547_v6 }
 0x123   : > { %v680_v42 = vadd.f32 %v679_v47, %v659_v13  ;;  %v970_v62 = vadd.f32 %v969_v59, %v949_v45  ;;  %v606_v27 = vpop.f32.mrf.mxu0  ;;  %v896_v57 = vpop.f32.mrf.mxu1  ;;  %13756 = vst [vmem:[#allocation15_spill] sm:$0xff] %v8870_v51 }
 0x124   : > { %v660_v49 = vsel %vm13418_vm10, %v606_v27, 0.0  ;;  %v950_v53 = vsel %vm13418_vm10, %v896_v57, 0.0  ;;  %vm13421_vm10 = vcmp.eq.s32.totalorder %v8833_v63, %v8532_v32 }
 0x125   : > { %v701_v43 = vadd.f32 %v700_v10, %v660_v49  ;;  %v991_v21 = vadd.f32 %v990_v37, %v950_v53  ;;  %v610_v44 = vpop.f32.mrf.mxu0  ;;  %v900_v1 = vpop.f32.mrf.mxu1  ;;  %7304 = vmatmul.mubr.msk.f32.gmra.mxu0 %vm429_vm6, %v8161_v2  ;;  %7322 = vmatmul.mubr.msk.f32.gmra.mxu1 %vm429_vm6, %v8164_v3  ;;  %v8859_v3 = vadd.s32 104, %v7941_v18  ;;  %v13447_v49 = vshra.s32 %v8870_v51, 7 }
 0x126   : > { %v661_v61 = vsel %vm13419_vm11, %v610_v44, 0.0  ;;  %v951_v16 = vsel %vm13419_vm11, %v900_v1, 0.0  ;;  %2341 = vmatprep.mubr.f32.mxu0 %v13458_v0  ;;  %2583 = vmatprep.mubr.f32.mxu1 %v13458_v0  ;;  %vm13422_vm11 = vcmp.eq.s32.totalorder %v8833_v63, %v8547_v6  ;;  %v13758_v44 = vld [vmem:[#allocation12_spill] sm:$0xff] }
 0x127   : > { %v681_v12 = vadd.f32 %v680_v42, %v661_v61  ;;  %v971_v2 = vadd.f32 %v970_v62, %v951_v16  ;;  %v612_v47 = vpop.f32.mrf.mxu0  ;;  %v902_v59 = vpop.f32.mrf.mxu1 }
 0x128   : > { %v662_v15 = vsel %vm13420_vm9, %v612_v47, 0.0  ;;  %v952_v55 = vsel %vm13420_vm9, %v902_v59, 0.0  ;;  %vm13423_vm9 = vcmp.eq.s32.totalorder %v8859_v3, %v8532_v32  ;;  %v8916_v47 = vadd.s32 120, %v7941_v18 }
 0x129   : > { %v702_v23 = vadd.f32 %v701_v43, %v662_v15  ;;  %v992_v35 = vadd.f32 %v991_v21, %v952_v55  ;;  %v616_v10 = vpop.f32.mrf.mxu0  ;;  %v906_v37 = vpop.f32.mrf.mxu1  ;;  %7305 = vmatmul.mubr.msk.f32.gmra.mxu0 %vm429_vm6, %v8174_v5  ;;  %7323 = vmatmul.mubr.msk.f32.gmra.mxu1 %vm429_vm6, %v8177_v8  ;;  %v8887_v5 = vadd.s32 112, %v7941_v18  ;;  %v1323_v8 = vand.u32 127, %v7963_v26 }
 0x12a   : > { %v663_v41 = vsel %vm13421_vm10, %v616_v10, 0.0  ;;  %v953_v39 = vsel %vm13421_vm10, %v906_v37, 0.0  ;;  %2347 = vmatprep.mubr.f32.mxu0 %v13458_v0  ;;  %2589 = vmatprep.mubr.f32.mxu1 %v13458_v0  ;;  %vm13424_vm10 = vcmp.eq.s32.totalorder %v8859_v3, %v8547_v6  ;;  %13759 = vst [vmem:[#allocation12_spill] sm:$0xff] %v8916_v47 }
 0x12b   : > { %13757 = vst [vmem:[#allocation16_spill] sm:$0xff] %v8887_v5  ;;  %v682_v13 = vadd.f32 %v681_v12, %v663_v41  ;;  %v972_v45 = vadd.f32 %v971_v2, %v953_v39  ;;  %v618_v42 = vpop.f32.mrf.mxu0  ;;  %v908_v62 = vpop.f32.mrf.mxu1  ;;  %v1347_v59 = vrot.slane %v1323_v8, %v7957_v24 }
 0x12c   : > { %v664_v27 = vsel %vm13422_vm11, %v618_v42, 0.0  ;;  %v954_v57 = vsel %vm13422_vm11, %v908_v62, 0.0  ;;  %vm13425_vm11 = vcmp.eq.s32.totalorder %v8887_v5, %v8532_v32 }
 0x12d   : > { %v703_v53 = vadd.f32 %v702_v23, %v664_v27  ;;  %v993_v43 = vadd.f32 %v992_v35, %v954_v57  ;;  %v622_v26 = vpop.f32.mrf.mxu0  ;;  %v912_v21 = vpop.f32.mrf.mxu1  ;;  %7306 = vmatmul.mubr.msk.f32.gmra.mxu0 %vm429_vm6, %v13758_v44  ;;  %7324 = vmatmul.mubr.msk.f32.gmra.mxu1 %vm429_vm6, %v8194_v14  ;;  %v1351_v23 = vrot.slane %v1323_v8, %v7960_v25 }
 0x12e   : > { %v665_v1 = vsel %vm13423_vm9, %v622_v26, 0.0  ;;  %v955_v61 = vsel %vm13423_vm9, %v912_v21, 0.0  ;;  %2353 = vmatprep.mubr.f32.mxu0 %v13458_v0  ;;  %2595 = vmatprep.mubr.f32.mxu1 %v13458_v0  ;;  %v3753_v35 = vrot.slane %v13447_v49, %v7960_v25  ;;  %vm13426_vm9 = vcmp.eq.s32.totalorder %v8887_v5, %v8547_v6 }
 0x12f   : > { %v683_v16 = vadd.f32 %v682_v13, %v665_v1  ;;  %v973_v14 = vadd.f32 %v972_v45, %v955_v61  ;;  %v624_v12 = vpop.f32.mrf.mxu0  ;;  %v914_v2 = vpop.f32.mrf.mxu1 }
 0x130   : > { %v666_v15 = vsel %vm13424_vm10, %v624_v12, 0.0  ;;  %v956_v55 = vsel %vm13424_vm10, %v914_v2, 0.0  ;;  %vm13427_vm10 = vcmp.eq.s32.totalorder %v8916_v47, %v8532_v32 }
 0x131   : > { %v704_v10 = vadd.f32 %v703_v53, %v666_v15  ;;  %v994_v37 = vadd.f32 %v993_v43, %v956_v55  ;;  %v628_v41 = vpop.f32.mrf.mxu0  ;;  %v918_v39 = vpop.f32.mrf.mxu1  ;;  %7307 = vmatmul.mubr.msk.f32.gmra.mxu0 %vm429_vm6, %v8204_v19  ;;  %7325 = vmatmul.mubr.msk.f32.gmra.mxu1 %vm429_vm6, %v8207_v22  ;;  %v8946_v22 = vrot.slane %v1347_v59, %v7957_v24 }
 0x132   : > { %v667_v8 = vsel %vm13425_vm11, %v628_v41, 0.0  ;;  %v957_v13 = vsel %vm13425_vm11, %v918_v39, 0.0  ;;  %2359 = vmatprep.mubr.f32.mxu0 %v13458_v0  ;;  %2601 = vmatprep.mubr.f32.mxu1 %v13458_v0  ;;  %v8955_v53 = vrot.slane %v1351_v23, %v7957_v24  ;;  %v3761_v43 = vrot.slane %v3753_v35, %v7957_v24  ;;  %v7664_v39 = vld [vmem:[%s7975_s6] sm:$0xff] }
 0x133   : > { %v684_v45 = vadd.f32 %v683_v16, %v667_v8  ;;  %v974_v19 = vadd.f32 %v973_v14, %v957_v13  ;;  %v630_v42 = vpop.f32.mrf.mxu0  ;;  %v920_v62 = vpop.f32.mrf.mxu1  ;;  %vm13429_vm11 = vcmp.eq.s32.totalorder %v8916_v47, %v8547_v6  ;;  %vm13476_vm5 = vcmp.eq.s32.totalorder %v8595_v7, %v8946_v22 }
 0x134   : > { %v668_v27 = vsel %vm13426_vm9, %v630_v42, 0.0  ;;  %v958_v57 = vsel %vm13426_vm9, %v920_v62, 0.0  ;;  %vm13431_vm9 = vcmp.eq.s32.totalorder %v7941_v18, %v8946_v22  ;;  %vm8983_vm8 = vcmp.eq.s32.totalorder %v7941_v18, %v3761_v43 }
 0x135   : > { %v705_v26 = vadd.f32 %v704_v10, %v668_v27  ;;  %v995_v21 = vadd.f32 %v994_v37, %v958_v57  ;;  %v634_v44 = vpop.f32.mrf.mxu0  ;;  %v924_v1 = vpop.f32.mrf.mxu1  ;;  %7308 = vmatmul.mubr.msk.f32.gmra.mxu0 %vm429_vm6, %v8219_v28  ;;  %7326 = vmatmul.mubr.msk.f32.gmra.mxu1 %vm429_vm6, %v8222_v29  ;;  %vm1363_vm7 = vcmp.eq.s32.totalorder %v8540_v34, %v8955_v53 }
 0x136   : > { %v669_v61 = vsel %vm13427_vm10, %v634_v44, 0.0  ;;  %v959_v16 = vsel %vm13427_vm10, %v924_v1, 0.0  ;;  %2753 = vmatprep.mubr.f32.mxu0 %v13458_v0  ;;  %3070 = vmatprep.mubr.f32.mxu1 %v13458_v0  ;;  %vm13433_vm10 = vcmp.eq.s32.totalorder %v7941_v18, %v8955_v53  ;;  %v9022_v1 = vld [vmem:[%s7975_s6 + $0x108] sm:$0xff] }
 0x137   : > { %v685_v14 = vadd.f32 %v684_v45, %v669_v61  ;;  %v975_v28 = vadd.f32 %v974_v19, %v959_v16  ;;  %v636_v12 = vpop.f32.mrf.mxu0  ;;  %v926_v29 = vpop.f32.mrf.mxu1  ;;  %v7666_v61 = vld [vmem:[%s7975_s6 + $0x8] sm:$0xff] }
 0x138   : > { %v670_v2 = vsel %vm13429_vm11, %v636_v12, 0.0  ;;  %v960_v59 = vsel %vm13429_vm11, %v926_v29, 0.0  ;;  %vm1362_vm11 = vcmp.eq.s32.totalorder %v8540_v34, %v8946_v22 }
 0x139   : > { %v686_v55 = vrot.slane %v685_v14, 4  ;;  %v976_v23 = vrot.slane %v975_v28, 4  ;;  %v706_v35 = vadd.f32 %v705_v26, %v670_v2  ;;  %v996_v10 = vadd.f32 %v995_v21, %v960_v59  ;;  %v1124_v37 = vpop.f32.mrf.mxu0  ;;  %v1458_v41 = vpop.f32.mrf.mxu1  ;;  %7329 = vmatmul.mubr.msk.f32.vlgmr.msra.gmra.mxu0 %vm429_vm6, %v8232_v31  ;;  %7347 = vmatmul.mubr.msk.f32.vlgmr.msra.gmra.mxu1 %vm429_vm6, %v7664_v39 }
 0x13a   : > { %v1553_v8 = vsel %vm13431_vm9, %v1458_v41, 0.0  ;;  %7364 = vmatpush1.msk.msra.mxu0 %vm8535_vm12, %v13750_v9  ;;  %7382 = vmatpush1.msk.msra.mxu1 %vm8535_vm12, %v13750_v9  ;;  %vm1364_vm12 = vcmp.eq.s32.totalorder %v8562_v38, %v8946_v22  ;;  %vm13493_vm9 = vcmp.eq.s32.totalorder %v8562_v38, %v8955_v53  ;;  %v1219_v16 = vsel %vm397_vm13, %v1124_v37, 0.0 }
 0x13b   : > { %v687_v31 = vadd.f32 %v686_v55, %v685_v14  ;;  %v977_v13 = vadd.f32 %v976_v23, %v975_v28  ;;  %v707_v45 = vrot.slane %v706_v35, 4  ;;  %v997_v19 = vrot.slane %v996_v10, 4  ;;  %v1126_v42 = vpop.f32.mrf.mxu0  ;;  %v1460_v62 = vpop.f32.mrf.mxu1  ;;  %2759 = vmatprep.mubr.f32.mxu0 %v13458_v0  ;;  %3076 = vmatprep.mubr.f32.mxu1 %v13458_v0 }
 0x13c   : > { %v1554_v33 = vsel %vm13433_vm10, %v1460_v62, 0.0  ;;  %7399 = vmatprep.subr.msk.mxu0 %vm8983_vm8, %v13750_v9  ;;  %7417 = vmatprep.subr.msk.mxu1 %vm8983_vm8, %v13750_v9  ;;  %vm13472_vm10 = vcmp.eq.s32.totalorder %v8595_v7, %v8955_v53  ;;  %v1220_v14 = vsel %vm398_vm15, %v1126_v42, 0.0  ;;  %vm13471_vm13 = vcmp.eq.s32.totalorder %v8626_v46, %v8946_v22 }
 0x13d   : > { %v688_v27 = vrot.slane %v687_v31, 2  ;;  %v978_v57 = vrot.slane %v977_v13, 2  ;;  %v708_v43 = vadd.f32 %v707_v45, %v706_v35  ;;  %v998_v26 = vadd.f32 %v997_v19, %v996_v10  ;;  %v1130_v21 = vpop.f32.mrf.mxu0  ;;  %v1464_v44 = vpop.f32.mrf.mxu1  ;;  %7330 = vmatmul.mubr.msk.f32.gmra.mxu0 %vm429_vm6, %v9022_v1  ;;  %7348 = vmatmul.mubr.msk.f32.gmra.mxu1 %vm429_vm6, %v7666_v61 }
 0x13e   : > { %v1221_v28 = vsel %vm399_vm14, %v1130_v21, 0.0  ;;  %v1555_v12 = vsel %vm1362_vm11, %v1464_v44, 0.0  ;;  %2765 = vmatprep.mubr.f32.mxu0 %v13458_v0  ;;  %3082 = vmatprep.mubr.f32.mxu1 %v13458_v0  ;;  %vm13467_vm14 = vcmp.eq.s32.totalorder %v8626_v46, %v8955_v53  ;;  %vm13764_vm15 = vcmp.eq.s32.totalorder %v8626_v46, %v8532_v32 }
 0x13f   : > { %v689_v29 = vadd.f32 %v688_v27, %v687_v31  ;;  %v979_v2 = vadd.f32 %v978_v57, %v977_v13  ;;  %v709_v59 = vrot.slane %v708_v43, 2  ;;  %v999_v55 = vrot.slane %v998_v26, 2  ;;  %v1132_v23 = vpop.f32.mrf.mxu0  ;;  %v1466_v35 = vpop.f32.mrf.mxu1  ;;  %v9051_v27 = vld [vmem:[%s7975_s6 + $0x110] sm:$0xff] }
 0x140   : > { %v1251_v10 = vadd.f32 %v1221_v28, %v1219_v16  ;;  %v1585_v37 = vadd.f32 %v1555_v12, %v1553_v8  ;;  %v1222_v41 = vsel %vm400_vm0, %v1132_v23, 0.0  ;;  %v1556_v39 = vsel %vm1363_vm7, %v1466_v35, 0.0  ;;  %v7668_v8 = vld [vmem:[%s7975_s6 + $0x10] sm:$0xff] }
 0x141   : > { %v690_v45 = vrot.slane %v689_v29, 1  ;;  %v980_v19 = vrot.slane %v979_v2, 1  ;;  %v710_v31 = vadd.f32 %v709_v59, %v708_v43  ;;  %v1000_v42 = vadd.f32 %v999_v55, %v998_v26  ;;  %v1136_v13 = vpop.f32.mrf.mxu0  ;;  %v1470_v62 = vpop.f32.mrf.mxu1  ;;  %7331 = vmatmul.mubr.msk.f32.gmra.mxu0 %vm429_vm6, %v9051_v27  ;;  %7349 = vmatmul.mubr.msk.f32.gmra.mxu1 %vm429_vm6, %v7668_v8 }
 0x142   : > { %v1272_v57 = vadd.f32 %v1222_v41, %v1220_v14  ;;  %v1606_v21 = vadd.f32 %v1556_v39, %v1554_v33  ;;  %v1223_v44 = vsel %vm401_vm1, %v1136_v13, 0.0  ;;  %v1557_v43 = vsel %vm1364_vm12, %v1470_v62, 0.0  ;;  %2771 = vmatprep.mubr.f32.mxu0 %v13458_v0  ;;  %3088 = vmatprep.mubr.f32.mxu1 %v13458_v0  ;;  %v9287_v13 = vld [vmem:[%s7975_s6 + $0x158] sm:$0xff] }
 0x143   : > { %v9065_v26 = vadd.f32 %v690_v45, %v689_v29  ;;  %v9067_v61 = vadd.f32 %v980_v19, %v979_v2  ;;  %v711_v16 = vrot.slane %v710_v31, 1  ;;  %v1001_v14 = vrot.slane %v1000_v42, 1  ;;  %v1138_v33 = vpop.f32.mrf.mxu0  ;;  %v1472_v28 = vpop.f32.mrf.mxu1  ;;  %v9080_v19 = vld [vmem:[%s7975_s6 + $0x118] sm:$0xff] }
 0x144   : > { %v1252_v12 = vadd.f32 %v1251_v10, %v1223_v44  ;;  %v1586_v59 = vadd.f32 %v1585_v37, %v1557_v43  ;;  %v1224_v55 = vsel %vm402_vm2, %v1138_v33, 0.0  ;;  %v1558_v23 = vsel %vm13493_vm9, %v1472_v28, 0.0 }
 0x145   : > { %13762 = vst [vmem:[#allocation17_spill] sm:$0xff] %v9067_v61  ;;  %v9075_v29 = vadd.f32 %v711_v16, %v710_v31  ;;  %v9077_v35 = vadd.f32 %v1001_v14, %v1000_v42  ;;  %v1273_v2 = vadd.f32 %v1272_v57, %v1224_v55  ;;  %v1607_v41 = vadd.f32 %v1606_v21, %v1558_v23  ;;  %v1142_v39 = vpop.f32.mrf.mxu0  ;;  %v1476_v45 = vpop.f32.mrf.mxu1  ;;  %v7670_v31 = vld [vmem:[%s7975_s6 + $0x18] sm:$0xff]  ;;  %v9107_v55 = vld [vmem:[%s7975_s6 + $0x120] sm:$0xff] }
 0x146   : > { %7332 = vmatmul.mubr.msk.f32.gmra.mxu0 %vm429_vm6, %v9080_v19  ;;  %v1225_v10 = vsel %vm403_vm3, %v1142_v39, 0.0  ;;  %v1559_v37 = vsel %vm13476_vm5, %v1476_v45, 0.0  ;;  %7350 = vmatmul.mubr.msk.f32.gmra.mxu1 %vm429_vm6, %v7670_v31  ;;  %v7672_v23 = vld [vmem:[%s7975_s6 + $0x20] sm:$0xff]  ;;  %vm13460_vm0 = vcmp.eq.s32.totalorder %v8651_v48, %v8946_v22  ;;  %vm13765_vm1 = vcmp.eq.s32.totalorder %v8626_v46, %v8547_v6 }
 0x147   : > { %13763 = vst [vmem:[#allocation18_spill] sm:$0xff] %v9077_v35  ;;  %2777 = vmatprep.mubr.f32.mxu0 %v13458_v0  ;;  %v1253_v62 = vadd.f32 %v1252_v12, %v1225_v10  ;;  %v1587_v8 = vadd.f32 %v1586_v59, %v1559_v37  ;;  %v1144_v57 = vpop.f32.mrf.mxu0  ;;  %v1478_v21 = vpop.f32.mrf.mxu1  ;;  %3094 = vmatprep.mubr.f32.mxu1 %v13458_v0 }
 0x148   : > { %v1226_v44 = vsel %vm404_vm4, %v1144_v57, 0.0  ;;  %v1560_v43 = vsel %vm13472_vm10, %v1478_v21, 0.0  ;;  %v9132_v21 = vld [vmem:[%s7975_s6 + $0x128] sm:$0xff]  ;;  %vm13435_vm2 = vcmp.eq.s32.totalorder %v8651_v48, %v8955_v53  ;;  %vm13766_vm3 = vcmp.eq.s32.totalorder %v8651_v48, %v8532_v32 }
 0x149   : > { %v1274_v16 = vadd.f32 %v1273_v2, %v1226_v44  ;;  %v1608_v14 = vadd.f32 %v1607_v41, %v1560_v43  ;;  %v1148_v33 = vpop.f32.mrf.mxu0  ;;  %v1482_v28 = vpop.f32.mrf.mxu1  ;;  %vm13434_vm4 = vcmp.eq.s32.totalorder %v8676_v50, %v8946_v22  ;;  %vm13492_vm10 = vcmp.eq.s32.totalorder %v8916_v47, %v8955_v53 }
 0x14a   : > { %7333 = vmatmul.mubr.msk.f32.gmra.mxu0 %vm429_vm6, %v9107_v55  ;;  %v1227_v12 = vsel %vm13764_vm15, %v1148_v33, 0.0  ;;  %v1561_v59 = vsel %vm13471_vm13, %v1482_v28, 0.0  ;;  %7351 = vmatmul.mubr.msk.f32.gmra.mxu1 %vm429_vm6, %v7672_v23  ;;  %vm13767_vm15 = vcmp.eq.s32.totalorder %v8651_v48, %v8547_v6  ;;  %vm13803_vm13 = vcmp.eq.s32.totalorder %v8887_v5, %v8547_v6 }
 0x14b   : > { %2783 = vmatprep.mubr.f32.mxu0 %v13458_v0  ;;  %v1254_v2 = vadd.f32 %v1253_v62, %v1227_v12  ;;  %v1588_v41 = vadd.f32 %v1587_v8, %v1561_v59  ;;  %v1150_v39 = vpop.f32.mrf.mxu0  ;;  %v1484_v45 = vpop.f32.mrf.mxu1  ;;  %3100 = vmatprep.mubr.f32.mxu1 %v13458_v0  ;;  %vm13815_vm5 = vcmp.eq.s32.totalorder %v8916_v47, %v8532_v32 }
 0x14c   : > { %v1228_v10 = vsel %vm13765_vm1, %v1150_v39, 0.0  ;;  %v1562_v37 = vsel %vm13467_vm14, %v1484_v45, 0.0  ;;  %vm13437_vm1 = vcmp.eq.s32.totalorder %v8676_v50, %v8955_v53  ;;  %v13849_v15 = vcombine.low %v9065_v26, %v9075_v29 }
 0x14d   : > { %v1275_v31 = vadd.f32 %v1274_v16, %v1228_v10  ;;  %v1609_v57 = vadd.f32 %v1608_v14, %v1562_v37  ;;  %v1154_v62 = vpop.f32.mrf.mxu0  ;;  %v1488_v8 = vpop.f32.mrf.mxu1  ;;  %v7674_v16 = vld [vmem:[%s7975_s6 + $0x28] sm:$0xff]  ;;  %v9157_v10 = vld [vmem:[%s7975_s6 + $0x130] sm:$0xff] }
 0x14e   : > { %7334 = vmatmul.mubr.msk.f32.gmra.mxu0 %vm429_vm6, %v9132_v21  ;;  %v1229_v44 = vsel %vm13766_vm3, %v1154_v62, 0.0  ;;  %v1563_v43 = vsel %vm13460_vm0, %v1488_v8, 0.0  ;;  %7352 = vmatmul.mubr.msk.f32.gmra.mxu1 %vm429_vm6, %v7674_v16  ;;  %vm13768_vm3 = vcmp.eq.s32.totalorder %v8676_v50, %v8532_v32  ;;  %vm13468_vm0 = vcmp.eq.s32.totalorder %v8859_v3, %v8955_v53 }
 0x14f   : > { %2789 = vmatprep.mubr.f32.mxu0 %v13458_v0  ;;  %v1255_v14 = vadd.f32 %v1254_v2, %v1229_v44  ;;  %v1589_v33 = vadd.f32 %v1588_v41, %v1563_v43  ;;  %v1156_v28 = vpop.f32.mrf.mxu0  ;;  %v1490_v12 = vpop.f32.mrf.mxu1  ;;  %3106 = vmatprep.mubr.f32.mxu1 %v13458_v0 }
 0x150   : > { %v1230_v59 = vsel %vm13767_vm15, %v1156_v28, 0.0  ;;  %v1564_v23 = vsel %vm13435_vm2, %v1490_v12, 0.0  ;;  %vm13436_vm15 = vcmp.eq.s32.totalorder %v8701_v52, %v8946_v22  ;;  %vm13770_vm2 = vcmp.eq.s32.totalorder %v8701_v52, %v8532_v32 }
 0x151   : > { %v1276_v39 = vadd.f32 %v1275_v31, %v1230_v59  ;;  %v1610_v45 = vadd.f32 %v1609_v57, %v1564_v23  ;;  %v1160_v2 = vpop.f32.mrf.mxu0  ;;  %v1494_v41 = vpop.f32.mrf.mxu1  ;;  %v7676_v31 = vld [vmem:[%s7975_s6 + $0x30] sm:$0xff]  ;;  %v9182_v23 = vld [vmem:[%s7975_s6 + $0x138] sm:$0xff] }
 0x152   : > { %7335 = vmatmul.mubr.msk.f32.gmra.mxu0 %vm429_vm6, %v9157_v10  ;;  %v1231_v37 = vsel %vm13768_vm3, %v1160_v2, 0.0  ;;  %v1565_v62 = vsel %vm13434_vm4, %v1494_v41, 0.0  ;;  %7353 = vmatmul.mubr.msk.f32.gmra.mxu1 %vm429_vm6, %v7676_v31  ;;  %vm13769_vm3 = vcmp.eq.s32.totalorder %v8676_v50, %v8547_v6  ;;  %vm13439_vm4 = vcmp.eq.s32.totalorder %v8701_v52, %v8955_v53 }
 0x153   : > { %2795 = vmatprep.mubr.f32.mxu0 %v13458_v0  ;;  %v1256_v57 = vadd.f32 %v1255_v14, %v1231_v37  ;;  %v1590_v8 = vadd.f32 %v1589_v33, %v1565_v62  ;;  %v1162_v44 = vpop.f32.mrf.mxu0  ;;  %v1496_v43 = vpop.f32.mrf.mxu1  ;;  %3112 = vmatprep.mubr.f32.mxu1 %v13458_v0 }
 0x154   : > { %v1232_v16 = vsel %vm13769_vm3, %v1162_v44, 0.0  ;;  %v1566_v28 = vsel %vm13437_vm1, %v1496_v43, 0.0  ;;  %vm13771_vm3 = vcmp.eq.s32.totalorder %v8701_v52, %v8547_v6  ;;  %vm13772_vm1 = vcmp.eq.s32.totalorder %v8726_v54, %v8532_v32 }
 0x155   : > { %v1277_v12 = vadd.f32 %v1276_v39, %v1232_v16  ;;  %v1611_v59 = vadd.f32 %v1610_v45, %v1566_v28  ;;  %v1166_v14 = vpop.f32.mrf.mxu0  ;;  %v1500_v33 = vpop.f32.mrf.mxu1  ;;  %v7678_v39 = vld [vmem:[%s7975_s6 + $0x38] sm:$0xff] }
 0x156   : > { %7336 = vmatmul.mubr.msk.f32.gmra.mxu0 %vm429_vm6, %v9182_v23  ;;  %v1233_v2 = vsel %vm13770_vm2, %v1166_v14, 0.0  ;;  %v1567_v41 = vsel %vm13436_vm15, %v1500_v33, 0.0  ;;  %7354 = vmatmul.mubr.msk.f32.gmra.mxu1 %vm429_vm6, %v7678_v39  ;;  %vm13438_vm2 = vcmp.eq.s32.totalorder %v8726_v54, %v8946_v22  ;;  %v9207_v14 = vld [vmem:[%s7975_s6 + $0x140] sm:$0xff]  ;;  %vm13441_vm15 = vcmp.eq.s32.totalorder %v8726_v54, %v8955_v53 }
 0x157   : > { %2801 = vmatprep.mubr.f32.mxu0 %v13458_v0  ;;  %v1257_v45 = vadd.f32 %v1256_v57, %v1233_v2  ;;  %v1591_v37 = vadd.f32 %v1590_v8, %v1567_v41  ;;  %v1168_v62 = vpop.f32.mrf.mxu0  ;;  %v1502_v31 = vpop.f32.mrf.mxu1  ;;  %3118 = vmatprep.mubr.f32.mxu1 %v13458_v0 }
 0x158   : > { %v1234_v44 = vsel %vm13771_vm3, %v1168_v62, 0.0  ;;  %v1568_v43 = vsel %vm13439_vm4, %v1502_v31, 0.0  ;;  %vm13773_vm3 = vcmp.eq.s32.totalorder %v8726_v54, %v8547_v6  ;;  %vm13774_vm4 = vcmp.eq.s32.totalorder %v8751_v56, %v8532_v32 }
 0x159   : > { %v1278_v16 = vadd.f32 %v1277_v12, %v1234_v44  ;;  %v1612_v28 = vadd.f32 %v1611_v59, %v1568_v43  ;;  %v1172_v57 = vpop.f32.mrf.mxu0  ;;  %v1506_v8 = vpop.f32.mrf.mxu1  ;;  %v7680_v12 = vld [vmem:[%s7975_s6 + $0x40] sm:$0xff] }
 0x15a   : > { %7337 = vmatmul.mubr.msk.f32.gmra.mxu0 %vm429_vm6, %v9207_v14  ;;  %v1235_v33 = vsel %vm13772_vm1, %v1172_v57, 0.0  ;;  %v1569_v2 = vsel %vm13438_vm2, %v1506_v8, 0.0  ;;  %7355 = vmatmul.mubr.msk.f32.gmra.mxu1 %vm429_vm6, %v7680_v12  ;;  %vm13440_vm1 = vcmp.eq.s32.totalorder %v8751_v56, %v8946_v22  ;;  %v9232_v8 = vld [vmem:[%s7975_s6 + $0x148] sm:$0xff]  ;;  %vm13444_vm2 = vcmp.eq.s32.totalorder %v8751_v56, %v8955_v53 }
 0x15b   : > { %2807 = vmatprep.mubr.f32.mxu0 %v13458_v0  ;;  %v1258_v59 = vadd.f32 %v1257_v45, %v1235_v33  ;;  %v1592_v41 = vadd.f32 %v1591_v37, %v1569_v2  ;;  %v1174_v39 = vpop.f32.mrf.mxu0  ;;  %v1508_v62 = vpop.f32.mrf.mxu1  ;;  %3124 = vmatprep.mubr.f32.mxu1 %v13458_v0 }
 0x15c   : > { %v1236_v31 = vsel %vm13773_vm3, %v1174_v39, 0.0  ;;  %v1570_v44 = vsel %vm13441_vm15, %v1508_v62, 0.0  ;;  %vm13775_vm3 = vcmp.eq.s32.totalorder %v8751_v56, %v8547_v6  ;;  %vm13776_vm15 = vcmp.eq.s32.totalorder %v8776_v58, %v8532_v32 }
 0x15d   : > { %v1279_v43 = vadd.f32 %v1278_v16, %v1236_v31  ;;  %v1613_v57 = vadd.f32 %v1612_v28, %v1570_v44  ;;  %v1178_v45 = vpop.f32.mrf.mxu0  ;;  %v1512_v37 = vpop.f32.mrf.mxu1  ;;  %v7682_v16 = vld [vmem:[%s7975_s6 + $0x48] sm:$0xff] }
 0x15e   : > { %7338 = vmatmul.mubr.msk.f32.gmra.mxu0 %vm429_vm6, %v9232_v8  ;;  %v1237_v33 = vsel %vm13774_vm4, %v1178_v45, 0.0  ;;  %v1571_v2 = vsel %vm13440_vm1, %v1512_v37, 0.0  ;;  %7356 = vmatmul.mubr.msk.f32.gmra.mxu1 %vm429_vm6, %v7682_v16  ;;  %vm13443_vm4 = vcmp.eq.s32.totalorder %v8776_v58, %v8946_v22  ;;  %vm13445_vm1 = vcmp.eq.s32.totalorder %v8776_v58, %v8955_v53 }
 0x15f   : > { %2813 = vmatprep.mubr.f32.mxu0 %v13458_v0  ;;  %v1259_v28 = vadd.f32 %v1258_v59, %v1237_v33  ;;  %v1593_v12 = vadd.f32 %v1592_v41, %v1571_v2  ;;  %v1180_v39 = vpop.f32.mrf.mxu0  ;;  %v1514_v62 = vpop.f32.mrf.mxu1  ;;  %3130 = vmatprep.mubr.f32.mxu1 %v13458_v0  ;;  %v9257_v33 = vld [vmem:[%s7975_s6 + $0x150] sm:$0xff] }
 0x160   : > { %v1238_v31 = vsel %vm13775_vm3, %v1180_v39, 0.0  ;;  %v1572_v44 = vsel %vm13444_vm2, %v1514_v62, 0.0  ;;  %vm13780_vm3 = vcmp.eq.s32.totalorder %v8776_v58, %v8547_v6 }
 0x161   : > { %v1280_v45 = vadd.f32 %v1279_v43, %v1238_v31  ;;  %v1614_v37 = vadd.f32 %v1613_v57, %v1572_v44  ;;  %v1184_v59 = vpop.f32.mrf.mxu0  ;;  %v1518_v41 = vpop.f32.mrf.mxu1  ;;  %v7684_v43 = vld [vmem:[%s7975_s6 + $0x50] sm:$0xff]  ;;  %v13777_v44 = vld [vmem:[#allocation2_spill] sm:$0xff] }
 0x162   : > { %7339 = vmatmul.mubr.msk.f32.gmra.mxu0 %vm429_vm6, %v9257_v33  ;;  %v1239_v2 = vsel %vm13776_vm15, %v1184_v59, 0.0  ;;  %v1573_v16 = vsel %vm13443_vm4, %v1518_v41, 0.0  ;;  %7357 = vmatmul.mubr.msk.f32.gmra.mxu1 %vm429_vm6, %v7684_v43  ;;  %vm13446_vm15 = vcmp.eq.s32.totalorder %v8802_v60, %v8946_v22  ;;  %v13778_v59 = vfloor.f32 %v13777_v44 }
 0x163   : > { %2819 = vmatprep.mubr.f32.mxu0 %v13458_v0  ;;  %v1260_v57 = vadd.f32 %v1259_v28, %v1239_v2  ;;  %v1594_v39 = vadd.f32 %v1593_v12, %v1573_v16  ;;  %v1186_v62 = vpop.f32.mrf.mxu0  ;;  %v1520_v31 = vpop.f32.mrf.mxu1  ;;  %3136 = vmatprep.mubr.f32.mxu1 %v13458_v0  ;;  %vm13449_vm4 = vcmp.eq.s32.totalorder %v8802_v60, %v8955_v53 }
 0x164   : > { %v9278_v41 = vsub.f32 %v13777_v44, %v13778_v59  ;;  %v1240_v43 = vsel %vm13780_vm3, %v1186_v62, 0.0  ;;  %v1574_v28 = vsel %vm13445_vm1, %v1520_v31, 0.0  ;;  %v13781_v44 = vld [vmem:[#allocation3_spill] sm:$0xff]  ;;  %vm13782_vm3 = vcmp.eq.s32.totalorder %v8802_v60, %v8532_v32 }
 0x165   : > { %v1281_v12 = vadd.f32 %v1280_v45, %v1240_v43  ;;  %v1615_v2 = vadd.f32 %v1614_v37, %v1574_v28  ;;  %v1190_v16 = vpop.f32.mrf.mxu0  ;;  %v1524_v4 = vpop.f32.mrf.mxu1  ;;  %vm328_vm2 = vcmp.ge.s32.totalorder %v13781_v44, 0  ;;  %v7686_v37 = vld [vmem:[%s7975_s6 + $0x58] sm:$0xff]  ;;  %vm329_vm1 = vcmp.lt.s32.totalorder %v13781_v44, 8 }
 0x166   : > { %13779 = vst [vmem:[#allocation2_spill] sm:$0xff] %v9278_v41  ;;  %7340 = vmatmul.mubr.msk.f32.gmra.mxu0 %vm429_vm6, %v9287_v13  ;;  %v1241_v62 = vsel %vm13782_vm3, %v1190_v16, 0.0  ;;  %v1575_v45 = vsel %vm13446_vm15, %v1524_v4, 0.0  ;;  %7358 = vmatmul.mubr.msk.f32.gmra.mxu1 %vm429_vm6, %v7686_v37  ;;  %vm13457_vm3 = vcmp.eq.s32.totalorder %v8833_v63, %v8946_v22  ;;  %v9308_v4 = vsub.f32 1.0, %v9278_v41 }
 0x167   : > { %2825 = vmatprep.mubr.f32.mxu0 %v13458_v0  ;;  %v1261_v31 = vadd.f32 %v1260_v57, %v1241_v62  ;;  %v1595_v59 = vadd.f32 %v1594_v39, %v1575_v45  ;;  %v1192_v43 = vpop.f32.mrf.mxu0  ;;  %v1526_v28 = vpop.f32.mrf.mxu1  ;;  %3142 = vmatprep.mubr.f32.mxu1 %v13458_v0  ;;  %vm13784_vm15 = vcmp.eq.s32.totalorder %v8802_v60, %v8547_v6  ;;  %v13451_v39 = vmov 0  }
 0x168   : > { %13783 = vst [vmem:[#allocation3_spill] sm:$0xff] %v9308_v4  ;;  %v1242_v16 = vsel %vm13784_vm15, %v1192_v43, 0.0  ;;  %v1576_v57 = vsel %vm13449_vm4, %v1526_v28, 0.0  ;;  %v9319_v62 = vsel %vm328_vm2, 1, %v13451_v39  ;;  %vm13466_vm15 = vcmp.eq.s32.totalorder %v8833_v63, %v8955_v53  ;;  %v7688_v28 = vld [vmem:[%s7975_s6 + $0x60] sm:$0xff] }
 0x169   : > { %v1282_v45 = vadd.f32 %v1281_v12, %v1242_v16  ;;  %v1616_v37 = vadd.f32 %v1615_v2, %v1576_v57  ;;  %v1196_v42 = vpop.f32.mrf.mxu0  ;;  %v1530_v49 = vpop.f32.mrf.mxu1  ;;  %v9331_v43 = vsel %vm329_vm1, 1, %v13451_v39  ;;  %vm13785_vm4 = vcmp.eq.s32.totalorder %v8833_v63, %v8532_v32  ;;  %v13786_v16 = vld [vmem:[#allocation8_spill] sm:$0xff] }
 0x16a   : > { %7341 = vmatmul.mubr.msk.f32.gmra.mxu0 %vm429_vm6, %v9322_v30  ;;  %v1243_v12 = vsel %vm13785_vm4, %v1196_v42, 0.0  ;;  %v1577_v2 = vsel %vm13457_vm3, %v1530_v49, 0.0  ;;  %7359 = vmatmul.mubr.msk.f32.gmra.mxu1 %vm429_vm6, %v7688_v28  ;;  %v13787_v57 = vmul.u32 8, %v8814_v36  ;;  %vm13463_vm4 = vcmp.eq.s32.totalorder %v8859_v3, %v8946_v22 }
 0x16b   : > { %2831 = vmatprep.mubr.f32.mxu0 %v13458_v0  ;;  %v1262_v39 = vadd.f32 %v1261_v31, %v1243_v12  ;;  %v1596_v20 = vadd.f32 %v1595_v59, %v1577_v2  ;;  %v1198_v17 = vpop.f32.mrf.mxu0  ;;  %v1532_v35 = vpop.f32.mrf.mxu1  ;;  %3148 = vmatprep.mubr.f32.mxu1 %v13458_v0  ;;  %v332_v49 = vrot.slane %v9319_v62, 7  ;;  %vm13789_vm3 = vcmp.eq.s32.totalorder %v8833_v63, %v8547_v6  ;;  %v9360_v0 = vld [vmem:[%s7975_s6 + $0x168] sm:$0xff] }
 0x16c   : > { %v9345_v40 = vadd.s32 %v13787_v57, %v13786_v16  ;;  %v1244_v36 = vsel %vm13789_vm3, %v1198_v17, 0.0  ;;  %v1578_v31 = vsel %vm13466_vm15, %v1532_v35, 0.0  ;;  %v336_v59 = vrot.slane %v9331_v43, 7  ;;  %13790 = vst [vmem:[#allocation20_spill] sm:$0xff] %v9360_v0 }
 0x16d   : > { %v1283_v12 = vadd.f32 %v1282_v45, %v1244_v36  ;;  %v1617_v2 = vadd.f32 %v1616_v37, %v1578_v31  ;;  %v1202_v28 = vpop.f32.mrf.mxu0  ;;  %v1536_v57 = vpop.f32.mrf.mxu1  ;;  %vm13791_vm3 = vcmp.eq.s32.totalorder %v8859_v3, %v8532_v32  ;;  %v7690_v37 = vld [vmem:[%s7975_s6 + $0x68] sm:$0xff]  ;;  %v13792_v36 = vmov 0.0  }
 0x16e   : > { %13788 = vst [vmem:[#allocation19_spill] sm:$0xff] %v9345_v40  ;;  %7342 = vmatmul.mubr.msk.f32.gmra.mxu0 %vm429_vm6, %v9360_v0  ;;  %v1245_v35 = vsel %vm13791_vm3, %v1202_v28, 0.0  ;;  %v1579_v45 = vsel %vm13463_vm4, %v1536_v57, 0.0  ;;  %7360 = vmatmul.mubr.msk.f32.gmra.mxu1 %vm429_vm6, %v7690_v37  ;;  %vm13470_vm3 = vcmp.eq.s32.totalorder %v8887_v5, %v8946_v22  ;;  %v13793_v28 = vshra.s32 %v8870_v51, 7  ;;  %v9394_v51 = vld [vmem:[%s7975_s6 + $0x170] sm:$0xff] }
 0x16f   : > { %2837 = vmatprep.mubr.f32.mxu0 %v13792_v36  ;;  %v1263_v42 = vadd.f32 %v1262_v39, %v1245_v35  ;;  %v1597_v16 = vadd.f32 %v1596_v20, %v1579_v45  ;;  %v1204_v61 = vpop.f32.mrf.mxu0  ;;  %v1538_v17 = vpop.f32.mrf.mxu1  ;;  %3154 = vmatprep.mubr.f32.mxu1 %v13792_v36  ;;  %v350_v37 = vrot.slane %v9331_v43, 6  ;;  %v9385_v0 = vrot.slane %v9308_v4, 6  ;;  %13796 = vst [vmem:[#allocation22_spill] sm:$0xff] %v9394_v51  ;;  %v13797_v43 = vld [vmem:[#allocation4_spill] sm:$0xff] }
 0x170   : > { %v3749_v57 = vrot.slane %v13793_v28, %v7957_v24  ;;  %vm13795_vm4 = vcmp.eq.s32.totalorder %v8859_v3, %v8547_v6  ;;  %v1580_v39 = vsel %vm13468_vm0, %v1538_v17, 0.0  ;;  %vm13475_vm15 = vcmp.eq.s32.totalorder %v8887_v5, %v8955_v53 }
 0x171   : > { %13794 = vst [vmem:[#allocation21_spill] sm:$0xff] %v9385_v0  ;;  %v1246_v20 = vsel %vm13795_vm4, %v1204_v61, 0.0  ;;  %v1618_v45 = vadd.f32 %v1617_v2, %v1580_v39  ;;  %v1208_v31 = vpop.f32.mrf.mxu0  ;;  %v1542_v11 = vpop.f32.mrf.mxu1  ;;  %vm13483_vm14 = vcmp.ge.s32.totalorder %v13797_v43, 0  ;;  %vm13798_vm4 = vcmp.eq.s32.totalorder %v8887_v5, %v8532_v32  ;;  %v7692_v2 = vld [vmem:[%s7975_s6 + $0x70] sm:$0xff] }
 0x172   : > { %v1284_v35 = vadd.f32 %v1283_v12, %v1246_v20  ;;  %7343 = vmatmul.mubr.msk.f32.gmra.mxu0 %vm429_vm6, %v9394_v51  ;;  %v1247_v61 = vsel %vm13798_vm4, %v1208_v31, 0.0  ;;  %v1581_v12 = vsel %vm13470_vm3, %v1542_v11, 0.0  ;;  %7361 = vmatmul.mubr.msk.f32.gmra.mxu1 %vm429_vm6, %v7692_v2  ;;  %vm13484_vm0 = vcmp.lt.s32.totalorder %v13797_v43, 8 }
 0x173   : > { %2843 = vmatprep.mubr.f32.mxu0 %v13792_v36  ;;  %v13799_v17 = vshra.s32 %v9345_v40, 7  ;;  %v1264_v20 = vadd.f32 %v1263_v42, %v1247_v61  ;;  %v1598_v39 = vadd.f32 %v1597_v16, %v1581_v12  ;;  %v1210_v51 = vpop.f32.mrf.mxu0  ;;  %v1544_v31 = vpop.f32.mrf.mxu1  ;;  %3160 = vmatprep.mubr.f32.mxu1 %v13792_v36  ;;  %vm13485_vm4 = vcmp.eq.s32.totalorder %v8916_v47, %v8946_v22 }
 0x174   : > { %v3757_v11 = vrot.slane %v3749_v57, %v7957_v24  ;;  %vm9418_vm3 = vcmp.ne.s32.totalorder %v332_v49, 0  ;;  %v13800_v2 = vmov 0  ;;  %v1582_v16 = vsel %vm13475_vm15, %v1544_v31, 0.0  ;;  %v9431_v49 = vld [vmem:[%s7975_s6 + $0x178] sm:$0xff] }
 0x175   : > { %v4554_v28 = vrot.slane %v13799_v17, %v7960_v25  ;;  %v13801_v2 = vsel %vm9418_vm3, 4294967295, %v13800_v2  ;;  %v1248_v17 = vsel %vm13803_vm13, %v1210_v51, 0.0  ;;  %v1619_v61 = vadd.f32 %v1618_v45, %v1582_v16  ;;  %v1214_v12 = vpop.f32.mrf.mxu0  ;;  %v1548_v57 = vpop.f32.mrf.mxu1  ;;  %13804 = vst [vmem:[#allocation24_spill] sm:$0xff] %v9431_v49 }
 0x176   : > { %13802 = vst [vmem:[#allocation23_spill] sm:$0xff] %v13801_v2  ;;  %v1285_v42 = vadd.f32 %v1284_v35, %v1248_v17  ;;  %7344 = vmatmul.mubr.msk.f32.gmra.mxu0 %vm429_vm6, %v9431_v49  ;;  %v13805_v40 = vmov 0   ;;  %vm9445_vm13 = vcmp.ne.s32.totalorder %v336_v59, 0  ;;  %v13808_v35 = vmov 0 }
 0x177   : > { %v9438_v51 = vsel %vm13483_vm14, 1, %v13805_v40  ;;  %v9443_v31 = vsel %vm13484_vm0, 1, %v13805_v40  ;;  %v13809_v35 = vsel %vm9445_vm13, 4294967295, %v13808_v35  ;;  %v13811_v45 = vrot.slane %v9319_v62, 6  ;;  %v7694_v40 = vld [vmem:[%s7975_s6 + $0x78] sm:$0xff]  ;;  %3312 = vmatprep.mubr.f32.mxu0 %v13792_v36  ;;  %v1216_v25 = vpop.f32.mrf.mxu0  ;;  %v1550_v32 = vpop.f32.mrf.mxu1  ;;  %vm9478_vm14 = vmand %vm328_vm2, %vm329_vm1 }
 0x178   : > { %13806 = vst [vmem:[#allocation25_spill] sm:$0xff] %v9438_v51  ;;  %13807 = vst [vmem:[#allocation26_spill] sm:$0xff] %v9443_v31  ;;  %v13812_v17 = vmov 0  ;;  %v1249_v16 = vsel %vm13815_vm5, %v1214_v12, 0.0  ;;  %v1583_v43 = vsel %vm13485_vm4, %v1548_v57, 0.0  ;;  %7362 = vmatmul.mubr.msk.f32.gmra.mxu1 %vm429_vm6, %v7694_v40  ;;  %v4562_v59 = vrot.slane %v4554_v28, %v7957_v24 }
 0x179   : > { %13810 = vst [vmem:[#allocation27_spill] sm:$0xff] %v13809_v35  ;;  %vm9451_vm15 = vcmp.ne.s32.totalorder %v13811_v45, 0  ;;  %v13816_v62 = vrot.slane %v9308_v4, 7  ;;  %v1265_v49 = vadd.f32 %v1264_v20, %v1249_v16  ;;  %v1599_v5 = vadd.f32 %v1598_v39, %v1583_v43  ;;  %3554 = vmatprep.mubr.f32.mxu1 %v13792_v36 }
 0x17a   : > { %v13813_v17 = vsel %vm9451_vm15, 4294967295, %v13812_v17  ;;  %vm9470_vm5 = vcmp.eq.s32.totalorder %v7941_v18, %v3757_v11  ;;  %v13817_v12 = vmov 0  ;;  %v13820_v28 = vmov 0 }
 0x17b   : > { %13814 = vst [vmem:[#allocation28_spill] sm:$0xff] %v13813_v17  ;;  %v342_v45 = vmul.f32 %v13816_v62, %v9308_v4  ;;  %v13818_v12 = vsel %vm9470_vm5, 4294967295, %v13817_v12  ;;  %v13821_v28 = vsel %vm9478_vm14, 4294967295, %v13820_v28  ;;  %vm13823_vm0 = vcmp.eq.s32.totalorder %v8916_v47, %v8547_v6  ;;  %v1700_v4 = vpop.f32.mrf.mxu0  ;;  %v1942_v6 = vpop.f32.mrf.mxu1  ;;  %v9544_v47 = vld [vmem:[%s7975_s6 + $0x88] sm:$0xff] }
 0x17c   : > { %13819 = vst [vmem:[#allocation29_spill] sm:$0xff] %v13818_v12  ;;  %13822 = vst [vmem:[#allocation30_spill] sm:$0xff] %v13821_v28  ;;  %v1250_v43 = vsel %vm13823_vm0, %v1216_v25, 0.0  ;;  %v1307_v20 = vrot.slane %v9438_v51, 6  ;;  %v1312_v39 = vrot.slane %v9443_v31, 6  ;;  %v1584_v11 = vsel %vm13492_vm10, %v1550_v32, 0.0 }
 0x17d   : > { %vm9490_vm4 = vcmp.ne.s32.totalorder %v350_v37, 0  ;;  %v13824_v57 = vmov 0  ;;  %v1266_v44 = vrot.slane %v1265_v49, 4  ;;  %v1600_v16 = vrot.slane %v1599_v5, 4  ;;  %v9495_v25 = vld [vmem:[%s7975_s6 + $0x80] sm:$0xff] }
 0x17e   : > { %v13825_v57 = vsel %vm9490_vm4, 4294967295, %v13824_v57  ;;  %v1286_v40 = vadd.f32 %v1285_v42, %v1250_v43  ;;  %v1620_v62 = vadd.f32 %v1619_v61, %v1584_v11  ;;  %13827 = vst [vmem:[#allocation32_spill] sm:$0xff] %v9495_v25  ;;  %7365 = vmatmul.mubr.msk.f32.vlgmr.msra.gmra.mxu0 %vm429_vm6, %v9495_v25  ;;  %v9500_v31 = vrot.slane %v9278_v41, 6  ;;  %v7696_v42 = vld [vmem:[%s7975_s6 + $0x100] sm:$0xff]  ;;  %v1944_v41 = vpop.f32.mrf.mxu1 }
 0x17f   : > { %13826 = vst [vmem:[#allocation31_spill] sm:$0xff] %v13825_v57  ;;  %vm13829_vm0 = vcmp.eq.s32.totalorder %v7941_v18, %v8946_v22  ;;  %7383 = vmatmul.mubr.msk.f32.vlgmr.msra.gmra.mxu1 %vm429_vm6, %v7696_v42  ;;  %7400 = vmatpush1.msk.msra.mxu0 %vm9470_vm5, %v13750_v9  ;;  %vm9514_vm1 = vcmp.eq.s32.totalorder %v7941_v18, %v4562_v59  ;;  %v1702_v42 = vpop.f32.mrf.mxu0  ;;  %v13833_v51 = vmov 0 }
 0x180   : > { %13828 = vst [vmem:[#allocation33_spill] sm:$0xff] %v9500_v31  ;;  %v1795_v37 = vsel %vm13829_vm0, %v1700_v4, 0.0  ;;  %vm13830_vm2 = vmmov %vm13829_vm0  ;;  %v1267_v4 = vadd.f32 %v1266_v44, %v1265_v49  ;;  %v1601_v43 = vadd.f32 %v1600_v16, %v1599_v5  ;;  %v1287_v11 = vrot.slane %v1286_v40, 4  ;;  %7418 = vmatpush1.msk.msra.mxu1 %vm9470_vm5, %v13750_v9  ;;  %3318 = vmatprep.mubr.f32.mxu0 %v13792_v36  ;;  %v1948_v25 = vpop.f32.mrf.mxu1 }
 0x181   : > { %v2037_v32 = vsel %vm13830_vm2, %v1942_v6, 0.0  ;;  %vm334_vm0 = vmand %vm9478_vm14, %vm9418_vm3  ;;  %v1621_v6 = vrot.slane %v1620_v62, 4  ;;  %v9527_v59 = vmul.f32 %v9385_v0, %v342_v45  ;;  %vm9529_vm2 = vcmp.ne.s32.totalorder %v1307_v20, 0  ;;  %3560 = vmatprep.mubr.f32.mxu1 %v13792_v36  ;;  %7435 = vmatprep.subr.msk.mxu0 %vm8983_vm8, %v13750_v9  ;;  %v1706_v12 = vpop.f32.mrf.mxu0 }
 0x182   : > { %v13834_v51 = vsel %vm9529_vm2, 4294967295, %v13833_v51  ;;  %vm13836_vm10 = vcmp.eq.s32.totalorder %v7941_v18, %v8955_v53  ;;  %v1268_v44 = vrot.slane %v1267_v4, 2  ;;  %v1602_v16 = vrot.slane %v1601_v43, 2  ;;  %7366 = vmatmul.mubr.msk.f32.gmra.mxu0 %vm429_vm6, %v9544_v47  ;;  %7453 = vmatprep.subr.msk.mxu1 %vm9514_vm1, %v13750_v9  ;;  %vm9558_vm8 = vmand %vm334_vm0, %vm9445_vm13  ;;  %v1950_v2 = vpop.f32.mrf.mxu1 }
 0x183   : > { %13835 = vst [vmem:[#allocation34_spill] sm:$0xff] %v13834_v51  ;;  %v1796_v5 = vsel %vm13836_vm10, %v1702_v42, 0.0  ;;  %vm13837_vm9 = vmmov %vm13836_vm10  ;;  %v1288_v20 = vadd.f32 %v1287_v11, %v1286_v40  ;;  %v1622_v0 = vadd.f32 %v1621_v6, %v1620_v62  ;;  %v9567_v40 = vmul.f32 %v9500_v31, %v342_v45  ;;  %7384 = vmatmul.mubr.msk.f32.gmra.mxu1 %vm429_vm6, %v9022_v1  ;;  %v1708_v45 = vpop.f32.mrf.mxu0 }
 0x184   : > { %v2038_v49 = vsel %vm13837_vm9, %v1944_v41, 0.0  ;;  %vm9562_vm9 = vcmp.ne.s32.totalorder %v1312_v39, 0  ;;  %v13840_v41 = vmov 0  ;;  %v1797_v62 = vsel %vm1362_vm11, %v1706_v12, 0.0  ;;  %3324 = vmatprep.mubr.f32.mxu0 %v13792_v36  ;;  %3566 = vmatprep.mubr.f32.mxu1 %v13792_v36  ;;  %vm349_vm10 = vmand %vm9558_vm8, %vm9451_vm15 }
 0x185   : > { %v13841_v41 = vsel %vm9562_vm9, 4294967295, %v13840_v41  ;;  %v2039_v11 = vsel %vm1362_vm11, %v1948_v25, 0.0  ;;  %v1269_v39 = vadd.f32 %v1268_v44, %v1267_v4  ;;  %v1603_v6 = vadd.f32 %v1602_v16, %v1601_v43  ;;  %v1712_v28 = vpop.f32.mrf.mxu0  ;;  %vm9617_vm11 = vmand %vm349_vm10, %vm9490_vm4 }
 0x186   : > { %13842 = vst [vmem:[#allocation35_spill] sm:$0xff] %v13841_v41  ;;  %v1289_v42 = vrot.slane %v1288_v20, 2  ;;  %v1623_v35 = vrot.slane %v1622_v0, 2  ;;  %v1827_v31 = vadd.f32 %v1797_v62, %v1795_v37  ;;  %v2069_v12 = vadd.f32 %v2039_v11, %v2037_v32  ;;  %v1954_v37 = vpop.f32.mrf.mxu1  ;;  %v9590_v32 = vld [vmem:[%s7975_s6 + $0x90] sm:$0xff]  ;;  %v9957_v41 = vld [vmem:[%s7975_s6] sm:$0xff] }
 0x187   : > { %v1798_v25 = vsel %vm1363_vm7, %v1708_v45, 0.0  ;;  %v2040_v1 = vsel %vm1363_vm7, %v1950_v2, 0.0  ;;  %v1270_v4 = vrot.slane %v1269_v39, 1  ;;  %v1604_v43 = vrot.slane %v1603_v6, 1  ;;  %7367 = vmatmul.mubr.msk.f32.gmra.mxu0 %vm429_vm6, %v9590_v32  ;;  %vm1309_vm7 = vmand %vm9558_vm8, %vm9529_vm2  ;;  %7385 = vmatmul.mubr.msk.f32.gmra.mxu1 %vm429_vm6, %v9051_v27 }
 0x188   : > { %v1290_v44 = vadd.f32 %v1289_v42, %v1288_v20  ;;  %v1624_v16 = vadd.f32 %v1623_v35, %v1622_v0  ;;  %v1848_v2 = vadd.f32 %v1798_v25, %v1796_v5  ;;  %v2090_v62 = vadd.f32 %v2040_v1, %v2038_v49  ;;  %3330 = vmatprep.mubr.f32.mxu0 %v13792_v36  ;;  %v1714_v5 = vpop.f32.mrf.mxu0  ;;  %v1956_v49 = vpop.f32.mrf.mxu1  ;;  %vm9636_vm10 = vmand %vm1309_vm7, %vm9562_vm9 }
 0x189   : > { %v1799_v11 = vsel %vm1364_vm12, %v1712_v28, 0.0  ;;  %v2041_v0 = vsel %vm1364_vm12, %v1954_v37, 0.0  ;;  %v9607_v35 = vadd.f32 %v1270_v4, %v1269_v39  ;;  %v1605_v20 = vadd.f32 %v1604_v43, %v1603_v6  ;;  %3572 = vmatprep.mubr.f32.mxu1 %v13792_v36 }
 0x18a   : > { %v1291_v42 = vrot.slane %v1290_v44, 1  ;;  %v1625_v45 = vrot.slane %v1624_v16, 1  ;;  %v1828_v28 = vadd.f32 %v1827_v31, %v1799_v11  ;;  %v2070_v39 = vadd.f32 %v2069_v12, %v2041_v0  ;;  %v1718_v37 = vpop.f32.mrf.mxu0  ;;  %v1960_v11 = vpop.f32.mrf.mxu1  ;;  %v9641_v0 = vld [vmem:[%s7975_s6 + $0x98] sm:$0xff] }
 0x18b   : > { %vm13845_vm12 = vcmp.eq.s32.totalorder %v8562_v38, %v8955_v53  ;;  %7368 = vmatmul.mubr.msk.f32.gmra.mxu0 %vm429_vm6, %v9641_v0  ;;  %vm13850_vm8 = vcmp.eq.s32.totalorder %v8595_v7, %v8946_v22  ;;  %7386 = vmatmul.mubr.msk.f32.gmra.mxu1 %vm429_vm6, %v9080_v19  ;;  %v9668_v19 = vsel %vm9636_vm10, %v9567_v40, 0.0 }
 0x18c   : > { %v1800_v6 = vsel %vm13845_vm12, %v1714_v5, 0.0  ;;  %vm13846_vm0 = vmmov %vm13845_vm12  ;;  %v9627_v1 = vadd.f32 %v1291_v42, %v1290_v44  ;;  %v1626_v12 = vadd.f32 %v1625_v45, %v1624_v16  ;;  %v716_v44 = vrot.slane %v13849_v15, 6  ;;  %3336 = vmatprep.mubr.f32.mxu0 %v13792_v36  ;;  %v1720_v45 = vpop.f32.mrf.mxu0  ;;  %v1962_v5 = vpop.f32.mrf.mxu1  ;;  %3578 = vmatprep.mubr.f32.mxu1 %v13792_v36 }
 0x18d   : > { %v2042_v25 = vsel %vm13846_vm0, %v1956_v49, 0.0  ;;  %v1849_v4 = vadd.f32 %v1848_v2, %v1800_v6  ;;  %v1801_v42 = vsel %vm13850_vm8, %v1718_v37, 0.0  ;;  %vm13851_vm7 = vmmov %vm13850_vm8  ;;  %v9663_v49 = vsel %vm9617_vm11, %v9527_v59, 0.0  ;;  %v9677_v59 = vld [vmem:[%s7975_s6 + $0xa0] sm:$0xff] }
 0x18e   : > { %v2091_v43 = vadd.f32 %v2090_v62, %v2042_v25  ;;  %v2043_v16 = vsel %vm13851_vm7, %v1960_v11, 0.0  ;;  %v1629_v62 = vcombine.low %v1605_v20, %v1626_v12  ;;  %v1829_v26 = vadd.f32 %v1828_v28, %v1801_v42  ;;  %v1724_v12 = vpop.f32.mrf.mxu0  ;;  %v1966_v27 = vpop.f32.mrf.mxu1 }
 0x18f   : > { %v2071_v29 = vadd.f32 %v2070_v39, %v2043_v16  ;;  %vm13852_vm12 = vcmp.eq.s32.totalorder %v8595_v7, %v8955_v53  ;;  %7369 = vmatmul.mubr.msk.f32.gmra.mxu0 %vm429_vm6, %v9677_v59  ;;  %vm13854_vm11 = vcmp.eq.s32.totalorder %v8626_v46, %v8946_v22  ;;  %7387 = vmatmul.mubr.msk.f32.gmra.mxu1 %vm429_vm6, %v9107_v55 }
 0x190   : > { %v1802_v20 = vsel %vm13852_vm12, %v1720_v45, 0.0  ;;  %vm13853_vm0 = vmmov %vm13852_vm12  ;;  %v1630_v39 = vrot.slane %v1629_v62, 6  ;;  %v1803_v40 = vsel %vm13854_vm11, %v1724_v12, 0.0  ;;  %3342 = vmatprep.mubr.f32.mxu0 %v13792_v36  ;;  %v1726_v15 = vpop.f32.mrf.mxu0  ;;  %v1968_v42 = vpop.f32.mrf.mxu1  ;;  %3584 = vmatprep.mubr.f32.mxu1 %v13792_v36  ;;  %vm13856_vm8 = vcmp.eq.s32.totalorder %v8626_v46, %v8955_v53 }
 0x191   : > { %v2044_v28 = vsel %vm13853_vm0, %v1962_v5, 0.0  ;;  %v1850_v6 = vadd.f32 %v1849_v4, %v1802_v20  ;;  %vm13855_vm10 = vmmov %vm13854_vm11  ;;  %v718_v4 = vmul.f32 %v716_v44, %v9663_v49  ;;  %v1830_v37 = vadd.f32 %v1829_v26, %v1803_v40  ;;  %v9702_v26 = vld [vmem:[%s7975_s6 + $0xa8] sm:$0xff] }
 0x192   : > { %v2092_v25 = vadd.f32 %v2091_v43, %v2044_v28  ;;  %v2045_v31 = vsel %vm13855_vm10, %v1966_v27, 0.0  ;;  %v1632_v43 = vmul.f32 %v1630_v39, %v9668_v19  ;;  %v1804_v16 = vsel %vm13856_vm8, %v1726_v15, 0.0  ;;  %vm13857_vm7 = vmmov %vm13856_vm8  ;;  %v1730_v5 = vpop.f32.mrf.mxu0  ;;  %v1972_v20 = vpop.f32.mrf.mxu1  ;;  %v9723_v15 = vld [vmem:[%s7975_s6 + $0xb0] sm:$0xff] }
 0x193   : > { %v2072_v11 = vadd.f32 %v2071_v29, %v2045_v31  ;;  %v2046_v55 = vsel %vm13857_vm7, %v1968_v42, 0.0  ;;  %v1851_v45 = vadd.f32 %v1850_v6, %v1804_v16  ;;  %7370 = vmatmul.mubr.msk.f32.gmra.mxu0 %vm429_vm6, %v9702_v26  ;;  %vm13859_vm12 = vcmp.eq.s32.totalorder %v8651_v48, %v8946_v22  ;;  %7388 = vmatmul.mubr.msk.f32.gmra.mxu1 %vm429_vm6, %v9132_v21 }
 0x194   : > { %v9699_v62 = vadd.f32 %v1632_v43, %v718_v4  ;;  %v2093_v44 = vadd.f32 %v2092_v25, %v2046_v55  ;;  %v1805_v29 = vsel %vm13859_vm12, %v1730_v5, 0.0  ;;  %vm13860_vm0 = vmmov %vm13859_vm12  ;;  %3348 = vmatprep.mubr.f32.mxu0 %v13792_v36  ;;  %v1732_v25 = vpop.f32.mrf.mxu0  ;;  %v1974_v12 = vpop.f32.mrf.mxu1  ;;  %3590 = vmatprep.mubr.f32.mxu1 %v13792_v36  ;;  %vm13861_vm11 = vcmp.eq.s32.totalorder %v8651_v48, %v8955_v53 }
 0x195   : > { %v2047_v28 = vsel %vm13860_vm0, %v1972_v20, 0.0  ;;  %v1831_v39 = vadd.f32 %v1830_v37, %v1805_v29  ;;  %v1806_v27 = vsel %vm13861_vm11, %v1732_v25, 0.0  ;;  %vm13862_vm10 = vmmov %vm13861_vm11  ;;  %vm13863_vm8 = vcmp.eq.s32.totalorder %v8676_v50, %v8946_v22  ;;  %v9744_v25 = vld [vmem:[%s7975_s6 + $0xb8] sm:$0xff] }
 0x196   : > { %13858 = vst [vmem:[#allocation36_spill] sm:$0xff] %v9699_v62  ;;  %v2073_v6 = vadd.f32 %v2072_v11, %v2047_v28  ;;  %v2048_v40 = vsel %vm13862_vm10, %v1974_v12, 0.0  ;;  %v1852_v31 = vadd.f32 %v1851_v45, %v1806_v27  ;;  %v1736_v43 = vpop.f32.mrf.mxu0  ;;  %v1978_v21 = vpop.f32.mrf.mxu1  ;;  %vm13864_vm7 = vmmov %vm13863_vm8  ;;  %vm13865_vm12 = vcmp.eq.s32.totalorder %v8676_v50, %v8955_v53 }
 0x197   : > { %v2094_v4 = vadd.f32 %v2093_v44, %v2048_v40  ;;  %7371 = vmatmul.mubr.msk.f32.gmra.mxu0 %vm429_vm6, %v9723_v15  ;;  %v1807_v37 = vsel %vm13863_vm8, %v1736_v43, 0.0  ;;  %v2049_v11 = vsel %vm13864_vm7, %v1978_v21, 0.0  ;;  %7389 = vmatmul.mubr.msk.f32.gmra.mxu1 %vm429_vm6, %v9157_v10  ;;  %vm13866_vm0 = vmmov %vm13865_vm12  ;;  %vm13867_vm11 = vcmp.eq.s32.totalorder %v8701_v52, %v8946_v22 }
 0x198   : > { %3354 = vmatprep.mubr.f32.mxu0 %v13792_v36  ;;  %v1832_v42 = vadd.f32 %v1831_v39, %v1807_v37  ;;  %v2074_v16 = vadd.f32 %v2073_v6, %v2049_v11  ;;  %v1738_v55 = vpop.f32.mrf.mxu0  ;;  %v1980_v45 = vpop.f32.mrf.mxu1  ;;  %3596 = vmatprep.mubr.f32.mxu1 %v13792_v36  ;;  %vm13868_vm10 = vmmov %vm13867_vm11  ;;  %vm13869_vm8 = vcmp.eq.s32.totalorder %v8701_v52, %v8955_v53 }
 0x199   : > { %v1808_v44 = vsel %vm13865_vm12, %v1738_v55, 0.0  ;;  %v2050_v5 = vsel %vm13866_vm0, %v1980_v45, 0.0  ;;  %vm13870_vm7 = vmmov %vm13869_vm8  ;;  %v9765_v55 = vld [vmem:[%s7975_s6 + $0xc0] sm:$0xff]  ;;  %vm13871_vm12 = vcmp.eq.s32.totalorder %v8726_v54, %v8946_v22 }
 0x19a   : > { %v1853_v20 = vadd.f32 %v1852_v31, %v1808_v44  ;;  %v2095_v29 = vadd.f32 %v2094_v4, %v2050_v5  ;;  %v1742_v28 = vpop.f32.mrf.mxu0  ;;  %v1984_v10 = vpop.f32.mrf.mxu1  ;;  %vm13872_vm0 = vmmov %vm13871_vm12 }
 0x19b   : > { %7372 = vmatmul.mubr.msk.f32.gmra.mxu0 %vm429_vm6, %v9744_v25  ;;  %v1809_v39 = vsel %vm13867_vm11, %v1742_v28, 0.0  ;;  %v2051_v6 = vsel %vm13868_vm10, %v1984_v10, 0.0  ;;  %7390 = vmatmul.mubr.msk.f32.gmra.mxu1 %vm429_vm6, %v9182_v23  ;;  %vm13873_vm11 = vcmp.eq.s32.totalorder %v8726_v54, %v8955_v53 }
 0x19c   : > { %3360 = vmatprep.mubr.f32.mxu0 %v13792_v36  ;;  %v1833_v12 = vadd.f32 %v1832_v42, %v1809_v39  ;;  %v2075_v27 = vadd.f32 %v2074_v16, %v2051_v6  ;;  %v1744_v40 = vpop.f32.mrf.mxu0  ;;  %v1986_v31 = vpop.f32.mrf.mxu1  ;;  %3602 = vmatprep.mubr.f32.mxu1 %v13792_v36  ;;  %vm13874_vm10 = vmmov %vm13873_vm11 }
 0x19d   : > { %v1810_v4 = vsel %vm13869_vm8, %v1744_v40, 0.0  ;;  %v2052_v43 = vsel %vm13870_vm7, %v1986_v31, 0.0  ;;  %v9786_v40 = vld [vmem:[%s7975_s6 + $0xc8] sm:$0xff]  ;;  %vm13875_vm8 = vcmp.eq.s32.totalorder %v8751_v56, %v8946_v22 }
 0x19e   : > { %v1854_v21 = vadd.f32 %v1853_v20, %v1810_v4  ;;  %v2096_v37 = vadd.f32 %v2095_v29, %v2052_v43  ;;  %v1748_v11 = vpop.f32.mrf.mxu0  ;;  %v1990_v23 = vpop.f32.mrf.mxu1  ;;  %vm13876_vm7 = vmmov %vm13875_vm8 }
 0x19f   : > { %7373 = vmatmul.mubr.msk.f32.gmra.mxu0 %vm429_vm6, %v9765_v55  ;;  %v1811_v42 = vsel %vm13871_vm12, %v1748_v11, 0.0  ;;  %v2053_v16 = vsel %vm13872_vm0, %v1990_v23, 0.0  ;;  %7391 = vmatmul.mubr.msk.f32.gmra.mxu1 %vm429_vm6, %v9207_v14  ;;  %vm13877_vm12 = vcmp.eq.s32.totalorder %v8751_v56, %v8955_v53 }
 0x1a0   : > { %3366 = vmatprep.mubr.f32.mxu0 %v13792_v36  ;;  %v1834_v45 = vadd.f32 %v1833_v12, %v1811_v42  ;;  %v2076_v44 = vadd.f32 %v2075_v27, %v2053_v16  ;;  %v1750_v5 = vpop.f32.mrf.mxu0  ;;  %v1992_v20 = vpop.f32.mrf.mxu1  ;;  %3608 = vmatprep.mubr.f32.mxu1 %v13792_v36  ;;  %vm13878_vm0 = vmmov %vm13877_vm12 }
 0x1a1   : > { %v1812_v29 = vsel %vm13873_vm11, %v1750_v5, 0.0  ;;  %v2054_v28 = vsel %vm13874_vm10, %v1992_v20, 0.0  ;;  %v9807_v5 = vld [vmem:[%s7975_s6 + $0xd0] sm:$0xff]  ;;  %vm13879_vm11 = vcmp.eq.s32.totalorder %v8776_v58, %v8946_v22 }
 0x1a2   : > { %v1855_v10 = vadd.f32 %v1854_v21, %v1812_v29  ;;  %v2097_v39 = vadd.f32 %v2096_v37, %v2054_v28  ;;  %v1754_v6 = vpop.f32.mrf.mxu0  ;;  %v1996_v14 = vpop.f32.mrf.mxu1  ;;  %vm13880_vm10 = vmmov %vm13879_vm11 }
 0x1a3   : > { %7374 = vmatmul.mubr.msk.f32.gmra.mxu0 %vm429_vm6, %v9786_v40  ;;  %v1813_v12 = vsel %vm13875_vm8, %v1754_v6, 0.0  ;;  %v2055_v27 = vsel %vm13876_vm7, %v1996_v14, 0.0  ;;  %7392 = vmatmul.mubr.msk.f32.gmra.mxu1 %vm429_vm6, %v9232_v8  ;;  %vm13881_vm8 = vcmp.eq.s32.totalorder %v8776_v58, %v8955_v53 }
 0x1a4   : > { %3372 = vmatprep.mubr.f32.mxu0 %v13792_v36  ;;  %v1835_v31 = vadd.f32 %v1834_v45, %v1813_v12  ;;  %v2077_v4 = vadd.f32 %v2076_v44, %v2055_v27  ;;  %v1756_v43 = vpop.f32.mrf.mxu0  ;;  %v1998_v21 = vpop.f32.mrf.mxu1  ;;  %3614 = vmatprep.mubr.f32.mxu1 %v13792_v36  ;;  %vm13882_vm7 = vmmov %vm13881_vm8 }
 0x1a5   : > { %v1814_v37 = vsel %vm13877_vm12, %v1756_v43, 0.0  ;;  %v2056_v11 = vsel %vm13878_vm0, %v1998_v21, 0.0  ;;  %v9828_v43 = vld [vmem:[%s7975_s6 + $0xd8] sm:$0xff]  ;;  %vm13883_vm12 = vcmp.eq.s32.totalorder %v8802_v60, %v8946_v22 }
 0x1a6   : > { %v1856_v23 = vadd.f32 %v1855_v10, %v1814_v37  ;;  %v2098_v42 = vadd.f32 %v2097_v39, %v2056_v11  ;;  %v1760_v16 = vpop.f32.mrf.mxu0  ;;  %v2002_v8 = vpop.f32.mrf.mxu1  ;;  %vm13884_vm0 = vmmov %vm13883_vm12 }
 0x1a7   : > { %7375 = vmatmul.mubr.msk.f32.gmra.mxu0 %vm429_vm6, %v9807_v5  ;;  %v1815_v45 = vsel %vm13879_vm11, %v1760_v16, 0.0  ;;  %v2057_v44 = vsel %vm13880_vm10, %v2002_v8, 0.0  ;;  %7393 = vmatmul.mubr.msk.f32.gmra.mxu1 %vm429_vm6, %v9257_v33  ;;  %vm13885_vm11 = vcmp.eq.s32.totalorder %v8802_v60, %v8955_v53 }
 0x1a8   : > { %3378 = vmatprep.mubr.f32.mxu0 %v13792_v36  ;;  %v1836_v20 = vadd.f32 %v1835_v31, %v1815_v45  ;;  %v2078_v29 = vadd.f32 %v2077_v4, %v2057_v44  ;;  %v1762_v28 = vpop.f32.mrf.mxu0  ;;  %v2004_v10 = vpop.f32.mrf.mxu1  ;;  %3620 = vmatprep.mubr.f32.mxu1 %v13792_v36  ;;  %vm13886_vm10 = vmmov %vm13885_vm11 }
 0x1a9   : > { %v1816_v39 = vsel %vm13881_vm8, %v1762_v28, 0.0  ;;  %v2058_v6 = vsel %vm13882_vm7, %v2004_v10, 0.0  ;;  %v9849_v28 = vld [vmem:[%s7975_s6 + $0xe0] sm:$0xff]  ;;  %vm13887_vm8 = vcmp.eq.s32.totalorder %v8833_v63, %v8946_v22 }
 0x1aa   : > { %v1857_v14 = vadd.f32 %v1856_v23, %v1816_v39  ;;  %v2099_v12 = vadd.f32 %v2098_v42, %v2058_v6  ;;  %v1766_v27 = vpop.f32.mrf.mxu0  ;;  %v2008_v33 = vpop.f32.mrf.mxu1  ;;  %vm13888_vm7 = vmmov %vm13887_vm8 }
 0x1ab   : > { %7376 = vmatmul.mubr.msk.f32.gmra.mxu0 %vm429_vm6, %v9828_v43  ;;  %v1817_v31 = vsel %vm13883_vm12, %v1766_v27, 0.0  ;;  %v2059_v4 = vsel %vm13884_vm0, %v2008_v33, 0.0  ;;  %7394 = vmatmul.mubr.msk.f32.gmra.mxu1 %vm429_vm6, %v9287_v13  ;;  %vm13890_vm12 = vcmp.eq.s32.totalorder %v8833_v63, %v8955_v53 }
 0x1ac   : > { %3384 = vmatprep.mubr.f32.mxu0 %v13792_v36  ;;  %v1837_v21 = vadd.f32 %v1836_v20, %v1817_v31  ;;  %v2079_v37 = vadd.f32 %v2078_v29, %v2059_v4  ;;  %v1768_v11 = vpop.f32.mrf.mxu0  ;;  %v2010_v23 = vpop.f32.mrf.mxu1  ;;  %3626 = vmatprep.mubr.f32.mxu1 %v13792_v36  ;;  %vm13891_vm0 = vmmov %vm13890_vm12 }
 0x1ad   : > { %v1818_v42 = vsel %vm13885_vm11, %v1768_v11, 0.0  ;;  %v2060_v16 = vsel %vm13886_vm10, %v2010_v23, 0.0  ;;  %vm13892_vm11 = vcmp.eq.s32.totalorder %v8859_v3, %v8946_v22 }
 0x1ae   : > { %v1858_v8 = vadd.f32 %v1857_v14, %v1818_v42  ;;  %v2100_v45 = vadd.f32 %v2099_v12, %v2060_v16  ;;  %v1772_v44 = vpop.f32.mrf.mxu0  ;;  %v2014_v13 = vpop.f32.mrf.mxu1  ;;  %v13889_v12 = vld [vmem:[#allocation11_spill] sm:$0xff]  ;;  %vm13893_vm10 = vmmov %vm13892_vm11  ;;  %v13894_v16 = vld [vmem:[#allocation20_spill] sm:$0xff] }
 0x1af   : > { %7377 = vmatmul.mubr.msk.f32.gmra.mxu0 %vm429_vm6, %v9849_v28  ;;  %v1819_v20 = vsel %vm13887_vm8, %v1772_v44, 0.0  ;;  %v2061_v29 = vsel %vm13888_vm7, %v2014_v13, 0.0  ;;  %7395 = vmatmul.mubr.msk.f32.gmra.mxu1 %vm429_vm6, %v9322_v30  ;;  %v2136_v27 = vand.u32 127, %v13889_v12  ;;  %vm13896_vm8 = vcmp.eq.s32.totalorder %v8859_v3, %v8955_v53 }
 0x1b0   : > { %3390 = vmatprep.mubr.f32.mxu0 %v13792_v36  ;;  %v1838_v10 = vadd.f32 %v1837_v21, %v1819_v20  ;;  %v2080_v39 = vadd.f32 %v2079_v37, %v2061_v29  ;;  %v1774_v6 = vpop.f32.mrf.mxu0  ;;  %v2016_v14 = vpop.f32.mrf.mxu1  ;;  %3632 = vmatprep.mubr.f32.mxu1 %v13792_v36  ;;  %v9871_v21 = vld [vmem:[%s7975_s6 + $0xe8] sm:$0xff]  ;;  %v13895_v29 = vld [vmem:[#allocation10_spill] sm:$0xff]  ;;  %vm13897_vm7 = vmmov %vm13896_vm8 }
 0x1b1   : > { %v1820_v33 = vsel %vm13890_vm12, %v1774_v6, 0.0  ;;  %v2062_v31 = vsel %vm13891_vm0, %v2016_v14, 0.0  ;;  %v2160_v20 = vrot.slane %v2136_v27, %v7957_v24  ;;  %v2164_v6 = vrot.slane %v2136_v27, %v13895_v29  ;;  %v13900_v27 = vld [vmem:[#allocation16_spill] sm:$0xff] }
 0x1b2   : > { %v1859_v4 = vadd.f32 %v1858_v8, %v1820_v33  ;;  %v2101_v30 = vadd.f32 %v2100_v45, %v2062_v31  ;;  %v1778_v11 = vpop.f32.mrf.mxu0  ;;  %v2020_v23 = vpop.f32.mrf.mxu1  ;;  %v13898_v33 = vld [vmem:[#allocation19_spill] sm:$0xff]  ;;  %vm13901_vm12 = vcmp.eq.s32.totalorder %v13900_v27, %v8946_v22  ;;  %13916 = vst [vmem:[#allocation16_spill] sm:$0xff] %v9957_v41 }
 0x1b3   : > { %7378 = vmatmul.mubr.msk.f32.gmra.mxu0 %vm429_vm6, %v9871_v21  ;;  %v1821_v37 = vsel %vm13892_vm11, %v1778_v11, 0.0  ;;  %v2063_v42 = vsel %vm13893_vm10, %v2020_v23, 0.0  ;;  %7396 = vmatmul.mubr.msk.f32.gmra.mxu1 %vm429_vm6, %v13894_v16  ;;  %vm13902_vm0 = vmmov %vm13901_vm12  ;;  %vm13904_vm11 = vcmp.eq.s32.totalorder %v13900_v27, %v8955_v53 }
 0x1b4   : > { %3396 = vmatprep.mubr.f32.mxu0 %v13792_v36  ;;  %v1839_v8 = vadd.f32 %v1838_v10, %v1821_v37  ;;  %v2081_v45 = vadd.f32 %v2080_v39, %v2063_v42  ;;  %v1780_v44 = vpop.f32.mrf.mxu0  ;;  %v2022_v13 = vpop.f32.mrf.mxu1  ;;  %3638 = vmatprep.mubr.f32.mxu1 %v13792_v36  ;;  %v13899_v10 = vshra.s32 %v13898_v33, 7  ;;  %v9897_v42 = vld [vmem:[%s7975_s6 + $0xf0] sm:$0xff]  ;;  %vm13905_vm10 = vmmov %vm13904_vm11  ;;  %v9925_v33 = vld [vmem:[%s7975_s6 + $0xf8] sm:$0xff] }
 0x1b5   : > { %v1822_v14 = vsel %vm13896_vm8, %v1780_v44, 0.0  ;;  %v2064_v12 = vsel %vm13897_vm7, %v2022_v13, 0.0  ;;  %v13903_v13 = vld [vmem:[#allocation22_spill] sm:$0xff]  ;;  %13906 = vst [vmem:[#allocation11_spill] sm:$0xff] %v9925_v33 }
 0x1b6   : > { %v4550_v39 = vrot.slane %v13899_v10, %v7957_v24  ;;  %v1860_v31 = vadd.f32 %v1859_v4, %v1822_v14  ;;  %v2102_v11 = vadd.f32 %v2101_v30, %v2064_v12  ;;  %v1784_v23 = vpop.f32.mrf.mxu0  ;;  %v2026_v37 = vpop.f32.mrf.mxu1  ;;  %v9912_v10 = vrot.slane %v2160_v20, %v7957_v24  ;;  %v13907_v20 = vld [vmem:[#allocation12_spill] sm:$0xff] }
 0x1b7   : > { %7379 = vmatmul.mubr.msk.f32.gmra.mxu0 %vm429_vm6, %v9897_v42  ;;  %v1823_v16 = vsel %vm13901_vm12, %v1784_v23, 0.0  ;;  %v2065_v44 = vsel %vm13902_vm0, %v2026_v37, 0.0  ;;  %7397 = vmatmul.mubr.msk.f32.gmra.mxu1 %vm429_vm6, %v13903_v13  ;;  %v9915_v23 = vrot.slane %v2164_v6, %v7957_v24  ;;  %vm13908_vm8 = vcmp.eq.s32.totalorder %v13907_v20, %v8946_v22 }
 0x1b8   : > { %3402 = vmatprep.mubr.f32.mxu0 %v13792_v36  ;;  %v1840_v4 = vadd.f32 %v1839_v8, %v1823_v16  ;;  %v2082_v30 = vadd.f32 %v2081_v45, %v2065_v44  ;;  %v1786_v14 = vpop.f32.mrf.mxu0  ;;  %v2028_v12 = vpop.f32.mrf.mxu1  ;;  %3644 = vmatprep.mubr.f32.mxu1 %v13792_v36  ;;  %v4558_v8 = vrot.slane %v4550_v39, %v7957_v24  ;;  %vm13909_vm7 = vmmov %vm13908_vm8 }
 0x1b9   : > { %v1824_v37 = vsel %vm13904_vm11, %v1786_v14, 0.0  ;;  %v2066_v13 = vsel %vm13905_vm10, %v2028_v12, 0.0  ;;  %v13910_v12 = vld [vmem:[#allocation24_spill] sm:$0xff]  ;;  %vm13513_vm12 = vcmp.eq.s32.totalorder %v7941_v18, %v9912_v10  ;;  %vm13551_vm0 = vcmp.eq.s32.totalorder %v7941_v18, %v9915_v23 }
 0x1ba   : > { %v1861_v45 = vadd.f32 %v1860_v31, %v1824_v37  ;;  %v2103_v16 = vadd.f32 %v2102_v11, %v2066_v13  ;;  %v1790_v44 = vpop.f32.mrf.mxu0  ;;  %v2032_v2 = vpop.f32.mrf.mxu1  ;;  %vm13911_vm11 = vcmp.eq.s32.totalorder %v13907_v20, %v8955_v53  ;;  %v13917_v53 = vld [vmem:[#allocation32_spill] sm:$0xff] }
 0x1bb   : > { %7380 = vmatmul.mubr.msk.f32.gmra.mxu0 %vm429_vm6, %v9925_v33  ;;  %v1825_v6 = vsel %vm13908_vm8, %v1790_v44, 0.0  ;;  %v2067_v14 = vsel %vm13909_vm7, %v2032_v2, 0.0  ;;  %7398 = vmatmul.mubr.msk.f32.gmra.mxu1 %vm429_vm6, %v13910_v12  ;;  %vm13912_vm10 = vmmov %vm13911_vm11  ;;  %vm9950_vm8 = vcmp.eq.s32.totalorder %v7941_v18, %v4558_v8  ;;  %v13920_v8 = vld [vmem:[#allocation18_spill] sm:$0xff]  ;;  %v10026_v33 = vld [vmem:[%s7975_s6 + $0x10] sm:$0xff] }
 0x1bc   : > { %3878 = vmatprep.mubr.f32.mxu0 %v13792_v36  ;;  %v1841_v39 = vadd.f32 %v1840_v4, %v1825_v6  ;;  %v2083_v31 = vadd.f32 %v2082_v30, %v2067_v14  ;;  %v1792_v11 = vpop.f32.mrf.mxu0  ;;  %v2034_v37 = vpop.f32.mrf.mxu1  ;;  %4120 = vmatprep.mubr.f32.mxu1 %v13792_v36  ;;  %v13913_v4 = vmov 0 }
 0x1bd   : > { %v1826_v22 = vsel %vm13911_vm11, %v1792_v11, 0.0  ;;  %v2068_v2 = vsel %vm13912_vm10, %v2034_v37, 0.0  ;;  %v13914_v4 = vsel %vm9950_vm8, 4294967295, %v13913_v4  ;;  %vm13547_vm11 = vcmp.eq.s32.totalorder %v8540_v34, %v9915_v23 }
 0x1be   : > { %13915 = vst [vmem:[#allocation20_spill] sm:$0xff] %v13914_v4  ;;  %v1842_v30 = vrot.slane %v1841_v39, 4  ;;  %v2084_v13 = vrot.slane %v2083_v31, 4  ;;  %v1862_v44 = vadd.f32 %v1861_v45, %v1826_v22  ;;  %v2104_v6 = vadd.f32 %v2103_v16, %v2068_v2  ;;  %v2271_v14 = vpop.f32.mrf.mxu0  ;;  %v2513_v12 = vpop.f32.mrf.mxu1 }
 0x1bf   : > { %7401 = vmatmul.mubr.msk.f32.vlgmr.msra.gmra.mxu0 %vm429_vm6, %v9957_v41  ;;  %7419 = vmatmul.mubr.msk.f32.vlgmr.msra.gmra.mxu1 %vm429_vm6, %v13917_v53  ;;  %vm13545_vm10 = vcmp.eq.s32.totalorder %v8562_v38, %v9912_v10  ;;  %v13919_v53 = vld [vmem:[#allocation17_spill] sm:$0xff] }
 0x1c0   : > { %7436 = vmatpush1.msk.msra.mxu0 %vm9470_vm5, %v13750_v9  ;;  %v1843_v45 = vadd.f32 %v1842_v30, %v1841_v39  ;;  %v2085_v16 = vadd.f32 %v2084_v13, %v2083_v31  ;;  %v1863_v11 = vrot.slane %v1862_v44, 4  ;;  %v2105_v37 = vrot.slane %v2104_v6, 4  ;;  %7454 = vmatpush1.msk.msra.mxu1 %vm9950_vm8, %v13750_v9  ;;  %v2273_v22 = vpop.f32.mrf.mxu0  ;;  %v2515_v2 = vpop.f32.mrf.mxu1 }
 0x1c1   : > { %3884 = vmatprep.mubr.f32.mxu0 %v13792_v36  ;;  %v13921_v51 = vcombine.low %v13919_v53, %v13920_v8  ;;  %v2366_v39 = vsel %vm13513_vm12, %v2271_v14, 0.0  ;;  %v2608_v31 = vsel %vm13513_vm12, %v2513_v12, 0.0  ;;  %4126 = vmatprep.mubr.f32.mxu1 %v13792_v36  ;;  %v9994_v14 = vld [vmem:[%s7975_s6 + $0x8] sm:$0xff]  ;;  %vm13543_vm12 = vcmp.eq.s32.totalorder %v8595_v7, %v9915_v23 }
 0x1c2   : > { %7471 = vmatprep.subr.msk.mxu0 %vm9514_vm1, %v13750_v9  ;;  %v1844_v30 = vrot.slane %v1843_v45, 2  ;;  %v1864_v13 = vadd.f32 %v1863_v11, %v1862_v44  ;;  %v2106_v53 = vadd.f32 %v2105_v37, %v2104_v6  ;;  %v2277_v8 = vpop.f32.mrf.mxu0  ;;  %v2519_v57 = vpop.f32.mrf.mxu1  ;;  %13922 = vst [vmem:[#allocation22_spill] sm:$0xff] %v9994_v14  ;;  %7489 = vmatprep.subr.msk.mxu1 %vm9514_vm1, %v13750_v9  ;;  %v2367_v12 = vsel %vm13551_vm0, %v2273_v22, 0.0 }
 0x1c3   : > { %v9979_v62 = vrot.slane %v13921_v51, 6  ;;  %v2086_v51 = vrot.slane %v2085_v16, 2  ;;  %7402 = vmatmul.mubr.msk.f32.gmra.mxu0 %vm429_vm6, %v9994_v14  ;;  %v2609_v44 = vsel %vm13551_vm0, %v2515_v2, 0.0  ;;  %vm13923_vm5 = vcmp.eq.s32.totalorder %v8540_v34, %v9912_v10  ;;  %7420 = vmatmul.mubr.msk.f32.gmra.mxu1 %vm429_vm6, %v9544_v47 }
 0x1c4   : > { %v2368_v6 = vsel %vm13923_vm5, %v2277_v8, 0.0  ;;  %vm13924_vm7 = vmmov %vm13923_vm5  ;;  %3890 = vmatprep.mubr.f32.mxu0 %v13792_v36  ;;  %v1845_v61 = vadd.f32 %v1844_v30, %v1843_v45  ;;  %v1865_v22 = vrot.slane %v1864_v13, 2  ;;  %v2107_v17 = vrot.slane %v2106_v53, 2  ;;  %v2279_v14 = vpop.f32.mrf.mxu0  ;;  %v2521_v2 = vpop.f32.mrf.mxu1  ;;  %4132 = vmatprep.mubr.f32.mxu1 %v13792_v36 }
 0x1c5   : > { %v2610_v11 = vsel %vm13924_vm7, %v2519_v57, 0.0  ;;  %v2087_v37 = vadd.f32 %v2086_v51, %v2085_v16  ;;  %v2398_v4 = vadd.f32 %v2368_v6, %v2366_v39  ;;  %v2369_v57 = vsel %vm13547_vm11, %v2279_v14, 0.0 }
 0x1c6   : > { %v2640_v8 = vadd.f32 %v2610_v11, %v2608_v31  ;;  %v2611_v47 = vsel %vm13547_vm11, %v2521_v2, 0.0  ;;  %v1846_v9 = vrot.slane %v1845_v61, 1  ;;  %v1866_v16 = vadd.f32 %v1865_v22, %v1864_v13  ;;  %v2283_v51 = vpop.f32.mrf.mxu0  ;;  %v2525_v41 = vpop.f32.mrf.mxu1 }
 0x1c7   : > { %v2088_v45 = vrot.slane %v2087_v37, 1  ;;  %v2108_v30 = vadd.f32 %v2107_v17, %v2106_v53  ;;  %7403 = vmatmul.mubr.msk.f32.gmra.mxu0 %vm429_vm6, %v10026_v33  ;;  %v2419_v39 = vadd.f32 %v2369_v57, %v2367_v12  ;;  %v2661_v31 = vadd.f32 %v2611_v47, %v2609_v44  ;;  %7421 = vmatmul.mubr.msk.f32.gmra.mxu1 %vm429_vm6, %v9590_v32 }
 0x1c8   : > { %v2370_v14 = vsel %vm13545_vm10, %v2283_v51, 0.0  ;;  %v2612_v6 = vsel %vm13545_vm10, %v2525_v41, 0.0  ;;  %3896 = vmatprep.mubr.f32.mxu0 %v13792_v36  ;;  %v1847_v17 = vadd.f32 %v1846_v9, %v1845_v61  ;;  %v1867_v53 = vrot.slane %v1866_v16, 1  ;;  %v2285_v12 = vpop.f32.mrf.mxu0  ;;  %v2527_v44 = vpop.f32.mrf.mxu1  ;;  %4138 = vmatprep.mubr.f32.mxu1 %v13792_v36  ;;  %v10047_v51 = vld [vmem:[%s7975_s6 + $0x18] sm:$0xff] }
 0x1c9   : > { %v2089_v13 = vadd.f32 %v2088_v45, %v2087_v37  ;;  %v2109_v11 = vrot.slane %v2108_v30, 1  ;;  %v2399_v22 = vadd.f32 %v2398_v4, %v2370_v14  ;;  %v2641_v2 = vadd.f32 %v2640_v8, %v2612_v6 }
 0x1ca   : > { %vm13925_vm1 = vcmp.eq.s32.totalorder %v8562_v38, %v9915_v23  ;;  %v1868_v57 = vadd.f32 %v1867_v53, %v1866_v16  ;;  %v2289_v47 = vpop.f32.mrf.mxu0  ;;  %v2531_v45 = vpop.f32.mrf.mxu1  ;;  %v13927_v4 = vcombine.low %v9607_v35, %v9627_v1  ;;  %vm13928_vm5 = vcmp.eq.s32.totalorder %v8595_v7, %v9912_v10 }
 0x1cb   : > { %v2371_v41 = vsel %vm13925_vm1, %v2285_v12, 0.0  ;;  %vm13926_vm7 = vmmov %vm13925_vm1  ;;  %v2110_v9 = vadd.f32 %v2109_v11, %v2108_v30  ;;  %7404 = vmatmul.mubr.msk.f32.gmra.mxu0 %vm429_vm6, %v10047_v51  ;;  %v2372_v14 = vsel %vm13928_vm5, %v2289_v47, 0.0  ;;  %7422 = vmatmul.mubr.msk.f32.gmra.mxu1 %vm429_vm6, %v9641_v0  ;;  %v1008_v53 = vmul.f32 %v9979_v62, %v9663_v49 }
 0x1cc   : > { %v2613_v32 = vsel %vm13926_vm7, %v2527_v44, 0.0  ;;  %v2420_v61 = vadd.f32 %v2419_v39, %v2371_v41  ;;  %v1296_v8 = vrot.slane %v13927_v4, 6  ;;  %vm13929_vm1 = vmmov %vm13928_vm5  ;;  %3902 = vmatprep.mubr.f32.mxu0 %v13792_v36  ;;  %vm13522_vm7 = vcmp.eq.s32.totalorder %v8626_v46, %v9912_v10  ;;  %v2533_v6 = vpop.f32.mrf.mxu1  ;;  %4144 = vmatprep.mubr.f32.mxu1 %v13792_v36  ;;  %v10077_v41 = vld [vmem:[%s7975_s6 + $0x20] sm:$0xff] }
 0x1cd   : > { %v2662_v37 = vadd.f32 %v2661_v31, %v2613_v32  ;;  %v2614_v16 = vsel %vm13929_vm1, %v2531_v45, 0.0  ;;  %v1871_v30 = vcombine.low %v1847_v17, %v1868_v57  ;;  %v2113_v39 = vcombine.low %v2089_v13, %v2110_v9  ;;  %v2291_v31 = vpop.f32.mrf.mxu0 }
 0x1ce   : > { %v2400_v35 = vadd.f32 %v2399_v22, %v2372_v14  ;;  %v2642_v1 = vadd.f32 %v2641_v2, %v2614_v16  ;;  %v2373_v0 = vsel %vm13543_vm12, %v2291_v31, 0.0  ;;  %v2615_v11 = vsel %vm13543_vm12, %v2533_v6, 0.0  ;;  %v2537_v2 = vpop.f32.mrf.mxu1 }
 0x1cf   : > { %vm13523_vm5 = vcmp.eq.s32.totalorder %v8626_v46, %v9915_v23  ;;  %v1872_v17 = vrot.slane %v1871_v30, 6  ;;  %v2114_v13 = vrot.slane %v2113_v39, 6  ;;  %v2421_v12 = vadd.f32 %v2420_v61, %v2373_v0  ;;  %v2295_v22 = vpop.f32.mrf.mxu0  ;;  %7405 = vmatmul.mubr.msk.f32.gmra.mxu0 %vm429_vm6, %v10077_v41  ;;  %7423 = vmatmul.mubr.msk.f32.gmra.mxu1 %vm429_vm6, %v9677_v59 }
 0x1d0   : > { %v2663_v44 = vadd.f32 %v2662_v37, %v2615_v11  ;;  %v1298_v62 = vmul.f32 %v1296_v8, %v9663_v49  ;;  %v2374_v32 = vsel %vm13522_vm7, %v2295_v22, 0.0  ;;  %v2616_v57 = vsel %vm13522_vm7, %v2537_v2, 0.0  ;;  %3908 = vmatprep.mubr.f32.mxu0 %v13792_v36  ;;  %v2539_v45 = vpop.f32.mrf.mxu1  ;;  %4150 = vmatprep.mubr.f32.mxu1 %v13792_v36  ;;  %v10132_v2 = vld [vmem:[%s7975_s6 + $0x30] sm:$0xff] }
 0x1d1   : > { %vm13524_vm1 = vcmp.eq.s32.totalorder %v8651_v48, %v9912_v10  ;;  %v1874_v9 = vmul.f32 %v1872_v17, %v9668_v19  ;;  %v2116_v49 = vmul.f32 %v2114_v13, %v9668_v19  ;;  %v2401_v61 = vadd.f32 %v2400_v35, %v2374_v32  ;;  %v2297_v47 = vpop.f32.mrf.mxu0  ;;  %v10109_v35 = vld [vmem:[%s7975_s6 + $0x28] sm:$0xff] }
 0x1d2   : > { %v2643_v37 = vadd.f32 %v2642_v1, %v2616_v57  ;;  %v2375_v59 = vsel %vm13523_vm5, %v2297_v47, 0.0  ;;  %v2617_v4 = vsel %vm13523_vm5, %v2539_v45, 0.0  ;;  %vm13525_vm7 = vcmp.eq.s32.totalorder %v8651_v48, %v9915_v23  ;;  %v2543_v39 = vpop.f32.mrf.mxu1 }
 0x1d3   : > { %v10104_v8 = vadd.f32 %v1874_v9, %v1008_v53  ;;  %v10106_v19 = vadd.f32 %v2116_v49, %v1298_v62  ;;  %v2422_v14 = vadd.f32 %v2421_v12, %v2375_v59  ;;  %v2664_v16 = vadd.f32 %v2663_v44, %v2617_v4  ;;  %v2301_v30 = vpop.f32.mrf.mxu0  ;;  %7406 = vmatmul.mubr.msk.f32.gmra.mxu0 %vm429_vm6, %v10109_v35 }
 0x1d4   : > { %v2376_v1 = vsel %vm13524_vm1, %v2301_v30, 0.0  ;;  %v2618_v31 = vsel %vm13524_vm1, %v2543_v39, 0.0  ;;  %7424 = vmatmul.mubr.msk.f32.gmra.mxu1 %vm429_vm6, %v9702_v26  ;;  %3914 = vmatprep.mubr.f32.mxu0 %v13792_v36  ;;  %v2545_v11 = vpop.f32.mrf.mxu1  ;;  %vm13526_vm5 = vcmp.eq.s32.totalorder %v8676_v50, %v9912_v10  ;;  %vm13527_vm1 = vcmp.eq.s32.totalorder %v8676_v50, %v9915_v23 }
 0x1d5   : > { %13930 = vst [vmem:[#allocation24_spill] sm:$0xff] %v10106_v19  ;;  %v2402_v6 = vadd.f32 %v2401_v61, %v2376_v1  ;;  %v2644_v53 = vadd.f32 %v2643_v37, %v2618_v31  ;;  %v2303_v0 = vpop.f32.mrf.mxu0  ;;  %4156 = vmatprep.mubr.f32.mxu1 %v13792_v36  ;;  %v2619_v13 = vsel %vm13525_vm7, %v2545_v11, 0.0  ;;  %vm13961_vm0 = vcmp.eq.s32.totalorder %v7941_v18, %v9915_v23 }
 0x1d6   : > { %v2377_v17 = vsel %vm13525_vm7, %v2303_v0, 0.0  ;;  %v2665_v12 = vadd.f32 %v2664_v16, %v2619_v13  ;;  %v2549_v22 = vpop.f32.mrf.mxu1  ;;  %vm13528_vm7 = vcmp.eq.s32.totalorder %v8701_v52, %v9912_v10 }
 0x1d7   : > { %v2423_v26 = vadd.f32 %v2422_v14, %v2377_v17  ;;  %v2307_v44 = vpop.f32.mrf.mxu0  ;;  %7407 = vmatmul.mubr.msk.f32.gmra.mxu0 %vm429_vm6, %v10132_v2  ;;  %v2620_v32 = vsel %vm13526_vm5, %v2549_v22, 0.0  ;;  %v10157_v14 = vld [vmem:[%s7975_s6 + $0x38] sm:$0xff] }
 0x1d8   : > { %v2378_v62 = vsel %vm13526_vm5, %v2307_v44, 0.0  ;;  %7425 = vmatmul.mubr.msk.f32.gmra.mxu1 %vm429_vm6, %v9723_v15  ;;  %3920 = vmatprep.mubr.f32.mxu0 %v13792_v36  ;;  %v2645_v9 = vadd.f32 %v2644_v53, %v2620_v32  ;;  %v2551_v61 = vpop.f32.mrf.mxu1  ;;  %vm13529_vm5 = vcmp.eq.s32.totalorder %v8701_v52, %v9915_v23 }
 0x1d9   : > { %v2403_v57 = vadd.f32 %v2402_v6, %v2378_v62  ;;  %v2309_v49 = vpop.f32.mrf.mxu0  ;;  %4162 = vmatprep.mubr.f32.mxu1 %v13792_v36  ;;  %v2621_v47 = vsel %vm13527_vm1, %v2551_v61, 0.0 }
 0x1da   : > { %v2379_v37 = vsel %vm13527_vm1, %v2309_v49, 0.0  ;;  %v2666_v45 = vadd.f32 %v2665_v12, %v2621_v47  ;;  %v2555_v4 = vpop.f32.mrf.mxu1  ;;  %vm13530_vm1 = vcmp.eq.s32.totalorder %v8726_v54, %v9912_v10 }
 0x1db   : > { %v2424_v15 = vadd.f32 %v2423_v26, %v2379_v37  ;;  %v2313_v59 = vpop.f32.mrf.mxu0  ;;  %7408 = vmatmul.mubr.msk.f32.gmra.mxu0 %vm429_vm6, %v10157_v14  ;;  %v2622_v30 = vsel %vm13528_vm7, %v2555_v4, 0.0  ;;  %v10182_v26 = vld [vmem:[%s7975_s6 + $0x40] sm:$0xff] }
 0x1dc   : > { %v2380_v16 = vsel %vm13528_vm7, %v2313_v59, 0.0  ;;  %7426 = vmatmul.mubr.msk.f32.gmra.mxu1 %vm429_vm6, %v9744_v25  ;;  %3926 = vmatprep.mubr.f32.mxu0 %v13792_v36  ;;  %v2646_v1 = vadd.f32 %v2645_v9, %v2622_v30  ;;  %v2557_v6 = vpop.f32.mrf.mxu1  ;;  %vm13531_vm7 = vcmp.eq.s32.totalorder %v8726_v54, %v9915_v23 }
 0x1dd   : > { %v2404_v39 = vadd.f32 %v2403_v57, %v2380_v16  ;;  %v2315_v31 = vpop.f32.mrf.mxu0  ;;  %4168 = vmatprep.mubr.f32.mxu1 %v13792_v36  ;;  %v2623_v0 = vsel %vm13529_vm5, %v2557_v6, 0.0 }
 0x1de   : > { %v2381_v53 = vsel %vm13529_vm5, %v2315_v31, 0.0  ;;  %v2667_v11 = vadd.f32 %v2666_v45, %v2623_v0  ;;  %v2561_v13 = vpop.f32.mrf.mxu1  ;;  %vm13532_vm5 = vcmp.eq.s32.totalorder %v8751_v56, %v9912_v10 }
 0x1df   : > { %v2425_v25 = vadd.f32 %v2424_v15, %v2381_v53  ;;  %v2319_v17 = vpop.f32.mrf.mxu0  ;;  %7409 = vmatmul.mubr.msk.f32.gmra.mxu0 %vm429_vm6, %v10182_v26  ;;  %v2624_v44 = vsel %vm13530_vm1, %v2561_v13, 0.0  ;;  %v10207_v15 = vld [vmem:[%s7975_s6 + $0x48] sm:$0xff] }
 0x1e0   : > { %v2382_v12 = vsel %vm13530_vm1, %v2319_v17, 0.0  ;;  %7427 = vmatmul.mubr.msk.f32.gmra.mxu1 %vm429_vm6, %v9765_v55  ;;  %3932 = vmatprep.mubr.f32.mxu0 %v13792_v36  ;;  %v2647_v62 = vadd.f32 %v2646_v1, %v2624_v44  ;;  %v2563_v57 = vpop.f32.mrf.mxu1  ;;  %vm13533_vm1 = vcmp.eq.s32.totalorder %v8751_v56, %v9915_v23 }
 0x1e1   : > { %v2405_v22 = vadd.f32 %v2404_v39, %v2382_v12  ;;  %v2321_v32 = vpop.f32.mrf.mxu0  ;;  %4174 = vmatprep.mubr.f32.mxu1 %v13792_v36  ;;  %v2625_v49 = vsel %vm13531_vm7, %v2563_v57, 0.0  ;;  %v10238_v12 = vld [vmem:[%s7975_s6 + $0x50] sm:$0xff] }
 0x1e2   : > { %v2383_v9 = vsel %vm13531_vm7, %v2321_v32, 0.0  ;;  %v2668_v61 = vadd.f32 %v2667_v11, %v2625_v49  ;;  %v2567_v47 = vpop.f32.mrf.mxu1  ;;  %vm13534_vm7 = vcmp.eq.s32.totalorder %v8776_v58, %v9912_v10 }
 0x1e3   : > { %v2426_v55 = vadd.f32 %v2425_v25, %v2383_v9  ;;  %v2325_v37 = vpop.f32.mrf.mxu0  ;;  %7410 = vmatmul.mubr.msk.f32.gmra.mxu0 %vm429_vm6, %v10207_v15  ;;  %v2626_v59 = vsel %vm13532_vm5, %v2567_v47, 0.0 }
 0x1e4   : > { %v2384_v45 = vsel %vm13532_vm5, %v2325_v37, 0.0  ;;  %7428 = vmatmul.mubr.msk.f32.gmra.mxu1 %vm429_vm6, %v9786_v40  ;;  %3938 = vmatprep.mubr.f32.mxu0 %v13792_v36  ;;  %v2648_v16 = vadd.f32 %v2647_v62, %v2626_v59  ;;  %v2569_v39 = vpop.f32.mrf.mxu1  ;;  %v13931_v40 = vld [vmem:[#allocation5_spill] sm:$0xff]  ;;  %vm13535_vm5 = vcmp.eq.s32.totalorder %v8776_v58, %v9915_v23 }
 0x1e5   : > { %v2406_v4 = vadd.f32 %v2405_v22, %v2384_v45  ;;  %v2327_v30 = vpop.f32.mrf.mxu0  ;;  %4180 = vmatprep.mubr.f32.mxu1 %v13792_v36  ;;  %v2627_v31 = vsel %vm13533_vm1, %v2569_v39, 0.0  ;;  %v13932_v6 = vrot.slane %v13931_v40, 7  ;;  %v13933_v53 = vmul.u32 8, %v13931_v40  ;;  %v10264_v59 = vld [vmem:[%s7975_s6 + $0x58] sm:$0xff] }
 0x1e6   : > { %v2385_v1 = vsel %vm13533_vm1, %v2327_v30, 0.0  ;;  %v2669_v11 = vadd.f32 %v2668_v61, %v2627_v31  ;;  %v2573_v13 = vpop.f32.mrf.mxu1  ;;  %vm13536_vm1 = vcmp.eq.s32.totalorder %v8802_v60, %v9912_v10 }
 0x1e7   : > { %v10235_v0 = vadd.s32 %v13933_v53, %v13932_v6  ;;  %v2427_v25 = vadd.f32 %v2426_v55, %v2385_v1  ;;  %v2331_v17 = vpop.f32.mrf.mxu0  ;;  %7411 = vmatmul.mubr.msk.f32.gmra.mxu0 %vm429_vm6, %v10238_v12  ;;  %v2628_v22 = vsel %vm13534_vm7, %v2573_v13, 0.0  ;;  %v13934_v6 = vld [vmem:[#allocation7_spill] sm:$0xff] }
 0x1e8   : > { %v2386_v44 = vsel %vm13534_vm7, %v2331_v17, 0.0  ;;  %7429 = vmatmul.mubr.msk.f32.gmra.mxu1 %vm429_vm6, %v9807_v5  ;;  %3944 = vmatprep.mubr.f32.mxu0 %v13792_v36  ;;  %v2649_v32 = vadd.f32 %v2648_v16, %v2628_v22  ;;  %v2575_v9 = vpop.f32.mrf.mxu1  ;;  %vm13537_vm7 = vcmp.eq.s32.totalorder %v8802_v60, %v9915_v23 }
 0x1e9   : > { %v2407_v62 = vadd.f32 %v2406_v4, %v2386_v44  ;;  %v2333_v57 = vpop.f32.mrf.mxu0  ;;  %4186 = vmatprep.mubr.f32.mxu1 %v13792_v36  ;;  %v2629_v55 = vsel %vm13535_vm5, %v2575_v9, 0.0  ;;  %v13552_v5 = vmul.u32 8, %v10235_v0 }
 0x1ea   : > { %v2387_v49 = vsel %vm13535_vm5, %v2333_v57, 0.0  ;;  %v2670_v37 = vadd.f32 %v2669_v11, %v2629_v55  ;;  %v2579_v45 = vpop.f32.mrf.mxu1  ;;  %vm13538_vm5 = vcmp.eq.s32.totalorder %v8833_v63, %v9912_v10 }
 0x1eb   : > { %v2428_v61 = vadd.f32 %v2427_v25, %v2387_v49  ;;  %v2337_v47 = vpop.f32.mrf.mxu0  ;;  %7412 = vmatmul.mubr.msk.f32.gmra.mxu0 %vm429_vm6, %v10264_v59  ;;  %v2630_v16 = vsel %vm13536_vm1, %v2579_v45, 0.0  ;;  %v10291_v53 = vadd.s32 %v13552_v5, %v13934_v6  ;;  %v13936_v25 = vld [vmem:[#allocation13_spill] sm:$0xff] }
 0x1ec   : > { %v2388_v4 = vsel %vm13536_vm1, %v2337_v47, 0.0  ;;  %7430 = vmatmul.mubr.msk.f32.gmra.mxu1 %vm429_vm6, %v9828_v43  ;;  %3950 = vmatprep.mubr.f32.mxu0 %v13792_v36  ;;  %v2650_v39 = vadd.f32 %v2649_v32, %v2630_v16  ;;  %v2581_v31 = vpop.f32.mrf.mxu1  ;;  %v2937_v11 = vand.u32 127, %v13936_v25  ;;  %vm13539_vm1 = vcmp.eq.s32.totalorder %v8833_v63, %v9915_v23 }
 0x1ed   : > { %v2408_v30 = vadd.f32 %v2407_v62, %v2388_v4  ;;  %v2339_v1 = vpop.f32.mrf.mxu0  ;;  %4192 = vmatprep.mubr.f32.mxu1 %v13792_v36  ;;  %v2631_v43 = vsel %vm13537_vm7, %v2581_v31, 0.0  ;;  %13935 = vst [vmem:[#allocation32_spill] sm:$0xff] %v10291_v53  ;;  %v10295_v62 = vld [vmem:[%s7975_s6 + $0x60] sm:$0xff] }
 0x1ee   : > { %v2389_v40 = vsel %vm13537_vm7, %v2339_v1, 0.0  ;;  %v2671_v13 = vadd.f32 %v2670_v37, %v2631_v43  ;;  %v2585_v22 = vpop.f32.mrf.mxu1  ;;  %vm13540_vm7 = vcmp.eq.s32.totalorder %v8859_v3, %v9912_v10  ;;  %v2961_v1 = vrot.slane %v2937_v11, %v7957_v24 }
 0x1ef   : > { %v2429_v17 = vadd.f32 %v2428_v61, %v2389_v40  ;;  %v2343_v44 = vpop.f32.mrf.mxu0  ;;  %7413 = vmatmul.mubr.msk.f32.gmra.mxu0 %vm429_vm6, %v10295_v62  ;;  %v2632_v57 = vsel %vm13538_vm5, %v2585_v22, 0.0  ;;  %v2965_v43 = vrot.slane %v2937_v11, %v13895_v29 }
 0x1f0   : > { %v2390_v32 = vsel %vm13538_vm5, %v2343_v44, 0.0  ;;  %7431 = vmatmul.mubr.msk.f32.gmra.mxu1 %vm429_vm6, %v9849_v28  ;;  %3956 = vmatprep.mubr.f32.mxu0 %v13792_v36  ;;  %v2651_v49 = vadd.f32 %v2650_v39, %v2632_v57  ;;  %v2587_v61 = vpop.f32.mrf.mxu1  ;;  %v13549_v28 = vshra.s32 %v10291_v53, 7  ;;  %v10321_v39 = vld [vmem:[%s7975_s6 + $0x68] sm:$0xff]  ;;  %vm13541_vm5 = vcmp.eq.s32.totalorder %v8859_v3, %v9915_v23 }
 0x1f1   : > { %v2409_v9 = vadd.f32 %v2408_v30, %v2390_v32  ;;  %v2345_v55 = vpop.f32.mrf.mxu0  ;;  %4198 = vmatprep.mubr.f32.mxu1 %v13792_v36  ;;  %v2633_v47 = vsel %vm13539_vm1, %v2587_v61, 0.0 }
 0x1f2   : > { %v2391_v37 = vsel %vm13539_vm1, %v2345_v55, 0.0  ;;  %v2672_v4 = vadd.f32 %v2671_v13, %v2633_v47  ;;  %v2591_v30 = vpop.f32.mrf.mxu1  ;;  %vm13542_vm1 = vcmp.eq.s32.totalorder %v13900_v27, %v9912_v10  ;;  %v5360_v11 = vrot.slane %v13549_v28, %v13895_v29  ;;  %v10429_v28 = vld [vmem:[%s7975_s6 + $0x100] sm:$0xff] }
 0x1f3   : > { %v2430_v45 = vadd.f32 %v2429_v17, %v2391_v37  ;;  %v2349_v16 = vpop.f32.mrf.mxu0  ;;  %7414 = vmatmul.mubr.msk.f32.gmra.mxu0 %vm429_vm6, %v10321_v39  ;;  %v2634_v40 = vsel %vm13540_vm7, %v2591_v30, 0.0  ;;  %v10358_v55 = vrot.slane %v2961_v1, %v7957_v24  ;;  %v10370_v47 = vrot.slane %v2965_v43, %v7957_v24  ;;  %v13937_v1 = vld [vmem:[#allocation25_spill] sm:$0xff]  ;;  %v13938_v43 = vld [vmem:[#allocation2_spill] sm:$0xff]  ;;  %13950 = vst [vmem:[#allocation7_spill] sm:$0xff] %v10429_v28 }
 0x1f4   : > { %v2392_v31 = vsel %vm13540_vm7, %v2349_v16, 0.0  ;;  %7432 = vmatmul.mubr.msk.f32.gmra.mxu1 %vm429_vm6, %v9871_v21  ;;  %3962 = vmatprep.mubr.f32.mxu0 %v13792_v36  ;;  %v2652_v25 = vadd.f32 %v2651_v49, %v2634_v40  ;;  %v2593_v13 = vpop.f32.mrf.mxu1  ;;  %v10351_v49 = vld [vmem:[%s7975_s6 + $0x70] sm:$0xff]  ;;  %vm13544_vm7 = vcmp.eq.s32.totalorder %v13900_v27, %v9915_v23 }
 0x1f5   : > { %v2410_v6 = vadd.f32 %v2409_v9, %v2392_v31  ;;  %v2351_v17 = vpop.f32.mrf.mxu0  ;;  %4204 = vmatprep.mubr.f32.mxu1 %v13792_v36  ;;  %v2635_v21 = vsel %vm13541_vm5, %v2593_v13, 0.0  ;;  %v2118_v31 = vrot.slane %v13937_v1, 7  ;;  %vm13553_vm12 = vcmp.eq.s32.totalorder %v7941_v18, %v10358_v55 }
 0x1f6   : > { %v2393_v44 = vsel %vm13541_vm5, %v2351_v17, 0.0  ;;  %v2673_v32 = vadd.f32 %v2672_v4, %v2635_v21  ;;  %v2597_v9 = vpop.f32.mrf.mxu1  ;;  %vm13546_vm5 = vcmp.eq.s32.totalorder %v13907_v20, %v9912_v10 }
 0x1f7   : > { %v2431_v22 = vadd.f32 %v2430_v45, %v2393_v44  ;;  %v2355_v57 = vpop.f32.mrf.mxu0  ;;  %7415 = vmatmul.mubr.msk.f32.gmra.mxu0 %vm429_vm6, %v10351_v49  ;;  %v2636_v37 = vsel %vm13542_vm1, %v2597_v9, 0.0  ;;  %vm10405_vm10 = vcmp.ne.s32.totalorder %v2118_v31, 0  ;;  %v13947_v31 = vmov 0 }
 0x1f8   : > { %v2394_v61 = vsel %vm13542_vm1, %v2355_v57, 0.0  ;;  %7433 = vmatmul.mubr.msk.f32.gmra.mxu1 %vm429_vm6, %v9897_v42  ;;  %3968 = vmatprep.mubr.f32.mxu0 %v13792_v36  ;;  %v2653_v4 = vadd.f32 %v2652_v25, %v2636_v37  ;;  %v2599_v30 = vpop.f32.mrf.mxu1  ;;  %v5368_v25 = vrot.slane %v5360_v11, %v7957_v24  ;;  %v10385_v57 = vld [vmem:[%s7975_s6 + $0x78] sm:$0xff]  ;;  %vm13550_vm1 = vcmp.eq.s32.totalorder %v13907_v20, %v9915_v23  ;;  %v10514_v20 = vld [vmem:[%s7975_s6 + $0x110] sm:$0xff] }
 0x1f9   : > { %v2411_v45 = vadd.f32 %v2410_v6, %v2394_v61  ;;  %v2357_v16 = vpop.f32.mrf.mxu0  ;;  %4210 = vmatprep.mubr.f32.mxu1 %v13792_v36  ;;  %v2637_v40 = vsel %vm13544_vm7, %v2599_v30, 0.0  ;;  %v13548_v6 = vrot.slane %v13938_v43, 7  ;;  %13939 = vst [vmem:[#allocation29_spill] sm:$0xff] %v10385_v57  ;;  %v13942_v30 = vmov 0  ;;  %v13958_v43 = vld [vmem:[#allocation21_spill] sm:$0xff] }
 0x1fa   : > { %v2395_v42 = vsel %vm13544_vm7, %v2357_v16, 0.0  ;;  %v2674_v13 = vadd.f32 %v2673_v32, %v2637_v40  ;;  %v2603_v21 = vpop.f32.mrf.mxu1  ;;  %v13941_v32 = vld [vmem:[#allocation26_spill] sm:$0xff]  ;;  %vm13557_vm7 = vcmp.eq.s32.totalorder %v7941_v18, %v10370_v47  ;;  %v13943_v30 = vsel %vm10405_vm10, 4294967295, %v13942_v30  ;;  %v13945_v40 = vld [vmem:[#allocation3_spill] sm:$0xff] }
 0x1fb   : > { %v2432_v17 = vadd.f32 %v2431_v22, %v2395_v42  ;;  %v2361_v44 = vpop.f32.mrf.mxu0  ;;  %7416 = vmatmul.mubr.msk.f32.gmra.mxu0 %vm429_vm6, %v10385_v57  ;;  %v2638_v11 = vsel %vm13546_vm5, %v2603_v21, 0.0  ;;  %v13940_v22 = vld [vmem:[#allocation11_spill] sm:$0xff]  ;;  %v2121_v61 = vrot.slane %v13941_v32, 7  ;;  %13944 = vst [vmem:[#allocation17_spill] sm:$0xff] %v13943_v30  ;;  %vm10424_vm11 = vcmp.eq.s32.totalorder %v7941_v18, %v5368_v25 }
 0x1fc   : > { %v2396_v9 = vsel %vm13546_vm5, %v2361_v44, 0.0  ;;  %7434 = vmatmul.mubr.msk.f32.gmra.mxu1 %vm429_vm6, %v13940_v22  ;;  %4362 = vmatprep.mubr.f32.mxu0 %v13792_v36  ;;  %v2654_v16 = vadd.f32 %v2653_v4, %v2638_v11  ;;  %v2605_v42 = vpop.f32.mrf.mxu1  ;;  %v10415_v44 = vmul.f32 %v13548_v6, %v13945_v40  ;;  %v13948_v31 = vsel %vm10424_vm11, 4294967295, %v13947_v31 }
 0x1fd   : > { %v2412_v37 = vadd.f32 %v2411_v45, %v2396_v9  ;;  %v2363_v1 = vpop.f32.mrf.mxu0  ;;  %4679 = vmatprep.mubr.f32.mxu1 %v13792_v36  ;;  %v2639_v4 = vsel %vm13550_vm1, %v2605_v42, 0.0  ;;  %13949 = vst [vmem:[#allocation5_spill] sm:$0xff] %v13948_v31  ;;  %vm10433_vm5 = vcmp.ne.s32.totalorder %v2121_v61, 0  ;;  %v13954_v42 = vld [vmem:[#allocation16_spill] sm:$0xff] }
 0x1fe   : > { %13946 = vst [vmem:[#allocation18_spill] sm:$0xff] %v10415_v44  ;;  %v2397_v45 = vsel %vm13550_vm1, %v2363_v1, 0.0  ;;  %v2655_v9 = vrot.slane %v2654_v16, 4  ;;  %v2675_v22 = vadd.f32 %v2674_v13, %v2639_v4  ;;  %v3072_v6 = vpop.f32.mrf.mxu1  ;;  %v13951_v1 = vmov 0 }
 0x1ff   : > { %v2413_v21 = vrot.slane %v2412_v37, 4  ;;  %v2433_v11 = vadd.f32 %v2432_v17, %v2397_v45  ;;  %v2755_v32 = vpop.f32.mrf.mxu0  ;;  %7437 = vmatmul.mubr.msk.f32.vlgmr.msra.gmra.mxu0 %vm429_vm6, %v10429_v28  ;;  %v13952_v1 = vsel %vm10433_vm5, 4294967295, %v13951_v1  ;;  %v3167_v25 = vsel %vm13553_vm12, %v3072_v6, 0.0  ;;  %vm2120_vm12 = vmand %vm9478_vm14, %vm10405_vm10  ;;  %v10473_v28 = vld [vmem:[%s7975_s6 + $0x108] sm:$0xff] }
 0x200   : > { %13953 = vst [vmem:[#allocation13_spill] sm:$0xff] %v13952_v1  ;;  %7455 = vmatmul.mubr.msk.f32.vlgmr.msra.gmra.mxu1 %vm429_vm6, %v13954_v42  ;;  %v13955_v17 = vmov 1.0   ;;  %v2656_v45 = vadd.f32 %v2655_v9, %v2654_v16  ;;  %v2676_v5 = vrot.slane %v2675_v22, 4  ;;  %v3074_v42 = vpop.f32.mrf.mxu1  ;;  %4368 = vmatprep.mubr.f32.mxu0 %v13792_v36  ;;  %13959 = vst [vmem:[#allocation25_spill] sm:$0xff] %v10473_v28  ;;  %vm13963_vm1 = vcmp.eq.s32.totalorder %v8540_v34, %v10358_v55 }
 0x201   : > { %7472 = vmatpush1.msk.msra.mxu0 %vm9950_vm8, %v13955_v17  ;;  %v2414_v61 = vadd.f32 %v2413_v21, %v2412_v37  ;;  %v2434_v4 = vrot.slane %v2433_v11, 4  ;;  %7490 = vmatpush1.msk.msra.mxu1 %vm9950_vm8, %v13955_v17  ;;  %v2757_v6 = vpop.f32.mrf.mxu0  ;;  %v10459_v37 = vmul.f32 %v10415_v44, %v13958_v43  ;;  %v3168_v16 = vsel %vm13557_vm7, %v3074_v42, 0.0 }
 0x202   : > { %4685 = vmatprep.mubr.f32.mxu1 %v13792_v36  ;;  %7507 = vmatprep.subr.msk.mxu0 %vm10424_vm11, %v13955_v17  ;;  %v2657_v9 = vrot.slane %v2656_v45, 2  ;;  %v2677_v43 = vadd.f32 %v2676_v5, %v2675_v22  ;;  %v3078_v44 = vpop.f32.mrf.mxu1  ;;  %vm13960_vm7 = vcmp.eq.s32.totalorder %v7941_v18, %v9912_v10  ;;  %vm13962_vm8 = vcmp.eq.s32.totalorder %v8540_v34, %v9912_v10 }
 0x203   : > { %v2415_v21 = vrot.slane %v2414_v61, 2  ;;  %v2435_v13 = vadd.f32 %v2434_v4, %v2433_v11  ;;  %v2761_v19 = vpop.f32.mrf.mxu0  ;;  %7438 = vmatmul.mubr.msk.f32.gmra.mxu0 %vm429_vm6, %v10473_v28  ;;  %7525 = vmatprep.subr.msk.mxu1 %vm10424_vm11, %v13955_v17  ;;  %v2850_v42 = vsel %vm13960_vm7, %v2755_v32, 0.0  ;;  %v2851_v11 = vsel %vm13961_vm0, %v2757_v6, 0.0  ;;  %v13964_v4 = vld [vmem:[#allocation22_spill] sm:$0xff]  ;;  %vm10502_vm0 = vmand %vm2120_vm12, %vm10433_vm5 }
 0x204   : > { %v2852_v5 = vsel %vm13962_vm8, %v2761_v19, 0.0  ;;  %v3169_v22 = vsel %vm13963_vm1, %v3078_v44, 0.0  ;;  %7456 = vmatmul.mubr.msk.f32.gmra.mxu1 %vm429_vm6, %v13964_v4  ;;  %4374 = vmatprep.mubr.f32.mxu0 %v13792_v36  ;;  %v2658_v31 = vadd.f32 %v2657_v9, %v2656_v45  ;;  %v2678_v32 = vrot.slane %v2677_v43, 2  ;;  %v3080_v4 = vpop.f32.mrf.mxu1  ;;  %vm2130_vm12 = vmand %vm10502_vm0, %vm9451_vm15 }
 0x205   : > { %v2416_v28 = vadd.f32 %v2415_v21, %v2414_v61  ;;  %v2436_v44 = vrot.slane %v2435_v13, 2  ;;  %v2763_v6 = vpop.f32.mrf.mxu0  ;;  %4691 = vmatprep.mubr.f32.mxu1 %v13792_v36  ;;  %v2882_v61 = vadd.f32 %v2852_v5, %v2850_v42  ;;  %v3199_v45 = vadd.f32 %v3169_v22, %v3167_v25 }
 0x206   : > { %vm13967_vm7 = vcmp.eq.s32.totalorder %v8540_v34, %v9915_v23  ;;  %vm13968_vm14 = vcmp.eq.s32.totalorder %v8540_v34, %v10370_v47  ;;  %v2659_v1 = vrot.slane %v2658_v31, 1  ;;  %v2679_v17 = vadd.f32 %v2678_v32, %v2677_v43  ;;  %v3084_v57 = vpop.f32.mrf.mxu1 }
 0x207   : > { %v2853_v40 = vsel %vm13967_vm7, %v2763_v6, 0.0  ;;  %v3170_v21 = vsel %vm13968_vm14, %v3080_v4, 0.0  ;;  %v2417_v9 = vrot.slane %v2416_v28, 1  ;;  %v2437_v30 = vadd.f32 %v2436_v44, %v2435_v13  ;;  %v2767_v18 = vpop.f32.mrf.mxu0  ;;  %7439 = vmatmul.mubr.msk.f32.gmra.mxu0 %vm429_vm6, %v10514_v20 }
 0x208   : > { %v2903_v42 = vadd.f32 %v2853_v40, %v2851_v11  ;;  %v3220_v5 = vadd.f32 %v3170_v21, %v3168_v16  ;;  %vm13970_vm1 = vcmp.eq.s32.totalorder %v8562_v38, %v9912_v10  ;;  %vm13971_vm8 = vcmp.eq.s32.totalorder %v8562_v38, %v10358_v55  ;;  %7457 = vmatmul.mubr.msk.f32.gmra.mxu1 %vm429_vm6, %v10026_v33  ;;  %v3086_v16 = vpop.f32.mrf.mxu1 }
 0x209   : > { %v2854_v22 = vsel %vm13970_vm1, %v2767_v18, 0.0  ;;  %v3171_v43 = vsel %vm13971_vm8, %v3084_v57, 0.0  ;;  %4380 = vmatprep.mubr.f32.mxu0 %v13792_v36  ;;  %v2418_v13 = vadd.f32 %v2417_v9, %v2416_v28  ;;  %v2660_v44 = vadd.f32 %v2659_v1, %v2658_v31  ;;  %v2769_v11 = vpop.f32.mrf.mxu0  ;;  %4697 = vmatprep.mubr.f32.mxu1 %v13792_v36  ;;  %vm10545_vm1 = vmand %vm2130_vm12, %vm9490_vm4  ;;  %v10550_v9 = vld [vmem:[%s7975_s6 + $0x118] sm:$0xff]  ;;  %v10580_v28 = vld [vmem:[%s7975_s6 + $0x120] sm:$0xff] }
 0x20a   : > { %v2438_v32 = vrot.slane %v2437_v30, 1  ;;  %v2680_v6 = vrot.slane %v2679_v17, 1  ;;  %v2883_v4 = vadd.f32 %v2882_v61, %v2854_v22  ;;  %v3200_v18 = vadd.f32 %v3199_v45, %v3171_v43  ;;  %v3090_v43 = vpop.f32.mrf.mxu1 }
 0x20b   : > { %vm13972_vm7 = vcmp.eq.s32.totalorder %v8562_v38, %v9915_v23  ;;  %vm13973_vm14 = vcmp.eq.s32.totalorder %v8562_v38, %v10370_v47  ;;  %v2773_v21 = vpop.f32.mrf.mxu0  ;;  %7440 = vmatmul.mubr.msk.f32.gmra.mxu0 %vm429_vm6, %v10550_v9  ;;  %vm13977_vm8 = vcmp.eq.s32.totalorder %v8595_v7, %v9912_v10  ;;  %vm13603_vm12 = vcmp.eq.s32.totalorder %v8595_v7, %v10370_v47 }
 0x20c   : > { %v2855_v57 = vsel %vm13972_vm7, %v2769_v11, 0.0  ;;  %v3172_v33 = vsel %vm13973_vm14, %v3086_v16, 0.0  ;;  %v2439_v31 = vadd.f32 %v2438_v32, %v2437_v30  ;;  %v2681_v1 = vadd.f32 %v2680_v6, %v2679_v17  ;;  %7458 = vmatmul.mubr.msk.f32.gmra.mxu1 %vm429_vm6, %v10047_v51  ;;  %4386 = vmatprep.mubr.f32.mxu0 %v13792_v36  ;;  %v3092_v11 = vpop.f32.mrf.mxu1 }
 0x20d   : > { %v2904_v61 = vadd.f32 %v2903_v42, %v2855_v57  ;;  %v3221_v45 = vadd.f32 %v3220_v5, %v3172_v33  ;;  %v2856_v22 = vsel %vm13977_vm8, %v2773_v21, 0.0  ;;  %vm13978_vm7 = vcmp.eq.s32.totalorder %v8595_v7, %v10358_v55  ;;  %v2775_v32 = vpop.f32.mrf.mxu0  ;;  %4703 = vmatprep.mubr.f32.mxu1 %v13792_v36 }
 0x20e   : > { %v2442_v30 = vcombine.low %v2418_v13, %v2439_v31  ;;  %v2684_v17 = vcombine.low %v2660_v44, %v2681_v1  ;;  %v2884_v42 = vadd.f32 %v2883_v4, %v2856_v22  ;;  %v3173_v5 = vsel %vm13978_vm7, %v3090_v43, 0.0  ;;  %v3096_v31 = vpop.f32.mrf.mxu1 }
 0x20f   : > { %v10569_v51 = vsel %vm10545_vm1, %v10459_v37, 0.0  ;;  %v3201_v6 = vadd.f32 %v3200_v18, %v3173_v5  ;;  %vm13979_vm14 = vcmp.eq.s32.totalorder %v8595_v7, %v9915_v23  ;;  %vm13568_vm8 = vcmp.eq.s32.totalorder %v8626_v46, %v10358_v55  ;;  %v2779_v33 = vpop.f32.mrf.mxu0  ;;  %7441 = vmatmul.mubr.msk.f32.gmra.mxu0 %vm429_vm6, %v10580_v28 }
 0x210   : > { %v2857_v13 = vsel %vm13979_vm14, %v2775_v32, 0.0  ;;  %v2443_v44 = vrot.slane %v2442_v30, 6  ;;  %v2685_v16 = vrot.slane %v2684_v17, 6  ;;  %v3174_v57 = vsel %vm13603_vm12, %v3092_v11, 0.0  ;;  %7459 = vmatmul.mubr.msk.f32.gmra.mxu1 %vm429_vm6, %v10077_v41  ;;  %4392 = vmatprep.mubr.f32.mxu0 %v13792_v36  ;;  %v3098_v30 = vpop.f32.mrf.mxu1  ;;  %v13982_v17 = vld [vmem:[#allocation36_spill] sm:$0xff]  ;;  %v10613_v11 = vld [vmem:[%s7975_s6 + $0x128] sm:$0xff] }
 0x211   : > { %v2905_v4 = vadd.f32 %v2904_v61, %v2857_v13  ;;  %v3222_v37 = vadd.f32 %v3221_v45, %v3174_v57  ;;  %vm13980_vm1 = vcmp.eq.s32.totalorder %v8626_v46, %v9912_v10  ;;  %vm13569_vm7 = vcmp.eq.s32.totalorder %v8626_v46, %v10370_v47  ;;  %v2781_v22 = vpop.f32.mrf.mxu0  ;;  %4709 = vmatprep.mubr.f32.mxu1 %v13792_v36 }
 0x212   : > { %v2858_v18 = vsel %vm13980_vm1, %v2779_v33, 0.0  ;;  %v2445_v1 = vmul.f32 %v2443_v44, %v10569_v51  ;;  %v2687_v61 = vmul.f32 %v2685_v16, %v10569_v51  ;;  %v3175_v45 = vsel %vm13568_vm8, %v3096_v31, 0.0  ;;  %v3102_v57 = vpop.f32.mrf.mxu1 }
 0x213   : > { %v2885_v21 = vadd.f32 %v2884_v42, %v2858_v18  ;;  %v3202_v43 = vadd.f32 %v3201_v6, %v3175_v45  ;;  %vm13981_vm14 = vcmp.eq.s32.totalorder %v8626_v46, %v9915_v23  ;;  %vm13570_vm1 = vcmp.eq.s32.totalorder %v8651_v48, %v10358_v55  ;;  %v2785_v6 = vpop.f32.mrf.mxu0  ;;  %7442 = vmatmul.mubr.msk.f32.gmra.mxu0 %vm429_vm6, %v10613_v11 }
 0x214   : > { %v2859_v41 = vsel %vm13981_vm14, %v2781_v22, 0.0  ;;  %v10604_v5 = vadd.f32 %v2445_v1, %v13982_v17  ;;  %v10607_v42 = vadd.f32 %v2687_v61, %v10104_v8  ;;  %v3176_v13 = vsel %vm13569_vm7, %v3098_v30, 0.0  ;;  %7460 = vmatmul.mubr.msk.f32.gmra.mxu1 %vm429_vm6, %v10109_v35  ;;  %4398 = vmatprep.mubr.f32.mxu0 %v13792_v36  ;;  %v3104_v31 = vpop.f32.mrf.mxu1 }
 0x215   : > { %v2906_v32 = vadd.f32 %v2905_v4, %v2859_v41  ;;  %v3223_v44 = vadd.f32 %v3222_v37, %v3176_v13  ;;  %vm13984_vm14 = vcmp.eq.s32.totalorder %v8651_v48, %v9912_v10  ;;  %vm13571_vm8 = vcmp.eq.s32.totalorder %v8651_v48, %v10370_v47  ;;  %v2787_v33 = vpop.f32.mrf.mxu0  ;;  %4715 = vmatprep.mubr.f32.mxu1 %v13792_v36 }
 0x216   : > { %13983 = vst [vmem:[#allocation11_spill] sm:$0xff] %v10607_v42  ;;  %v2860_v16 = vsel %vm13984_vm14, %v2785_v6, 0.0  ;;  %v3177_v4 = vsel %vm13570_vm1, %v3102_v57, 0.0  ;;  %vm13985_vm14 = vcmp.eq.s32.totalorder %v8651_v48, %v9915_v23  ;;  %vm13572_vm7 = vcmp.eq.s32.totalorder %v8676_v50, %v10358_v55  ;;  %v10663_v57 = vld [vmem:[%s7975_s6 + $0x138] sm:$0xff] }
 0x217   : > { %v2886_v8 = vadd.f32 %v2885_v21, %v2860_v16  ;;  %v3203_v37 = vadd.f32 %v3202_v43, %v3177_v4  ;;  %v2861_v18 = vsel %vm13985_vm14, %v2787_v33, 0.0  ;;  %v3178_v1 = vsel %vm13571_vm8, %v3104_v31, 0.0  ;;  %v2791_v61 = vpop.f32.mrf.mxu0  ;;  %v10638_v21 = vld [vmem:[%s7975_s6 + $0x130] sm:$0xff]  ;;  %v3108_v43 = vpop.f32.mrf.mxu1 }
 0x218   : > { %v2907_v35 = vadd.f32 %v2906_v32, %v2861_v18  ;;  %7443 = vmatmul.mubr.msk.f32.gmra.mxu0 %vm429_vm6, %v10638_v21  ;;  %v3224_v45 = vadd.f32 %v3223_v44, %v3178_v1  ;;  %vm13986_vm1 = vcmp.eq.s32.totalorder %v8676_v50, %v9912_v10  ;;  %7461 = vmatmul.mubr.msk.f32.gmra.mxu1 %vm429_vm6, %v10132_v2  ;;  %v3179_v30 = vsel %vm13572_vm7, %v3108_v43, 0.0  ;;  %v10688_v43 = vld [vmem:[%s7975_s6 + $0x140] sm:$0xff] }
 0x219   : > { %v2862_v22 = vsel %vm13986_vm1, %v2791_v61, 0.0  ;;  %vm13573_vm14 = vcmp.eq.s32.totalorder %v8676_v50, %v10370_v47  ;;  %4404 = vmatprep.mubr.f32.mxu0 %v13792_v36  ;;  %v2793_v17 = vpop.f32.mrf.mxu0  ;;  %4721 = vmatprep.mubr.f32.mxu1 %v13792_v36  ;;  %v3204_v32 = vadd.f32 %v3203_v37, %v3179_v30  ;;  %vm13987_vm1 = vcmp.eq.s32.totalorder %v8676_v50, %v9915_v23  ;;  %v3110_v6 = vpop.f32.mrf.mxu1 }
 0x21a   : > { %v2887_v41 = vadd.f32 %v2886_v8, %v2862_v22  ;;  %v2863_v13 = vsel %vm13987_vm1, %v2793_v17, 0.0  ;;  %vm13574_vm8 = vcmp.eq.s32.totalorder %v8701_v52, %v10358_v55  ;;  %v3180_v44 = vsel %vm13573_vm14, %v3110_v6, 0.0 }
 0x21b   : > { %v2908_v2 = vadd.f32 %v2907_v35, %v2863_v13  ;;  %v2797_v16 = vpop.f32.mrf.mxu0  ;;  %v3225_v8 = vadd.f32 %v3224_v45, %v3180_v44  ;;  %vm13988_vm7 = vcmp.eq.s32.totalorder %v8701_v52, %v9912_v10  ;;  %v3114_v33 = vpop.f32.mrf.mxu1  ;;  %vm13575_vm1 = vcmp.eq.s32.totalorder %v8701_v52, %v10370_v47 }
 0x21c   : > { %7444 = vmatmul.mubr.msk.f32.gmra.mxu0 %vm429_vm6, %v10663_v57  ;;  %v2864_v4 = vsel %vm13988_vm7, %v2797_v16, 0.0  ;;  %7462 = vmatmul.mubr.msk.f32.gmra.mxu1 %vm429_vm6, %v10157_v14  ;;  %v3181_v18 = vsel %vm13574_vm8, %v3114_v33, 0.0  ;;  %vm13989_vm7 = vcmp.eq.s32.totalorder %v8701_v52, %v9915_v23  ;;  %vm13576_vm14 = vcmp.eq.s32.totalorder %v8726_v54, %v10358_v55  ;;  %v10713_v33 = vld [vmem:[%s7975_s6 + $0x148] sm:$0xff] }
 0x21d   : > { %4410 = vmatprep.mubr.f32.mxu0 %v13792_v36  ;;  %v2888_v37 = vadd.f32 %v2887_v41, %v2864_v4  ;;  %v2799_v31 = vpop.f32.mrf.mxu0  ;;  %4727 = vmatprep.mubr.f32.mxu1 %v13792_v36  ;;  %v3205_v35 = vadd.f32 %v3204_v32, %v3181_v18  ;;  %v3116_v61 = vpop.f32.mrf.mxu1  ;;  %vm13990_vm8 = vcmp.eq.s32.totalorder %v8726_v54, %v9912_v10 }
 0x21e   : > { %v2865_v1 = vsel %vm13989_vm7, %v2799_v31, 0.0  ;;  %v3182_v45 = vsel %vm13575_vm1, %v3116_v61, 0.0  ;;  %vm13577_vm7 = vcmp.eq.s32.totalorder %v8726_v54, %v10370_v47  ;;  %vm13578_vm1 = vcmp.eq.s32.totalorder %v8751_v56, %v10358_v55 }
 0x21f   : > { %v2909_v14 = vadd.f32 %v2908_v2, %v2865_v1  ;;  %v2803_v22 = vpop.f32.mrf.mxu0  ;;  %v3226_v41 = vadd.f32 %v3225_v8, %v3182_v45  ;;  %v3120_v17 = vpop.f32.mrf.mxu1 }
 0x220   : > { %7445 = vmatmul.mubr.msk.f32.gmra.mxu0 %vm429_vm6, %v10688_v43  ;;  %v2866_v30 = vsel %vm13990_vm8, %v2803_v22, 0.0  ;;  %7463 = vmatmul.mubr.msk.f32.gmra.mxu1 %vm429_vm6, %v10182_v26  ;;  %v3183_v13 = vsel %vm13576_vm14, %v3120_v17, 0.0  ;;  %vm13991_vm8 = vcmp.eq.s32.totalorder %v8726_v54, %v9915_v23  ;;  %vm13992_vm14 = vcmp.eq.s32.totalorder %v8751_v56, %v9912_v10  ;;  %v10738_v17 = vld [vmem:[%s7975_s6 + $0x150] sm:$0xff] }
 0x221   : > { %4416 = vmatprep.mubr.f32.mxu0 %v13792_v36  ;;  %v2889_v32 = vadd.f32 %v2888_v37, %v2866_v30  ;;  %v2805_v6 = vpop.f32.mrf.mxu0  ;;  %4733 = vmatprep.mubr.f32.mxu1 %v13792_v36  ;;  %v3206_v2 = vadd.f32 %v3205_v35, %v3183_v13  ;;  %v3122_v16 = vpop.f32.mrf.mxu1 }
 0x222   : > { %v2867_v44 = vsel %vm13991_vm8, %v2805_v6, 0.0  ;;  %v3184_v8 = vsel %vm13577_vm7, %v3122_v16, 0.0  ;;  %vm13579_vm8 = vcmp.eq.s32.totalorder %v8751_v56, %v10370_v47  ;;  %vm13580_vm7 = vcmp.eq.s32.totalorder %v8776_v58, %v10358_v55 }
 0x223   : > { %v2910_v26 = vadd.f32 %v2909_v14, %v2867_v44  ;;  %v2809_v4 = vpop.f32.mrf.mxu0  ;;  %v3227_v37 = vadd.f32 %v3226_v41, %v3184_v8  ;;  %v3126_v31 = vpop.f32.mrf.mxu1 }
 0x224   : > { %7446 = vmatmul.mubr.msk.f32.gmra.mxu0 %vm429_vm6, %v10713_v33  ;;  %v2868_v18 = vsel %vm13992_vm14, %v2809_v4, 0.0  ;;  %7464 = vmatmul.mubr.msk.f32.gmra.mxu1 %vm429_vm6, %v10207_v15  ;;  %v3185_v1 = vsel %vm13578_vm1, %v3126_v31, 0.0  ;;  %vm13993_vm14 = vcmp.eq.s32.totalorder %v8751_v56, %v9915_v23  ;;  %vm13994_vm1 = vcmp.eq.s32.totalorder %v8776_v58, %v9912_v10  ;;  %v10763_v31 = vld [vmem:[%s7975_s6 + $0x158] sm:$0xff] }
 0x225   : > { %4422 = vmatprep.mubr.f32.mxu0 %v13792_v36  ;;  %v2890_v35 = vadd.f32 %v2889_v32, %v2868_v18  ;;  %v2811_v61 = vpop.f32.mrf.mxu0  ;;  %4739 = vmatprep.mubr.f32.mxu1 %v13792_v36  ;;  %v3207_v14 = vadd.f32 %v3206_v2, %v3185_v1  ;;  %v3128_v22 = vpop.f32.mrf.mxu1 }
 0x226   : > { %v2869_v45 = vsel %vm13993_vm14, %v2811_v61, 0.0  ;;  %v3186_v41 = vsel %vm13579_vm8, %v3128_v22, 0.0  ;;  %vm13581_vm14 = vcmp.eq.s32.totalorder %v8776_v58, %v10370_v47  ;;  %vm13582_vm8 = vcmp.eq.s32.totalorder %v8802_v60, %v10358_v55 }
 0x227   : > { %v2911_v15 = vadd.f32 %v2910_v26, %v2869_v45  ;;  %v2815_v30 = vpop.f32.mrf.mxu0  ;;  %v3228_v32 = vadd.f32 %v3227_v37, %v3186_v41  ;;  %v3132_v6 = vpop.f32.mrf.mxu1 }
 0x228   : > { %7447 = vmatmul.mubr.msk.f32.gmra.mxu0 %vm429_vm6, %v10738_v17  ;;  %v2870_v13 = vsel %vm13994_vm1, %v2815_v30, 0.0  ;;  %7465 = vmatmul.mubr.msk.f32.gmra.mxu1 %vm429_vm6, %v10238_v12  ;;  %v3187_v44 = vsel %vm13580_vm7, %v3132_v6, 0.0  ;;  %vm13995_vm1 = vcmp.eq.s32.totalorder %v8776_v58, %v9915_v23  ;;  %vm13996_vm7 = vcmp.eq.s32.totalorder %v8802_v60, %v9912_v10  ;;  %v10788_v6 = vld [vmem:[%s7975_s6 + $0x160] sm:$0xff] }
 0x229   : > { %4428 = vmatprep.mubr.f32.mxu0 %v13792_v36  ;;  %v2891_v2 = vadd.f32 %v2890_v35, %v2870_v13  ;;  %v2817_v16 = vpop.f32.mrf.mxu0  ;;  %4745 = vmatprep.mubr.f32.mxu1 %v13792_v36  ;;  %v3208_v26 = vadd.f32 %v3207_v14, %v3187_v44  ;;  %v3134_v4 = vpop.f32.mrf.mxu1 }
 0x22a   : > { %v2871_v8 = vsel %vm13995_vm1, %v2817_v16, 0.0  ;;  %v3188_v37 = vsel %vm13581_vm14, %v3134_v4, 0.0  ;;  %vm13583_vm1 = vcmp.eq.s32.totalorder %v8802_v60, %v10370_v47  ;;  %vm13584_vm14 = vcmp.eq.s32.totalorder %v8833_v63, %v10358_v55 }
 0x22b   : > { %v2912_v12 = vadd.f32 %v2911_v15, %v2871_v8  ;;  %v2821_v18 = vpop.f32.mrf.mxu0  ;;  %v3229_v35 = vadd.f32 %v3228_v32, %v3188_v37  ;;  %v3138_v61 = vpop.f32.mrf.mxu1  ;;  %v14000_v8 = vmul.u32 8, %v10235_v0 }
 0x22c   : > { %7448 = vmatmul.mubr.msk.f32.gmra.mxu0 %vm429_vm6, %v10763_v31  ;;  %v2872_v1 = vsel %vm13996_vm7, %v2821_v18, 0.0  ;;  %7466 = vmatmul.mubr.msk.f32.gmra.mxu1 %vm429_vm6, %v10264_v59  ;;  %v3189_v45 = vsel %vm13582_vm8, %v3138_v61, 0.0  ;;  %vm13997_vm7 = vcmp.eq.s32.totalorder %v8802_v60, %v9915_v23  ;;  %vm13998_vm8 = vcmp.eq.s32.totalorder %v8833_v63, %v9912_v10 }
 0x22d   : > { %4434 = vmatprep.mubr.f32.mxu0 %v13792_v36  ;;  %v2892_v14 = vadd.f32 %v2891_v2, %v2872_v1  ;;  %v2823_v22 = vpop.f32.mrf.mxu0  ;;  %4751 = vmatprep.mubr.f32.mxu1 %v13792_v36  ;;  %v3209_v15 = vadd.f32 %v3208_v26, %v3189_v45  ;;  %v3140_v30 = vpop.f32.mrf.mxu1  ;;  %v13999_v26 = vld [vmem:[#allocation8_spill] sm:$0xff]  ;;  %v10818_v45 = vld [vmem:[%s7975_s6 + $0x168] sm:$0xff] }
 0x22e   : > { %v2873_v41 = vsel %vm13997_vm7, %v2823_v22, 0.0  ;;  %v3190_v32 = vsel %vm13583_vm1, %v3140_v30, 0.0  ;;  %vm13585_vm7 = vcmp.eq.s32.totalorder %v8833_v63, %v10370_v47  ;;  %v10803_v4 = vadd.s32 %v14000_v8, %v13999_v26 }
 0x22f   : > { %v2913_v59 = vadd.f32 %v2912_v12, %v2873_v41  ;;  %v2827_v13 = vpop.f32.mrf.mxu0  ;;  %v3230_v2 = vadd.f32 %v3229_v35, %v3190_v32  ;;  %v3144_v16 = vpop.f32.mrf.mxu1  ;;  %vm13586_vm1 = vcmp.eq.s32.totalorder %v8859_v3, %v10358_v55 }
 0x230   : > { %7449 = vmatmul.mubr.msk.f32.gmra.mxu0 %vm429_vm6, %v10788_v6  ;;  %v2874_v44 = vsel %vm13998_vm8, %v2827_v13, 0.0  ;;  %7467 = vmatmul.mubr.msk.f32.gmra.mxu1 %vm429_vm6, %v10295_v62  ;;  %14001 = vst [vmem:[#allocation26_spill] sm:$0xff] %v10803_v4  ;;  %v3191_v37 = vsel %vm13584_vm14, %v3144_v16, 0.0  ;;  %vm14002_vm8 = vcmp.eq.s32.totalorder %v8833_v63, %v9915_v23  ;;  %vm14003_vm14 = vcmp.eq.s32.totalorder %v8859_v3, %v9912_v10 }
 0x231   : > { %4440 = vmatprep.mubr.f32.mxu0 %v13792_v36  ;;  %v2893_v12 = vadd.f32 %v2892_v14, %v2874_v44  ;;  %v2829_v18 = vpop.f32.mrf.mxu0  ;;  %4757 = vmatprep.mubr.f32.mxu1 %v13792_v36  ;;  %v3210_v35 = vadd.f32 %v3209_v15, %v3191_v37  ;;  %v3146_v1 = vpop.f32.mrf.mxu1  ;;  %v13592_v30 = vshra.s32 %v10803_v4, 7 }
 0x232   : > { %v2875_v62 = vsel %vm14002_vm8, %v2829_v18, 0.0  ;;  %v3192_v61 = vsel %vm13585_vm7, %v3146_v1, 0.0  ;;  %vm13587_vm8 = vcmp.eq.s32.totalorder %v8859_v3, %v10370_v47  ;;  %vm13588_vm7 = vcmp.eq.s32.totalorder %v13900_v27, %v10358_v55  ;;  %v10847_v18 = vld [vmem:[%s7975_s6 + $0x170] sm:$0xff] }
 0x233   : > { %v2914_v0 = vadd.f32 %v2913_v59, %v2875_v62  ;;  %v2833_v14 = vpop.f32.mrf.mxu0  ;;  %v3231_v22 = vadd.f32 %v3230_v2, %v3192_v61  ;;  %v3150_v41 = vpop.f32.mrf.mxu1  ;;  %v14004_v2 = vshra.s32 %v10291_v53, 7 }
 0x234   : > { %7450 = vmatmul.mubr.msk.f32.gmra.mxu0 %vm429_vm6, %v10818_v45  ;;  %v2876_v15 = vsel %vm14003_vm14, %v2833_v14, 0.0  ;;  %7468 = vmatmul.mubr.msk.f32.gmra.mxu1 %vm429_vm6, %v10321_v39  ;;  %v3193_v32 = vsel %vm13586_vm1, %v3150_v41, 0.0  ;;  %vm14005_vm14 = vcmp.eq.s32.totalorder %v8859_v3, %v9915_v23  ;;  %vm14006_vm1 = vcmp.eq.s32.totalorder %v13900_v27, %v9912_v10 }
 0x235   : > { %4446 = vmatprep.mubr.f32.mxu0 %v13792_v36  ;;  %v2894_v59 = vadd.f32 %v2893_v12, %v2876_v15  ;;  %v2835_v13 = vpop.f32.mrf.mxu0  ;;  %4763 = vmatprep.mubr.f32.mxu1 %v13792_v36  ;;  %v5356_v39 = vrot.slane %v14004_v2, %v7957_v24  ;;  %v3211_v44 = vadd.f32 %v3210_v35, %v3193_v32  ;;  %v3152_v26 = vpop.f32.mrf.mxu1 }
 0x236   : > { %v2877_v16 = vsel %vm14005_vm14, %v2835_v13, 0.0  ;;  %v3194_v12 = vsel %vm13587_vm8, %v3152_v26, 0.0  ;;  %vm13589_vm14 = vcmp.eq.s32.totalorder %v13900_v27, %v10370_v47  ;;  %v14008_v13 = vld [vmem:[#allocation12_spill] sm:$0xff]  ;;  %v10876_v26 = vld [vmem:[%s7975_s6 + $0x178] sm:$0xff] }
 0x237   : > { %v2915_v8 = vadd.f32 %v2914_v0, %v2877_v16  ;;  %v2839_v37 = vpop.f32.mrf.mxu0  ;;  %v3232_v35 = vadd.f32 %v3231_v22, %v3194_v12  ;;  %v3156_v1 = vpop.f32.mrf.mxu1  ;;  %v6161_v0 = vrot.slane %v13592_v30, %v13895_v29  ;;  %vm13590_vm8 = vcmp.eq.s32.totalorder %v14008_v13, %v10358_v55 }
 0x238   : > { %7451 = vmatmul.mubr.msk.f32.gmra.mxu0 %vm429_vm6, %v10847_v18  ;;  %v2878_v62 = vsel %vm14006_vm1, %v2839_v37, 0.0  ;;  %7469 = vmatmul.mubr.msk.f32.gmra.mxu1 %vm429_vm6, %v10351_v49  ;;  %v3195_v14 = vsel %vm13588_vm7, %v3156_v1, 0.0  ;;  %v5364_v49 = vrot.slane %v5356_v39, %v7957_v24  ;;  %vm14007_vm1 = vcmp.eq.s32.totalorder %v13900_v27, %v9915_v23  ;;  %v14010_v37 = vld [vmem:[#allocation29_spill] sm:$0xff] }
 0x239   : > { %4452 = vmatprep.mubr.f32.mxu0 %v13792_v36  ;;  %v2895_v61 = vadd.f32 %v2894_v59, %v2878_v62  ;;  %v2841_v22 = vpop.f32.mrf.mxu0  ;;  %4769 = vmatprep.mubr.f32.mxu1 %v13792_v36  ;;  %v3212_v15 = vadd.f32 %v3211_v44, %v3195_v14  ;;  %v3158_v32 = vpop.f32.mrf.mxu1  ;;  %vm14009_vm7 = vcmp.eq.s32.totalorder %v14008_v13, %v9912_v10  ;;  %v14011_v10 = vld [vmem:[#allocation6_spill] sm:$0xff]  ;;  %v14012_v14 = vmov 0 }
 0x23a   : > { %v2879_v41 = vsel %vm14007_vm1, %v2841_v22, 0.0  ;;  %v3196_v59 = vsel %vm13589_vm14, %v3158_v32, 0.0  ;;  %vm13591_vm1 = vcmp.eq.s32.totalorder %v14008_v13, %v10370_v47  ;;  %vm14015_vm14 = vcmp.eq.s32.totalorder %v14008_v13, %v9915_v23 }
 0x23b   : > { %v2916_v2 = vadd.f32 %v2915_v8, %v2879_v41  ;;  %v2845_v16 = vpop.f32.mrf.mxu0  ;;  %v3233_v39 = vadd.f32 %v3232_v35, %v3196_v59  ;;  %v3162_v12 = vpop.f32.mrf.mxu1  ;;  %v6169_v8 = vrot.slane %v6161_v0, %v7957_v24 }
 0x23c   : > { %7452 = vmatmul.mubr.msk.f32.gmra.mxu0 %vm429_vm6, %v10876_v26  ;;  %v2880_v44 = vsel %vm14009_vm7, %v2845_v16, 0.0  ;;  %7470 = vmatmul.mubr.msk.f32.gmra.mxu1 %vm429_vm6, %v14010_v37  ;;  %v3197_v35 = vsel %vm13590_vm8, %v3162_v12, 0.0  ;;  %vm10894_vm7 = vcmp.eq.s32.totalorder %v14011_v10, %v5364_v49  ;;  %vm14017_vm8 = vcmp.eq.s32.totalorder %v14011_v10, %v10358_v55  ;;  %v14018_v37 = vld [vmem:[#allocation7_spill] sm:$0xff] }
 0x23d   : > { %4921 = vmatprep.mubr.f32.mxu0 %v13792_v36  ;;  %v2896_v62 = vadd.f32 %v2895_v61, %v2880_v44  ;;  %v2847_v1 = vpop.f32.mrf.mxu0  ;;  %5163 = vmatprep.mubr.f32.mxu1 %v13792_v36  ;;  %v14013_v14 = vsel %vm10894_vm7, 4294967295, %v14012_v14  ;;  %v3213_v22 = vadd.f32 %v3212_v15, %v3197_v35  ;;  %v3164_v32 = vpop.f32.mrf.mxu1  ;;  %v10905_v44 = vld [vmem:[%s7975_s6 + $0x80] sm:$0xff]  ;;  %v14020_v35 = vmov 0 }
 0x23e   : > { %14014 = vst [vmem:[#allocation16_spill] sm:$0xff] %v14013_v14  ;;  %v2881_v41 = vsel %vm14015_vm14, %v2847_v1, 0.0  ;;  %v3198_v59 = vsel %vm13591_vm1, %v3164_v32, 0.0  ;;  %14016 = vst [vmem:[#allocation20_spill] sm:$0xff] %v10905_v44  ;;  %vm10918_vm14 = vcmp.eq.s32.totalorder %v14011_v10, %v6169_v8 }
 0x23f   : > { %v2897_v0 = vrot.slane %v2896_v62, 4  ;;  %v2917_v61 = vadd.f32 %v2916_v2, %v2881_v41  ;;  %v3314_v16 = vpop.f32.mrf.mxu0  ;;  %v3214_v49 = vrot.slane %v3213_v22, 4  ;;  %v3234_v12 = vadd.f32 %v3233_v39, %v3198_v59  ;;  %v3556_v15 = vpop.f32.mrf.mxu1  ;;  %vm14023_vm1 = vmmov %vm14017_vm8 }
 0x240   : > { %7473 = vmatmul.mubr.msk.f32.vlgmr.msra.gmra.mxu0 %vm429_vm6, %v10905_v44  ;;  %v3409_v23 = vsel %vm14017_vm8, %v3314_v16, 0.0  ;;  %7491 = vmatmul.mubr.msk.f32.vlgmr.msra.gmra.mxu1 %vm429_vm6, %v14018_v37  ;;  %v14019_v2 = vmov 1.0   ;;  %v14021_v35 = vsel %vm10918_vm14, 4294967295, %v14020_v35  ;;  %v3651_v41 = vsel %vm14023_vm1, %v3556_v15, 0.0  ;;  %v10991_v44 = vld [vmem:[%s7975_s6 + $0x98] sm:$0xff] }
 0x241   : > { %7508 = vmatpush1.msk.msra.mxu0 %vm10894_vm7, %v14019_v2  ;;  %14022 = vst [vmem:[#allocation30_spill] sm:$0xff] %v14021_v35  ;;  %v2898_v1 = vadd.f32 %v2897_v0, %v2896_v62  ;;  %v2918_v39 = vrot.slane %v2917_v61, 4  ;;  %7526 = vmatpush1.msk.msra.mxu1 %vm10894_vm7, %v14019_v2  ;;  %v3316_v32 = vpop.f32.mrf.mxu0  ;;  %v3215_v59 = vadd.f32 %v3214_v49, %v3213_v22  ;;  %v3235_v16 = vrot.slane %v3234_v12, 4  ;;  %v3558_v62 = vpop.f32.mrf.mxu1  ;;  %v10940_v22 = vld [vmem:[%s7975_s6 + $0x88] sm:$0xff]  ;;  %v14029_v0 = vld [vmem:[#allocation25_spill] sm:$0xff] }
 0x242   : > { %4927 = vmatprep.mubr.f32.mxu0 %v13792_v36  ;;  %vm14024_vm8 = vcmp.eq.s32.totalorder %v14011_v10, %v10370_v47  ;;  %5169 = vmatprep.mubr.f32.mxu1 %v13792_v36  ;;  %14027 = vst [vmem:[#allocation22_spill] sm:$0xff] %v10940_v22 }
 0x243   : > { %v3410_v8 = vsel %vm14024_vm8, %v3316_v32, 0.0  ;;  %7543 = vmatprep.subr.msk.mxu0 %vm10424_vm11, %v14019_v2  ;;  %v2899_v15 = vrot.slane %v2898_v1, 2  ;;  %v2919_v37 = vadd.f32 %v2918_v39, %v2917_v61  ;;  %vm14026_vm1 = vmmov %vm14024_vm8  ;;  %v3320_v53 = vpop.f32.mrf.mxu0  ;;  %7561 = vmatprep.subr.msk.mxu1 %vm10918_vm14, %v14019_v2  ;;  %v3216_v49 = vrot.slane %v3215_v59, 2  ;;  %v3562_v39 = vpop.f32.mrf.mxu1 }
 0x244   : > { %v3652_v30 = vsel %vm14026_vm1, %v3558_v62, 0.0  ;;  %7474 = vmatmul.mubr.msk.f32.gmra.mxu0 %vm429_vm6, %v10940_v22  ;;  %v3236_v32 = vadd.f32 %v3235_v16, %v3234_v12  ;;  %vm14028_vm11 = vcmp.eq.s32.totalorder %v8540_v34, %v10358_v55  ;;  %7492 = vmatmul.mubr.msk.f32.gmra.mxu1 %vm429_vm6, %v14029_v0  ;;  %vm14031_vm1 = vcmp.eq.s32.totalorder %v8540_v34, %v10370_v47 }
 0x245   : > { %v3411_v61 = vsel %vm14028_vm11, %v3320_v53, 0.0  ;;  %4933 = vmatprep.mubr.f32.mxu0 %v13792_v36  ;;  %v2900_v62 = vadd.f32 %v2899_v15, %v2898_v1  ;;  %v2920_v40 = vrot.slane %v2919_v37, 2  ;;  %vm14030_vm8 = vmmov %vm14028_vm11  ;;  %v3322_v22 = vpop.f32.mrf.mxu0  ;;  %5175 = vmatprep.mubr.f32.mxu1 %v13792_v36  ;;  %v3217_v12 = vadd.f32 %v3216_v49, %v3215_v59  ;;  %v3564_v35 = vpop.f32.mrf.mxu1 }
 0x246   : > { %v3441_v25 = vadd.f32 %v3411_v61, %v3409_v23  ;;  %v3653_v42 = vsel %vm14030_vm8, %v3562_v39, 0.0  ;;  %v3237_v16 = vrot.slane %v3236_v32, 2  ;;  %v3412_v0 = vsel %vm14031_vm1, %v3322_v22, 0.0  ;;  %vm14032_vm11 = vmmov %vm14031_vm1  ;;  %v10964_v39 = vld [vmem:[%s7975_s6 + $0x90] sm:$0xff] }
 0x247   : > { %v3683_v53 = vadd.f32 %v3653_v42, %v3651_v41  ;;  %v2901_v14 = vrot.slane %v2900_v62, 1  ;;  %v2921_v1 = vadd.f32 %v2920_v40, %v2919_v37  ;;  %v3462_v15 = vadd.f32 %v3412_v0, %v3410_v8  ;;  %v3326_v61 = vpop.f32.mrf.mxu0  ;;  %14033 = vst [vmem:[#allocation36_spill] sm:$0xff] %v10964_v39  ;;  %v3568_v49 = vpop.f32.mrf.mxu1  ;;  %vm2931_vm1 = vmand %vm10502_vm0, %vm9529_vm2 }
 0x248   : > { %v3654_v23 = vsel %vm14032_vm11, %v3564_v35, 0.0  ;;  %7475 = vmatmul.mubr.msk.f32.gmra.mxu0 %vm429_vm6, %v10964_v39  ;;  %v3218_v59 = vrot.slane %v3217_v12, 1  ;;  %v3238_v42 = vadd.f32 %v3237_v16, %v3236_v32  ;;  %vm14034_vm8 = vcmp.eq.s32.totalorder %v8562_v38, %v10358_v55  ;;  %7493 = vmatmul.mubr.msk.f32.gmra.mxu1 %vm429_vm6, %v10514_v20  ;;  %v14037_v32 = vld [vmem:[#allocation33_spill] sm:$0xff]  ;;  %v14038_v16 = vld [vmem:[#allocation18_spill] sm:$0xff] }
 0x249   : > { %v3704_v41 = vadd.f32 %v3654_v23, %v3652_v30  ;;  %v3413_v22 = vsel %vm14034_vm8, %v3326_v61, 0.0  ;;  %4939 = vmatprep.mubr.f32.mxu0 %v13792_v36  ;;  %v2922_v40 = vrot.slane %v2921_v1, 1  ;;  %vm14036_vm11 = vmmov %vm14034_vm8  ;;  %v3328_v37 = vpop.f32.mrf.mxu0  ;;  %5181 = vmatprep.mubr.f32.mxu1 %v13792_v36  ;;  %v2933_v20 = vmul.f32 %v14038_v16, %v14037_v32  ;;  %v3570_v39 = vpop.f32.mrf.mxu1 }
 0x24a   : > { %v3442_v8 = vadd.f32 %v3441_v25, %v3413_v22  ;;  %v3655_v30 = vsel %vm14036_vm11, %v3568_v49, 0.0  ;;  %v3239_v0 = vrot.slane %v3238_v42, 1  ;;  %vm14039_vm8 = vcmp.eq.s32.totalorder %v8562_v38, %v10370_v47  ;;  %vm11002_vm11 = vmand %vm2931_vm1, %vm9562_vm9 }
 0x24b   : > { %v3684_v23 = vadd.f32 %v3683_v53, %v3655_v30  ;;  %v3414_v61 = vsel %vm14039_vm8, %v3328_v37, 0.0  ;;  %v2902_v34 = vadd.f32 %v2901_v14, %v2900_v62  ;;  %v2923_v2 = vadd.f32 %v2922_v40, %v2921_v1  ;;  %vm14040_vm12 = vmmov %vm14039_vm8  ;;  %v3332_v49 = vpop.f32.mrf.mxu0 }
 0x24c   : > { %v3463_v25 = vadd.f32 %v3462_v15, %v3414_v61  ;;  %v3656_v22 = vsel %vm14040_vm12, %v3570_v39, 0.0  ;;  %7476 = vmatmul.mubr.msk.f32.gmra.mxu0 %vm429_vm6, %v10991_v44  ;;  %v3219_v16 = vadd.f32 %v3218_v59, %v3217_v12  ;;  %v3240_v62 = vadd.f32 %v3239_v0, %v3238_v42  ;;  %v3574_v39 = vpop.f32.mrf.mxu1  ;;  %7494 = vmatmul.mubr.msk.f32.gmra.mxu1 %vm429_vm6, %v10550_v9  ;;  %v11027_v61 = vld [vmem:[%s7975_s6 + $0xa0] sm:$0xff] }
 0x24d   : > { %v3705_v1 = vadd.f32 %v3704_v41, %v3656_v22  ;;  %vm14044_vm12 = vcmp.eq.s32.totalorder %v8595_v7, %v10358_v55  ;;  %4945 = vmatprep.mubr.f32.mxu0 %v13792_v36  ;;  %v2926_v19 = vcombine.low %v2902_v34, %v2923_v2  ;;  %v3334_v40 = vpop.f32.mrf.mxu0  ;;  %5187 = vmatprep.mubr.f32.mxu1 %v13792_v36  ;;  %v11021_v0 = vsel %vm11002_vm11, %v2933_v20, 0.0 }
 0x24e   : > { %v3415_v15 = vsel %vm14044_vm12, %v3332_v49, 0.0  ;;  %vm14045_vm0 = vmmov %vm14044_vm12  ;;  %v3243_v42 = vcombine.low %v3219_v16, %v3240_v62  ;;  %vm14046_vm1 = vcmp.eq.s32.totalorder %v8595_v7, %v10370_v47  ;;  %v3576_v37 = vpop.f32.mrf.mxu1  ;;  %vm14048_vm12 = vcmp.eq.s32.totalorder %v8626_v46, %v10358_v55 }
 0x24f   : > { %v3443_v12 = vadd.f32 %v3442_v8, %v3415_v15  ;;  %v3657_v59 = vsel %vm14045_vm0, %v3574_v39, 0.0  ;;  %v3416_v30 = vsel %vm14046_vm1, %v3334_v40, 0.0  ;;  %v2927_v9 = vrot.slane %v2926_v19, 6  ;;  %vm14047_vm8 = vmmov %vm14046_vm1  ;;  %v3338_v8 = vpop.f32.mrf.mxu0  ;;  %v14051_v19 = vld [vmem:[#allocation24_spill] sm:$0xff] }
 0x250   : > { %v3685_v41 = vadd.f32 %v3684_v23, %v3657_v59  ;;  %v3464_v34 = vadd.f32 %v3463_v25, %v3416_v30  ;;  %v3658_v2 = vsel %vm14047_vm8, %v3576_v37, 0.0  ;;  %7477 = vmatmul.mubr.msk.f32.gmra.mxu0 %vm429_vm6, %v11027_v61  ;;  %v3244_v23 = vrot.slane %v3243_v42, 6  ;;  %v3580_v16 = vpop.f32.mrf.mxu1  ;;  %7495 = vmatmul.mubr.msk.f32.gmra.mxu1 %vm429_vm6, %v10580_v28  ;;  %vm14049_vm11 = vmmov %vm14048_vm12  ;;  %v11053_v42 = vld [vmem:[%s7975_s6 + $0xa8] sm:$0xff] }
 0x251   : > { %v3706_v22 = vadd.f32 %v3705_v1, %v3658_v2  ;;  %v3417_v49 = vsel %vm14048_vm12, %v3338_v8, 0.0  ;;  %4951 = vmatprep.mubr.f32.mxu0 %v13792_v36  ;;  %v2929_v20 = vmul.f32 %v2927_v9, %v10569_v51  ;;  %v3659_v14 = vsel %vm14049_vm11, %v3580_v16, 0.0  ;;  %v3340_v62 = vpop.f32.mrf.mxu0  ;;  %5193 = vmatprep.mubr.f32.mxu1 %v13792_v36 }
 0x252   : > { %v3444_v25 = vadd.f32 %v3443_v12, %v3417_v49  ;;  %v3246_v1 = vmul.f32 %v3244_v23, %v11021_v0  ;;  %v3686_v15 = vadd.f32 %v3685_v41, %v3659_v14  ;;  %vm14050_vm0 = vcmp.eq.s32.totalorder %v8626_v46, %v10370_v47  ;;  %v3582_v28 = vpop.f32.mrf.mxu1 }
 0x253   : > { %v3418_v39 = vsel %vm14050_vm0, %v3340_v62, 0.0  ;;  %v11047_v59 = vadd.f32 %v2929_v20, %v14051_v19  ;;  %vm14052_vm1 = vmmov %vm14050_vm0  ;;  %v3344_v40 = vpop.f32.mrf.mxu0  ;;  %vm14054_vm8 = vcmp.eq.s32.totalorder %v8651_v48, %v10358_v55  ;;  %vm14056_vm11 = vcmp.eq.s32.totalorder %v8651_v48, %v10370_v47  ;;  %v11077_v20 = vld [vmem:[%s7975_s6 + $0xb0] sm:$0xff] }
 0x254   : > { %v3465_v51 = vadd.f32 %v3464_v34, %v3418_v39  ;;  %v3660_v12 = vsel %vm14052_vm1, %v3582_v28, 0.0  ;;  %7478 = vmatmul.mubr.msk.f32.gmra.mxu0 %vm429_vm6, %v11053_v42  ;;  %v11058_v41 = vadd.f32 %v3246_v1, %v10604_v5  ;;  %v3419_v37 = vsel %vm14054_vm8, %v3344_v40, 0.0  ;;  %v3586_v9 = vpop.f32.mrf.mxu1  ;;  %7496 = vmatmul.mubr.msk.f32.gmra.mxu1 %vm429_vm6, %v10613_v11  ;;  %vm14055_vm12 = vmmov %vm14054_vm8 }
 0x255   : > { %v3707_v30 = vadd.f32 %v3706_v22, %v3660_v12  ;;  %4957 = vmatprep.mubr.f32.mxu0 %v13792_v36  ;;  %v3445_v34 = vadd.f32 %v3444_v25, %v3419_v37  ;;  %v3661_v2 = vsel %vm14055_vm12, %v3586_v9, 0.0  ;;  %v3346_v8 = vpop.f32.mrf.mxu0  ;;  %5199 = vmatprep.mubr.f32.mxu1 %v13792_v36  ;;  %vm14057_vm0 = vmmov %vm14056_vm11  ;;  %vm14058_vm1 = vcmp.eq.s32.totalorder %v8676_v50, %v10358_v55 }
 0x256   : > { %14053 = vst [vmem:[#allocation8_spill] sm:$0xff] %v11058_v41  ;;  %v3687_v5 = vadd.f32 %v3686_v15, %v3661_v2  ;;  %v3420_v23 = vsel %vm14056_vm11, %v3346_v8, 0.0  ;;  %v3588_v22 = vpop.f32.mrf.mxu1  ;;  %vm14059_vm8 = vmmov %vm14058_vm1  ;;  %vm14060_vm12 = vcmp.eq.s32.totalorder %v8676_v50, %v10370_v47  ;;  %v11396_v41 = vld [vmem:[%s7975_s6 + $0x18] sm:$0xff] }
 0x257   : > { %v3466_v49 = vadd.f32 %v3465_v51, %v3420_v23  ;;  %v3662_v11 = vsel %vm14057_vm0, %v3588_v22, 0.0  ;;  %v3350_v16 = vpop.f32.mrf.mxu0  ;;  %vm14061_vm11 = vmmov %vm14060_vm12  ;;  %vm14062_vm0 = vcmp.eq.s32.totalorder %v8701_v52, %v10358_v55 }
 0x258   : > { %7479 = vmatmul.mubr.msk.f32.gmra.mxu0 %vm429_vm6, %v11077_v20  ;;  %v3708_v25 = vadd.f32 %v3707_v30, %v3662_v11  ;;  %v3421_v14 = vsel %vm14058_vm1, %v3350_v16, 0.0  ;;  %v3592_v62 = vpop.f32.mrf.mxu1  ;;  %7497 = vmatmul.mubr.msk.f32.gmra.mxu1 %vm429_vm6, %v10638_v21  ;;  %v11098_v30 = vld [vmem:[%s7975_s6 + $0xb8] sm:$0xff]  ;;  %vm14063_vm1 = vmmov %vm14062_vm0 }
 0x259   : > { %4963 = vmatprep.mubr.f32.mxu0 %v13792_v36  ;;  %v3446_v1 = vadd.f32 %v3445_v34, %v3421_v14  ;;  %v3663_v15 = vsel %vm14059_vm8, %v3592_v62, 0.0  ;;  %v3352_v39 = vpop.f32.mrf.mxu0  ;;  %5205 = vmatprep.mubr.f32.mxu1 %v13792_v36  ;;  %vm14064_vm8 = vcmp.eq.s32.totalorder %v8701_v52, %v10370_v47 }
 0x25a   : > { %v3688_v28 = vadd.f32 %v3687_v5, %v3663_v15  ;;  %v3422_v19 = vsel %vm14060_vm12, %v3352_v39, 0.0  ;;  %v3594_v51 = vpop.f32.mrf.mxu1  ;;  %vm14065_vm12 = vmmov %vm14064_vm8 }
 0x25b   : > { %v3467_v12 = vadd.f32 %v3466_v49, %v3422_v19  ;;  %v3664_v21 = vsel %vm14061_vm11, %v3594_v51, 0.0  ;;  %v3356_v40 = vpop.f32.mrf.mxu0  ;;  %vm14066_vm11 = vcmp.eq.s32.totalorder %v8726_v54, %v10358_v55 }
 0x25c   : > { %7480 = vmatmul.mubr.msk.f32.gmra.mxu0 %vm429_vm6, %v11098_v30  ;;  %v3709_v37 = vadd.f32 %v3708_v25, %v3664_v21  ;;  %v3423_v9 = vsel %vm14062_vm0, %v3356_v40, 0.0  ;;  %v3598_v34 = vpop.f32.mrf.mxu1  ;;  %7498 = vmatmul.mubr.msk.f32.gmra.mxu1 %vm429_vm6, %v10663_v57  ;;  %v11119_v25 = vld [vmem:[%s7975_s6 + $0xc0] sm:$0xff]  ;;  %vm14067_vm0 = vmmov %vm14066_vm11 }
 0x25d   : > { %4969 = vmatprep.mubr.f32.mxu0 %v13792_v36  ;;  %v3447_v2 = vadd.f32 %v3446_v1, %v3423_v9  ;;  %v3665_v8 = vsel %vm14063_vm1, %v3598_v34, 0.0  ;;  %v3358_v5 = vpop.f32.mrf.mxu0  ;;  %5211 = vmatprep.mubr.f32.mxu1 %v13792_v36  ;;  %vm14068_vm1 = vcmp.eq.s32.totalorder %v8726_v54, %v10370_v47 }
 0x25e   : > { %v3689_v23 = vadd.f32 %v3688_v28, %v3665_v8  ;;  %v3424_v22 = vsel %vm14064_vm8, %v3358_v5, 0.0  ;;  %v3600_v49 = vpop.f32.mrf.mxu1  ;;  %vm14069_vm8 = vmmov %vm14068_vm1 }
 0x25f   : > { %v3468_v11 = vadd.f32 %v3467_v12, %v3424_v22  ;;  %v3666_v57 = vsel %vm14065_vm12, %v3600_v49, 0.0  ;;  %v3362_v16 = vpop.f32.mrf.mxu0  ;;  %vm14070_vm12 = vcmp.eq.s32.totalorder %v8751_v56, %v10358_v55 }
 0x260   : > { %7481 = vmatmul.mubr.msk.f32.gmra.mxu0 %vm429_vm6, %v11119_v25  ;;  %v3710_v14 = vadd.f32 %v3709_v37, %v3666_v57  ;;  %v3425_v62 = vsel %vm14066_vm11, %v3362_v16, 0.0  ;;  %v3604_v1 = vpop.f32.mrf.mxu1  ;;  %7499 = vmatmul.mubr.msk.f32.gmra.mxu1 %vm429_vm6, %v10688_v43  ;;  %v11140_v37 = vld [vmem:[%s7975_s6 + $0xc8] sm:$0xff]  ;;  %vm14071_vm11 = vmmov %vm14070_vm12 }
 0x261   : > { %4975 = vmatprep.mubr.f32.mxu0 %v13792_v36  ;;  %v3448_v15 = vadd.f32 %v3447_v2, %v3425_v62  ;;  %v3667_v39 = vsel %vm14067_vm0, %v3604_v1, 0.0  ;;  %v3364_v28 = vpop.f32.mrf.mxu0  ;;  %5217 = vmatprep.mubr.f32.mxu1 %v13792_v36  ;;  %vm14072_vm0 = vcmp.eq.s32.totalorder %v8751_v56, %v10370_v47 }
 0x262   : > { %v3690_v19 = vadd.f32 %v3689_v23, %v3667_v39  ;;  %v3426_v51 = vsel %vm14068_vm1, %v3364_v28, 0.0  ;;  %v3606_v12 = vpop.f32.mrf.mxu1  ;;  %vm14073_vm1 = vmmov %vm14072_vm0 }
 0x263   : > { %v3469_v21 = vadd.f32 %v3468_v11, %v3426_v51  ;;  %v3668_v43 = vsel %vm14069_vm8, %v3606_v12, 0.0  ;;  %v3368_v40 = vpop.f32.mrf.mxu0  ;;  %vm14074_vm8 = vcmp.eq.s32.totalorder %v8776_v58, %v10358_v55 }
 0x264   : > { %7482 = vmatmul.mubr.msk.f32.gmra.mxu0 %vm429_vm6, %v11140_v37  ;;  %v3711_v9 = vadd.f32 %v3710_v14, %v3668_v43  ;;  %v3427_v34 = vsel %vm14070_vm12, %v3368_v40, 0.0  ;;  %v3610_v2 = vpop.f32.mrf.mxu1  ;;  %7500 = vmatmul.mubr.msk.f32.gmra.mxu1 %vm429_vm6, %v10713_v33  ;;  %v11161_v14 = vld [vmem:[%s7975_s6 + $0xd0] sm:$0xff]  ;;  %vm14075_vm12 = vmmov %vm14074_vm8 }
 0x265   : > { %4981 = vmatprep.mubr.f32.mxu0 %v13792_v36  ;;  %v3449_v8 = vadd.f32 %v3448_v15, %v3427_v34  ;;  %v3669_v5 = vsel %vm14071_vm11, %v3610_v2, 0.0  ;;  %v3370_v23 = vpop.f32.mrf.mxu0  ;;  %5223 = vmatprep.mubr.f32.mxu1 %v13792_v36  ;;  %vm14076_vm11 = vcmp.eq.s32.totalorder %v8776_v58, %v10370_v47 }
 0x266   : > { %v3691_v22 = vadd.f32 %v3690_v19, %v3669_v5  ;;  %v3428_v49 = vsel %vm14072_vm0, %v3370_v23, 0.0  ;;  %v3612_v11 = vpop.f32.mrf.mxu1  ;;  %vm14077_vm0 = vmmov %vm14076_vm11 }
 0x267   : > { %v3470_v57 = vadd.f32 %v3469_v21, %v3428_v49  ;;  %v3670_v33 = vsel %vm14073_vm1, %v3612_v11, 0.0  ;;  %v3374_v16 = vpop.f32.mrf.mxu0  ;;  %vm14078_vm1 = vcmp.eq.s32.totalorder %v8802_v60, %v10358_v55 }
 0x268   : > { %7483 = vmatmul.mubr.msk.f32.gmra.mxu0 %vm429_vm6, %v11161_v14  ;;  %v3712_v62 = vadd.f32 %v3711_v9, %v3670_v33  ;;  %v3429_v1 = vsel %vm14074_vm8, %v3374_v16, 0.0  ;;  %v3616_v15 = vpop.f32.mrf.mxu1  ;;  %7501 = vmatmul.mubr.msk.f32.gmra.mxu1 %vm429_vm6, %v10738_v17  ;;  %v11182_v9 = vld [vmem:[%s7975_s6 + $0xd8] sm:$0xff]  ;;  %vm14079_vm8 = vmmov %vm14078_vm1 }
 0x269   : > { %4987 = vmatprep.mubr.f32.mxu0 %v13792_v36  ;;  %v3450_v39 = vadd.f32 %v3449_v8, %v3429_v1  ;;  %v3671_v28 = vsel %vm14075_vm12, %v3616_v15, 0.0  ;;  %v3376_v19 = vpop.f32.mrf.mxu0  ;;  %5229 = vmatprep.mubr.f32.mxu1 %v13792_v36  ;;  %vm14080_vm12 = vcmp.eq.s32.totalorder %v8802_v60, %v10370_v47 }
 0x26a   : > { %v3692_v51 = vadd.f32 %v3691_v22, %v3671_v28  ;;  %v3430_v12 = vsel %vm14076_vm11, %v3376_v19, 0.0  ;;  %v3618_v21 = vpop.f32.mrf.mxu1  ;;  %vm14081_vm11 = vmmov %vm14080_vm12 }
 0x26b   : > { %v3471_v43 = vadd.f32 %v3470_v57, %v3430_v12  ;;  %v3672_v17 = vsel %vm14077_vm0, %v3618_v21, 0.0  ;;  %v3380_v40 = vpop.f32.mrf.mxu0  ;;  %vm14082_vm0 = vcmp.eq.s32.totalorder %v8833_v63, %v10358_v55 }
 0x26c   : > { %7484 = vmatmul.mubr.msk.f32.gmra.mxu0 %vm429_vm6, %v11182_v9  ;;  %v3713_v34 = vadd.f32 %v3712_v62, %v3672_v17  ;;  %v3431_v2 = vsel %vm14078_vm1, %v3380_v40, 0.0  ;;  %v3622_v8 = vpop.f32.mrf.mxu1  ;;  %7502 = vmatmul.mubr.msk.f32.gmra.mxu1 %vm429_vm6, %v10763_v31  ;;  %v11203_v62 = vld [vmem:[%s7975_s6 + $0xe0] sm:$0xff]  ;;  %vm14083_vm1 = vmmov %vm14082_vm0 }
 0x26d   : > { %4993 = vmatprep.mubr.f32.mxu0 %v13792_v36  ;;  %v3451_v5 = vadd.f32 %v3450_v39, %v3431_v2  ;;  %v3673_v23 = vsel %vm14079_vm8, %v3622_v8, 0.0  ;;  %v3382_v22 = vpop.f32.mrf.mxu0  ;;  %5235 = vmatprep.mubr.f32.mxu1 %v13792_v36  ;;  %vm14084_vm8 = vcmp.eq.s32.totalorder %v8833_v63, %v10370_v47  ;;  %v14086_v2 = vld [vmem:[#allocation15_spill] sm:$0xff] }
 0x26e   : > { %v3693_v49 = vadd.f32 %v3692_v51, %v3673_v23  ;;  %v3432_v11 = vsel %vm14080_vm12, %v3382_v22, 0.0  ;;  %v3624_v57 = vpop.f32.mrf.mxu1  ;;  %vm14085_vm12 = vmmov %vm14084_vm8  ;;  %v3745_v8 = vand.u32 127, %v14086_v2 }
 0x26f   : > { %v3472_v33 = vadd.f32 %v3471_v43, %v3432_v11  ;;  %v3674_v31 = vsel %vm14081_vm11, %v3624_v57, 0.0  ;;  %v3386_v16 = vpop.f32.mrf.mxu0  ;;  %vm14087_vm11 = vcmp.eq.s32.totalorder %v8859_v3, %v10358_v55 }
 0x270   : > { %7485 = vmatmul.mubr.msk.f32.gmra.mxu0 %vm429_vm6, %v11203_v62  ;;  %v3714_v1 = vadd.f32 %v3713_v34, %v3674_v31  ;;  %v3433_v15 = vsel %vm14082_vm0, %v3386_v16, 0.0  ;;  %v3628_v39 = vpop.f32.mrf.mxu1  ;;  %7503 = vmatmul.mubr.msk.f32.gmra.mxu1 %vm429_vm6, %v10788_v6  ;;  %v11224_v34 = vld [vmem:[%s7975_s6 + $0xe8] sm:$0xff]  ;;  %vm14088_vm0 = vmmov %vm14087_vm11 }
 0x271   : > { %4999 = vmatprep.mubr.f32.mxu0 %v13792_v36  ;;  %v3452_v28 = vadd.f32 %v3451_v5, %v3433_v15  ;;  %v3675_v19 = vsel %vm14083_vm1, %v3628_v39, 0.0  ;;  %v3388_v51 = vpop.f32.mrf.mxu0  ;;  %5241 = vmatprep.mubr.f32.mxu1 %v13792_v36  ;;  %vm14089_vm1 = vcmp.eq.s32.totalorder %v8859_v3, %v10370_v47 }
 0x272   : > { %v3694_v12 = vadd.f32 %v3693_v49, %v3675_v19  ;;  %v3434_v21 = vsel %vm14084_vm8, %v3388_v51, 0.0  ;;  %v3630_v43 = vpop.f32.mrf.mxu1  ;;  %vm14091_vm8 = vmmov %vm14089_vm1  ;;  %v11249_v19 = vld [vmem:[%s7975_s6 + $0xf0] sm:$0xff]  ;;  %v3769_v51 = vrot.slane %v3745_v8, %v7957_v24 }
 0x273   : > { %v3473_v17 = vadd.f32 %v3472_v33, %v3434_v21  ;;  %v3676_v6 = vsel %vm14085_vm12, %v3630_v43, 0.0  ;;  %v3392_v40 = vpop.f32.mrf.mxu0  ;;  %vm14092_vm12 = vcmp.eq.s32.totalorder %v13900_v27, %v10358_v55 }
 0x274   : > { %7486 = vmatmul.mubr.msk.f32.gmra.mxu0 %vm429_vm6, %v11224_v34  ;;  %v3715_v5 = vadd.f32 %v3714_v1, %v3676_v6  ;;  %v3435_v23 = vsel %vm14087_vm11, %v3392_v40, 0.0  ;;  %v3634_v22 = vpop.f32.mrf.mxu1  ;;  %7504 = vmatmul.mubr.msk.f32.gmra.mxu1 %vm429_vm6, %v10818_v45  ;;  %v14090_v1 = vshra.s32 %v10803_v4, 7  ;;  %vm14093_vm11 = vmmov %vm14092_vm12 }
 0x275   : > { %5005 = vmatprep.mubr.f32.mxu0 %v13792_v36  ;;  %v3453_v49 = vadd.f32 %v3452_v28, %v3435_v23  ;;  %v3677_v11 = vsel %vm14088_vm0, %v3634_v22, 0.0  ;;  %v3394_v57 = vpop.f32.mrf.mxu0  ;;  %5247 = vmatprep.mubr.f32.mxu1 %v13792_v36  ;;  %vm14094_vm0 = vcmp.eq.s32.totalorder %v13900_v27, %v10370_v47 }
 0x276   : > { %v3695_v33 = vadd.f32 %v3694_v12, %v3677_v11  ;;  %v3436_v31 = vsel %vm14089_vm1, %v3394_v57, 0.0  ;;  %v3636_v16 = vpop.f32.mrf.mxu1  ;;  %v6157_v45 = vrot.slane %v14090_v1, %v7957_v24  ;;  %vm14095_vm1 = vmmov %vm14094_vm0  ;;  %v11273_v57 = vld [vmem:[%s7975_s6 + $0xf8] sm:$0xff] }
 0x277   : > { %v3474_v15 = vadd.f32 %v3473_v17, %v3436_v31  ;;  %v3678_v39 = vsel %vm14091_vm8, %v3636_v16, 0.0  ;;  %v3398_v28 = vpop.f32.mrf.mxu0  ;;  %v3773_v17 = vrot.slane %v3745_v8, %v13895_v29  ;;  %vm14096_vm8 = vcmp.eq.s32.totalorder %v14008_v13, %v10358_v55 }
 0x278   : > { %7487 = vmatmul.mubr.msk.f32.gmra.mxu0 %vm429_vm6, %v11249_v19  ;;  %v3716_v12 = vadd.f32 %v3715_v5, %v3678_v39  ;;  %v3437_v21 = vsel %vm14092_vm12, %v3398_v28, 0.0  ;;  %v3640_v43 = vpop.f32.mrf.mxu1  ;;  %7505 = vmatmul.mubr.msk.f32.gmra.mxu1 %vm429_vm6, %v10847_v18  ;;  %v6165_v18 = vrot.slane %v6157_v45, %v7957_v24  ;;  %vm14097_vm12 = vmmov %vm14096_vm8 }
 0x279   : > { %5011 = vmatprep.mubr.f32.mxu0 %v13792_v36  ;;  %v3454_v6 = vadd.f32 %v3453_v49, %v3437_v21  ;;  %v3679_v40 = vsel %vm14093_vm11, %v3640_v43, 0.0  ;;  %v3400_v2 = vpop.f32.mrf.mxu0  ;;  %5253 = vmatprep.mubr.f32.mxu1 %v13792_v36  ;;  %v11287_v45 = vrot.slane %v3773_v17, %v7957_v24  ;;  %vm14098_vm11 = vcmp.eq.s32.totalorder %v14008_v13, %v10370_v47  ;;  %v14105_v47 = vld [vmem:[#allocation14_spill] sm:$0xff] }
 0x27a   : > { %v3696_v5 = vadd.f32 %v3695_v33, %v3679_v40  ;;  %v3438_v23 = vsel %vm14094_vm0, %v3400_v2, 0.0  ;;  %v3642_v22 = vpop.f32.mrf.mxu1  ;;  %v11278_v33 = vrot.slane %v3769_v51, %v7957_v24  ;;  %vm11297_vm0 = vcmp.eq.s32.totalorder %v14011_v10, %v6165_v18  ;;  %v11307_v40 = vld [vmem:[%s7975_s6] sm:$0xff] }
 0x27b   : > { %v3475_v11 = vadd.f32 %v3474_v15, %v3438_v23  ;;  %v3680_v8 = vsel %vm14095_vm1, %v3642_v22, 0.0  ;;  %v3404_v49 = vpop.f32.mrf.mxu0  ;;  %vm14101_vm1 = vmmov %vm14098_vm11  ;;  %v14102_v22 = vld [vmem:[#allocation20_spill] sm:$0xff]  ;;  %v14103_v18 = vmov 1.0  }
 0x27c   : > { %7488 = vmatmul.mubr.msk.f32.gmra.mxu0 %vm429_vm6, %v11273_v57  ;;  %v3717_v31 = vadd.f32 %v3716_v12, %v3680_v8  ;;  %v3439_v16 = vsel %vm14096_vm8, %v3404_v49, 0.0  ;;  %v3646_v1 = vpop.f32.mrf.mxu1  ;;  %7506 = vmatmul.mubr.msk.f32.gmra.mxu1 %vm429_vm6, %v10876_v26  ;;  %vm13605_vm8 = vcmp.eq.s32.totalorder %v14011_v10, %v11278_v33 }
 0x27d   : > { %5485 = vmatprep.mubr.f32.mxu0 %v13792_v36  ;;  %v3455_v15 = vadd.f32 %v3454_v6, %v3439_v16  ;;  %v3681_v39 = vsel %vm14097_vm12, %v3646_v1, 0.0  ;;  %v3406_v28 = vpop.f32.mrf.mxu0  ;;  %5727 = vmatprep.mubr.f32.mxu1 %v13792_v36  ;;  %vm13638_vm12 = vcmp.eq.s32.totalorder %v14011_v10, %v11287_v45 }
 0x27e   : > { %v3697_v51 = vadd.f32 %v3696_v5, %v3681_v39  ;;  %v3440_v12 = vsel %vm14098_vm11, %v3406_v28, 0.0  ;;  %v3648_v26 = vpop.f32.mrf.mxu1  ;;  %vm13609_vm11 = vcmp.eq.s32.totalorder %v8562_v38, %v11287_v45 }
 0x27f   : > { %v3456_v43 = vrot.slane %v3455_v15, 4  ;;  %v3476_v17 = vadd.f32 %v3475_v11, %v3440_v12  ;;  %v3682_v55 = vsel %vm14101_vm1, %v3648_v26, 0.0  ;;  %v3880_v6 = vpop.f32.mrf.mxu0  ;;  %vm13635_vm1 = vcmp.eq.s32.totalorder %v14105_v47, %v11287_v45 }
 0x280   : > { %7509 = vmatmul.mubr.msk.f32.vlgmr.msra.gmra.mxu0 %vm429_vm6, %v11307_v40  ;;  %v3698_v2 = vrot.slane %v3697_v51, 4  ;;  %v3718_v5 = vadd.f32 %v3717_v31, %v3682_v55  ;;  %v4122_v23 = vpop.f32.mrf.mxu1  ;;  %7527 = vmatmul.mubr.msk.f32.vlgmr.msra.gmra.mxu1 %vm429_vm6, %v14102_v22 }
 0x281   : > { %7544 = vmatpush1.msk.msra.mxu0 %vm10894_vm7, %v14103_v18  ;;  %v3457_v8 = vadd.f32 %v3456_v43, %v3455_v15  ;;  %v3477_v49 = vrot.slane %v3476_v17, 4  ;;  %7562 = vmatpush1.msk.msra.mxu1 %vm11297_vm0, %v14103_v18  ;;  %v3882_v31 = vpop.f32.mrf.mxu0  ;;  %vm13634_vm7 = vcmp.eq.s32.totalorder %v8562_v38, %v11278_v33  ;;  %v3975_v15 = vsel %vm13605_vm8, %v3880_v6, 0.0  ;;  %v11344_v6 = vld [vmem:[%s7975_s6 + $0x8] sm:$0xff] }
 0x282   : > { %5491 = vmatprep.mubr.f32.mxu0 %v13792_v36  ;;  %v3699_v16 = vadd.f32 %v3698_v2, %v3697_v51  ;;  %v3719_v1 = vrot.slane %v3718_v5, 4  ;;  %v4124_v39 = vpop.f32.mrf.mxu1  ;;  %5733 = vmatprep.mubr.f32.mxu1 %v13792_v36  ;;  %v4217_v51 = vsel %vm13605_vm8, %v4122_v23, 0.0  ;;  %v3976_v43 = vsel %vm13638_vm12, %v3882_v31, 0.0 }
 0x283   : > { %7579 = vmatprep.subr.msk.mxu0 %vm10918_vm14, %v14103_v18  ;;  %v3458_v12 = vrot.slane %v3457_v8, 2  ;;  %v3478_v26 = vadd.f32 %v3477_v49, %v3476_v17  ;;  %v3886_v55 = vpop.f32.mrf.mxu0  ;;  %7597 = vmatprep.subr.msk.mxu1 %vm10918_vm14, %v14103_v18  ;;  %v4218_v23 = vsel %vm13638_vm12, %v4124_v39, 0.0  ;;  %vm14107_vm8 = vcmp.eq.s32.totalorder %v14105_v47, %v11278_v33  ;;  %v14108_v49 = vld [vmem:[#allocation22_spill] sm:$0xff] }
 0x284   : > { %7510 = vmatmul.mubr.msk.f32.gmra.mxu0 %vm429_vm6, %v11344_v6  ;;  %v3700_v2 = vrot.slane %v3699_v16, 2  ;;  %v3720_v17 = vadd.f32 %v3719_v1, %v3718_v5  ;;  %v3977_v22 = vsel %vm14107_vm8, %v3886_v55, 0.0  ;;  %v4128_v11 = vpop.f32.mrf.mxu1  ;;  %7528 = vmatmul.mubr.msk.f32.gmra.mxu1 %vm429_vm6, %v14108_v49  ;;  %vm14109_vm14 = vmmov %vm14107_vm8  ;;  %vm13610_vm8 = vcmp.eq.s32.totalorder %v8595_v7, %v11278_v33 }
 0x285   : > { %5497 = vmatprep.mubr.f32.mxu0 %v13792_v36  ;;  %v3459_v31 = vadd.f32 %v3458_v12, %v3457_v8  ;;  %v3479_v28 = vrot.slane %v3478_v26, 2  ;;  %v4007_v4 = vadd.f32 %v3977_v22, %v3975_v15  ;;  %v4219_v5 = vsel %vm14109_vm14, %v4128_v11, 0.0  ;;  %v3888_v1 = vpop.f32.mrf.mxu0  ;;  %5739 = vmatprep.mubr.f32.mxu1 %v13792_v36  ;;  %v11371_v11 = vld [vmem:[%s7975_s6 + $0x10] sm:$0xff] }
 0x286   : > { %v3701_v39 = vadd.f32 %v3700_v2, %v3699_v16  ;;  %v3721_v53 = vrot.slane %v3720_v17, 2  ;;  %v4249_v55 = vadd.f32 %v4219_v5, %v4217_v51  ;;  %v3978_v49 = vsel %vm13635_vm1, %v3888_v1, 0.0  ;;  %v4130_v32 = vpop.f32.mrf.mxu1  ;;  %14110 = vst [vmem:[#allocation12_spill] sm:$0xff] %v11371_v11 }
 0x287   : > { %v3460_v35 = vrot.slane %v3459_v31, 1  ;;  %v3480_v8 = vadd.f32 %v3479_v28, %v3478_v26  ;;  %v4028_v12 = vadd.f32 %v3978_v49, %v3976_v43  ;;  %v4220_v15 = vsel %vm13635_vm1, %v4130_v32, 0.0  ;;  %v3892_v22 = vpop.f32.mrf.mxu0  ;;  %v14111_v26 = vld [vmem:[#allocation36_spill] sm:$0xff] }
 0x288   : > { %7511 = vmatmul.mubr.msk.f32.gmra.mxu0 %vm429_vm6, %v11371_v11  ;;  %v3702_v16 = vrot.slane %v3701_v39, 1  ;;  %v3722_v51 = vadd.f32 %v3721_v53, %v3720_v17  ;;  %v4270_v2 = vadd.f32 %v4220_v15, %v4218_v23  ;;  %v3979_v5 = vsel %vm13634_vm7, %v3892_v22, 0.0  ;;  %v4134_v1 = vpop.f32.mrf.mxu1  ;;  %7529 = vmatmul.mubr.msk.f32.gmra.mxu1 %vm429_vm6, %v14111_v26 }
 0x289   : > { %5503 = vmatprep.mubr.f32.mxu0 %v13792_v36  ;;  %v3481_v32 = vrot.slane %v3480_v8, 1  ;;  %v4008_v43 = vadd.f32 %v4007_v4, %v3979_v5  ;;  %v4221_v28 = vsel %vm13634_vm7, %v4134_v1, 0.0  ;;  %v3894_v49 = vpop.f32.mrf.mxu0  ;;  %5745 = vmatprep.mubr.f32.mxu1 %v13792_v36  ;;  %vm13611_vm14 = vcmp.eq.s32.totalorder %v8595_v7, %v11287_v45 }
 0x28a   : > { %v3723_v53 = vrot.slane %v3722_v51, 1  ;;  %v4250_v17 = vadd.f32 %v4249_v55, %v4221_v28  ;;  %v3980_v23 = vsel %vm13609_vm11, %v3894_v49, 0.0  ;;  %v4136_v15 = vpop.f32.mrf.mxu1  ;;  %v3461_v4 = vadd.f32 %v3460_v35, %v3459_v31 }
 0x28b   : > { %v3482_v22 = vadd.f32 %v3481_v32, %v3480_v8  ;;  %v4029_v5 = vadd.f32 %v4028_v12, %v3980_v23  ;;  %v4222_v1 = vsel %vm13609_vm11, %v4136_v15, 0.0  ;;  %v3898_v26 = vpop.f32.mrf.mxu0  ;;  %v3703_v55 = vadd.f32 %v3702_v16, %v3701_v39  ;;  %v11419_v23 = vld [vmem:[%s7975_s6 + $0x20] sm:$0xff] }
 0x28c   : > { %7512 = vmatmul.mubr.msk.f32.gmra.mxu0 %vm429_vm6, %v11396_v41  ;;  %v3724_v28 = vadd.f32 %v3723_v53, %v3722_v51  ;;  %v4271_v49 = vadd.f32 %v4270_v2, %v4222_v1  ;;  %v3981_v11 = vsel %vm13610_vm8, %v3898_v26, 0.0  ;;  %v4140_v35 = vpop.f32.mrf.mxu1  ;;  %7530 = vmatmul.mubr.msk.f32.gmra.mxu1 %vm429_vm6, %v10991_v44  ;;  %vm13612_vm11 = vcmp.eq.s32.totalorder %v8626_v46, %v11278_v33 }
 0x28d   : > { %5509 = vmatprep.mubr.f32.mxu0 %v13792_v36  ;;  %v3485_v31 = vcombine.low %v3461_v4, %v3482_v22  ;;  %v4009_v8 = vadd.f32 %v4008_v43, %v3981_v11  ;;  %v4223_v12 = vsel %vm13610_vm8, %v4140_v35, 0.0  ;;  %v3900_v39 = vpop.f32.mrf.mxu0  ;;  %5751 = vmatprep.mubr.f32.mxu1 %v13792_v36  ;;  %vm13613_vm8 = vcmp.eq.s32.totalorder %v8626_v46, %v11287_v45 }
 0x28e   : > { %v3727_v16 = vcombine.low %v3703_v55, %v3724_v28  ;;  %v4251_v51 = vadd.f32 %v4250_v17, %v4223_v12  ;;  %v3982_v44 = vsel %vm13611_vm14, %v3900_v39, 0.0  ;;  %v4142_v2 = vpop.f32.mrf.mxu1 }
 0x28f   : > { %v3486_v32 = vrot.slane %v3485_v31, 6  ;;  %v4030_v53 = vadd.f32 %v4029_v5, %v3982_v44  ;;  %v4224_v11 = vsel %vm13611_vm14, %v4142_v2, 0.0  ;;  %v3904_v43 = vpop.f32.mrf.mxu0  ;;  %vm13614_vm14 = vcmp.eq.s32.totalorder %v8651_v48, %v11278_v33  ;;  %v14112_v31 = vld [vmem:[#allocation11_spill] sm:$0xff] }
 0x290   : > { %7513 = vmatmul.mubr.msk.f32.gmra.mxu0 %vm429_vm6, %v11419_v23  ;;  %v3728_v17 = vrot.slane %v3727_v16, 6  ;;  %v4272_v15 = vadd.f32 %v4271_v49, %v4224_v11  ;;  %v3983_v4 = vsel %vm13612_vm11, %v3904_v43, 0.0  ;;  %v4146_v22 = vpop.f32.mrf.mxu1  ;;  %7531 = vmatmul.mubr.msk.f32.gmra.mxu1 %vm429_vm6, %v11027_v61  ;;  %v11449_v44 = vld [vmem:[%s7975_s6 + $0x28] sm:$0xff] }
 0x291   : > { %5515 = vmatprep.mubr.f32.mxu0 %v13792_v36  ;;  %v3488_v5 = vmul.f32 %v3486_v32, %v11021_v0  ;;  %v4010_v1 = vadd.f32 %v4009_v8, %v3983_v4  ;;  %v4225_v26 = vsel %vm13612_vm11, %v4146_v22, 0.0  ;;  %v3906_v55 = vpop.f32.mrf.mxu0  ;;  %5757 = vmatprep.mubr.f32.mxu1 %v13792_v36  ;;  %vm13615_vm11 = vcmp.eq.s32.totalorder %v8651_v48, %v11287_v45 }
 0x292   : > { %v3730_v28 = vmul.f32 %v3728_v17, %v11021_v0  ;;  %v4252_v49 = vadd.f32 %v4251_v51, %v4225_v26  ;;  %v3984_v61 = vsel %vm13613_vm8, %v3906_v55, 0.0  ;;  %v4148_v35 = vpop.f32.mrf.mxu1 }
 0x293   : > { %v11443_v8 = vadd.f32 %v3488_v5, %v14112_v31  ;;  %v4031_v12 = vadd.f32 %v4030_v53, %v3984_v61  ;;  %v4226_v39 = vsel %vm13613_vm8, %v4148_v35, 0.0  ;;  %v3910_v16 = vpop.f32.mrf.mxu0  ;;  %vm13616_vm8 = vcmp.eq.s32.totalorder %v8676_v50, %v11278_v33  ;;  %v11477_v5 = vld [vmem:[%s7975_s6 + $0x30] sm:$0xff] }
 0x294   : > { %7514 = vmatmul.mubr.msk.f32.gmra.mxu0 %vm429_vm6, %v11449_v44  ;;  %v11456_v0 = vadd.f32 %v3730_v28, %v11047_v59  ;;  %v4273_v51 = vadd.f32 %v4272_v15, %v4226_v39  ;;  %v3985_v2 = vsel %vm13614_vm14, %v3910_v16, 0.0  ;;  %v4152_v32 = vpop.f32.mrf.mxu1  ;;  %7532 = vmatmul.mubr.msk.f32.gmra.mxu1 %vm429_vm6, %v11053_v42 }
 0x295   : > { %5521 = vmatprep.mubr.f32.mxu0 %v13792_v36  ;;  %v4011_v53 = vadd.f32 %v4010_v1, %v3985_v2  ;;  %v4227_v11 = vsel %vm13614_vm14, %v4152_v32, 0.0  ;;  %v3912_v43 = vpop.f32.mrf.mxu0  ;;  %5763 = vmatprep.mubr.f32.mxu1 %v13792_v36  ;;  %vm13617_vm14 = vcmp.eq.s32.totalorder %v8676_v50, %v11287_v45 }
 0x296   : > { %14113 = vst [vmem:[#allocation29_spill] sm:$0xff] %v11456_v0  ;;  %v4253_v59 = vadd.f32 %v4252_v49, %v4227_v11  ;;  %v3986_v17 = vsel %vm13615_vm11, %v3912_v43, 0.0  ;;  %v4154_v15 = vpop.f32.mrf.mxu1 }
 0x297   : > { %v4032_v42 = vadd.f32 %v4031_v12, %v3986_v17  ;;  %v4228_v4 = vsel %vm13615_vm11, %v4154_v15, 0.0  ;;  %v3916_v22 = vpop.f32.mrf.mxu0  ;;  %vm13618_vm11 = vcmp.eq.s32.totalorder %v8701_v52, %v11278_v33 }
 0x298   : > { %7515 = vmatmul.mubr.msk.f32.gmra.mxu0 %vm429_vm6, %v11477_v5  ;;  %v4274_v1 = vadd.f32 %v4273_v51, %v4228_v4  ;;  %v3987_v26 = vsel %vm13616_vm8, %v3916_v22, 0.0  ;;  %v4158_v55 = vpop.f32.mrf.mxu1  ;;  %7533 = vmatmul.mubr.msk.f32.gmra.mxu1 %vm429_vm6, %v11077_v20  ;;  %v11502_v51 = vld [vmem:[%s7975_s6 + $0x38] sm:$0xff] }
 0x299   : > { %5527 = vmatprep.mubr.f32.mxu0 %v13792_v36  ;;  %v4012_v28 = vadd.f32 %v4011_v53, %v3987_v26  ;;  %v4229_v49 = vsel %vm13616_vm8, %v4158_v55, 0.0  ;;  %v3918_v61 = vpop.f32.mrf.mxu0  ;;  %5769 = vmatprep.mubr.f32.mxu1 %v13792_v36  ;;  %vm13619_vm8 = vcmp.eq.s32.totalorder %v8701_v52, %v11287_v45 }
 0x29a   : > { %v4254_v35 = vadd.f32 %v4253_v59, %v4229_v49  ;;  %v3988_v31 = vsel %vm13617_vm14, %v3918_v61, 0.0  ;;  %v4160_v12 = vpop.f32.mrf.mxu1 }
 0x29b   : > { %v4033_v20 = vadd.f32 %v4032_v42, %v3988_v31  ;;  %v4230_v39 = vsel %vm13617_vm14, %v4160_v12, 0.0  ;;  %v3922_v16 = vpop.f32.mrf.mxu0  ;;  %vm13620_vm14 = vcmp.eq.s32.totalorder %v8726_v54, %v11278_v33 }
 0x29c   : > { %7516 = vmatmul.mubr.msk.f32.gmra.mxu0 %vm429_vm6, %v11502_v51  ;;  %v4275_v2 = vadd.f32 %v4274_v1, %v4230_v39  ;;  %v3989_v32 = vsel %vm13618_vm11, %v3922_v16, 0.0  ;;  %v4164_v53 = vpop.f32.mrf.mxu1  ;;  %7534 = vmatmul.mubr.msk.f32.gmra.mxu1 %vm429_vm6, %v11098_v30  ;;  %v11527_v1 = vld [vmem:[%s7975_s6 + $0x40] sm:$0xff] }
 0x29d   : > { %5533 = vmatprep.mubr.f32.mxu0 %v13792_v36  ;;  %v4013_v11 = vadd.f32 %v4012_v28, %v3989_v32  ;;  %v4231_v43 = vsel %vm13618_vm11, %v4164_v53, 0.0  ;;  %v3924_v59 = vpop.f32.mrf.mxu0  ;;  %5775 = vmatprep.mubr.f32.mxu1 %v13792_v36  ;;  %vm13621_vm11 = vcmp.eq.s32.totalorder %v8726_v54, %v11287_v45 }
 0x29e   : > { %v4255_v17 = vadd.f32 %v4254_v35, %v4231_v43  ;;  %v3990_v15 = vsel %vm13619_vm8, %v3924_v59, 0.0  ;;  %v4166_v42 = vpop.f32.mrf.mxu1 }
 0x29f   : > { %v4034_v30 = vadd.f32 %v4033_v20, %v3990_v15  ;;  %v4232_v4 = vsel %vm13619_vm8, %v4166_v42, 0.0  ;;  %v3928_v22 = vpop.f32.mrf.mxu0  ;;  %vm13622_vm8 = vcmp.eq.s32.totalorder %v8751_v56, %v11278_v33 }
 0x2a0   : > { %7517 = vmatmul.mubr.msk.f32.gmra.mxu0 %vm429_vm6, %v11527_v1  ;;  %v4276_v26 = vadd.f32 %v4275_v2, %v4232_v4  ;;  %v3991_v55 = vsel %vm13620_vm14, %v3928_v22, 0.0  ;;  %v4170_v28 = vpop.f32.mrf.mxu1  ;;  %7535 = vmatmul.mubr.msk.f32.gmra.mxu1 %vm429_vm6, %v11119_v25  ;;  %v11552_v2 = vld [vmem:[%s7975_s6 + $0x48] sm:$0xff] }
 0x2a1   : > { %5539 = vmatprep.mubr.f32.mxu0 %v13792_v36  ;;  %v4014_v49 = vadd.f32 %v4013_v11, %v3991_v55  ;;  %v4233_v61 = vsel %vm13620_vm14, %v4170_v28, 0.0  ;;  %v3930_v35 = vpop.f32.mrf.mxu0  ;;  %5781 = vmatprep.mubr.f32.mxu1 %v13792_v36  ;;  %vm13623_vm14 = vcmp.eq.s32.totalorder %v8751_v56, %v11287_v45 }
 0x2a2   : > { %v4256_v31 = vadd.f32 %v4255_v17, %v4233_v61  ;;  %v3992_v12 = vsel %vm13621_vm11, %v3930_v35, 0.0  ;;  %v4172_v20 = vpop.f32.mrf.mxu1 }
 0x2a3   : > { %v4035_v25 = vadd.f32 %v4034_v30, %v3992_v12  ;;  %v4234_v39 = vsel %vm13621_vm11, %v4172_v20, 0.0  ;;  %v3934_v16 = vpop.f32.mrf.mxu0  ;;  %vm13624_vm11 = vcmp.eq.s32.totalorder %v8776_v58, %v11278_v33 }
 0x2a4   : > { %7518 = vmatmul.mubr.msk.f32.gmra.mxu0 %vm429_vm6, %v11552_v2  ;;  %v4277_v32 = vadd.f32 %v4276_v26, %v4234_v39  ;;  %v3993_v53 = vsel %vm13622_vm8, %v3934_v16, 0.0  ;;  %v4176_v11 = vpop.f32.mrf.mxu1  ;;  %7536 = vmatmul.mubr.msk.f32.gmra.mxu1 %vm429_vm6, %v11140_v37  ;;  %v11577_v26 = vld [vmem:[%s7975_s6 + $0x50] sm:$0xff] }
 0x2a5   : > { %5545 = vmatprep.mubr.f32.mxu0 %v13792_v36  ;;  %v4015_v43 = vadd.f32 %v4014_v49, %v3993_v53  ;;  %v4235_v59 = vsel %vm13622_vm8, %v4176_v11, 0.0  ;;  %v3936_v17 = vpop.f32.mrf.mxu0  ;;  %5787 = vmatprep.mubr.f32.mxu1 %v13792_v36  ;;  %vm13625_vm8 = vcmp.eq.s32.totalorder %v8776_v58, %v11287_v45 }
 0x2a6   : > { %v4257_v15 = vadd.f32 %v4256_v31, %v4235_v59  ;;  %v3994_v42 = vsel %vm13623_vm14, %v3936_v17, 0.0  ;;  %v4178_v30 = vpop.f32.mrf.mxu1 }
 0x2a7   : > { %v4036_v37 = vadd.f32 %v4035_v25, %v3994_v42  ;;  %v4236_v4 = vsel %vm13623_vm14, %v4178_v30, 0.0  ;;  %v3940_v22 = vpop.f32.mrf.mxu0  ;;  %vm13626_vm14 = vcmp.eq.s32.totalorder %v8802_v60, %v11278_v33 }
 0x2a8   : > { %7519 = vmatmul.mubr.msk.f32.gmra.mxu0 %vm429_vm6, %v11577_v26  ;;  %v4278_v55 = vadd.f32 %v4277_v32, %v4236_v4  ;;  %v3995_v28 = vsel %vm13624_vm11, %v3940_v22, 0.0  ;;  %v4182_v49 = vpop.f32.mrf.mxu1  ;;  %7537 = vmatmul.mubr.msk.f32.gmra.mxu1 %vm429_vm6, %v11161_v14  ;;  %v11602_v32 = vld [vmem:[%s7975_s6 + $0x58] sm:$0xff] }
 0x2a9   : > { %5551 = vmatprep.mubr.f32.mxu0 %v13792_v36  ;;  %v4016_v61 = vadd.f32 %v4015_v43, %v3995_v28  ;;  %v4237_v35 = vsel %vm13624_vm11, %v4182_v49, 0.0  ;;  %v3942_v31 = vpop.f32.mrf.mxu0  ;;  %5793 = vmatprep.mubr.f32.mxu1 %v13792_v36  ;;  %vm13627_vm11 = vcmp.eq.s32.totalorder %v8802_v60, %v11287_v45 }
 0x2aa   : > { %v4258_v12 = vadd.f32 %v4257_v15, %v4237_v35  ;;  %v3996_v20 = vsel %vm13625_vm8, %v3942_v31, 0.0  ;;  %v4184_v25 = vpop.f32.mrf.mxu1 }
 0x2ab   : > { %v4037_v14 = vadd.f32 %v4036_v37, %v3996_v20  ;;  %v4238_v39 = vsel %vm13625_vm8, %v4184_v25, 0.0  ;;  %v3946_v16 = vpop.f32.mrf.mxu0  ;;  %vm13628_vm8 = vcmp.eq.s32.totalorder %v8833_v63, %v11278_v33  ;;  %v14114_v20 = vld [vmem:[#allocation19_spill] sm:$0xff] }
 0x2ac   : > { %7520 = vmatmul.mubr.msk.f32.gmra.mxu0 %vm429_vm6, %v11602_v32  ;;  %v4279_v53 = vadd.f32 %v4278_v55, %v4238_v39  ;;  %v3997_v11 = vsel %vm13626_vm14, %v3946_v16, 0.0  ;;  %v4188_v43 = vpop.f32.mrf.mxu1  ;;  %7538 = vmatmul.mubr.msk.f32.gmra.mxu1 %vm429_vm6, %v11182_v9  ;;  %v11627_v55 = vld [vmem:[%s7975_s6 + $0x60] sm:$0xff]  ;;  %v4546_v25 = vand.u32 127, %v14114_v20 }
 0x2ad   : > { %5557 = vmatprep.mubr.f32.mxu0 %v13792_v36  ;;  %v4017_v59 = vadd.f32 %v4016_v61, %v3997_v11  ;;  %v4239_v17 = vsel %vm13626_vm14, %v4188_v43, 0.0  ;;  %v3948_v15 = vpop.f32.mrf.mxu0  ;;  %5799 = vmatprep.mubr.f32.mxu1 %v13792_v36  ;;  %vm13629_vm14 = vcmp.eq.s32.totalorder %v8833_v63, %v11287_v45  ;;  %v11653_v43 = vld [vmem:[%s7975_s6 + $0x68] sm:$0xff] }
 0x2ae   : > { %v4259_v42 = vadd.f32 %v4258_v12, %v4239_v17  ;;  %v3998_v30 = vsel %vm13627_vm11, %v3948_v15, 0.0  ;;  %v4190_v37 = vpop.f32.mrf.mxu1 }
 0x2af   : > { %v4038_v9 = vadd.f32 %v4037_v14, %v3998_v30  ;;  %v4240_v4 = vsel %vm13627_vm11, %v4190_v37, 0.0  ;;  %v3952_v22 = vpop.f32.mrf.mxu0  ;;  %vm13630_vm11 = vcmp.eq.s32.totalorder %v8859_v3, %v11278_v33 }
 0x2b0   : > { %7521 = vmatmul.mubr.msk.f32.gmra.mxu0 %vm429_vm6, %v11627_v55  ;;  %v4280_v28 = vadd.f32 %v4279_v53, %v4240_v4  ;;  %v3999_v49 = vsel %vm13628_vm8, %v3952_v22, 0.0  ;;  %v4194_v61 = vpop.f32.mrf.mxu1  ;;  %7539 = vmatmul.mubr.msk.f32.gmra.mxu1 %vm429_vm6, %v11203_v62 }
 0x2b1   : > { %5563 = vmatprep.mubr.f32.mxu0 %v13792_v36  ;;  %v4018_v35 = vadd.f32 %v4017_v59, %v3999_v49  ;;  %v4241_v31 = vsel %vm13628_vm8, %v4194_v61, 0.0  ;;  %v3954_v12 = vpop.f32.mrf.mxu0  ;;  %5805 = vmatprep.mubr.f32.mxu1 %v13792_v36  ;;  %vm13631_vm8 = vcmp.eq.s32.totalorder %v8859_v3, %v11287_v45 }
 0x2b2   : > { %v4260_v14 = vadd.f32 %v4259_v42, %v4241_v31  ;;  %v4000_v62 = vsel %vm13629_vm14, %v3954_v12, 0.0  ;;  %v4196_v39 = vpop.f32.mrf.mxu1  ;;  %v11680_v31 = vld [vmem:[%s7975_s6 + $0x70] sm:$0xff] }
 0x2b3   : > { %v4039_v16 = vadd.f32 %v4038_v9, %v4000_v62  ;;  %v4242_v53 = vsel %vm13629_vm14, %v4196_v39, 0.0  ;;  %v3958_v11 = vpop.f32.mrf.mxu0  ;;  %vm13632_vm14 = vcmp.eq.s32.totalorder %v13900_v27, %v11278_v33  ;;  %v4570_v9 = vrot.slane %v4546_v25, %v7957_v24 }
 0x2b4   : > { %7522 = vmatmul.mubr.msk.f32.gmra.mxu0 %vm429_vm6, %v11653_v43  ;;  %v4281_v59 = vadd.f32 %v4280_v28, %v4242_v53  ;;  %v4001_v17 = vsel %vm13630_vm11, %v3958_v11, 0.0  ;;  %v4200_v15 = vpop.f32.mrf.mxu1  ;;  %7540 = vmatmul.mubr.msk.f32.gmra.mxu1 %vm429_vm6, %v11224_v34  ;;  %v4574_v28 = vrot.slane %v4546_v25, %v13895_v29 }
 0x2b5   : > { %5569 = vmatprep.mubr.f32.mxu0 %v13792_v36  ;;  %v4019_v42 = vadd.f32 %v4018_v35, %v4001_v17  ;;  %v4243_v30 = vsel %vm13630_vm11, %v4200_v15, 0.0  ;;  %v3960_v37 = vpop.f32.mrf.mxu0  ;;  %5811 = vmatprep.mubr.f32.mxu1 %v13792_v36  ;;  %vm13633_vm11 = vcmp.eq.s32.totalorder %v13900_v27, %v11287_v45 }
 0x2b6   : > { %v4261_v4 = vadd.f32 %v4260_v14, %v4243_v30  ;;  %v4002_v34 = vsel %vm13631_vm8, %v3960_v37, 0.0  ;;  %v4202_v22 = vpop.f32.mrf.mxu1  ;;  %v11711_v30 = vld [vmem:[%s7975_s6 + $0x78] sm:$0xff] }
 0x2b7   : > { %v4040_v49 = vadd.f32 %v4039_v16, %v4002_v34  ;;  %v4244_v61 = vsel %vm13631_vm8, %v4202_v22, 0.0  ;;  %v3964_v35 = vpop.f32.mrf.mxu0  ;;  %vm13636_vm8 = vcmp.eq.s32.totalorder %v14008_v13, %v11278_v33  ;;  %v11699_v16 = vrot.slane %v4570_v9, %v7957_v24 }
 0x2b8   : > { %7523 = vmatmul.mubr.msk.f32.gmra.mxu0 %vm429_vm6, %v11680_v31  ;;  %v4282_v12 = vadd.f32 %v4281_v59, %v4244_v61  ;;  %v4003_v20 = vsel %vm13632_vm14, %v3964_v35, 0.0  ;;  %v4206_v25 = vpop.f32.mrf.mxu1  ;;  %7541 = vmatmul.mubr.msk.f32.gmra.mxu1 %vm429_vm6, %v11249_v19  ;;  %v11705_v59 = vrot.slane %v4574_v28, %v7957_v24  ;;  %v14115_v28 = vld [vmem:[#allocation2_spill] sm:$0xff] }
 0x2b9   : > { %5575 = vmatprep.mubr.f32.mxu0 %v13792_v36  ;;  %v4020_v14 = vadd.f32 %v4019_v42, %v4003_v20  ;;  %v4245_v62 = vsel %vm13632_vm14, %v4206_v25, 0.0  ;;  %v3966_v39 = vpop.f32.mrf.mxu0  ;;  %5817 = vmatprep.mubr.f32.mxu1 %v13792_v36  ;;  %vm13637_vm14 = vcmp.eq.s32.totalorder %v14008_v13, %v11287_v45  ;;  %v14119_v25 = vld [vmem:[#allocation4_spill] sm:$0xff] }
 0x2ba   : > { %v4262_v53 = vadd.f32 %v4261_v4, %v4245_v62  ;;  %v4004_v19 = vsel %vm13633_vm11, %v3966_v39, 0.0  ;;  %v4208_v11 = vpop.f32.mrf.mxu1  ;;  %vm14121_vm7 = vcmp.ge.s32.totalorder %v14119_v25, 0 }
 0x2bb   : > { %v4041_v17 = vadd.f32 %v4040_v49, %v4004_v19  ;;  %v4246_v15 = vsel %vm13633_vm11, %v4208_v11, 0.0  ;;  %v3970_v42 = vpop.f32.mrf.mxu0  ;;  %v14116_v49 = vld [vmem:[#allocation3_spill] sm:$0xff]  ;;  %vm14120_vm11 = vcmp.lt.s32.totalorder %v14119_v25, 8 }
 0x2bc   : > { %7524 = vmatmul.mubr.msk.f32.gmra.mxu0 %vm429_vm6, %v11711_v30  ;;  %v4283_v37 = vadd.f32 %v4282_v12, %v4246_v15  ;;  %v4005_v9 = vsel %vm13636_vm8, %v3970_v42, 0.0  ;;  %v4212_v4 = vpop.f32.mrf.mxu1  ;;  %7542 = vmatmul.mubr.msk.f32.gmra.mxu1 %vm429_vm6, %v11273_v57  ;;  %v14117_v61 = vrot.slane %v14116_v49, 7  ;;  %vm11736_vm1 = vmand %vm14121_vm7, %vm14120_vm11  ;;  %v14122_v57 = vmov 0  ;;  %v11749_v15 = vld [vmem:[%s7975_s6 + $0x100] sm:$0xff] }
 0x2bd   : > { %5969 = vmatprep.mubr.f32.mxu0 %v13792_v36  ;;  %v4021_v34 = vadd.f32 %v4020_v14, %v4005_v9  ;;  %v4247_v22 = vsel %vm13636_vm8, %v4212_v4, 0.0  ;;  %v3972_v12 = vpop.f32.mrf.mxu0  ;;  %6286 = vmatprep.mubr.f32.mxu1 %v13792_v36  ;;  %v14123_v57 = vsel %vm11736_vm1, 4294967295, %v14122_v57  ;;  %vm13639_vm8 = vcmp.eq.s32.totalorder %v14011_v10, %v11699_v16  ;;  %vm3733_vm12 = vmand %vm11736_vm1, %vm9418_vm3 }
 0x2be   : > { %v11729_v35 = vmul.f32 %v14117_v61, %v14115_v28  ;;  %v4263_v20 = vadd.f32 %v4262_v53, %v4247_v22  ;;  %14124 = vst [vmem:[#allocation5_spill] sm:$0xff] %v14123_v57  ;;  %v4006_v14 = vsel %vm13637_vm14, %v3972_v12, 0.0  ;;  %v4214_v62 = vpop.f32.mrf.mxu1  ;;  %vm13640_vm11 = vcmp.eq.s32.totalorder %v14011_v10, %v11705_v59 }
 0x2bf   : > { %v4022_v39 = vrot.slane %v4021_v34, 4  ;;  %v4042_v19 = vadd.f32 %v4041_v17, %v4006_v14  ;;  %v4248_v53 = vsel %vm13637_vm14, %v4214_v62, 0.0  ;;  %v4364_v11 = vpop.f32.mrf.mxu0  ;;  %vm4587_vm14 = vcmp.eq.s32.totalorder %v8562_v38, %v11699_v16 }
 0x2c0   : > { %14118 = vst [vmem:[#allocation7_spill] sm:$0xff] %v11729_v35  ;;  %7545 = vmatmul.mubr.msk.f32.vlgmr.msra.gmra.mxu0 %vm429_vm6, %v11749_v15  ;;  %v4264_v42 = vrot.slane %v4263_v20, 4  ;;  %v4284_v9 = vadd.f32 %v4283_v37, %v4248_v53  ;;  %v4681_v4 = vpop.f32.mrf.mxu1  ;;  %7563 = vmatmul.mubr.msk.f32.vlgmr.msra.gmra.mxu1 %vm429_vm6, %v11307_v40  ;;  %v14126_v37 = vld [vmem:[#allocation21_spill] sm:$0xff]  ;;  %vm4588_vm7 = vcmp.eq.s32.totalorder %v8562_v38, %v11705_v59  ;;  %v11791_v53 = vld [vmem:[%s7975_s6 + $0x108] sm:$0xff] }
 0x2c1   : > { %7580 = vmatpush1.msk.msra.mxu0 %vm11297_vm0, %v14103_v18  ;;  %v4023_v17 = vadd.f32 %v4022_v39, %v4021_v34  ;;  %v11770_v49 = vmul.f32 %v11729_v35, %v14126_v37  ;;  %v4043_v40 = vrot.slane %v4042_v19, 4  ;;  %v4776_v61 = vsel %vm13639_vm8, %v4681_v4, 0.0  ;;  %7598 = vmatpush1.msk.msra.mxu1 %vm11297_vm0, %v14103_v18  ;;  %v4366_v34 = vpop.f32.mrf.mxu0  ;;  %vm11802_vm0 = vmand %vm3733_vm12, %vm9445_vm13  ;;  %v11866_v35 = vld [vmem:[%s7975_s6 + $0x118] sm:$0xff] }
 0x2c2   : > { %5975 = vmatprep.mubr.f32.mxu0 %v13792_v36  ;;  %v4265_v12 = vadd.f32 %v4264_v42, %v4263_v20  ;;  %v4285_v25 = vrot.slane %v4284_v9, 4  ;;  %v4683_v14 = vpop.f32.mrf.mxu1  ;;  %6292 = vmatprep.mubr.f32.mxu1 %v13792_v36  ;;  %vm14127_vm8 = vcmp.eq.s32.totalorder %v14011_v10, %v11278_v33  ;;  %vm14134_vm3 = vcmp.eq.s32.totalorder %v14105_v47, %v11699_v16  ;;  %vm3739_vm12 = vmand %vm11802_vm0, %vm9451_vm15 }
 0x2c3   : > { %v4024_v62 = vrot.slane %v4023_v17, 2  ;;  %v4044_v39 = vadd.f32 %v4043_v40, %v4042_v19  ;;  %v4459_v21 = vsel %vm14127_vm8, %v4364_v11, 0.0  ;;  %v4777_v18 = vsel %vm13640_vm11, %v4683_v14, 0.0  ;;  %v4370_v20 = vpop.f32.mrf.mxu0 }
 0x2c4   : > { %7546 = vmatmul.mubr.msk.f32.gmra.mxu0 %vm429_vm6, %v11791_v53  ;;  %v4266_v42 = vrot.slane %v4265_v12, 2  ;;  %v14129_v19 = vmov 0  ;;  %v4286_v11 = vadd.f32 %v4285_v25, %v4284_v9  ;;  %vm14132_vm8 = vcmp.eq.s32.totalorder %v14011_v10, %v11287_v45  ;;  %v4687_v37 = vpop.f32.mrf.mxu1  ;;  %7564 = vmatmul.mubr.msk.f32.gmra.mxu1 %vm429_vm6, %v11344_v6 }
 0x2c5   : > { %v14130_v19 = vsel %vm11802_vm0, 4294967295, %v14129_v19  ;;  %v4460_v40 = vsel %vm14132_vm8, %v4366_v34, 0.0  ;;  %vm14133_vm11 = vcmp.eq.s32.totalorder %v14105_v47, %v11278_v33  ;;  %5981 = vmatprep.mubr.f32.mxu0 %v13792_v36  ;;  %v4025_v22 = vadd.f32 %v4024_v62, %v4023_v17  ;;  %v4372_v25 = vpop.f32.mrf.mxu0  ;;  %6298 = vmatprep.mubr.f32.mxu1 %v13792_v36 }
 0x2c6   : > { %14131 = vst [vmem:[#allocation25_spill] sm:$0xff] %v14130_v19  ;;  %v4461_v14 = vsel %vm14133_vm11, %v4370_v20, 0.0  ;;  %v4045_v4 = vrot.slane %v4044_v39, 2  ;;  %v4778_v9 = vsel %vm14134_vm3, %v4687_v37, 0.0  ;;  %v4267_v34 = vadd.f32 %v4266_v42, %v4265_v12  ;;  %v4689_v29 = vpop.f32.mrf.mxu1  ;;  %v11830_v42 = vld [vmem:[%s7975_s6 + $0x110] sm:$0xff] }
 0x2c7   : > { %v4491_v57 = vadd.f32 %v4461_v14, %v4459_v21  ;;  %v4287_v28 = vrot.slane %v4286_v11, 2  ;;  %v4808_v20 = vadd.f32 %v4778_v9, %v4776_v61  ;;  %vm14135_vm13 = vcmp.eq.s32.totalorder %v14105_v47, %v11287_v45  ;;  %v4376_v12 = vpop.f32.mrf.mxu0 }
 0x2c8   : > { %v4462_v6 = vsel %vm14135_vm13, %v4372_v25, 0.0  ;;  %v4026_v24 = vrot.slane %v4025_v22, 1  ;;  %v4046_v62 = vadd.f32 %v4045_v4, %v4044_v39  ;;  %vm14137_vm11 = vcmp.eq.s32.totalorder %v14105_v47, %v11705_v59  ;;  %7547 = vmatmul.mubr.msk.f32.gmra.mxu0 %vm429_vm6, %v11830_v42  ;;  %v4693_v0 = vpop.f32.mrf.mxu1  ;;  %v14139_v39 = vld [vmem:[#allocation12_spill] sm:$0xff]  ;;  %vm11853_vm13 = vmand %vm3739_vm12, %vm9490_vm4 }
 0x2c9   : > { %v4512_v21 = vadd.f32 %v4462_v6, %v4460_v40  ;;  %v4779_v37 = vsel %vm14137_vm11, %v4689_v29, 0.0  ;;  %v4268_v61 = vrot.slane %v4267_v34, 1  ;;  %v4288_v14 = vadd.f32 %v4287_v28, %v4286_v11  ;;  %7565 = vmatmul.mubr.msk.f32.gmra.mxu1 %vm429_vm6, %v14139_v39  ;;  %5987 = vmatprep.mubr.f32.mxu0 %v13792_v36  ;;  %v4378_v6 = vpop.f32.mrf.mxu0 }
 0x2ca   : > { %v4829_v9 = vadd.f32 %v4779_v37, %v4777_v18  ;;  %vm14138_vm8 = vcmp.eq.s32.totalorder %v8562_v38, %v11278_v33  ;;  %v4047_v29 = vrot.slane %v4046_v62, 1  ;;  %v4780_v4 = vsel %vm4587_vm14, %v4693_v0, 0.0  ;;  %6304 = vmatprep.mubr.f32.mxu1 %v13792_v36  ;;  %v4695_v37 = vpop.f32.mrf.mxu1 }
 0x2cb   : > { %v4463_v25 = vsel %vm14138_vm8, %v4376_v12, 0.0  ;;  %vm4589_vm3 = vcmp.eq.s32.totalorder %v8595_v7, %v11699_v16  ;;  %v4289_v18 = vrot.slane %v4288_v14, 1  ;;  %v4809_v11 = vadd.f32 %v4808_v20, %v4780_v4  ;;  %v4382_v17 = vpop.f32.mrf.mxu0 }
 0x2cc   : > { %v4492_v40 = vadd.f32 %v4491_v57, %v4463_v25  ;;  %vm14143_vm11 = vcmp.eq.s32.totalorder %v8562_v38, %v11287_v45  ;;  %vm13650_vm8 = vcmp.eq.s32.totalorder %v8595_v7, %v11705_v59  ;;  %v4027_v12 = vadd.f32 %v4026_v24, %v4025_v22  ;;  %7548 = vmatmul.mubr.msk.f32.gmra.mxu0 %vm429_vm6, %v11866_v35  ;;  %v4699_v24 = vpop.f32.mrf.mxu1 }
 0x2cd   : > { %v4464_v0 = vsel %vm14143_vm11, %v4378_v6, 0.0  ;;  %v4048_v25 = vadd.f32 %v4047_v29, %v4046_v62  ;;  %v4781_v28 = vsel %vm4588_vm7, %v4695_v37, 0.0  ;;  %v4269_v20 = vadd.f32 %v4268_v61, %v4267_v34  ;;  %7566 = vmatmul.mubr.msk.f32.gmra.mxu1 %vm429_vm6, %v11396_v41  ;;  %5993 = vmatprep.mubr.f32.mxu0 %v13792_v36  ;;  %v4384_v61 = vpop.f32.mrf.mxu0 }
 0x2ce   : > { %v4513_v39 = vadd.f32 %v4512_v21, %v4464_v0  ;;  %v4290_v4 = vadd.f32 %v4289_v18, %v4288_v14  ;;  %v4830_v6 = vadd.f32 %v4829_v9, %v4781_v28  ;;  %vm14144_vm12 = vcmp.eq.s32.totalorder %v8595_v7, %v11278_v33  ;;  %6310 = vmatprep.mubr.f32.mxu1 %v13792_v36  ;;  %v4701_v9 = vpop.f32.mrf.mxu1  ;;  %v11894_v28 = vld [vmem:[%s7975_s6 + $0x120] sm:$0xff] }
 0x2cf   : > { %v4465_v19 = vsel %vm14144_vm12, %v4382_v17, 0.0  ;;  %v11879_v22 = vsel %vm11853_vm13, %v11770_v49, 0.0  ;;  %v4051_v62 = vcombine.low %v4027_v12, %v4048_v25  ;;  %v4782_v21 = vsel %vm4589_vm3, %v4699_v24, 0.0  ;;  %v14148_v24 = vld [vmem:[#allocation8_spill] sm:$0xff] }
 0x2d0   : > { %v4493_v34 = vadd.f32 %v4492_v40, %v4465_v19  ;;  %v4293_v17 = vcombine.low %v4269_v20, %v4290_v4  ;;  %v4810_v14 = vadd.f32 %v4809_v11, %v4782_v21  ;;  %vm14145_vm11 = vcmp.eq.s32.totalorder %v8595_v7, %v11287_v45  ;;  %v4388_v40 = vpop.f32.mrf.mxu0  ;;  %7549 = vmatmul.mubr.msk.f32.gmra.mxu0 %vm429_vm6, %v11894_v28  ;;  %v4705_v0 = vpop.f32.mrf.mxu1 }
 0x2d1   : > { %v4466_v41 = vsel %vm14145_vm11, %v4384_v61, 0.0  ;;  %vm13652_vm13 = vcmp.eq.s32.totalorder %v8626_v46, %v11699_v16  ;;  %v4052_v49 = vrot.slane %v4051_v62, 6  ;;  %v4783_v19 = vsel %vm13650_vm8, %v4701_v9, 0.0  ;;  %7567 = vmatmul.mubr.msk.f32.gmra.mxu1 %vm429_vm6, %v11419_v23  ;;  %5999 = vmatprep.mubr.f32.mxu0 %v13792_v36 }
 0x2d2   : > { %v4514_v29 = vadd.f32 %v4513_v39, %v4466_v41  ;;  %v4294_v57 = vrot.slane %v4293_v17, 6  ;;  %v4831_v18 = vadd.f32 %v4830_v6, %v4783_v19  ;;  %vm14146_vm12 = vcmp.eq.s32.totalorder %v8626_v46, %v11278_v33  ;;  %v4390_v39 = vpop.f32.mrf.mxu0  ;;  %6316 = vmatprep.mubr.f32.mxu1 %v13792_v36  ;;  %v4707_v6 = vpop.f32.mrf.mxu1  ;;  %v11924_v17 = vld [vmem:[%s7975_s6 + $0x128] sm:$0xff] }
 0x2d3   : > { %v4467_v11 = vsel %vm14146_vm12, %v4388_v40, 0.0  ;;  %vm13651_vm11 = vcmp.eq.s32.totalorder %v8626_v46, %v11705_v59  ;;  %v4054_v37 = vmul.f32 %v4052_v49, %v11879_v22  ;;  %v4784_v25 = vsel %vm13652_vm13, %v4705_v0, 0.0 }
 0x2d4   : > { %v4494_v12 = vadd.f32 %v4493_v34, %v4467_v11  ;;  %v4296_v20 = vmul.f32 %v4294_v57, %v11879_v22  ;;  %v4811_v4 = vadd.f32 %v4810_v14, %v4784_v25  ;;  %vm14147_vm12 = vcmp.eq.s32.totalorder %v8626_v46, %v11287_v45  ;;  %v4394_v61 = vpop.f32.mrf.mxu0  ;;  %7550 = vmatmul.mubr.msk.f32.gmra.mxu0 %vm429_vm6, %v11924_v17  ;;  %v4711_v49 = vpop.f32.mrf.mxu1 }
 0x2d5   : > { %v4468_v23 = vsel %vm14147_vm12, %v4390_v39, 0.0  ;;  %vm13653_vm8 = vcmp.eq.s32.totalorder %v8651_v48, %v11699_v16  ;;  %v11918_v62 = vadd.f32 %v4054_v37, %v14148_v24  ;;  %v4785_v21 = vsel %vm13651_vm11, %v4707_v6, 0.0  ;;  %7568 = vmatmul.mubr.msk.f32.gmra.mxu1 %vm429_vm6, %v11449_v44  ;;  %6005 = vmatprep.mubr.f32.mxu0 %v13792_v36  ;;  %v11952_v37 = vld [vmem:[%s7975_s6 + $0x130] sm:$0xff] }
 0x2d6   : > { %v4515_v34 = vadd.f32 %v4514_v29, %v4468_v23  ;;  %v11929_v14 = vadd.f32 %v4296_v20, %v11443_v8  ;;  %v4832_v41 = vadd.f32 %v4831_v18, %v4785_v21  ;;  %vm14149_vm12 = vcmp.eq.s32.totalorder %v8651_v48, %v11278_v33  ;;  %v4396_v19 = vpop.f32.mrf.mxu0  ;;  %6322 = vmatprep.mubr.f32.mxu1 %v13792_v36  ;;  %v4713_v18 = vpop.f32.mrf.mxu1 }
 0x2d7   : > { %v4469_v9 = vsel %vm14149_vm12, %v4394_v61, 0.0  ;;  %vm13654_vm11 = vcmp.eq.s32.totalorder %v8651_v48, %v11705_v59  ;;  %v4786_v8 = vsel %vm13653_vm8, %v4711_v49, 0.0  ;;  %vm14150_vm12 = vcmp.eq.s32.totalorder %v8651_v48, %v11287_v45 }
 0x2d8   : > { %v4495_v29 = vadd.f32 %v4494_v12, %v4469_v9  ;;  %v4812_v40 = vadd.f32 %v4811_v4, %v4786_v8  ;;  %v4470_v57 = vsel %vm14150_vm12, %v4396_v19, 0.0  ;;  %vm13655_vm13 = vcmp.eq.s32.totalorder %v8676_v50, %v11699_v16  ;;  %v4400_v0 = vpop.f32.mrf.mxu0  ;;  %7551 = vmatmul.mubr.msk.f32.gmra.mxu0 %vm429_vm6, %v11952_v37  ;;  %v4717_v39 = vpop.f32.mrf.mxu1 }
 0x2d9   : > { %v4516_v44 = vadd.f32 %v4515_v34, %v4470_v57  ;;  %v4787_v11 = vsel %vm13654_vm11, %v4713_v18, 0.0  ;;  %vm14151_vm8 = vcmp.eq.s32.totalorder %v8676_v50, %v11278_v33  ;;  %7569 = vmatmul.mubr.msk.f32.gmra.mxu1 %vm429_vm6, %v11477_v5  ;;  %vm13656_vm12 = vcmp.eq.s32.totalorder %v8676_v50, %v11705_v59  ;;  %6011 = vmatprep.mubr.f32.mxu0 %v13792_v36 }
 0x2da   : > { %v4833_v12 = vadd.f32 %v4832_v41, %v4787_v11  ;;  %v4471_v25 = vsel %vm14151_vm8, %v4400_v0, 0.0  ;;  %v4788_v4 = vsel %vm13655_vm13, %v4717_v39, 0.0  ;;  %v4402_v23 = vpop.f32.mrf.mxu0  ;;  %6328 = vmatprep.mubr.f32.mxu1 %v13792_v36  ;;  %vm14152_vm8 = vcmp.eq.s32.totalorder %v8676_v50, %v11287_v45  ;;  %v4719_v34 = vpop.f32.mrf.mxu1  ;;  %v11977_v41 = vld [vmem:[%s7975_s6 + $0x138] sm:$0xff] }
 0x2db   : > { %v4496_v20 = vadd.f32 %v4495_v29, %v4471_v25  ;;  %v4813_v6 = vadd.f32 %v4812_v40, %v4788_v4  ;;  %v4472_v24 = vsel %vm14152_vm8, %v4402_v23, 0.0  ;;  %vm13657_vm11 = vcmp.eq.s32.totalorder %v8701_v52, %v11699_v16 }
 0x2dc   : > { %v4517_v5 = vadd.f32 %v4516_v44, %v4472_v24  ;;  %v4789_v21 = vsel %vm13656_vm12, %v4719_v34, 0.0  ;;  %v4406_v61 = vpop.f32.mrf.mxu0  ;;  %7552 = vmatmul.mubr.msk.f32.gmra.mxu0 %vm429_vm6, %v11977_v41  ;;  %vm14153_vm13 = vcmp.eq.s32.totalorder %v8701_v52, %v11278_v33  ;;  %v4723_v29 = vpop.f32.mrf.mxu1  ;;  %vm13658_vm8 = vcmp.eq.s32.totalorder %v8701_v52, %v11705_v59 }
 0x2dd   : > { %v4834_v9 = vadd.f32 %v4833_v12, %v4789_v21  ;;  %v4473_v49 = vsel %vm14153_vm13, %v4406_v61, 0.0  ;;  %7570 = vmatmul.mubr.msk.f32.gmra.mxu1 %vm429_vm6, %v11502_v51  ;;  %6017 = vmatprep.mubr.f32.mxu0 %v13792_v36  ;;  %v4790_v19 = vsel %vm13657_vm11, %v4723_v29, 0.0  ;;  %vm14154_vm13 = vcmp.eq.s32.totalorder %v8701_v52, %v11287_v45  ;;  %v12002_v12 = vld [vmem:[%s7975_s6 + $0x140] sm:$0xff] }
 0x2de   : > { %v4497_v8 = vadd.f32 %v4496_v20, %v4473_v49  ;;  %v4408_v40 = vpop.f32.mrf.mxu0  ;;  %6334 = vmatprep.mubr.f32.mxu1 %v13792_v36  ;;  %v4814_v57 = vadd.f32 %v4813_v6, %v4790_v19  ;;  %v4725_v44 = vpop.f32.mrf.mxu1  ;;  %vm13659_vm12 = vcmp.eq.s32.totalorder %v8726_v54, %v11699_v16  ;;  %vm14155_vm11 = vcmp.eq.s32.totalorder %v8726_v54, %v11278_v33 }
 0x2df   : > { %v4474_v18 = vsel %vm14154_vm13, %v4408_v40, 0.0  ;;  %v4791_v11 = vsel %vm13658_vm8, %v4725_v44, 0.0  ;;  %vm13660_vm13 = vcmp.eq.s32.totalorder %v8726_v54, %v11705_v59  ;;  %vm13661_vm8 = vcmp.eq.s32.totalorder %v8751_v56, %v11699_v16 }
 0x2e0   : > { %v4518_v51 = vadd.f32 %v4517_v5, %v4474_v18  ;;  %v4412_v0 = vpop.f32.mrf.mxu0  ;;  %7553 = vmatmul.mubr.msk.f32.gmra.mxu0 %vm429_vm6, %v12002_v12  ;;  %v4835_v25 = vadd.f32 %v4834_v9, %v4791_v11  ;;  %v4729_v20 = vpop.f32.mrf.mxu1  ;;  %v12027_v9 = vld [vmem:[%s7975_s6 + $0x148] sm:$0xff] }
 0x2e1   : > { %v4475_v39 = vsel %vm14155_vm11, %v4412_v0, 0.0  ;;  %7571 = vmatmul.mubr.msk.f32.gmra.mxu1 %vm429_vm6, %v11527_v1  ;;  %6023 = vmatprep.mubr.f32.mxu0 %v13792_v36  ;;  %v4792_v23 = vsel %vm13659_vm12, %v4729_v20, 0.0  ;;  %vm14156_vm11 = vcmp.eq.s32.totalorder %v8726_v54, %v11287_v45  ;;  %vm14157_vm12 = vcmp.eq.s32.totalorder %v8751_v56, %v11278_v33 }
 0x2e2   : > { %v4498_v4 = vadd.f32 %v4497_v8, %v4475_v39  ;;  %v4414_v6 = vpop.f32.mrf.mxu0  ;;  %6340 = vmatprep.mubr.f32.mxu1 %v13792_v36  ;;  %v4815_v24 = vadd.f32 %v4814_v57, %v4792_v23  ;;  %v4731_v5 = vpop.f32.mrf.mxu1 }
 0x2e3   : > { %v4476_v34 = vsel %vm14156_vm11, %v4414_v6, 0.0  ;;  %v4793_v21 = vsel %vm13660_vm13, %v4731_v5, 0.0  ;;  %vm13662_vm11 = vcmp.eq.s32.totalorder %v8751_v56, %v11705_v59  ;;  %vm13663_vm13 = vcmp.eq.s32.totalorder %v8776_v58, %v11699_v16 }
 0x2e4   : > { %v4519_v1 = vadd.f32 %v4518_v51, %v4476_v34  ;;  %v4418_v61 = vpop.f32.mrf.mxu0  ;;  %7554 = vmatmul.mubr.msk.f32.gmra.mxu0 %vm429_vm6, %v12027_v9  ;;  %v4836_v49 = vadd.f32 %v4835_v25, %v4793_v21  ;;  %v4735_v8 = vpop.f32.mrf.mxu1  ;;  %v12052_v25 = vld [vmem:[%s7975_s6 + $0x150] sm:$0xff] }
 0x2e5   : > { %v4477_v29 = vsel %vm14157_vm12, %v4418_v61, 0.0  ;;  %7572 = vmatmul.mubr.msk.f32.gmra.mxu1 %vm429_vm6, %v11552_v2  ;;  %6029 = vmatprep.mubr.f32.mxu0 %v13792_v36  ;;  %v4794_v40 = vsel %vm13661_vm8, %v4735_v8, 0.0  ;;  %vm14158_vm12 = vcmp.eq.s32.totalorder %v8751_v56, %v11287_v45  ;;  %vm14159_vm8 = vcmp.eq.s32.totalorder %v8776_v58, %v11278_v33 }
 0x2e6   : > { %v4499_v19 = vadd.f32 %v4498_v4, %v4477_v29  ;;  %v4420_v57 = vpop.f32.mrf.mxu0  ;;  %6346 = vmatprep.mubr.f32.mxu1 %v13792_v36  ;;  %v4816_v18 = vadd.f32 %v4815_v24, %v4794_v40  ;;  %v4737_v51 = vpop.f32.mrf.mxu1 }
 0x2e7   : > { %v4478_v44 = vsel %vm14158_vm12, %v4420_v57, 0.0  ;;  %v4795_v11 = vsel %vm13662_vm11, %v4737_v51, 0.0  ;;  %vm13664_vm12 = vcmp.eq.s32.totalorder %v8776_v58, %v11705_v59  ;;  %vm13665_vm11 = vcmp.eq.s32.totalorder %v8802_v60, %v11699_v16 }
 0x2e8   : > { %v4520_v2 = vadd.f32 %v4519_v1, %v4478_v44  ;;  %v4424_v0 = vpop.f32.mrf.mxu0  ;;  %7555 = vmatmul.mubr.msk.f32.gmra.mxu0 %vm429_vm6, %v12052_v25  ;;  %v4837_v39 = vadd.f32 %v4836_v49, %v4795_v11  ;;  %v4741_v4 = vpop.f32.mrf.mxu1  ;;  %v12077_v49 = vld [vmem:[%s7975_s6 + $0x158] sm:$0xff] }
 0x2e9   : > { %v4479_v20 = vsel %vm14159_vm8, %v4424_v0, 0.0  ;;  %7573 = vmatmul.mubr.msk.f32.gmra.mxu1 %vm429_vm6, %v11577_v26  ;;  %6035 = vmatprep.mubr.f32.mxu0 %v13792_v36  ;;  %v4796_v6 = vsel %vm13663_vm13, %v4741_v4, 0.0  ;;  %vm14160_vm8 = vcmp.eq.s32.totalorder %v8776_v58, %v11287_v45  ;;  %vm14161_vm13 = vcmp.eq.s32.totalorder %v8802_v60, %v11278_v33 }
 0x2ea   : > { %v4500_v23 = vadd.f32 %v4499_v19, %v4479_v20  ;;  %v4426_v24 = vpop.f32.mrf.mxu0  ;;  %6352 = vmatprep.mubr.f32.mxu1 %v13792_v36  ;;  %v4817_v34 = vadd.f32 %v4816_v18, %v4796_v6  ;;  %v4743_v1 = vpop.f32.mrf.mxu1 }
 0x2eb   : > { %v4480_v5 = vsel %vm14160_vm8, %v4426_v24, 0.0  ;;  %v4797_v21 = vsel %vm13664_vm12, %v4743_v1, 0.0  ;;  %vm13666_vm8 = vcmp.eq.s32.totalorder %v8802_v60, %v11705_v59  ;;  %vm13667_vm12 = vcmp.eq.s32.totalorder %v8833_v63, %v11699_v16 }
 0x2ec   : > { %v4521_v26 = vadd.f32 %v4520_v2, %v4480_v5  ;;  %v4430_v61 = vpop.f32.mrf.mxu0  ;;  %7556 = vmatmul.mubr.msk.f32.gmra.mxu0 %vm429_vm6, %v12077_v49  ;;  %v4838_v29 = vadd.f32 %v4837_v39, %v4797_v21  ;;  %v4747_v19 = vpop.f32.mrf.mxu1  ;;  %v12102_v39 = vld [vmem:[%s7975_s6 + $0x160] sm:$0xff] }
 0x2ed   : > { %v4481_v8 = vsel %vm14161_vm13, %v4430_v61, 0.0  ;;  %7574 = vmatmul.mubr.msk.f32.gmra.mxu1 %vm429_vm6, %v11602_v32  ;;  %6041 = vmatprep.mubr.f32.mxu0 %v13792_v36  ;;  %v4798_v57 = vsel %vm13665_vm11, %v4747_v19, 0.0  ;;  %vm14162_vm13 = vcmp.eq.s32.totalorder %v8802_v60, %v11287_v45  ;;  %vm14163_vm11 = vcmp.eq.s32.totalorder %v8833_v63, %v11278_v33 }
 0x2ee   : > { %v4501_v40 = vadd.f32 %v4500_v23, %v4481_v8  ;;  %v4432_v18 = vpop.f32.mrf.mxu0  ;;  %6358 = vmatprep.mubr.f32.mxu1 %v13792_v36  ;;  %v4818_v44 = vadd.f32 %v4817_v34, %v4798_v57  ;;  %v4749_v2 = vpop.f32.mrf.mxu1 }
 0x2ef   : > { %v4482_v51 = vsel %vm14162_vm13, %v4432_v18, 0.0  ;;  %v4799_v11 = vsel %vm13666_vm8, %v4749_v2, 0.0  ;;  %vm13668_vm13 = vcmp.eq.s32.totalorder %v8833_v63, %v11705_v59  ;;  %vm13669_vm8 = vcmp.eq.s32.totalorder %v8859_v3, %v11699_v16 }
 0x2f0   : > { %v4522_v32 = vadd.f32 %v4521_v26, %v4482_v51  ;;  %v4436_v0 = vpop.f32.mrf.mxu0  ;;  %7557 = vmatmul.mubr.msk.f32.gmra.mxu0 %vm429_vm6, %v12102_v39  ;;  %v4839_v20 = vadd.f32 %v4838_v29, %v4799_v11  ;;  %v4753_v23 = vpop.f32.mrf.mxu1  ;;  %v12127_v29 = vld [vmem:[%s7975_s6 + $0x168] sm:$0xff] }
 0x2f1   : > { %v4483_v4 = vsel %vm14163_vm11, %v4436_v0, 0.0  ;;  %7575 = vmatmul.mubr.msk.f32.gmra.mxu1 %vm429_vm6, %v11627_v55  ;;  %6047 = vmatprep.mubr.f32.mxu0 %v13792_v36  ;;  %v4800_v24 = vsel %vm13667_vm12, %v4753_v23, 0.0  ;;  %vm14164_vm11 = vcmp.eq.s32.totalorder %v8833_v63, %v11287_v45  ;;  %vm14165_vm12 = vcmp.eq.s32.totalorder %v8859_v3, %v11278_v33 }
 0x2f2   : > { %v4502_v6 = vadd.f32 %v4501_v40, %v4483_v4  ;;  %v4438_v34 = vpop.f32.mrf.mxu0  ;;  %6364 = vmatprep.mubr.f32.mxu1 %v13792_v36  ;;  %v4819_v5 = vadd.f32 %v4818_v44, %v4800_v24  ;;  %v4755_v26 = vpop.f32.mrf.mxu1 }
 0x2f3   : > { %v4484_v1 = vsel %vm14164_vm11, %v4438_v34, 0.0  ;;  %v4801_v21 = vsel %vm13668_vm13, %v4755_v26, 0.0  ;;  %vm13670_vm11 = vcmp.eq.s32.totalorder %v8859_v3, %v11705_v59  ;;  %vm13671_vm13 = vcmp.eq.s32.totalorder %v13900_v27, %v11699_v16 }
 0x2f4   : > { %v4523_v55 = vadd.f32 %v4522_v32, %v4484_v1  ;;  %v4442_v61 = vpop.f32.mrf.mxu0  ;;  %7558 = vmatmul.mubr.msk.f32.gmra.mxu0 %vm429_vm6, %v12127_v29  ;;  %v4840_v8 = vadd.f32 %v4839_v20, %v4801_v21  ;;  %v4759_v40 = vpop.f32.mrf.mxu1  ;;  %v12152_v20 = vld [vmem:[%s7975_s6 + $0x170] sm:$0xff] }
 0x2f5   : > { %v4485_v19 = vsel %vm14165_vm12, %v4442_v61, 0.0  ;;  %7576 = vmatmul.mubr.msk.f32.gmra.mxu1 %vm429_vm6, %v11653_v43  ;;  %6053 = vmatprep.mubr.f32.mxu0 %v13792_v36  ;;  %v4802_v18 = vsel %vm13669_vm8, %v4759_v40, 0.0  ;;  %vm14166_vm12 = vcmp.eq.s32.totalorder %v8859_v3, %v11287_v45  ;;  %vm14167_vm8 = vcmp.eq.s32.totalorder %v13900_v27, %v11278_v33 }
 0x2f6   : > { %v4503_v57 = vadd.f32 %v4502_v6, %v4485_v19  ;;  %v4444_v44 = vpop.f32.mrf.mxu0  ;;  %6370 = vmatprep.mubr.f32.mxu1 %v13792_v36  ;;  %v4820_v51 = vadd.f32 %v4819_v5, %v4802_v18  ;;  %v4761_v32 = vpop.f32.mrf.mxu1 }
 0x2f7   : > { %v4486_v2 = vsel %vm14166_vm12, %v4444_v44, 0.0  ;;  %v4803_v11 = vsel %vm13670_vm11, %v4761_v32, 0.0  ;;  %vm4612_vm12 = vcmp.eq.s32.totalorder %v13900_v27, %v11705_v59  ;;  %vm13672_vm11 = vcmp.eq.s32.totalorder %v14008_v13, %v11699_v16 }
 0x2f8   : > { %v4524_v43 = vadd.f32 %v4523_v55, %v4486_v2  ;;  %v4448_v0 = vpop.f32.mrf.mxu0  ;;  %7559 = vmatmul.mubr.msk.f32.gmra.mxu0 %vm429_vm6, %v12152_v20  ;;  %v4841_v4 = vadd.f32 %v4840_v8, %v4803_v11  ;;  %v4765_v6 = vpop.f32.mrf.mxu1  ;;  %v12177_v8 = vld [vmem:[%s7975_s6 + $0x178] sm:$0xff] }
 0x2f9   : > { %v4487_v23 = vsel %vm14167_vm8, %v4448_v0, 0.0  ;;  %7577 = vmatmul.mubr.msk.f32.gmra.mxu1 %vm429_vm6, %v11680_v31  ;;  %6059 = vmatprep.mubr.f32.mxu0 %v13792_v36  ;;  %v4804_v34 = vsel %vm13671_vm13, %v4765_v6, 0.0  ;;  %vm14168_vm8 = vcmp.eq.s32.totalorder %v13900_v27, %v11287_v45  ;;  %vm14169_vm13 = vcmp.eq.s32.totalorder %v14008_v13, %v11278_v33 }
 0x2fa   : > { %v4504_v24 = vadd.f32 %v4503_v57, %v4487_v23  ;;  %v4450_v5 = vpop.f32.mrf.mxu0  ;;  %6376 = vmatprep.mubr.f32.mxu1 %v13792_v36  ;;  %v4821_v1 = vadd.f32 %v4820_v51, %v4804_v34  ;;  %v4767_v55 = vpop.f32.mrf.mxu1 }
 0x2fb   : > { %v4488_v26 = vsel %vm14168_vm8, %v4450_v5, 0.0  ;;  %v4805_v21 = vsel %vm4612_vm12, %v4767_v55, 0.0  ;;  %vm13673_vm8 = vcmp.eq.s32.totalorder %v14008_v13, %v11705_v59 }
 0x2fc   : > { %v4525_v31 = vadd.f32 %v4524_v43, %v4488_v26  ;;  %v4454_v61 = vpop.f32.mrf.mxu0  ;;  %7560 = vmatmul.mubr.msk.f32.gmra.mxu0 %vm429_vm6, %v12177_v8  ;;  %v4842_v19 = vadd.f32 %v4841_v4, %v4805_v21  ;;  %v4771_v57 = vpop.f32.mrf.mxu1  ;;  %v7792_v4 = vld [vmem:[%s7975_s6 + $0x80] sm:$0xff] }
 0x2fd   : > { %v4489_v40 = vsel %vm14169_vm13, %v4454_v61, 0.0  ;;  %7578 = vmatmul.mubr.msk.f32.gmra.mxu1 %vm429_vm6, %v11711_v30  ;;  %6528 = vmatprep.mubr.f32.mxu0 %v13792_v36  ;;  %v4806_v44 = vsel %vm13672_vm11, %v4771_v57, 0.0  ;;  %vm14170_vm13 = vcmp.eq.s32.totalorder %v14008_v13, %v11287_v45  ;;  %vm14171_vm11 = vcmp.eq.s32.totalorder %v14011_v10, %v11699_v16 }
 0x2fe   : > { %v4505_v18 = vadd.f32 %v4504_v24, %v4489_v40  ;;  %v4456_v51 = vpop.f32.mrf.mxu0  ;;  %6770 = vmatprep.mubr.f32.mxu1 %v13792_v36  ;;  %v4822_v33 = vadd.f32 %v4821_v1, %v4806_v44  ;;  %v4773_v32 = vpop.f32.mrf.mxu1 }
 0x2ff   : > { %v4490_v2 = vsel %vm14170_vm13, %v4456_v51, 0.0  ;;  %v4807_v11 = vsel %vm13673_vm8, %v4773_v32, 0.0  ;;  %vm14172_vm13 = vmmov %vm14171_vm11 }
 0x300   : > { %v4506_v30 = vrot.slane %v4505_v18, 4  ;;  %v4526_v43 = vadd.f32 %v4525_v31, %v4490_v2  ;;  %v4923_v0 = vpop.f32.mrf.mxu0  ;;  %7581 = vmatmul.mubr.msk.f32.vlgmr.msra.gmra.mxu0 %vm429_vm6, %v7792_v4  ;;  %v4823_v23 = vrot.slane %v4822_v33, 4  ;;  %v4843_v6 = vadd.f32 %v4842_v19, %v4807_v11  ;;  %v5165_v34 = vpop.f32.mrf.mxu1 }
 0x301   : > { %v5018_v24 = vsel %vm14171_vm11, %v4923_v0, 0.0  ;;  %7599 = vmatmul.mubr.msk.f32.vlgmr.msra.gmra.mxu1 %vm429_vm6, %v11749_v15  ;;  %6534 = vmatprep.mubr.f32.mxu0 %v13792_v36  ;;  %v5260_v1 = vsel %vm14172_vm13, %v5165_v34, 0.0  ;;  %vm14173_vm11 = vcmp.eq.s32.totalorder %v14011_v10, %v11705_v59  ;;  %vm14175_vm13 = vcmp.eq.s32.totalorder %v14105_v47, %v11699_v16 }
 0x302   : > { %v4507_v45 = vadd.f32 %v4506_v30, %v4505_v18  ;;  %v4527_v5 = vrot.slane %v4526_v43, 4  ;;  %v4925_v26 = vpop.f32.mrf.mxu0  ;;  %6776 = vmatprep.mubr.f32.mxu1 %v13792_v36  ;;  %v4824_v55 = vadd.f32 %v4823_v23, %v4822_v33  ;;  %v4844_v31 = vrot.slane %v4843_v6, 4  ;;  %v5167_v61 = vpop.f32.mrf.mxu1  ;;  %vm14174_vm8 = vmmov %vm14173_vm11  ;;  %v7793_v18 = vld [vmem:[%s7975_s6 + $0x88] sm:$0xff] }
 0x303   : > { %v5019_v21 = vsel %vm14173_vm11, %v4925_v26, 0.0  ;;  %v5261_v40 = vsel %vm14174_vm8, %v5167_v61, 0.0  ;;  %vm14176_vm8 = vmmov %vm14175_vm13  ;;  %vm14177_vm11 = vcmp.eq.s32.totalorder %v14105_v47, %v11705_v59  ;;  %v7794_v61 = vld [vmem:[%s7975_s6 + $0x90] sm:$0xff] }
 0x304   : > { %v4508_v19 = vrot.slane %v4507_v45, 2  ;;  %v4528_v15 = vadd.f32 %v4527_v5, %v4526_v43  ;;  %v4929_v57 = vpop.f32.mrf.mxu0  ;;  %7582 = vmatmul.mubr.msk.f32.gmra.mxu0 %vm429_vm6, %v7793_v18  ;;  %v4825_v44 = vrot.slane %v4824_v55, 2  ;;  %v4845_v51 = vadd.f32 %v4844_v31, %v4843_v6  ;;  %v5171_v2 = vpop.f32.mrf.mxu1 }
 0x305   : > { %v5020_v33 = vsel %vm14175_vm13, %v4929_v57, 0.0  ;;  %7600 = vmatmul.mubr.msk.f32.gmra.mxu1 %vm429_vm6, %v11791_v53  ;;  %6540 = vmatprep.mubr.f32.mxu0 %v13792_v36  ;;  %v5262_v11 = vsel %vm14176_vm8, %v5171_v2, 0.0  ;;  %vm14178_vm13 = vmmov %vm14177_vm11  ;;  %v14181_v2 = vld [vmem:[#allocation33_spill] sm:$0xff] }
 0x306   : > { %v4509_v32 = vadd.f32 %v4508_v19, %v4507_v45  ;;  %v4529_v30 = vrot.slane %v4528_v15, 2  ;;  %v5050_v43 = vadd.f32 %v5020_v33, %v5018_v24  ;;  %v4931_v0 = vpop.f32.mrf.mxu0  ;;  %6782 = vmatprep.mubr.f32.mxu1 %v13792_v36  ;;  %v4826_v4 = vadd.f32 %v4825_v44, %v4824_v55  ;;  %v5173_v34 = vpop.f32.mrf.mxu1  ;;  %vm4540_vm8 = vmand %vm11802_vm0, %vm9529_vm2 }
 0x307   : > { %v4846_v23 = vrot.slane %v4845_v51, 2  ;;  %v5292_v6 = vadd.f32 %v5262_v11, %v5260_v1  ;;  %v5021_v53 = vsel %vm14177_vm11, %v4931_v0, 0.0  ;;  %v5263_v24 = vsel %vm14178_vm13, %v5173_v34, 0.0 }
 0x308   : > { %v4510_v5 = vrot.slane %v4509_v32, 1  ;;  %v4530_v45 = vadd.f32 %v4529_v30, %v4528_v15  ;;  %v5071_v26 = vadd.f32 %v5021_v53, %v5019_v21  ;;  %v4935_v31 = vpop.f32.mrf.mxu0  ;;  %7583 = vmatmul.mubr.msk.f32.gmra.mxu0 %vm429_vm6, %v7794_v61  ;;  %v4827_v19 = vrot.slane %v4826_v4, 1  ;;  %v5177_v18 = vpop.f32.mrf.mxu1  ;;  %v14182_v30 = vld [vmem:[#allocation7_spill] sm:$0xff] }
 0x309   : > { %v4847_v55 = vadd.f32 %v4846_v23, %v4845_v51  ;;  %v5313_v57 = vadd.f32 %v5263_v24, %v5261_v40  ;;  %v5022_v1 = vsel %vm4587_vm14, %v4935_v31, 0.0  ;;  %7601 = vmatmul.mubr.msk.f32.gmra.mxu1 %vm429_vm6, %v11830_v42  ;;  %6546 = vmatprep.mubr.f32.mxu0 %v13792_v36  ;;  %v5264_v40 = vsel %vm4587_vm14, %v5177_v18, 0.0  ;;  %vm12268_vm14 = vmand %vm4540_vm8, %vm9562_vm9 }
 0x30a   : > { %v4531_v21 = vrot.slane %v4530_v45, 1  ;;  %v5051_v33 = vadd.f32 %v5050_v43, %v5022_v1  ;;  %v4937_v51 = vpop.f32.mrf.mxu0  ;;  %6788 = vmatprep.mubr.f32.mxu1 %v13792_v36  ;;  %v4542_v42 = vmul.f32 %v14182_v30, %v14181_v2  ;;  %v5293_v0 = vadd.f32 %v5292_v6, %v5264_v40  ;;  %v5179_v53 = vpop.f32.mrf.mxu1  ;;  %v7795_v1 = vld [vmem:[%s7975_s6 + $0x98] sm:$0xff] }
 0x30b   : > { %v4848_v11 = vrot.slane %v4847_v55, 1  ;;  %v5023_v23 = vsel %vm4588_vm7, %v4937_v51, 0.0  ;;  %v4511_v34 = vadd.f32 %v4510_v5, %v4509_v32  ;;  %v5265_v31 = vsel %vm4588_vm7, %v5179_v53, 0.0 }
 0x30c   : > { %v4532_v24 = vadd.f32 %v4531_v21, %v4530_v45  ;;  %v5072_v43 = vadd.f32 %v5071_v26, %v5023_v23  ;;  %v4941_v61 = vpop.f32.mrf.mxu0  ;;  %7584 = vmatmul.mubr.msk.f32.gmra.mxu0 %vm429_vm6, %v7795_v1  ;;  %v4828_v18 = vadd.f32 %v4827_v19, %v4826_v4  ;;  %v5314_v5 = vadd.f32 %v5313_v57, %v5265_v31  ;;  %v5183_v26 = vpop.f32.mrf.mxu1 }
 0x30d   : > { %v4849_v6 = vadd.f32 %v4848_v11, %v4847_v55  ;;  %v5024_v45 = vsel %vm4589_vm3, %v4941_v61, 0.0  ;;  %7602 = vmatmul.mubr.msk.f32.gmra.mxu1 %vm429_vm6, %v11866_v35  ;;  %6552 = vmatprep.mubr.f32.mxu0 %v13792_v36  ;;  %v5266_v21 = vsel %vm4589_vm3, %v5183_v26, 0.0  ;;  %vm14186_vm7 = vcmp.eq.s32.totalorder %v8595_v7, %v11705_v59 }
 0x30e   : > { %v4535_v4 = vcombine.low %v4511_v34, %v4532_v24  ;;  %v5052_v19 = vadd.f32 %v5051_v33, %v5024_v45  ;;  %v4943_v44 = vpop.f32.mrf.mxu0  ;;  %6794 = vmatprep.mubr.f32.mxu1 %v13792_v36  ;;  %v5294_v57 = vadd.f32 %v5293_v0, %v5266_v21  ;;  %v5185_v51 = vpop.f32.mrf.mxu1  ;;  %v12287_v11 = vsel %vm12268_vm14, %v4542_v42, 0.0  ;;  %vm14187_vm0 = vmmov %vm14186_vm7  ;;  %v7796_v34 = vld [vmem:[%s7975_s6 + $0xa0] sm:$0xff]  ;;  %v14191_v45 = vld [vmem:[#allocation29_spill] sm:$0xff] }
 0x30f   : > { %v4852_v55 = vcombine.low %v4828_v18, %v4849_v6  ;;  %v5025_v40 = vsel %vm14186_vm7, %v4943_v44, 0.0  ;;  %v5267_v23 = vsel %vm14187_vm0, %v5185_v51, 0.0  ;;  %vm14188_vm3 = vcmp.eq.s32.totalorder %v8626_v46, %v11699_v16  ;;  %v7797_v21 = vld [vmem:[%s7975_s6 + $0xa8] sm:$0xff] }
 0x310   : > { %v4536_v35 = vrot.slane %v4535_v4, 6  ;;  %v5073_v33 = vadd.f32 %v5072_v43, %v5025_v40  ;;  %v4947_v53 = vpop.f32.mrf.mxu0  ;;  %7585 = vmatmul.mubr.msk.f32.gmra.mxu0 %vm429_vm6, %v7796_v34  ;;  %v5315_v24 = vadd.f32 %v5314_v5, %v5267_v23  ;;  %v5189_v61 = vpop.f32.mrf.mxu1  ;;  %vm14189_vm11 = vmmov %vm14188_vm3  ;;  %vm14190_vm13 = vcmp.eq.s32.totalorder %v8626_v46, %v11705_v59 }
 0x311   : > { %v4853_v0 = vrot.slane %v4852_v55, 6  ;;  %v5026_v31 = vsel %vm14188_vm3, %v4947_v53, 0.0  ;;  %7603 = vmatmul.mubr.msk.f32.gmra.mxu1 %vm429_vm6, %v11894_v28  ;;  %6558 = vmatprep.mubr.f32.mxu0 %v13792_v36  ;;  %v5268_v1 = vsel %vm14189_vm11, %v5189_v61, 0.0  ;;  %vm14192_vm8 = vmmov %vm14190_vm13  ;;  %vm14193_vm14 = vcmp.eq.s32.totalorder %v8651_v48, %v11699_v16 }
 0x312   : > { %v4538_v42 = vmul.f32 %v4536_v35, %v11879_v22  ;;  %v5053_v43 = vadd.f32 %v5052_v19, %v5026_v31  ;;  %v4949_v18 = vpop.f32.mrf.mxu0  ;;  %6800 = vmatprep.mubr.f32.mxu1 %v13792_v36  ;;  %v5295_v6 = vadd.f32 %v5294_v57, %v5268_v1  ;;  %v5191_v28 = vpop.f32.mrf.mxu1  ;;  %vm14194_vm7 = vmmov %vm14193_vm14  ;;  %vm14195_vm0 = vcmp.eq.s32.totalorder %v8651_v48, %v11705_v59 }
 0x313   : > { %v4855_v32 = vmul.f32 %v4853_v0, %v12287_v11  ;;  %v5027_v5 = vsel %vm14190_vm13, %v4949_v18, 0.0  ;;  %v5269_v4 = vsel %vm14192_vm8, %v5191_v28, 0.0  ;;  %vm14196_vm3 = vmmov %vm14195_vm0  ;;  %vm14197_vm11 = vcmp.eq.s32.totalorder %v8676_v50, %v11699_v16 }
 0x314   : > { %v12310_v26 = vadd.f32 %v4538_v42, %v14191_v45  ;;  %v5074_v22 = vadd.f32 %v5073_v33, %v5027_v5  ;;  %v4953_v19 = vpop.f32.mrf.mxu0  ;;  %7586 = vmatmul.mubr.msk.f32.gmra.mxu0 %vm429_vm6, %v7797_v21  ;;  %v5316_v55 = vadd.f32 %v5315_v24, %v5269_v4  ;;  %v5195_v40 = vpop.f32.mrf.mxu1  ;;  %v7798_v24 = vld [vmem:[%s7975_s6 + $0xb0] sm:$0xff]  ;;  %vm14198_vm13 = vmmov %vm14197_vm11  ;;  %vm14199_vm8 = vcmp.eq.s32.totalorder %v8676_v50, %v11705_v59 }
 0x315   : > { %v12318_v44 = vadd.f32 %v4855_v32, %v11918_v62  ;;  %v5028_v57 = vsel %vm14193_vm14, %v4953_v19, 0.0  ;;  %7604 = vmatmul.mubr.msk.f32.gmra.mxu1 %vm429_vm6, %v11924_v17  ;;  %6564 = vmatprep.mubr.f32.mxu0 %v13792_v36  ;;  %v5270_v35 = vsel %vm14194_vm7, %v5195_v40, 0.0  ;;  %vm14200_vm14 = vmmov %vm14199_vm8  ;;  %vm14201_vm7 = vcmp.eq.s32.totalorder %v8701_v52, %v11699_v16 }
 0x316   : > { %v5054_v51 = vadd.f32 %v5053_v43, %v5028_v57  ;;  %v4955_v33 = vpop.f32.mrf.mxu0  ;;  %6806 = vmatprep.mubr.f32.mxu1 %v13792_v36  ;;  %v5296_v62 = vadd.f32 %v5295_v6, %v5270_v35  ;;  %v5197_v53 = vpop.f32.mrf.mxu1 }
 0x317   : > { %v5029_v23 = vsel %vm14195_vm0, %v4955_v33, 0.0  ;;  %v5271_v17 = vsel %vm14196_vm3, %v5197_v53, 0.0  ;;  %vm14202_vm0 = vmmov %vm14201_vm7  ;;  %vm14203_vm3 = vcmp.eq.s32.totalorder %v8701_v52, %v11705_v59  ;;  %v7800_v53 = vld [vmem:[%s7975_s6 + $0xc0] sm:$0xff] }
 0x318   : > { %v5075_v34 = vadd.f32 %v5074_v22, %v5029_v23  ;;  %v4959_v0 = vpop.f32.mrf.mxu0  ;;  %7587 = vmatmul.mubr.msk.f32.gmra.mxu0 %vm429_vm6, %v7798_v24  ;;  %v5317_v31 = vadd.f32 %v5316_v55, %v5271_v17  ;;  %v5201_v42 = vpop.f32.mrf.mxu1  ;;  %v7799_v22 = vld [vmem:[%s7975_s6 + $0xb8] sm:$0xff] }
 0x319   : > { %v5030_v61 = vsel %vm14197_vm11, %v4959_v0, 0.0  ;;  %7605 = vmatmul.mubr.msk.f32.gmra.mxu1 %vm429_vm6, %v11952_v37  ;;  %6570 = vmatprep.mubr.f32.mxu0 %v13792_v36  ;;  %v5272_v1 = vsel %vm14198_vm13, %v5201_v42, 0.0  ;;  %vm14204_vm11 = vmmov %vm14203_vm3  ;;  %vm14205_vm13 = vcmp.eq.s32.totalorder %v8726_v54, %v11699_v16 }
 0x31a   : > { %v5055_v43 = vadd.f32 %v5054_v51, %v5030_v61  ;;  %v4961_v18 = vpop.f32.mrf.mxu0  ;;  %6812 = vmatprep.mubr.f32.mxu1 %v13792_v36  ;;  %v5297_v32 = vadd.f32 %v5296_v62, %v5272_v1  ;;  %v5203_v5 = vpop.f32.mrf.mxu1 }
 0x31b   : > { %v5031_v6 = vsel %vm14199_vm8, %v4961_v18, 0.0  ;;  %v5273_v37 = vsel %vm14200_vm14, %v5203_v5, 0.0  ;;  %vm14206_vm8 = vmmov %vm14205_vm13  ;;  %vm14207_vm14 = vcmp.eq.s32.totalorder %v8726_v54, %v11705_v59 }
 0x31c   : > { %v5076_v28 = vadd.f32 %v5075_v34, %v5031_v6  ;;  %v4965_v45 = vpop.f32.mrf.mxu0  ;;  %7588 = vmatmul.mubr.msk.f32.gmra.mxu0 %vm429_vm6, %v7799_v22  ;;  %v5318_v4 = vadd.f32 %v5317_v31, %v5273_v37  ;;  %v5207_v21 = vpop.f32.mrf.mxu1  ;;  %v7801_v6 = vld [vmem:[%s7975_s6 + $0xc8] sm:$0xff] }
 0x31d   : > { %v5032_v19 = vsel %vm14201_vm7, %v4965_v45, 0.0  ;;  %7606 = vmatmul.mubr.msk.f32.gmra.mxu1 %vm429_vm6, %v11977_v41  ;;  %6576 = vmatprep.mubr.f32.mxu0 %v13792_v36  ;;  %v5274_v57 = vsel %vm14202_vm0, %v5207_v21, 0.0  ;;  %vm14208_vm7 = vmmov %vm14207_vm14  ;;  %vm14209_vm0 = vcmp.eq.s32.totalorder %v8751_v56, %v11699_v16 }
 0x31e   : > { %v5056_v55 = vadd.f32 %v5055_v43, %v5032_v19  ;;  %v4967_v40 = vpop.f32.mrf.mxu0  ;;  %6818 = vmatprep.mubr.f32.mxu1 %v13792_v36  ;;  %v5298_v51 = vadd.f32 %v5297_v32, %v5274_v57  ;;  %v5209_v33 = vpop.f32.mrf.mxu1 }
 0x31f   : > { %v5033_v35 = vsel %vm14203_vm3, %v4967_v40, 0.0  ;;  %v5275_v41 = vsel %vm14204_vm11, %v5209_v33, 0.0  ;;  %vm14210_vm3 = vmmov %vm14209_vm0  ;;  %vm14211_vm11 = vcmp.eq.s32.totalorder %v8751_v56, %v11705_v59 }
 0x320   : > { %v5077_v62 = vadd.f32 %v5076_v28, %v5033_v35  ;;  %v4971_v23 = vpop.f32.mrf.mxu0  ;;  %7589 = vmatmul.mubr.msk.f32.gmra.mxu0 %vm429_vm6, %v7800_v53  ;;  %v5319_v34 = vadd.f32 %v5318_v4, %v5275_v41  ;;  %v5213_v0 = vpop.f32.mrf.mxu1 }
 0x321   : > { %v5034_v17 = vsel %vm14205_vm13, %v4971_v23, 0.0  ;;  %7607 = vmatmul.mubr.msk.f32.gmra.mxu1 %vm429_vm6, %v12002_v12  ;;  %6582 = vmatprep.mubr.f32.mxu0 %v13792_v36  ;;  %v5276_v31 = vsel %vm14206_vm8, %v5213_v0, 0.0  ;;  %vm14212_vm13 = vmmov %vm14211_vm11  ;;  %vm14213_vm8 = vcmp.eq.s32.totalorder %v8776_v58, %v11699_v16 }
 0x322   : > { %v5057_v24 = vadd.f32 %v5056_v55, %v5034_v17  ;;  %v4973_v61 = vpop.f32.mrf.mxu0  ;;  %6824 = vmatprep.mubr.f32.mxu1 %v13792_v36  ;;  %v5299_v42 = vadd.f32 %v5298_v51, %v5276_v31  ;;  %v5215_v1 = vpop.f32.mrf.mxu1  ;;  %v7802_v51 = vld [vmem:[%s7975_s6 + $0xd0] sm:$0xff] }
 0x323   : > { %v5035_v43 = vsel %vm14207_vm14, %v4973_v61, 0.0  ;;  %v5277_v12 = vsel %vm14208_vm7, %v5215_v1, 0.0  ;;  %vm14214_vm14 = vmmov %vm14213_vm8  ;;  %vm14215_vm7 = vcmp.eq.s32.totalorder %v8776_v58, %v11705_v59  ;;  %v7803_v61 = vld [vmem:[%s7975_s6 + $0xd8] sm:$0xff] }
 0x324   : > { %v5078_v18 = vadd.f32 %v5077_v62, %v5035_v43  ;;  %v4977_v32 = vpop.f32.mrf.mxu0  ;;  %7590 = vmatmul.mubr.msk.f32.gmra.mxu0 %vm429_vm6, %v7801_v6  ;;  %v5320_v5 = vadd.f32 %v5319_v34, %v5277_v12  ;;  %v5219_v37 = vpop.f32.mrf.mxu1 }
 0x325   : > { %v5036_v28 = vsel %vm14209_vm0, %v4977_v32, 0.0  ;;  %7608 = vmatmul.mubr.msk.f32.gmra.mxu1 %vm429_vm6, %v12027_v9  ;;  %6588 = vmatprep.mubr.f32.mxu0 %v13792_v36  ;;  %v5278_v22 = vsel %vm14210_vm3, %v5219_v37, 0.0  ;;  %vm14216_vm0 = vmmov %vm14215_vm7  ;;  %vm14217_vm3 = vcmp.eq.s32.totalorder %v8802_v60, %v11699_v16 }
 0x326   : > { %v5058_v45 = vadd.f32 %v5057_v24, %v5036_v28  ;;  %v4979_v4 = vpop.f32.mrf.mxu0  ;;  %6830 = vmatprep.mubr.f32.mxu1 %v13792_v36  ;;  %v5300_v19 = vadd.f32 %v5299_v42, %v5278_v22  ;;  %v5221_v55 = vpop.f32.mrf.mxu1  ;;  %v7804_v22 = vld [vmem:[%s7975_s6 + $0xe0] sm:$0xff] }
 0x327   : > { %v5037_v21 = vsel %vm14211_vm11, %v4979_v4, 0.0  ;;  %v5279_v9 = vsel %vm14212_vm13, %v5221_v55, 0.0  ;;  %vm14218_vm11 = vmmov %vm14217_vm3  ;;  %vm14219_vm13 = vcmp.eq.s32.totalorder %v8802_v60, %v11705_v59 }
 0x328   : > { %v5079_v57 = vadd.f32 %v5078_v18, %v5037_v21  ;;  %v4983_v40 = vpop.f32.mrf.mxu0  ;;  %7591 = vmatmul.mubr.msk.f32.gmra.mxu0 %vm429_vm6, %v7802_v51  ;;  %v5321_v35 = vadd.f32 %v5320_v5, %v5279_v9  ;;  %v5225_v62 = vpop.f32.mrf.mxu1 }
 0x329   : > { %v5038_v33 = vsel %vm14213_vm8, %v4983_v40, 0.0  ;;  %7609 = vmatmul.mubr.msk.f32.gmra.mxu1 %vm429_vm6, %v12052_v25  ;;  %6594 = vmatprep.mubr.f32.mxu0 %v13792_v36  ;;  %v5280_v23 = vsel %vm14214_vm14, %v5225_v62, 0.0  ;;  %vm14220_vm8 = vmmov %vm14219_vm13  ;;  %vm14221_vm14 = vcmp.eq.s32.totalorder %v8833_v63, %v11699_v16 }
 0x32a   : > { %v5059_v41 = vadd.f32 %v5058_v45, %v5038_v33  ;;  %v4985_v53 = vpop.f32.mrf.mxu0  ;;  %6836 = vmatprep.mubr.f32.mxu1 %v13792_v36  ;;  %v5301_v34 = vadd.f32 %v5300_v19, %v5280_v23  ;;  %v5227_v0 = vpop.f32.mrf.mxu1  ;;  %v14225_v23 = vld [vmem:[#allocation32_spill] sm:$0xff] }
 0x32b   : > { %v5039_v17 = vsel %vm14215_vm7, %v4985_v53, 0.0  ;;  %v5281_v25 = vsel %vm14216_vm0, %v5227_v0, 0.0  ;;  %vm14222_vm7 = vmmov %vm14221_vm14  ;;  %vm14223_vm0 = vcmp.eq.s32.totalorder %v8833_v63, %v11705_v59  ;;  %v5352_v53 = vand.u32 127, %v14225_v23 }
 0x32c   : > { %v5080_v24 = vadd.f32 %v5079_v57, %v5039_v17  ;;  %v4989_v31 = vpop.f32.mrf.mxu0  ;;  %7592 = vmatmul.mubr.msk.f32.gmra.mxu0 %vm429_vm6, %v7803_v61  ;;  %v5322_v42 = vadd.f32 %v5321_v35, %v5281_v25  ;;  %v5231_v1 = vpop.f32.mrf.mxu1 }
 0x32d   : > { %v5040_v43 = vsel %vm14217_vm3, %v4989_v31, 0.0  ;;  %7610 = vmatmul.mubr.msk.f32.gmra.mxu1 %vm429_vm6, %v12077_v49  ;;  %6600 = vmatprep.mubr.f32.mxu0 %v13792_v36  ;;  %v5282_v12 = vsel %vm14218_vm11, %v5231_v1, 0.0  ;;  %vm14224_vm3 = vmmov %vm14223_vm0  ;;  %vm14226_vm11 = vcmp.eq.s32.totalorder %v8859_v3, %v11699_v16 }
 0x32e   : > { %v5060_v18 = vadd.f32 %v5059_v41, %v5040_v43  ;;  %v4991_v32 = vpop.f32.mrf.mxu0  ;;  %6842 = vmatprep.mubr.f32.mxu1 %v13792_v36  ;;  %v5302_v6 = vadd.f32 %v5301_v34, %v5282_v12  ;;  %v5233_v28 = vpop.f32.mrf.mxu1  ;;  %v7805_v41 = vld [vmem:[%s7975_s6 + $0xe8] sm:$0xff]  ;;  %v7806_v12 = vld [vmem:[%s7975_s6 + $0xf0] sm:$0xff] }
 0x32f   : > { %v5041_v5 = vsel %vm14219_vm13, %v4991_v32, 0.0  ;;  %v5283_v49 = vsel %vm14220_vm8, %v5233_v28, 0.0  ;;  %vm14227_vm13 = vmmov %vm14226_vm11  ;;  %vm14228_vm8 = vcmp.eq.s32.totalorder %v8859_v3, %v11705_v59  ;;  %v14230_v32 = vld [vmem:[#allocation9_spill] sm:$0xff] }
 0x330   : > { %v5081_v37 = vadd.f32 %v5080_v24, %v5041_v5  ;;  %v4995_v45 = vpop.f32.mrf.mxu0  ;;  %7593 = vmatmul.mubr.msk.f32.gmra.mxu0 %vm429_vm6, %v7804_v22  ;;  %v5323_v4 = vadd.f32 %v5322_v42, %v5283_v49  ;;  %v5237_v21 = vpop.f32.mrf.mxu1  ;;  %v14232_v49 = vld [vmem:[#allocation10_spill] sm:$0xff] }
 0x331   : > { %v5042_v19 = vsel %vm14221_vm14, %v4995_v45, 0.0  ;;  %7611 = vmatmul.mubr.msk.f32.gmra.mxu1 %vm429_vm6, %v12102_v39  ;;  %6606 = vmatprep.mubr.f32.mxu0 %v13792_v36  ;;  %v5284_v57 = vsel %vm14222_vm7, %v5237_v21, 0.0  ;;  %vm14229_vm14 = vmmov %vm14228_vm8  ;;  %vm14231_vm7 = vcmp.eq.s32.totalorder %v13900_v27, %v11699_v16  ;;  %v5380_v45 = vrot.slane %v5352_v53, %v14232_v49 }
 0x332   : > { %v5061_v55 = vadd.f32 %v5060_v18, %v5042_v19  ;;  %v4997_v9 = vpop.f32.mrf.mxu0  ;;  %6848 = vmatprep.mubr.f32.mxu1 %v13792_v36  ;;  %v5303_v40 = vadd.f32 %v5302_v6, %v5284_v57  ;;  %v5239_v35 = vpop.f32.mrf.mxu1  ;;  %v5376_v6 = vrot.slane %v5352_v53, %v14230_v32 }
 0x333   : > { %v5043_v51 = vsel %vm14223_vm0, %v4997_v9, 0.0  ;;  %v5285_v39 = vsel %vm14224_vm3, %v5239_v35, 0.0  ;;  %vm14233_vm0 = vmmov %vm14231_vm7  ;;  %vm14234_vm3 = vcmp.eq.s32.totalorder %v14008_v13, %v11699_v16 }
 0x334   : > { %v5082_v33 = vadd.f32 %v5081_v37, %v5043_v51  ;;  %v5001_v62 = vpop.f32.mrf.mxu0  ;;  %7594 = vmatmul.mubr.msk.f32.gmra.mxu0 %vm429_vm6, %v7805_v41  ;;  %v5324_v34 = vadd.f32 %v5323_v4, %v5285_v39  ;;  %v5243_v0 = vpop.f32.mrf.mxu1  ;;  %v7807_v51 = vld [vmem:[%s7975_s6 + $0xf8] sm:$0xff]  ;;  %v12504_v35 = vrot.slane %v5376_v6, %v14230_v32 }
 0x335   : > { %v5044_v17 = vsel %vm14226_vm11, %v5001_v62, 0.0  ;;  %7612 = vmatmul.mubr.msk.f32.gmra.mxu1 %vm429_vm6, %v12127_v29  ;;  %6612 = vmatprep.mubr.f32.mxu0 %v13792_v36  ;;  %v5286_v25 = vsel %vm14227_vm13, %v5243_v0, 0.0  ;;  %v12512_v62 = vrot.slane %v5380_v45, %v14230_v32  ;;  %vm14236_vm11 = vcmp.eq.s32.totalorder %v14008_v13, %v11705_v59 }
 0x336   : > { %v5062_v24 = vadd.f32 %v5061_v55, %v5044_v17  ;;  %v5003_v31 = vpop.f32.mrf.mxu0  ;;  %6854 = vmatprep.mubr.f32.mxu1 %v13792_v36  ;;  %v5304_v61 = vadd.f32 %v5303_v40, %v5286_v25  ;;  %v5245_v43 = vpop.f32.mrf.mxu1  ;;  %vm5389_vm13 = vcmp.eq.s32.totalorder %v14011_v10, %v12504_v35 }
 0x337   : > { %v5045_v42 = vsel %vm14228_vm8, %v5003_v31, 0.0  ;;  %v5287_v29 = vsel %vm14229_vm14, %v5245_v43, 0.0  ;;  %vm5390_vm8 = vcmp.eq.s32.totalorder %v14011_v10, %v12512_v62  ;;  %vm5391_vm14 = vcmp.eq.s32.totalorder %v14105_v47, %v12504_v35 }
 0x338   : > { %v5083_v1 = vadd.f32 %v5082_v33, %v5045_v42  ;;  %v5007_v18 = vpop.f32.mrf.mxu0  ;;  %7595 = vmatmul.mubr.msk.f32.gmra.mxu0 %vm429_vm6, %v7806_v12  ;;  %v5325_v5 = vadd.f32 %v5324_v34, %v5287_v29  ;;  %v5249_v37 = vpop.f32.mrf.mxu1 }
 0x339   : > { %v5046_v28 = vsel %vm14231_vm7, %v5007_v18, 0.0  ;;  %7613 = vmatmul.mubr.msk.f32.gmra.mxu1 %vm429_vm6, %v12152_v20  ;;  %6618 = vmatprep.mubr.f32.mxu0 %v13792_v36  ;;  %v5288_v4 = vsel %vm14233_vm0, %v5249_v37, 0.0  ;;  %vm13701_vm7 = vcmp.eq.s32.totalorder %v14105_v47, %v12512_v62  ;;  %vm13700_vm0 = vcmp.eq.s32.totalorder %v8562_v38, %v12504_v35 }
 0x33a   : > { %v5063_v22 = vadd.f32 %v5062_v24, %v5046_v28  ;;  %v5009_v19 = vpop.f32.mrf.mxu0  ;;  %6860 = vmatprep.mubr.f32.mxu1 %v13792_v36  ;;  %v5305_v21 = vadd.f32 %v5304_v61, %v5288_v4  ;;  %v5251_v57 = vpop.f32.mrf.mxu1 }
 0x33b   : > { %v5047_v55 = vsel %vm4612_vm12, %v5009_v19, 0.0  ;;  %v5289_v20 = vsel %vm4612_vm12, %v5251_v57, 0.0  ;;  %vm14235_vm12 = vmmov %vm14234_vm3 }
 0x33c   : > { %v5084_v9 = vadd.f32 %v5083_v1, %v5047_v55  ;;  %v5013_v40 = vpop.f32.mrf.mxu0  ;;  %7596 = vmatmul.mubr.msk.f32.gmra.mxu0 %vm429_vm6, %v7807_v51  ;;  %v5326_v33 = vadd.f32 %v5325_v5, %v5289_v20  ;;  %v5255_v39 = vpop.f32.mrf.mxu1 }
 0x33d   : > { %v5048_v36 = vsel %vm14234_vm3, %v5013_v40, 0.0  ;;  %7614 = vmatmul.mubr.msk.f32.gmra.mxu1 %vm429_vm6, %v12177_v8  ;;  %v5290_v23 = vsel %vm14235_vm12, %v5255_v39, 0.0  ;;  %vm14237_vm6 = vmmov %vm14236_vm11  ;;  %vm13678_vm3 = vcmp.eq.s32.totalorder %v8562_v38, %v12512_v62  ;;  %vm13674_vm12 = vcmp.eq.s32.totalorder %v8595_v7, %v12504_v35 }
 0x33e   : > { %v5064_v41 = vadd.f32 %v5063_v22, %v5048_v36  ;;  %v5015_v53 = vpop.f32.mrf.mxu0  ;;  %v5306_v34 = vadd.f32 %v5305_v21, %v5290_v23  ;;  %v5257_v0 = vpop.f32.mrf.mxu1 }
 0x33f   : > { %v5049_v17 = vsel %vm14236_vm11, %v5015_v53, 0.0  ;;  %v5291_v8 = vsel %vm14237_vm6, %v5257_v0, 0.0  ;;  %vm13675_vm11 = vcmp.eq.s32.totalorder %v8595_v7, %v12512_v62  ;;  %vm13676_vm6 = vcmp.eq.s32.totalorder %v8626_v46, %v12504_v35 }
 0x340   : > { %v5065_v24 = vrot.slane %v5064_v41, 4  ;;  %v5085_v25 = vadd.f32 %v5084_v9, %v5049_v17  ;;  %v5487_v31 = vpop.f32.mrf.mxu0  ;;  %v5307_v61 = vrot.slane %v5306_v34, 4  ;;  %v5327_v16 = vadd.f32 %v5326_v33, %v5291_v8  ;;  %v5729_v42 = vpop.f32.mrf.mxu1 }
 0x341   : > { %v5582_v12 = vsel %vm5389_vm13, %v5487_v31, 0.0  ;;  %v5824_v37 = vsel %vm5389_vm13, %v5729_v42, 0.0 }
 0x342   : > { %v5066_v43 = vadd.f32 %v5065_v24, %v5064_v41  ;;  %v5086_v1 = vrot.slane %v5085_v25, 4  ;;  %v5489_v29 = vpop.f32.mrf.mxu0  ;;  %v5308_v59 = vadd.f32 %v5307_v61, %v5306_v34  ;;  %v5328_v18 = vrot.slane %v5327_v16, 4  ;;  %v5731_v6 = vpop.f32.mrf.mxu1 }
 0x343   : > { %v5583_v45 = vsel %vm5390_vm8, %v5489_v29, 0.0  ;;  %v5825_v21 = vsel %vm5390_vm8, %v5731_v6, 0.0 }
 0x344   : > { %v5067_v5 = vrot.slane %v5066_v43, 2  ;;  %v5087_v28 = vadd.f32 %v5086_v1, %v5085_v25  ;;  %v5493_v22 = vpop.f32.mrf.mxu0  ;;  %v5309_v4 = vrot.slane %v5308_v59, 2  ;;  %v5329_v19 = vadd.f32 %v5328_v18, %v5327_v16  ;;  %v5735_v57 = vpop.f32.mrf.mxu1 }
 0x345   : > { %v5584_v55 = vsel %vm5391_vm14, %v5493_v22, 0.0  ;;  %v5826_v51 = vsel %vm5391_vm14, %v5735_v57, 0.0 }
 0x346   : > { %v5068_v9 = vadd.f32 %v5067_v5, %v5066_v43  ;;  %v5088_v20 = vrot.slane %v5087_v28, 2  ;;  %v5614_v40 = vadd.f32 %v5584_v55, %v5582_v12  ;;  %v5495_v33 = vpop.f32.mrf.mxu0  ;;  %v5310_v36 = vadd.f32 %v5309_v4, %v5308_v59  ;;  %v5737_v53 = vpop.f32.mrf.mxu1 }
 0x347   : > { %v5330_v39 = vrot.slane %v5329_v19, 2  ;;  %v5856_v41 = vadd.f32 %v5826_v51, %v5824_v37  ;;  %v5585_v23 = vsel %vm13701_vm7, %v5495_v33, 0.0  ;;  %v5827_v24 = vsel %vm13701_vm7, %v5737_v53, 0.0  ;;  %vm5341_vm7 = vmand %vm11736_vm1, %vm10405_vm10 }
 0x348   : > { %v5069_v34 = vrot.slane %v5068_v9, 1  ;;  %v5089_v17 = vadd.f32 %v5088_v20, %v5087_v28  ;;  %v5635_v0 = vadd.f32 %v5585_v23, %v5583_v45  ;;  %v5499_v25 = vpop.f32.mrf.mxu0  ;;  %v5311_v8 = vrot.slane %v5310_v36, 1  ;;  %v5741_v42 = vpop.f32.mrf.mxu1 }
 0x349   : > { %v5331_v31 = vadd.f32 %v5330_v39, %v5329_v19  ;;  %v5877_v61 = vadd.f32 %v5827_v24, %v5825_v21  ;;  %v5586_v16 = vsel %vm13700_vm0, %v5499_v25, 0.0  ;;  %v5828_v29 = vsel %vm13700_vm0, %v5741_v42, 0.0 }
 0x34a   : > { %v5090_v43 = vrot.slane %v5089_v17, 1  ;;  %v5615_v1 = vadd.f32 %v5614_v40, %v5586_v16  ;;  %v5501_v59 = vpop.f32.mrf.mxu0  ;;  %v5857_v12 = vadd.f32 %v5856_v41, %v5828_v29  ;;  %v5743_v5 = vpop.f32.mrf.mxu1  ;;  %v5070_v28 = vadd.f32 %v5069_v34, %v5068_v9 }
 0x34b   : > { %v5332_v18 = vrot.slane %v5331_v31, 1  ;;  %v5587_v6 = vsel %vm13678_vm3, %v5501_v59, 0.0  ;;  %v5829_v22 = vsel %vm13678_vm3, %v5743_v5, 0.0  ;;  %v5312_v19 = vadd.f32 %v5311_v8, %v5310_v36 }
 0x34c   : > { %v5091_v37 = vadd.f32 %v5090_v43, %v5089_v17  ;;  %v5636_v45 = vadd.f32 %v5635_v0, %v5587_v6  ;;  %v5505_v4 = vpop.f32.mrf.mxu0  ;;  %v5878_v55 = vadd.f32 %v5877_v61, %v5829_v22  ;;  %v5747_v20 = vpop.f32.mrf.mxu1  ;;  %vm13682_vm3 = vcmp.eq.s32.totalorder %v8676_v50, %v12512_v62 }
 0x34d   : > { %v5333_v21 = vadd.f32 %v5332_v18, %v5331_v31  ;;  %v5588_v57 = vsel %vm13674_vm12, %v5505_v4, 0.0  ;;  %v5830_v9 = vsel %vm13674_vm12, %v5747_v20, 0.0  ;;  %vm13677_vm12 = vcmp.eq.s32.totalorder %v8626_v46, %v12512_v62 }
 0x34e   : > { %v5094_v40 = vcombine.low %v5070_v28, %v5091_v37  ;;  %v5616_v51 = vadd.f32 %v5615_v1, %v5588_v57  ;;  %v5507_v33 = vpop.f32.mrf.mxu0  ;;  %v5858_v41 = vadd.f32 %v5857_v12, %v5830_v9  ;;  %v5749_v23 = vpop.f32.mrf.mxu1  ;;  %vm14247_vm10 = vcmp.eq.s32.totalorder %v14105_v47, %v12512_v62 }
 0x34f   : > { %v5336_v39 = vcombine.low %v5312_v19, %v5333_v21  ;;  %v5589_v36 = vsel %vm13675_vm11, %v5507_v33, 0.0  ;;  %v5831_v17 = vsel %vm13675_vm11, %v5749_v23, 0.0  ;;  %vm13679_vm11 = vcmp.eq.s32.totalorder %v8651_v48, %v12504_v35 }
 0x350   : > { %v5095_v53 = vrot.slane %v5094_v40, 6  ;;  %v5637_v34 = vadd.f32 %v5636_v45, %v5589_v36  ;;  %v5511_v0 = vpop.f32.mrf.mxu0  ;;  %v5879_v25 = vadd.f32 %v5878_v55, %v5831_v17  ;;  %v5753_v31 = vpop.f32.mrf.mxu1 }
 0x351   : > { %v5337_v24 = vrot.slane %v5336_v39, 6  ;;  %v5590_v8 = vsel %vm13676_vm6, %v5511_v0, 0.0  ;;  %v5832_v42 = vsel %vm13676_vm6, %v5753_v31, 0.0  ;;  %vm13680_vm6 = vcmp.eq.s32.totalorder %v8651_v48, %v12512_v62 }
 0x352   : > { %v5097_v61 = vmul.f32 %v5095_v53, %v12287_v11  ;;  %v5617_v16 = vadd.f32 %v5616_v51, %v5590_v8  ;;  %v5513_v43 = vpop.f32.mrf.mxu0  ;;  %v5859_v29 = vadd.f32 %v5858_v41, %v5832_v42  ;;  %v5755_v18 = vpop.f32.mrf.mxu1 }
 0x353   : > { %v5339_v1 = vmul.f32 %v5337_v24, %v12287_v11  ;;  %v5591_v59 = vsel %vm13677_vm12, %v5513_v43, 0.0  ;;  %v5833_v5 = vsel %vm13677_vm12, %v5755_v18, 0.0  ;;  %vm13681_vm12 = vcmp.eq.s32.totalorder %v8676_v50, %v12504_v35 }
 0x354   : > { %v12605_v12 = vadd.f32 %v5097_v61, %v11929_v14  ;;  %v5638_v6 = vadd.f32 %v5637_v34, %v5591_v59  ;;  %v5517_v28 = vpop.f32.mrf.mxu0  ;;  %v5880_v37 = vadd.f32 %v5879_v25, %v5833_v5  ;;  %v5759_v22 = vpop.f32.mrf.mxu1 }
 0x355   : > { %v12613_v11 = vadd.f32 %v5339_v1, %v12310_v26  ;;  %v5592_v45 = vsel %vm13679_vm11, %v5517_v28, 0.0  ;;  %v5834_v4 = vsel %vm13679_vm11, %v5759_v22, 0.0  ;;  %vm13683_vm11 = vcmp.eq.s32.totalorder %v8701_v52, %v12504_v35 }
 0x356   : > { %v5618_v14 = vadd.f32 %v5617_v16, %v5592_v45  ;;  %v5519_v19 = vpop.f32.mrf.mxu0  ;;  %v5860_v21 = vadd.f32 %v5859_v29, %v5834_v4  ;;  %v5761_v55 = vpop.f32.mrf.mxu1 }
 0x357   : > { %v5593_v26 = vsel %vm13680_vm6, %v5519_v19, 0.0  ;;  %v5835_v20 = vsel %vm13680_vm6, %v5761_v55, 0.0  ;;  %vm13684_vm6 = vcmp.eq.s32.totalorder %v8701_v52, %v12512_v62 }
 0x358   : > { %v5639_v57 = vadd.f32 %v5638_v6, %v5593_v26  ;;  %v5523_v40 = vpop.f32.mrf.mxu0  ;;  %v5881_v51 = vadd.f32 %v5880_v37, %v5835_v20  ;;  %v5765_v33 = vpop.f32.mrf.mxu1 }
 0x359   : > { %v5594_v9 = vsel %vm13681_vm12, %v5523_v40, 0.0  ;;  %v5836_v41 = vsel %vm13681_vm12, %v5765_v33, 0.0  ;;  %vm13685_vm12 = vcmp.eq.s32.totalorder %v8726_v54, %v12504_v35 }
 0x35a   : > { %v5619_v39 = vadd.f32 %v5618_v14, %v5594_v9  ;;  %v5525_v36 = vpop.f32.mrf.mxu0  ;;  %v5861_v23 = vadd.f32 %v5860_v21, %v5836_v41  ;;  %v5767_v34 = vpop.f32.mrf.mxu1 }
 0x35b   : > { %v5595_v53 = vsel %vm13682_vm3, %v5525_v36, 0.0  ;;  %v5837_v0 = vsel %vm13682_vm3, %v5767_v34, 0.0  ;;  %vm13686_vm3 = vcmp.eq.s32.totalorder %v8726_v54, %v12512_v62 }
 0x35c   : > { %v5640_v17 = vadd.f32 %v5639_v57, %v5595_v53  ;;  %v5529_v24 = vpop.f32.mrf.mxu0  ;;  %v5882_v25 = vadd.f32 %v5881_v51, %v5837_v0  ;;  %v5771_v31 = vpop.f32.mrf.mxu1 }
 0x35d   : > { %v5596_v8 = vsel %vm13683_vm11, %v5529_v24, 0.0  ;;  %v5838_v16 = vsel %vm13683_vm11, %v5771_v31, 0.0  ;;  %vm13687_vm11 = vcmp.eq.s32.totalorder %v8751_v56, %v12504_v35 }
 0x35e   : > { %v5620_v61 = vadd.f32 %v5619_v39, %v5596_v8  ;;  %v5531_v42 = vpop.f32.mrf.mxu0  ;;  %v5862_v43 = vadd.f32 %v5861_v23, %v5838_v16  ;;  %v5773_v29 = vpop.f32.mrf.mxu1 }
 0x35f   : > { %v5597_v1 = vsel %vm13684_vm6, %v5531_v42, 0.0  ;;  %v5839_v18 = vsel %vm13684_vm6, %v5773_v29, 0.0  ;;  %vm13688_vm6 = vcmp.eq.s32.totalorder %v8751_v56, %v12512_v62 }
 0x360   : > { %v5641_v59 = vadd.f32 %v5640_v17, %v5597_v1  ;;  %v5535_v6 = vpop.f32.mrf.mxu0  ;;  %v5883_v5 = vadd.f32 %v5882_v25, %v5839_v18  ;;  %v5777_v37 = vpop.f32.mrf.mxu1 }
 0x361   : > { %v5598_v28 = vsel %vm13685_vm12, %v5535_v6, 0.0  ;;  %v5840_v22 = vsel %vm13685_vm12, %v5777_v37, 0.0  ;;  %vm13689_vm12 = vcmp.eq.s32.totalorder %v8776_v58, %v12504_v35 }
 0x362   : > { %v5621_v45 = vadd.f32 %v5620_v61, %v5598_v28  ;;  %v5537_v14 = vpop.f32.mrf.mxu0  ;;  %v5863_v4 = vadd.f32 %v5862_v43, %v5840_v22  ;;  %v5779_v21 = vpop.f32.mrf.mxu1 }
 0x363   : > { %v5599_v19 = vsel %vm13686_vm3, %v5537_v14, 0.0  ;;  %v5841_v55 = vsel %vm13686_vm3, %v5779_v21, 0.0  ;;  %vm13690_vm3 = vcmp.eq.s32.totalorder %v8776_v58, %v12512_v62 }
 0x364   : > { %v5642_v26 = vadd.f32 %v5641_v59, %v5599_v19  ;;  %v5541_v57 = vpop.f32.mrf.mxu0  ;;  %v5884_v20 = vadd.f32 %v5883_v5, %v5841_v55  ;;  %v5783_v51 = vpop.f32.mrf.mxu1 }
 0x365   : > { %v5600_v40 = vsel %vm13687_vm11, %v5541_v57, 0.0  ;;  %v5842_v33 = vsel %vm13687_vm11, %v5783_v51, 0.0  ;;  %vm13691_vm11 = vcmp.eq.s32.totalorder %v8802_v60, %v12504_v35 }
 0x366   : > { %v5622_v9 = vadd.f32 %v5621_v45, %v5600_v40  ;;  %v5543_v39 = vpop.f32.mrf.mxu0  ;;  %v5864_v41 = vadd.f32 %v5863_v4, %v5842_v33  ;;  %v5785_v23 = vpop.f32.mrf.mxu1 }
 0x367   : > { %v5601_v36 = vsel %vm13688_vm6, %v5543_v39, 0.0  ;;  %v5843_v34 = vsel %vm13688_vm6, %v5785_v23, 0.0  ;;  %vm13693_vm6 = vcmp.eq.s32.totalorder %v8802_v60, %v12512_v62 }
 0x368   : > { %v5643_v53 = vadd.f32 %v5642_v26, %v5601_v36  ;;  %v5547_v17 = vpop.f32.mrf.mxu0  ;;  %v5885_v0 = vadd.f32 %v5884_v20, %v5843_v34  ;;  %v5789_v25 = vpop.f32.mrf.mxu1  ;;  %v14238_v36 = vld [vmem:[#allocation26_spill] sm:$0xff] }
 0x369   : > { %v5602_v24 = vsel %vm13689_vm12, %v5547_v17, 0.0  ;;  %v5844_v31 = vsel %vm13689_vm12, %v5789_v25, 0.0  ;;  %vm13692_vm12 = vcmp.eq.s32.totalorder %v8833_v63, %v12504_v35  ;;  %v6153_v23 = vand.u32 127, %v14238_v36  ;;  %v14239_v36 = vld [vmem:[#allocation2_spill] sm:$0xff] }
 0x36a   : > { %v5623_v8 = vadd.f32 %v5622_v9, %v5602_v24  ;;  %v5549_v61 = vpop.f32.mrf.mxu0  ;;  %v5865_v16 = vadd.f32 %v5864_v41, %v5844_v31  ;;  %v5791_v43 = vpop.f32.mrf.mxu1 }
 0x36b   : > { %v5603_v42 = vsel %vm13690_vm3, %v5549_v61, 0.0  ;;  %v5845_v29 = vsel %vm13690_vm3, %v5791_v43, 0.0  ;;  %vm13699_vm3 = vcmp.eq.s32.totalorder %v8833_v63, %v12512_v62 }
 0x36c   : > { %v5644_v1 = vadd.f32 %v5643_v53, %v5603_v42  ;;  %v5553_v59 = vpop.f32.mrf.mxu0  ;;  %v5886_v18 = vadd.f32 %v5885_v0, %v5845_v29  ;;  %v5795_v5 = vpop.f32.mrf.mxu1 }
 0x36d   : > { %v5604_v6 = vsel %vm13691_vm11, %v5553_v59, 0.0  ;;  %v5846_v37 = vsel %vm13691_vm11, %v5795_v5, 0.0  ;;  %vm13694_vm11 = vcmp.eq.s32.totalorder %v8859_v3, %v12504_v35 }
 0x36e   : > { %v5624_v28 = vadd.f32 %v5623_v8, %v5604_v6  ;;  %v5555_v45 = vpop.f32.mrf.mxu0  ;;  %v5866_v22 = vadd.f32 %v5865_v16, %v5846_v37  ;;  %v5797_v4 = vpop.f32.mrf.mxu1  ;;  %v6181_v6 = vrot.slane %v6153_v23, %v14232_v49 }
 0x36f   : > { %v5605_v14 = vsel %vm13693_vm6, %v5555_v45, 0.0  ;;  %v5847_v21 = vsel %vm13693_vm6, %v5797_v4, 0.0  ;;  %vm13696_vm6 = vcmp.eq.s32.totalorder %v13900_v27, %v12504_v35 }
 0x370   : > { %v5645_v19 = vadd.f32 %v5644_v1, %v5605_v14  ;;  %v5559_v26 = vpop.f32.mrf.mxu0  ;;  %v5887_v55 = vadd.f32 %v5886_v18, %v5847_v21  ;;  %v5801_v20 = vpop.f32.mrf.mxu1  ;;  %v6177_v1 = vrot.slane %v6153_v23, %v14230_v32  ;;  %v14240_v23 = vrot.slane %v14239_v36, 7 }
 0x371   : > { %v5606_v57 = vsel %vm13692_vm12, %v5559_v26, 0.0  ;;  %v5848_v51 = vsel %vm13692_vm12, %v5801_v20, 0.0  ;;  %vm13695_vm12 = vcmp.eq.s32.totalorder %v8859_v3, %v12512_v62 }
 0x372   : > { %v5625_v40 = vadd.f32 %v5624_v28, %v5606_v57  ;;  %v5561_v9 = vpop.f32.mrf.mxu0  ;;  %v5867_v33 = vadd.f32 %v5866_v22, %v5848_v51  ;;  %v5803_v41 = vpop.f32.mrf.mxu1  ;;  %v12774_v26 = vrot.slane %v6177_v1, %v14230_v32 }
 0x373   : > { %v5607_v39 = vsel %vm13699_vm3, %v5561_v9, 0.0  ;;  %v5849_v34 = vsel %vm13699_vm3, %v5803_v41, 0.0 }
 0x374   : > { %v5646_v53 = vadd.f32 %v5645_v19, %v5607_v39  ;;  %v5565_v17 = vpop.f32.mrf.mxu0  ;;  %v5888_v0 = vadd.f32 %v5887_v55, %v5849_v34  ;;  %v5807_v25 = vpop.f32.mrf.mxu1  ;;  %vm6192_vm3 = vcmp.eq.s32.totalorder %v14105_v47, %v12774_v26 }
 0x375   : > { %v5608_v24 = vsel %vm13694_vm11, %v5565_v17, 0.0  ;;  %v5850_v31 = vsel %vm13694_vm11, %v5807_v25, 0.0  ;;  %vm13697_vm11 = vcmp.eq.s32.totalorder %v13900_v27, %v12512_v62 }
 0x376   : > { %v5626_v8 = vadd.f32 %v5625_v40, %v5608_v24  ;;  %v5567_v61 = vpop.f32.mrf.mxu0  ;;  %v5868_v16 = vadd.f32 %v5867_v33, %v5850_v31  ;;  %v5809_v43 = vpop.f32.mrf.mxu1  ;;  %v12782_v40 = vrot.slane %v6181_v6, %v14230_v32 }
 0x377   : > { %v5609_v42 = vsel %vm13695_vm12, %v5567_v61, 0.0  ;;  %v5851_v59 = vsel %vm13695_vm12, %v5809_v43, 0.0  ;;  %vm13698_vm12 = vcmp.eq.s32.totalorder %v14008_v13, %v12504_v35 }
 0x378   : > { %v5647_v29 = vadd.f32 %v5646_v53, %v5609_v42  ;;  %v5571_v18 = vpop.f32.mrf.mxu0  ;;  %v5889_v5 = vadd.f32 %v5888_v0, %v5851_v59  ;;  %v5813_v37 = vpop.f32.mrf.mxu1  ;;  %v12793_v53 = vmul.f32 %v14240_v23, %v14239_v36  ;;  %vm6195_vm0 = vcmp.eq.s32.totalorder %v8562_v38, %v12782_v40 }
 0x379   : > { %v5610_v28 = vsel %vm13696_vm6, %v5571_v18, 0.0  ;;  %v5852_v22 = vsel %vm13696_vm6, %v5813_v37, 0.0  ;;  %vm13702_vm6 = vcmp.eq.s32.totalorder %v14008_v13, %v12512_v62  ;;  %v14243_v18 = vld [vmem:[#allocation21_spill] sm:$0xff]  ;;  %vm14249_vm1 = vcmp.eq.s32.totalorder %v14105_v47, %v12782_v40 }
 0x37a   : > { %v5627_v45 = vadd.f32 %v5626_v8, %v5610_v28  ;;  %v5573_v14 = vpop.f32.mrf.mxu0  ;;  %v5869_v4 = vadd.f32 %v5868_v16, %v5852_v22  ;;  %v5815_v21 = vpop.f32.mrf.mxu1  ;;  %v5348_v6 = vmul.f32 %v12793_v53, %v14243_v18 }
 0x37b   : > { %v5611_v19 = vsel %vm13697_vm11, %v5573_v14, 0.0  ;;  %v5853_v57 = vsel %vm13697_vm11, %v5815_v21, 0.0  ;;  %vm6190_vm11 = vcmp.eq.s32.totalorder %v14011_v10, %v12774_v26 }
 0x37c   : > { %v5648_v55 = vadd.f32 %v5647_v29, %v5611_v19  ;;  %v5577_v20 = vpop.f32.mrf.mxu0  ;;  %v5890_v51 = vadd.f32 %v5889_v5, %v5853_v57  ;;  %v5819_v33 = vpop.f32.mrf.mxu1 }
 0x37d   : > { %v5612_v9 = vsel %vm13698_vm12, %v5577_v20, 0.0  ;;  %v5854_v41 = vsel %vm13698_vm12, %v5819_v33, 0.0  ;;  %vm6191_vm12 = vcmp.eq.s32.totalorder %v14011_v10, %v12782_v40 }
 0x37e   : > { %v5628_v39 = vadd.f32 %v5627_v45, %v5612_v9  ;;  %v5579_v34 = vpop.f32.mrf.mxu0  ;;  %v5870_v17 = vadd.f32 %v5869_v4, %v5854_v41  ;;  %v5821_v24 = vpop.f32.mrf.mxu1 }
 0x37f   : > { %v5613_v0 = vsel %vm13702_vm6, %v5579_v34, 0.0  ;;  %v5855_v31 = vsel %vm13702_vm6, %v5821_v24, 0.0  ;;  %vm6194_vm6 = vcmp.eq.s32.totalorder %v8562_v38, %v12774_v26 }
 0x380   : > { %v5629_v25 = vrot.slane %v5628_v39, 4  ;;  %v5649_v8 = vadd.f32 %v5648_v55, %v5613_v0  ;;  %v5971_v61 = vpop.f32.mrf.mxu0  ;;  %v5871_v16 = vrot.slane %v5870_v17, 4  ;;  %v5891_v42 = vadd.f32 %v5890_v51, %v5855_v31  ;;  %v6288_v43 = vpop.f32.mrf.mxu1 }
 0x381   : > { %v6066_v22 = vsel %vm5389_vm13, %v5971_v61, 0.0  ;;  %v6383_v21 = vsel %vm6190_vm11, %v6288_v43, 0.0  ;;  %vm12835_vm13 = vmand %vm5341_vm7, %vm10433_vm5 }
 0x382   : > { %v5630_v1 = vadd.f32 %v5629_v25, %v5628_v39  ;;  %v5650_v5 = vrot.slane %v5649_v8, 4  ;;  %v5973_v28 = vpop.f32.mrf.mxu0  ;;  %v5872_v37 = vadd.f32 %v5871_v16, %v5870_v17  ;;  %v5892_v45 = vrot.slane %v5891_v42, 4  ;;  %v6290_v14 = vpop.f32.mrf.mxu1  ;;  %vm5346_vm5 = vmand %vm12835_vm13, %vm9451_vm15 }
 0x383   : > { %v6067_v55 = vsel %vm5390_vm8, %v5973_v28, 0.0  ;;  %v6384_v39 = vsel %vm6191_vm12, %v6290_v14, 0.0  ;;  %vm14250_vm8 = vcmp.eq.s32.totalorder %v8562_v38, %v12504_v35  ;;  %vm12873_vm7 = vmand %vm5346_vm5, %vm9490_vm4  ;;  %vm14255_vm15 = vcmp.eq.s32.totalorder %v8595_v7, %v12504_v35 }
 0x384   : > { %v5631_v4 = vrot.slane %v5630_v1, 2  ;;  %v5651_v19 = vadd.f32 %v5650_v5, %v5649_v8  ;;  %v5977_v57 = vpop.f32.mrf.mxu0  ;;  %v5873_v20 = vrot.slane %v5872_v37, 2  ;;  %v5893_v33 = vadd.f32 %v5892_v45, %v5891_v42  ;;  %v6294_v36 = vpop.f32.mrf.mxu1 }
 0x385   : > { %v6068_v41 = vsel %vm5391_vm14, %v5977_v57, 0.0  ;;  %v6385_v0 = vsel %vm6192_vm3, %v6294_v36, 0.0  ;;  %vm6196_vm14 = vcmp.eq.s32.totalorder %v8595_v7, %v12774_v26  ;;  %v12890_v43 = vsel %vm12873_vm7, %v5348_v6, 0.0 }
 0x386   : > { %v5632_v23 = vadd.f32 %v5631_v4, %v5630_v1  ;;  %v5652_v34 = vrot.slane %v5651_v19, 2  ;;  %v6098_v17 = vadd.f32 %v6068_v41, %v6066_v22  ;;  %v5979_v24 = vpop.f32.mrf.mxu0  ;;  %v5874_v25 = vadd.f32 %v5873_v20, %v5872_v37  ;;  %v6296_v16 = vpop.f32.mrf.mxu1 }
 0x387   : > { %v5894_v8 = vrot.slane %v5893_v33, 2  ;;  %v6415_v31 = vadd.f32 %v6385_v0, %v6383_v21  ;;  %v6069_v61 = vsel %vm14247_vm10, %v5979_v24, 0.0  ;;  %v6386_v59 = vsel %vm14249_vm1, %v6296_v16, 0.0 }
 0x388   : > { %v5633_v42 = vrot.slane %v5632_v23, 1  ;;  %v5653_v1 = vadd.f32 %v5652_v34, %v5651_v19  ;;  %v6119_v29 = vadd.f32 %v6069_v61, %v6067_v55  ;;  %v5983_v18 = vpop.f32.mrf.mxu0  ;;  %v5875_v5 = vrot.slane %v5874_v25, 1 }
 0x389   : > { %v5895_v28 = vadd.f32 %v5894_v8, %v5893_v33  ;;  %v6436_v37 = vadd.f32 %v6386_v59, %v6384_v39  ;;  %v6070_v45 = vsel %vm14250_vm8, %v5983_v18, 0.0  ;;  %v6300_v22 = vpop.f32.mrf.mxu1  ;;  %vm14254_vm10 = vcmp.eq.s32.totalorder %v8562_v38, %v12512_v62 }
 0x38a   : > { %v5654_v14 = vrot.slane %v5653_v1, 1  ;;  %v6099_v4 = vadd.f32 %v6098_v17, %v6070_v45  ;;  %v6387_v19 = vsel %vm6194_vm6, %v6300_v22, 0.0  ;;  %v5985_v21 = vpop.f32.mrf.mxu0  ;;  %vm6197_vm1 = vcmp.eq.s32.totalorder %v8595_v7, %v12782_v40 }
 0x38b   : > { %v5896_v20 = vrot.slane %v5895_v28, 1  ;;  %v6416_v51 = vadd.f32 %v6415_v31, %v6387_v19  ;;  %v6071_v33 = vsel %vm14254_vm10, %v5985_v21, 0.0  ;;  %v6302_v39 = vpop.f32.mrf.mxu1  ;;  %v5634_v41 = vadd.f32 %v5633_v42, %v5632_v23 }
 0x38c   : > { %v5655_v36 = vadd.f32 %v5654_v14, %v5653_v1  ;;  %v6120_v34 = vadd.f32 %v6119_v29, %v6071_v33  ;;  %v6388_v17 = vsel %vm6195_vm0, %v6302_v39, 0.0  ;;  %v5989_v0 = vpop.f32.mrf.mxu0  ;;  %v5876_v24 = vadd.f32 %v5875_v5, %v5874_v25 }
 0x38d   : > { %v5897_v8 = vadd.f32 %v5896_v20, %v5895_v28  ;;  %v6437_v61 = vadd.f32 %v6436_v37, %v6388_v17  ;;  %v6072_v31 = vsel %vm14255_vm15, %v5989_v0, 0.0  ;;  %v6306_v16 = vpop.f32.mrf.mxu1  ;;  %vm14256_vm4 = vcmp.eq.s32.totalorder %v8595_v7, %v12512_v62 }
 0x38e   : > { %v5658_v23 = vcombine.low %v5634_v41, %v5655_v36  ;;  %v6100_v42 = vadd.f32 %v6099_v4, %v6072_v31  ;;  %v6389_v1 = vsel %vm6196_vm14, %v6306_v16, 0.0  ;;  %v5991_v29 = vpop.f32.mrf.mxu0  ;;  %vm6198_vm5 = vcmp.eq.s32.totalorder %v8626_v46, %v12774_v26 }
 0x38f   : > { %v5900_v59 = vcombine.low %v5876_v24, %v5897_v8  ;;  %v6417_v25 = vadd.f32 %v6416_v51, %v6389_v1  ;;  %v6073_v18 = vsel %vm14256_vm4, %v5991_v29, 0.0  ;;  %v6308_v5 = vpop.f32.mrf.mxu1  ;;  %vm14257_vm8 = vcmp.eq.s32.totalorder %v8626_v46, %v12504_v35 }
 0x390   : > { %v5659_v28 = vrot.slane %v5658_v23, 6  ;;  %v6121_v6 = vadd.f32 %v6120_v34, %v6073_v18  ;;  %v6390_v37 = vsel %vm6197_vm1, %v6308_v5, 0.0  ;;  %v5995_v45 = vpop.f32.mrf.mxu0  ;;  %vm13703_vm7 = vcmp.eq.s32.totalorder %v8626_v46, %v12782_v40 }
 0x391   : > { %v5901_v22 = vrot.slane %v5900_v59, 6  ;;  %v6438_v14 = vadd.f32 %v6437_v61, %v6390_v37  ;;  %v6074_v4 = vsel %vm14257_vm8, %v5995_v45, 0.0  ;;  %v6312_v19 = vpop.f32.mrf.mxu1  ;;  %vm14258_vm10 = vcmp.eq.s32.totalorder %v8626_v46, %v12512_v62 }
 0x392   : > { %v5661_v21 = vmul.f32 %v5659_v28, %v12890_v43  ;;  %v6101_v55 = vadd.f32 %v6100_v42, %v6074_v4  ;;  %v6391_v57 = vsel %vm6198_vm5, %v6312_v19, 0.0  ;;  %v5997_v20 = vpop.f32.mrf.mxu0  ;;  %vm13704_vm15 = vcmp.eq.s32.totalorder %v8651_v48, %v12774_v26 }
 0x393   : > { %v5903_v51 = vmul.f32 %v5901_v22, %v12890_v43  ;;  %v6418_v33 = vadd.f32 %v6417_v25, %v6391_v57  ;;  %v6075_v39 = vsel %vm14258_vm10, %v5997_v20, 0.0  ;;  %v6314_v41 = vpop.f32.mrf.mxu1  ;;  %vm14259_vm4 = vcmp.eq.s32.totalorder %v8651_v48, %v12504_v35 }
 0x394   : > { %v12919_v36 = vadd.f32 %v5661_v21, %v12318_v44  ;;  %v6122_v34 = vadd.f32 %v6121_v6, %v6075_v39  ;;  %v6392_v17 = vsel %vm13703_vm7, %v6314_v41, 0.0  ;;  %v6001_v0 = vpop.f32.mrf.mxu0  ;;  %vm13705_vm8 = vcmp.eq.s32.totalorder %v8651_v48, %v12782_v40 }
 0x395   : > { %v12925_v24 = vadd.f32 %v5903_v51, %v12605_v12  ;;  %v6439_v8 = vadd.f32 %v6438_v14, %v6392_v17  ;;  %v6076_v61 = vsel %vm14259_vm4, %v6001_v0, 0.0  ;;  %v6318_v31 = vpop.f32.mrf.mxu1  ;;  %vm14260_vm10 = vcmp.eq.s32.totalorder %v8651_v48, %v12512_v62 }
 0x396   : > { %v6102_v44 = vadd.f32 %v6101_v55, %v6076_v61  ;;  %v6393_v16 = vsel %vm13704_vm15, %v6318_v31, 0.0  ;;  %v6003_v23 = vpop.f32.mrf.mxu0  ;;  %vm13706_vm7 = vcmp.eq.s32.totalorder %v8676_v50, %v12774_v26  ;;  %vm14261_vm4 = vcmp.eq.s32.totalorder %v8676_v50, %v12504_v35 }
 0x397   : > { %v6419_v42 = vadd.f32 %v6418_v33, %v6393_v16  ;;  %v6077_v12 = vsel %vm14260_vm10, %v6003_v23, 0.0  ;;  %v6320_v1 = vpop.f32.mrf.mxu1  ;;  %vm13707_vm15 = vcmp.eq.s32.totalorder %v8676_v50, %v12782_v40  ;;  %vm14262_vm10 = vcmp.eq.s32.totalorder %v8676_v50, %v12512_v62 }
 0x398   : > { %v6123_v29 = vadd.f32 %v6122_v34, %v6077_v12  ;;  %v6394_v59 = vsel %vm13705_vm8, %v6320_v1, 0.0  ;;  %v6007_v25 = vpop.f32.mrf.mxu0  ;;  %vm13708_vm8 = vcmp.eq.s32.totalorder %v8701_v52, %v12774_v26 }
 0x399   : > { %v6440_v18 = vadd.f32 %v6439_v8, %v6394_v59  ;;  %v6078_v5 = vsel %vm14261_vm4, %v6007_v25, 0.0  ;;  %v6324_v28 = vpop.f32.mrf.mxu1  ;;  %vm14263_vm4 = vcmp.eq.s32.totalorder %v8701_v52, %v12504_v35 }
 0x39a   : > { %v6103_v6 = vadd.f32 %v6102_v44, %v6078_v5  ;;  %v6395_v37 = vsel %vm13706_vm7, %v6324_v28, 0.0  ;;  %v6009_v45 = vpop.f32.mrf.mxu0  ;;  %vm13709_vm7 = vcmp.eq.s32.totalorder %v8701_v52, %v12782_v40 }
 0x39b   : > { %v6420_v22 = vadd.f32 %v6419_v42, %v6395_v37  ;;  %v6079_v14 = vsel %vm14262_vm10, %v6009_v45, 0.0  ;;  %v6326_v4 = vpop.f32.mrf.mxu1  ;;  %vm14264_vm10 = vcmp.eq.s32.totalorder %v8701_v52, %v12512_v62 }
 0x39c   : > { %v6124_v19 = vadd.f32 %v6123_v29, %v6079_v14  ;;  %v6396_v21 = vsel %vm13707_vm15, %v6326_v4, 0.0  ;;  %v6013_v55 = vpop.f32.mrf.mxu0  ;;  %vm13710_vm15 = vcmp.eq.s32.totalorder %v8726_v54, %v12774_v26 }
 0x39d   : > { %v6441_v57 = vadd.f32 %v6440_v18, %v6396_v21  ;;  %v6080_v20 = vsel %vm14263_vm4, %v6013_v55, 0.0  ;;  %v6330_v51 = vpop.f32.mrf.mxu1  ;;  %vm14265_vm4 = vcmp.eq.s32.totalorder %v8726_v54, %v12504_v35 }
 0x39e   : > { %v6104_v33 = vadd.f32 %v6103_v6, %v6080_v20  ;;  %v6397_v39 = vsel %vm13708_vm8, %v6330_v51, 0.0  ;;  %v6015_v41 = vpop.f32.mrf.mxu0  ;;  %vm13711_vm8 = vcmp.eq.s32.totalorder %v8726_v54, %v12782_v40 }
 0x39f   : > { %v6421_v34 = vadd.f32 %v6420_v22, %v6397_v39  ;;  %v6081_v17 = vsel %vm14264_vm10, %v6015_v41, 0.0  ;;  %v6332_v0 = vpop.f32.mrf.mxu1  ;;  %vm14266_vm10 = vcmp.eq.s32.totalorder %v8726_v54, %v12512_v62 }
 0x3a0   : > { %v6125_v8 = vadd.f32 %v6124_v19, %v6081_v17  ;;  %v6398_v61 = vsel %vm13709_vm7, %v6332_v0, 0.0  ;;  %v6019_v31 = vpop.f32.mrf.mxu0  ;;  %vm13712_vm7 = vcmp.eq.s32.totalorder %v8751_v56, %v12774_v26 }
 0x3a1   : > { %v6442_v44 = vadd.f32 %v6441_v57, %v6398_v61  ;;  %v6082_v16 = vsel %vm14265_vm4, %v6019_v31, 0.0  ;;  %v6336_v23 = vpop.f32.mrf.mxu1  ;;  %vm14267_vm4 = vcmp.eq.s32.totalorder %v8751_v56, %v12504_v35 }
 0x3a2   : > { %v6105_v42 = vadd.f32 %v6104_v33, %v6082_v16  ;;  %v6399_v12 = vsel %vm13710_vm15, %v6336_v23, 0.0  ;;  %v6021_v1 = vpop.f32.mrf.mxu0  ;;  %vm13713_vm15 = vcmp.eq.s32.totalorder %v8751_v56, %v12782_v40 }
 0x3a3   : > { %v6422_v29 = vadd.f32 %v6421_v34, %v6399_v12  ;;  %v6083_v59 = vsel %vm14266_vm10, %v6021_v1, 0.0  ;;  %v6338_v25 = vpop.f32.mrf.mxu1  ;;  %vm14268_vm10 = vcmp.eq.s32.totalorder %v8751_v56, %v12512_v62 }
 0x3a4   : > { %v6126_v18 = vadd.f32 %v6125_v8, %v6083_v59  ;;  %v6400_v5 = vsel %vm13711_vm8, %v6338_v25, 0.0  ;;  %v6025_v28 = vpop.f32.mrf.mxu0  ;;  %vm13714_vm8 = vcmp.eq.s32.totalorder %v8776_v58, %v12774_v26 }
 0x3a5   : > { %v6443_v6 = vadd.f32 %v6442_v44, %v6400_v5  ;;  %v6084_v37 = vsel %vm14267_vm4, %v6025_v28, 0.0  ;;  %v6342_v45 = vpop.f32.mrf.mxu1  ;;  %vm14269_vm4 = vcmp.eq.s32.totalorder %v8776_v58, %v12504_v35 }
 0x3a6   : > { %v6106_v22 = vadd.f32 %v6105_v42, %v6084_v37  ;;  %v6401_v14 = vsel %vm13712_vm7, %v6342_v45, 0.0  ;;  %v6027_v4 = vpop.f32.mrf.mxu0  ;;  %vm13715_vm7 = vcmp.eq.s32.totalorder %v8776_v58, %v12782_v40 }
 0x3a7   : > { %v6423_v19 = vadd.f32 %v6422_v29, %v6401_v14  ;;  %v6085_v21 = vsel %vm14268_vm10, %v6027_v4, 0.0  ;;  %v6344_v55 = vpop.f32.mrf.mxu1  ;;  %vm14270_vm10 = vcmp.eq.s32.totalorder %v8776_v58, %v12512_v62 }
 0x3a8   : > { %v6127_v57 = vadd.f32 %v6126_v18, %v6085_v21  ;;  %v6402_v20 = vsel %vm13713_vm15, %v6344_v55, 0.0  ;;  %v6031_v51 = vpop.f32.mrf.mxu0  ;;  %vm13716_vm15 = vcmp.eq.s32.totalorder %v8802_v60, %v12774_v26 }
 0x3a9   : > { %v6444_v33 = vadd.f32 %v6443_v6, %v6402_v20  ;;  %v6086_v39 = vsel %vm14269_vm4, %v6031_v51, 0.0  ;;  %v6348_v41 = vpop.f32.mrf.mxu1  ;;  %vm14271_vm4 = vcmp.eq.s32.totalorder %v8802_v60, %v12504_v35 }
 0x3aa   : > { %v6107_v34 = vadd.f32 %v6106_v22, %v6086_v39  ;;  %v6403_v17 = vsel %vm13714_vm8, %v6348_v41, 0.0  ;;  %v6033_v0 = vpop.f32.mrf.mxu0  ;;  %vm13717_vm8 = vcmp.eq.s32.totalorder %v8802_v60, %v12782_v40 }
 0x3ab   : > { %v6424_v8 = vadd.f32 %v6423_v19, %v6403_v17  ;;  %v6087_v61 = vsel %vm14270_vm10, %v6033_v0, 0.0  ;;  %v6350_v31 = vpop.f32.mrf.mxu1  ;;  %vm14272_vm10 = vcmp.eq.s32.totalorder %v8802_v60, %v12512_v62 }
 0x3ac   : > { %v6128_v44 = vadd.f32 %v6127_v57, %v6087_v61  ;;  %v6404_v16 = vsel %vm13715_vm7, %v6350_v31, 0.0  ;;  %v6037_v23 = vpop.f32.mrf.mxu0  ;;  %vm13718_vm7 = vcmp.eq.s32.totalorder %v8833_v63, %v12774_v26 }
 0x3ad   : > { %v6445_v42 = vadd.f32 %v6444_v33, %v6404_v16  ;;  %v6088_v12 = vsel %vm14271_vm4, %v6037_v23, 0.0  ;;  %v6354_v1 = vpop.f32.mrf.mxu1  ;;  %vm14273_vm4 = vcmp.eq.s32.totalorder %v8833_v63, %v12504_v35 }
 0x3ae   : > { %v6108_v29 = vadd.f32 %v6107_v34, %v6088_v12  ;;  %v6405_v59 = vsel %vm13716_vm15, %v6354_v1, 0.0  ;;  %v6039_v25 = vpop.f32.mrf.mxu0  ;;  %vm13719_vm15 = vcmp.eq.s32.totalorder %v8833_v63, %v12782_v40 }
 0x3af   : > { %v6425_v18 = vadd.f32 %v6424_v8, %v6405_v59  ;;  %v6089_v5 = vsel %vm14272_vm10, %v6039_v25, 0.0  ;;  %v6356_v28 = vpop.f32.mrf.mxu1  ;;  %vm14274_vm10 = vcmp.eq.s32.totalorder %v8833_v63, %v12512_v62 }
 0x3b0   : > { %v6129_v6 = vadd.f32 %v6128_v44, %v6089_v5  ;;  %v6406_v37 = vsel %vm13717_vm8, %v6356_v28, 0.0  ;;  %v6043_v45 = vpop.f32.mrf.mxu0  ;;  %vm13720_vm8 = vcmp.eq.s32.totalorder %v8859_v3, %v12774_v26 }
 0x3b1   : > { %v6446_v22 = vadd.f32 %v6445_v42, %v6406_v37  ;;  %v6090_v14 = vsel %vm14273_vm4, %v6043_v45, 0.0  ;;  %v6360_v4 = vpop.f32.mrf.mxu1  ;;  %vm14275_vm4 = vcmp.eq.s32.totalorder %v8859_v3, %v12504_v35 }
 0x3b2   : > { %v6109_v19 = vadd.f32 %v6108_v29, %v6090_v14  ;;  %v6407_v21 = vsel %vm13718_vm7, %v6360_v4, 0.0  ;;  %v6045_v55 = vpop.f32.mrf.mxu0  ;;  %vm13721_vm7 = vcmp.eq.s32.totalorder %v8859_v3, %v12782_v40 }
 0x3b3   : > { %v6426_v57 = vadd.f32 %v6425_v18, %v6407_v21  ;;  %v6091_v20 = vsel %vm14274_vm10, %v6045_v55, 0.0  ;;  %v6362_v51 = vpop.f32.mrf.mxu1  ;;  %vm14276_vm10 = vcmp.eq.s32.totalorder %v8859_v3, %v12512_v62 }
 0x3b4   : > { %v6130_v33 = vadd.f32 %v6129_v6, %v6091_v20  ;;  %v6408_v39 = vsel %vm13719_vm15, %v6362_v51, 0.0  ;;  %v6049_v41 = vpop.f32.mrf.mxu0  ;;  %vm13722_vm15 = vcmp.eq.s32.totalorder %v13900_v27, %v12774_v26 }
 0x3b5   : > { %v6447_v34 = vadd.f32 %v6446_v22, %v6408_v39  ;;  %v6092_v17 = vsel %vm14275_vm4, %v6049_v41, 0.0  ;;  %v6366_v0 = vpop.f32.mrf.mxu1  ;;  %vm14277_vm4 = vcmp.eq.s32.totalorder %v13900_v27, %v12504_v35 }
 0x3b6   : > { %v6110_v8 = vadd.f32 %v6109_v19, %v6092_v17  ;;  %v6409_v61 = vsel %vm13720_vm8, %v6366_v0, 0.0  ;;  %v6051_v31 = vpop.f32.mrf.mxu0  ;;  %vm6219_vm8 = vcmp.eq.s32.totalorder %v13900_v27, %v12782_v40 }
 0x3b7   : > { %v6427_v44 = vadd.f32 %v6426_v57, %v6409_v61  ;;  %v6093_v16 = vsel %vm14276_vm10, %v6051_v31, 0.0  ;;  %v6368_v23 = vpop.f32.mrf.mxu1  ;;  %vm14278_vm10 = vcmp.eq.s32.totalorder %v13900_v27, %v12512_v62 }
 0x3b8   : > { %v6131_v42 = vadd.f32 %v6130_v33, %v6093_v16  ;;  %v6410_v12 = vsel %vm13721_vm7, %v6368_v23, 0.0  ;;  %v6055_v1 = vpop.f32.mrf.mxu0  ;;  %vm6220_vm7 = vcmp.eq.s32.totalorder %v14008_v13, %v12774_v26 }
 0x3b9   : > { %v6448_v29 = vadd.f32 %v6447_v34, %v6410_v12  ;;  %v6094_v59 = vsel %vm14277_vm4, %v6055_v1, 0.0  ;;  %v6372_v25 = vpop.f32.mrf.mxu1  ;;  %vm14279_vm4 = vcmp.eq.s32.totalorder %v14008_v13, %v12504_v35 }
 0x3ba   : > { %v6111_v18 = vadd.f32 %v6110_v8, %v6094_v59  ;;  %v6411_v5 = vsel %vm13722_vm15, %v6372_v25, 0.0  ;;  %v6057_v28 = vpop.f32.mrf.mxu0  ;;  %vm6221_vm15 = vcmp.eq.s32.totalorder %v14008_v13, %v12782_v40 }
 0x3bb   : > { %v6428_v6 = vadd.f32 %v6427_v44, %v6411_v5  ;;  %v6095_v37 = vsel %vm14278_vm10, %v6057_v28, 0.0  ;;  %v6374_v45 = vpop.f32.mrf.mxu1  ;;  %vm14280_vm10 = vcmp.eq.s32.totalorder %v14008_v13, %v12512_v62 }
 0x3bc   : > { %v6132_v22 = vadd.f32 %v6131_v42, %v6095_v37  ;;  %v6412_v14 = vsel %vm6219_vm8, %v6374_v45, 0.0  ;;  %v6061_v4 = vpop.f32.mrf.mxu0 }
 0x3bd   : > { %v6449_v19 = vadd.f32 %v6448_v29, %v6412_v14  ;;  %v6096_v21 = vsel %vm14279_vm4, %v6061_v4, 0.0  ;;  %v6378_v55 = vpop.f32.mrf.mxu1  ;;  %vm6147_vm4 = vmand %vm12835_vm13, %vm9529_vm2  ;;  %vm14281_vm2 = vcmp.eq.s32.totalorder %v14105_v47, %v12782_v40  ;;  %vm14288_vm13 = vcmp.eq.s32.totalorder %v8676_v50, %v12774_v26 }
 0x3be   : > { %v6112_v57 = vadd.f32 %v6111_v18, %v6096_v21  ;;  %v6413_v20 = vsel %vm6220_vm7, %v6378_v55, 0.0  ;;  %v6063_v51 = vpop.f32.mrf.mxu0 }
 0x3bf   : > { %v6429_v33 = vadd.f32 %v6428_v6, %v6413_v20  ;;  %v6097_v39 = vsel %vm14280_vm10, %v6063_v51, 0.0  ;;  %v6380_v41 = vpop.f32.mrf.mxu1  ;;  %vm6148_vm10 = vmand %vm6147_vm4, %vm9562_vm9  ;;  %vm14292_vm4 = vcmp.eq.s32.totalorder %v8701_v52, %v12774_v26 }
 0x3c0   : > { %v6113_v34 = vrot.slane %v6112_v57, 4  ;;  %v6133_v17 = vadd.f32 %v6132_v22, %v6097_v39  ;;  %v6414_v35 = vsel %vm6221_vm15, %v6380_v41, 0.0  ;;  %v13101_v0 = vpop.f32.mrf.mxu0  ;;  %vm14282_vm9 = vmmov %vm14281_vm2 }
 0x3c1   : > { %v6430_v8 = vrot.slane %v6429_v33, 4  ;;  %v6450_v61 = vadd.f32 %v6449_v19, %v6414_v35  ;;  %v13103_v31 = vpop.f32.mrf.mxu1  ;;  %v6149_v35 = vmul.f32 %v12793_v53, %v14181_v2 }
 0x3c2   : > { %v6114_v44 = vadd.f32 %v6113_v34, %v6112_v57  ;;  %v6134_v16 = vrot.slane %v6133_v17, 4  ;;  %v13105_v23 = vpop.f32.mrf.mxu0 }
 0x3c3   : > { %v6431_v42 = vadd.f32 %v6430_v8, %v6429_v33  ;;  %v6451_v62 = vrot.slane %v6450_v61, 4  ;;  %v13107_v12 = vpop.f32.mrf.mxu1 }
 0x3c4   : > { %v6115_v1 = vrot.slane %v6114_v44, 2  ;;  %v6135_v29 = vadd.f32 %v6134_v16, %v6133_v17  ;;  %v6536_v59 = vpop.f32.mrf.mxu0 }
 0x3c5   : > { %v6432_v25 = vrot.slane %v6431_v42, 2  ;;  %v6452_v18 = vadd.f32 %v6451_v62, %v6450_v61  ;;  %v6778_v5 = vpop.f32.mrf.mxu1 }
 0x3c6   : > { %v6116_v28 = vadd.f32 %v6115_v1, %v6114_v44  ;;  %v6136_v6 = vrot.slane %v6135_v29, 2  ;;  %v6538_v37 = vpop.f32.mrf.mxu0 }
 0x3c7   : > { %v6433_v45 = vadd.f32 %v6432_v25, %v6431_v42  ;;  %v6453_v22 = vrot.slane %v6452_v18, 2  ;;  %v6780_v14 = vpop.f32.mrf.mxu1 }
 0x3c8   : > { %v6117_v4 = vrot.slane %v6116_v28, 1  ;;  %v6137_v19 = vadd.f32 %v6136_v6, %v6135_v29  ;;  %v6542_v21 = vpop.f32.mrf.mxu0  ;;  %v13117_v29 = vsel %vm6148_vm10, %v6149_v35, 0.0 }
 0x3c9   : > { %v6434_v55 = vrot.slane %v6433_v45, 1  ;;  %v6454_v57 = vadd.f32 %v6453_v22, %v6452_v18  ;;  %v6784_v20 = vpop.f32.mrf.mxu1 }
 0x3ca   : > { %v6138_v51 = vrot.slane %v6137_v19, 1  ;;  %v6544_v33 = vpop.f32.mrf.mxu0  ;;  %v6118_v34 = vadd.f32 %v6117_v4, %v6116_v28 }
 0x3cb   : > { %v6455_v39 = vrot.slane %v6454_v57, 1  ;;  %v6786_v41 = vpop.f32.mrf.mxu1  ;;  %v6435_v61 = vadd.f32 %v6434_v55, %v6433_v45 }
 0x3cc   : > { %v6139_v17 = vadd.f32 %v6138_v51, %v6137_v19  ;;  %v6548_v8 = vpop.f32.mrf.mxu0 }
 0x3cd   : > { %v6456_v44 = vadd.f32 %v6455_v39, %v6454_v57  ;;  %v6790_v16 = vpop.f32.mrf.mxu1  ;;  %v6631_v47 = vsel %vm6196_vm14, %v6548_v8, 0.0 }
 0x3ce   : > { %v6142_v42 = vcombine.low %v6118_v34, %v6139_v17  ;;  %v6550_v15 = vpop.f32.mrf.mxu0 }
 0x3cf   : > { %v6459_v62 = vcombine.low %v6435_v61, %v6456_v44  ;;  %v6792_v9 = vpop.f32.mrf.mxu1 }
 0x3d0   : > { %v6143_v1 = vrot.slane %v6142_v42, 6  ;;  %v6554_v25 = vpop.f32.mrf.mxu0  ;;  %v6874_v38 = vsel %vm6197_vm1, %v6792_v9, 0.0 }
 0x3d1   : > { %v6460_v18 = vrot.slane %v6459_v62, 6  ;;  %v6796_v28 = vpop.f32.mrf.mxu1  ;;  %v6625_v62 = vsel %vm6190_vm11, %v13101_v0, 0.0  ;;  %v6626_v0 = vsel %vm6191_vm12, %v13105_v23, 0.0  ;;  %v6630_v23 = vsel %vm6195_vm0, %v6544_v33, 0.0 }
 0x3d2   : > { %v6145_v6 = vmul.f32 %v6143_v1, %v12890_v43  ;;  %v6556_v2 = vpop.f32.mrf.mxu0  ;;  %v6867_v1 = vsel %vm6190_vm11, %v13103_v31, 0.0  ;;  %v6870_v31 = vsel %vm14282_vm9, %v6780_v14, 0.0  ;;  %v6632_v33 = vsel %vm6197_vm1, %v6550_v15, 0.0  ;;  %vm14290_vm1 = vmmov %vm14288_vm13 }
 0x3d3   : > { %v6462_v53 = vmul.f32 %v6460_v18, %v13117_v29  ;;  %v6798_v45 = vpop.f32.mrf.mxu1  ;;  %v6633_v8 = vsel %vm6198_vm5, %v6554_v25, 0.0  ;;  %vm14295_vm9 = vcmp.eq.s32.totalorder %v8701_v52, %v12782_v40 }
 0x3d4   : > { %v13122_v30 = vadd.f32 %v6145_v6, %v12613_v11  ;;  %v6560_v22 = vpop.f32.mrf.mxu0  ;;  %v6627_v11 = vsel %vm6192_vm3, %v6536_v59, 0.0  ;;  %v6628_v59 = vsel %vm14281_vm2, %v6538_v37, 0.0  ;;  %v6871_v37 = vsel %vm6194_vm6, %v6784_v20, 0.0  ;;  %vm14294_vm2 = vmmov %vm14292_vm4 }
 0x3d5   : > { %v13125_v4 = vadd.f32 %v6462_v53, %v12919_v36  ;;  %v6802_v19 = vpop.f32.mrf.mxu1  ;;  %v6869_v36 = vsel %vm6192_vm3, %v6778_v5, 0.0  ;;  %v6629_v5 = vsel %vm6194_vm6, %v6542_v21, 0.0  ;;  %v6657_v6 = vadd.f32 %v6627_v11, %v6625_v62 }
 0x3d6   : > { %v6562_v55 = vpop.f32.mrf.mxu0  ;;  %v6868_v21 = vsel %vm6191_vm12, %v13107_v12, 0.0  ;;  %v6899_v49 = vadd.f32 %v6869_v36, %v6867_v1  ;;  %v6678_v11 = vadd.f32 %v6628_v59, %v6626_v0  ;;  %v6872_v62 = vsel %vm6195_vm0, %v6786_v41, 0.0 }
 0x3d7   : > { %v6804_v57 = vpop.f32.mrf.mxu1  ;;  %v6658_v20 = vadd.f32 %v6657_v6, %v6629_v5  ;;  %v6873_v12 = vsel %vm6196_vm14, %v6790_v16, 0.0  ;;  %v6920_v1 = vadd.f32 %v6870_v31, %v6868_v21  ;;  %v6875_v41 = vsel %vm6198_vm5, %v6796_v28, 0.0 }
 0x3d8   : > { %v6566_v51 = vpop.f32.mrf.mxu0  ;;  %v6900_v10 = vadd.f32 %v6899_v49, %v6871_v37  ;;  %v6679_v5 = vadd.f32 %v6678_v11, %v6630_v23  ;;  %vm14283_vm0 = vcmp.eq.s32.totalorder %v8626_v46, %v12782_v40  ;;  %vm14284_vm3 = vcmp.eq.s32.totalorder %v8651_v48, %v12774_v26 }
 0x3d9   : > { %v6808_v39 = vpop.f32.mrf.mxu1  ;;  %v6659_v0 = vadd.f32 %v6658_v20, %v6631_v47  ;;  %v6921_v16 = vadd.f32 %v6920_v1, %v6872_v62  ;;  %v6634_v15 = vsel %vm14283_vm0, %v6556_v2, 0.0  ;;  %v6635_v25 = vsel %vm14284_vm3, %v6560_v22, 0.0  ;;  %vm14285_vm12 = vmmov %vm14283_vm0 }
 0x3da   : > { %v6568_v34 = vpop.f32.mrf.mxu0  ;;  %v6901_v6 = vadd.f32 %v6900_v10, %v6873_v12  ;;  %v6680_v37 = vadd.f32 %v6679_v5, %v6632_v33  ;;  %v6876_v7 = vsel %vm14285_vm12, %v6798_v45, 0.0  ;;  %vm14286_vm11 = vmmov %vm14284_vm3  ;;  %vm14287_vm6 = vcmp.eq.s32.totalorder %v8651_v48, %v12782_v40 }
 0x3db   : > { %v13127_v17 = vpop.f32.mrf.mxu1  ;;  %v6660_v21 = vadd.f32 %v6659_v0, %v6633_v8  ;;  %v6877_v9 = vsel %vm14286_vm11, %v6802_v19, 0.0  ;;  %v6922_v28 = vadd.f32 %v6921_v16, %v6874_v38  ;;  %v6636_v2 = vsel %vm14287_vm6, %v6562_v55, 0.0  ;;  %vm14289_vm14 = vmmov %vm14287_vm6 }
 0x3dc   : > { %v6572_v43 = vpop.f32.mrf.mxu0  ;;  %v6902_v23 = vadd.f32 %v6901_v6, %v6875_v41  ;;  %v6637_v22 = vsel %vm14288_vm13, %v6566_v51, 0.0  ;;  %v6681_v11 = vadd.f32 %v6680_v37, %v6634_v15  ;;  %v6878_v46 = vsel %vm14289_vm14, %v6804_v57, 0.0  ;;  %vm14297_vm3 = vmmov %vm14295_vm9 }
 0x3dd   : > { %v13129_v35 = vpop.f32.mrf.mxu1  ;;  %v6661_v20 = vadd.f32 %v6660_v21, %v6635_v25  ;;  %v6879_v45 = vsel %vm14290_vm1, %v6808_v39, 0.0  ;;  %v6923_v62 = vadd.f32 %v6922_v28, %v6876_v7  ;;  %vm14291_vm5 = vcmp.eq.s32.totalorder %v8676_v50, %v12782_v40 }
 0x3de   : > { %v13131_v61 = vpop.f32.mrf.mxu0  ;;  %v6903_v12 = vadd.f32 %v6902_v23, %v6877_v9  ;;  %v6638_v55 = vsel %vm14291_vm5, %v6568_v34, 0.0  ;;  %v6639_v51 = vsel %vm14292_vm4, %v6572_v43, 0.0  ;;  %v6682_v33 = vadd.f32 %v6681_v11, %v6636_v2  ;;  %vm14293_vm10 = vmmov %vm14291_vm5 }
 0x3df   : > { %v13136_v44 = vpop.f32.mrf.mxu1  ;;  %v6662_v8 = vadd.f32 %v6661_v20, %v6637_v22  ;;  %v6880_v48 = vsel %vm14293_vm10, %v13127_v17, 0.0  ;;  %v6881_v57 = vsel %vm14294_vm2, %v13129_v35, 0.0  ;;  %v6924_v5 = vadd.f32 %v6923_v62, %v6878_v46 }
 0x3e0   : > { %v13141_v42 = vpop.f32.mrf.mxu0  ;;  %v6904_v34 = vadd.f32 %v6903_v12, %v6879_v45  ;;  %v6640_v43 = vsel %vm14295_vm9, %v13131_v61, 0.0  ;;  %vm14296_vm0 = vcmp.eq.s32.totalorder %v8726_v54, %v12774_v26  ;;  %v6683_v17 = vadd.f32 %v6682_v33, %v6638_v55 }
 0x3e1   : > { %v13157_v18 = vpop.f32.mrf.mxu1  ;;  %v6641_v0 = vsel %vm14296_vm0, %v13141_v42, 0.0  ;;  %v6663_v38 = vadd.f32 %v6662_v8, %v6639_v51  ;;  %v6882_v35 = vsel %vm14297_vm3, %v13136_v44, 0.0  ;;  %vm14298_vm12 = vmmov %vm14296_vm0  ;;  %v6925_v61 = vadd.f32 %v6924_v5, %v6880_v48 }
 0x3e2   : > { %v13169_v53 = vpop.f32.mrf.mxu0  ;;  %v6883_v41 = vsel %vm14298_vm12, %v13157_v18, 0.0  ;;  %v6905_v6 = vadd.f32 %v6904_v34, %v6881_v57  ;;  %vm14299_vm11 = vcmp.eq.s32.totalorder %v8726_v54, %v12782_v40  ;;  %vm14300_vm6 = vcmp.eq.s32.totalorder %v8751_v56, %v12774_v26 }
 0x3e3   : > { %v13181_v14 = vpop.f32.mrf.mxu1  ;;  %v6642_v42 = vsel %vm14299_vm11, %v13169_v53, 0.0  ;;  %v6684_v52 = vadd.f32 %v6683_v17, %v6640_v43  ;;  %v6664_v44 = vadd.f32 %v6663_v38, %v6641_v0  ;;  %vm14301_vm13 = vmmov %vm14299_vm11  ;;  %v6926_v7 = vadd.f32 %v6925_v61, %v6882_v35 }
 0x3e4   : > { %v6584_v36 = vpop.f32.mrf.mxu0  ;;  %v6884_v18 = vsel %vm14301_vm13, %v13181_v14, 0.0  ;;  %vm14302_vm14 = vmmov %vm14300_vm6  ;;  %v6906_v9 = vadd.f32 %v6905_v6, %v6883_v41  ;;  %vm14303_vm1 = vcmp.eq.s32.totalorder %v8751_v56, %v12782_v40  ;;  %vm14304_vm5 = vcmp.eq.s32.totalorder %v8776_v58, %v12774_v26 }
 0x3e5   : > { %v6826_v59 = vpop.f32.mrf.mxu1  ;;  %v6643_v15 = vsel %vm14300_vm6, %v6584_v36, 0.0  ;;  %v6685_v23 = vadd.f32 %v6684_v52, %v6642_v42  ;;  %vm14305_vm4 = vmmov %vm14303_vm1  ;;  %v6927_v22 = vadd.f32 %v6926_v7, %v6884_v18  ;;  %vm14307_vm2 = vcmp.eq.s32.totalorder %v8776_v58, %v12782_v40 }
 0x3e6   : > { %v6586_v49 = vpop.f32.mrf.mxu0  ;;  %v6885_v37 = vsel %vm14302_vm14, %v6826_v59, 0.0  ;;  %v6665_v2 = vadd.f32 %v6664_v44, %v6643_v15  ;;  %vm14306_vm10 = vmmov %vm14304_vm5  ;;  %vm14308_vm9 = vcmp.eq.s32.totalorder %v8802_v60, %v12774_v26  ;;  %vm14311_vm12 = vcmp.eq.s32.totalorder %v8802_v60, %v12782_v40 }
 0x3e7   : > { %v6828_v31 = vpop.f32.mrf.mxu1  ;;  %v6644_v53 = vsel %vm14303_vm1, %v6586_v49, 0.0  ;;  %v6907_v11 = vadd.f32 %v6906_v9, %v6885_v37  ;;  %vm14309_vm0 = vmmov %vm14307_vm2  ;;  %vm14312_vm11 = vcmp.eq.s32.totalorder %v8833_v63, %v12774_v26  ;;  %vm14315_vm14 = vcmp.eq.s32.totalorder %v8833_v63, %v12782_v40 }
 0x3e8   : > { %v6590_v10 = vpop.f32.mrf.mxu0  ;;  %v6886_v54 = vsel %vm14305_vm4, %v6828_v31, 0.0  ;;  %v6686_v46 = vadd.f32 %v6685_v23, %v6644_v53  ;;  %vm14310_vm3 = vmmov %vm14308_vm9  ;;  %vm14316_vm1 = vcmp.eq.s32.totalorder %v8859_v3, %v12774_v26 }
 0x3e9   : > { %v6832_v47 = vpop.f32.mrf.mxu1  ;;  %v6645_v36 = vsel %vm14304_vm5, %v6590_v10, 0.0  ;;  %v6928_v62 = vadd.f32 %v6927_v22, %v6886_v54  ;;  %vm14313_vm6 = vmmov %vm14311_vm12 }
 0x3ea   : > { %v6592_v19 = vpop.f32.mrf.mxu0  ;;  %v6887_v14 = vsel %vm14306_vm10, %v6832_v47, 0.0  ;;  %v6666_v45 = vadd.f32 %v6665_v2, %v6645_v36  ;;  %vm14314_vm13 = vmmov %vm14312_vm11  ;;  %vm14319_vm10 = vcmp.eq.s32.totalorder %v8859_v3, %v12782_v40 }
 0x3eb   : > { %v6834_v1 = vpop.f32.mrf.mxu1  ;;  %v6646_v49 = vsel %vm14307_vm2, %v6592_v19, 0.0  ;;  %v6908_v12 = vadd.f32 %v6907_v11, %v6887_v14  ;;  %vm14317_vm5 = vmmov %vm14315_vm14  ;;  %vm14320_vm2 = vcmp.eq.s32.totalorder %v13900_v27, %v12774_v26 }
 0x3ec   : > { %v6596_v39 = vpop.f32.mrf.mxu0  ;;  %v6888_v56 = vsel %vm14309_vm0, %v6834_v1, 0.0  ;;  %v6687_v33 = vadd.f32 %v6686_v46, %v6646_v49  ;;  %vm14318_vm4 = vmmov %vm14316_vm1 }
 0x3ed   : > { %v6838_v50 = vpop.f32.mrf.mxu1  ;;  %v6647_v10 = vsel %vm14308_vm9, %v6596_v39, 0.0  ;;  %v6929_v57 = vadd.f32 %v6928_v62, %v6888_v56  ;;  %vm14321_vm9 = vmmov %vm14319_vm10 }
 0x3ee   : > { %v6598_v16 = vpop.f32.mrf.mxu0  ;;  %v6889_v31 = vsel %vm14310_vm3, %v6838_v50, 0.0  ;;  %v6667_v8 = vadd.f32 %v6666_v45, %v6647_v10  ;;  %vm14322_vm0 = vmmov %vm14320_vm2 }
 0x3ef   : > { %v6840_v25 = vpop.f32.mrf.mxu1  ;;  %v6648_v19 = vsel %vm14311_vm12, %v6598_v16, 0.0  ;;  %v6909_v39 = vadd.f32 %v6908_v12, %v6889_v31 }
 0x3f0   : > { %v6602_v21 = vpop.f32.mrf.mxu0  ;;  %v6890_v58 = vsel %vm14313_vm6, %v6840_v25, 0.0  ;;  %v6688_v0 = vadd.f32 %v6687_v33, %v6648_v19 }
 0x3f1   : > { %v6844_v28 = vpop.f32.mrf.mxu1  ;;  %v6649_v55 = vsel %vm14312_vm11, %v6602_v21, 0.0  ;;  %v6930_v35 = vadd.f32 %v6929_v57, %v6890_v58 }
 0x3f2   : > { %v6604_v59 = vpop.f32.mrf.mxu0  ;;  %v6891_v1 = vsel %vm14314_vm13, %v6844_v28, 0.0  ;;  %v6668_v50 = vadd.f32 %v6667_v8, %v6649_v55 }
 0x3f3   : > { %v6846_v20 = vpop.f32.mrf.mxu1  ;;  %v6650_v5 = vsel %vm14315_vm14, %v6604_v59, 0.0  ;;  %v6910_v41 = vadd.f32 %v6909_v39, %v6891_v1 }
 0x3f4   : > { %v6608_v47 = vpop.f32.mrf.mxu0  ;;  %v6892_v60 = vsel %vm14317_vm5, %v6846_v20, 0.0  ;;  %v6689_v42 = vadd.f32 %v6688_v0, %v6650_v5 }
 0x3f5   : > { %v6850_v51 = vpop.f32.mrf.mxu1  ;;  %v6651_v34 = vsel %vm14316_vm1, %v6608_v47, 0.0  ;;  %v6931_v44 = vadd.f32 %v6930_v35, %v6892_v60 }
 0x3f6   : > { %v6610_v48 = vpop.f32.mrf.mxu0  ;;  %v6893_v17 = vsel %vm14318_vm4, %v6850_v51, 0.0  ;;  %v6669_v15 = vadd.f32 %v6668_v50, %v6651_v34 }
 0x3f7   : > { %v6852_v43 = vpop.f32.mrf.mxu1  ;;  %v6652_v16 = vsel %vm14319_vm10, %v6610_v48, 0.0  ;;  %v6911_v18 = vadd.f32 %v6910_v41, %v6893_v17 }
 0x3f8   : > { %v6614_v38 = vpop.f32.mrf.mxu0  ;;  %v6894_v63 = vsel %vm14321_vm9, %v6852_v43, 0.0  ;;  %v6690_v7 = vadd.f32 %v6689_v42, %v6652_v16 }
 0x3f9   : > { %v6653_v61 = vsel %vm14320_vm2, %v6614_v38, 0.0  ;;  %v6856_v6 = vpop.f32.mrf.mxu1  ;;  %v6932_v36 = vadd.f32 %v6931_v44, %v6894_v63  ;;  %v14323_v63 = vld [vmem:[#allocation10_spill] sm:$0xff] }
 0x3fa   : > { %v6895_v25 = vsel %vm14322_vm0, %v6856_v6, 0.0  ;;  %v6616_v52 = vpop.f32.mrf.mxu0  ;;  %v6670_v9 = vadd.f32 %v6669_v15, %v6653_v61  ;;  %v6994_v15 = vrot.slane %v13125_v4, %v14230_v32 }
 0x3fb   : > { %v6654_v37 = vsel %vm6219_vm8, %v6616_v52, 0.0  ;;  %v6858_v21 = vpop.f32.mrf.mxu1  ;;  %v6912_v28 = vadd.f32 %v6911_v18, %v6895_v25  ;;  %v6998_v25 = vrot.slane %v13125_v4, %v14323_v63 }
 0x3fc   : > { %v6896_v53 = vsel %vm6219_vm8, %v6858_v21, 0.0  ;;  %v6620_v3 = vpop.f32.mrf.mxu0  ;;  %v6691_v54 = vadd.f32 %v6690_v7, %v6654_v37  ;;  %v14324_v37 = vld [vmem:[#allocation6_spill] sm:$0xff]  ;;  %v7004_v7 = vrot.slane %v6994_v15, %v14230_v32 }
 0x3fd   : > { %v6655_v23 = vsel %vm6220_vm7, %v6620_v3, 0.0  ;;  %v6862_v2 = vpop.f32.mrf.mxu1  ;;  %v6933_v11 = vadd.f32 %v6932_v36, %v6896_v53 }
 0x3fe   : > { %v6671_v14 = vadd.f32 %v6670_v9, %v6655_v23  ;;  %v6897_v59 = vsel %vm6220_vm7, %v6862_v2, 0.0  ;;  %v6622_v22 = vpop.f32.mrf.mxu0  ;;  %vm6949_vm7 = vcmp.eq.s32.totalorder %v14324_v37, 1  ;;  %v7008_v9 = vrot.slane %v6998_v25, %v14230_v32  ;;  %v7808_v2 = vld [vmem:[%s7918_s29] sm:$0x77] }
 0x3ff   : > { %v6913_v49 = vadd.f32 %v6912_v28, %v6897_v59  ;;  %v6656_v27 = vsel %vm6221_vm15, %v6622_v22, 0.0  ;;  %v6864_v10 = vpop.f32.mrf.mxu1 }
 0x400   : > { %v6672_v20 = vrot.slane %v6671_v14, 4  ;;  %v6692_v46 = vadd.f32 %v6691_v54, %v6656_v27  ;;  %v6898_v45 = vsel %vm6221_vm15, %v6864_v10, 0.0  ;;  %vm6948_vm15 = vcmp.eq.s32.totalorder %v14324_v37, 0 }
 0x401   : > { %v6914_v56 = vrot.slane %v6913_v49, 4  ;;  %v6934_v31 = vadd.f32 %v6933_v11, %v6898_v45 }
 0x402   : > { %v6673_v47 = vadd.f32 %v6672_v20, %v6671_v14  ;;  %v6693_v62 = vrot.slane %v6692_v46, 4 }
 0x403   : > { %v6915_v26 = vadd.f32 %v6914_v56, %v6913_v49  ;;  %v6935_v12 = vrot.slane %v6934_v31, 4 }
 0x404   : > { %v6674_v19 = vrot.slane %v6673_v47, 2  ;;  %v6694_v55 = vadd.f32 %v6693_v62, %v6692_v46 }
 0x405   : > { %v6916_v51 = vrot.slane %v6915_v26, 2  ;;  %v6936_v33 = vadd.f32 %v6935_v12, %v6934_v31 }
 0x406   : > { %v6675_v8 = vadd.f32 %v6674_v19, %v6673_v47  ;;  %v6695_v58 = vrot.slane %v6694_v55, 2 }
 0x407   : > { %v6917_v1 = vadd.f32 %v6916_v51, %v6915_v26  ;;  %v6937_v48 = vrot.slane %v6936_v33, 2 }
 0x408   : > { %v6676_v57 = vrot.slane %v6675_v8, 1  ;;  %v6696_v39 = vadd.f32 %v6695_v58, %v6694_v55 }
 0x409   : > { %v6918_v5 = vrot.slane %v6917_v1, 1  ;;  %v6938_v34 = vadd.f32 %v6937_v48, %v6936_v33 }
 0x40a   : > { %v6697_v13 = vrot.slane %v6696_v39, 1  ;;  %v6677_v43 = vadd.f32 %v6676_v57, %v6675_v8 }
 0x40b   : > { %v6939_v40 = vrot.slane %v6938_v34, 1  ;;  %v6919_v50 = vadd.f32 %v6918_v5, %v6917_v1 }
 0x40c   : > { %v6698_v0 = vadd.f32 %v6697_v13, %v6696_v39 }
 0x40d   : > { %v6940_v60 = vadd.f32 %v6939_v40, %v6938_v34 }
 0x40e   : > { %v6701_v17 = vcombine.low %v6677_v43, %v6698_v0 }
 0x40f   : > { %v6943_v38 = vcombine.low %v6919_v50, %v6940_v60 }
 0x410   : > { %v6702_v35 = vrot.slane %v6701_v17, 6 }
 0x411   : > { %v6944_v41 = vrot.slane %v6943_v38, 6 }
 0x412   : > { %v6704_v16 = vmul.f32 %v6702_v35, %v13117_v29 }
 0x413   : > { %v6946_v61 = vmul.f32 %v6944_v41, %v13117_v29 }
 0x414   : > { %v6705_v6 = vadd.f32 %v6704_v16, %v12925_v24 }
 0x415   : > { %v6947_v42 = vadd.f32 %v6946_v61, %v13122_v30 }
 0x416   : > { %v6954_v52 = vrot.slane %v6705_v6, %v14230_v32  ;;  %v6958_v44 = vrot.slane %v6705_v6, %v14323_v63 }
 0x417   : > { %v6973_v18 = vrot.slane %v6947_v42, %v14230_v32  ;;  %v6977_v29 = vrot.slane %v6947_v42, %v14323_v63 }
 0x418   : > { %v6964_v24 = vrot.slane %v6954_v52, %v14230_v32  ;;  %v6968_v30 = vrot.slane %v6958_v44, %v14230_v32 }
 0x419   : > { %v6983_v4 = vrot.slane %v6973_v18, %v14230_v32  ;;  %v6987_v21 = vrot.slane %v6977_v29, %v14230_v32 }
 0x41b   : > { %v6988_v53 = vsel %vm6949_vm7, %v6964_v24, %v6983_v4  ;;  %v6989_v3 = vsel %vm6949_vm7, %v6968_v30, %v6987_v21 }
 0x41c   : > { %v7009_v36 = vsel %vm6948_vm15, %v7004_v7, %v6988_v53  ;;  %v7010_v28 = vsel %vm6948_vm15, %v7008_v9, %v6989_v3 }
 0x41d   : > { %v7013_v23 = vcombine.low %v7009_v36, %v7010_v28 }
 0x41f   : > { %v7015_v54 = vadd.f32 %v7808_v2, %v7013_v23 }
 0x421   : > { %7016 = vst [vmem:[%s246_s9] sm:$0x77] %v7015_v54 }
 0x422 PF: > { %s13_s16 = sadd.s32 1, %s7847_s16   ;;  %s14325_s12 = smov %s7839_s14 }
 0x423   : > { %p10_p7 = scmp.ge.s32.totalorder %s13_s16, 6   ;;  %s14326_s13 = smov %s7843_s15 }
 0x424   : > { %s14327_s14 = smov %s14330_s17  ;;  %s14328_s15 = smov %s14334_s18 }
 0x425   :  { %12 = sbr.rel (!%p10_p7) target bundleno = 3 (0x3), region = 70 }

</bundles_post_ra>
